<compile_context>
chip_gen: v7x
topology: tpu7x:2x2x1
jax: 0.10.0
libtpu: 0.0.40
codegen_flags: <defaults>
</compile_context>

<pallas_src>
import functools
import math

import jax
import jax.numpy as jnp
from jax import lax
from jax.experimental import pallas as pl
from jax.experimental.pallas import tpu as pltpu

# ----------------------------------------------------------------------------
# Model configuration (matches FullTransformerModel.__init__ arguments).
# ----------------------------------------------------------------------------
INPUT_DIM = 16      # input_dim
OUTPUT_DIM = 16     # output_dim
D_MODEL = 128       # d_model  (lane-dense)
NHEAD = 4           # nhead
HEAD_DIM = D_MODEL // NHEAD
DIM_FF = 256        # dim_feedforward (lane-dense)
N_ENC = 2           # num_encoder_layers
N_DEC = 2           # num_decoder_layers
LN_EPS = 1e-5       # PyTorch LayerNorm default eps
PAD = 128           # lane-dense padding width for the 16-wide input/output dims

# Row offsets into the packed (N_VEC128, 128) bias / LayerNorm slab.
OFF_SEMB_B = 0
OFF_TEMB_B = 1
OFF_FC_B = 2
OFF_ENC_AB = 3
OFF_DEC_SAB = OFF_ENC_AB + 4 * N_ENC          # 11
OFF_DEC_CAB = OFF_DEC_SAB + 4 * N_DEC         # 19
OFF_ENC_B2 = OFF_DEC_CAB + 4 * N_DEC          # 27
OFF_DEC_B2 = OFF_ENC_B2 + N_ENC               # 29
OFF_ENC_LNW = OFF_DEC_B2 + N_DEC              # 31
OFF_ENC_LNB = OFF_ENC_LNW + 2 * N_ENC         # 35
OFF_DEC_LNW = OFF_ENC_LNB + 2 * N_ENC         # 39
OFF_DEC_LNB = OFF_DEC_LNW + 3 * N_DEC         # 45
N_VEC128 = OFF_DEC_LNB + 3 * N_DEC            # 51

# Row offsets into the packed (4, 256) FFN first-layer bias slab.
OFF_ENC_B1 = 0
OFF_DEC_B1 = N_ENC

# Leading-axis offsets into the stacked attention / FFN weight slabs.
ATT_ENC = 0
ATT_DEC_SA = 4 * N_ENC
ATT_DEC_CA = ATT_DEC_SA + 4 * N_DEC
FF_ENC = 0
FF_DEC = N_ENC


# ----------------------------------------------------------------------------
# In-kernel building blocks (jnp values resident in VMEM / vregs).
# ----------------------------------------------------------------------------
def _layernorm(x, gamma, beta):
    mu = jnp.mean(x, axis=-1, keepdims=True)
    xc = x - mu
    var = jnp.mean(xc * xc, axis=-1, keepdims=True)
    return xc * lax.rsqrt(var + LN_EPS) * gamma + beta


def _softmax_last(s):
    s = s - jnp.max(s, axis=-1, keepdims=True)
    e = jnp.exp(s)
    return e * pl.reciprocal(jnp.sum(e, axis=-1, keepdims=True), approx=True)


def _mha(xq, xkv, aw_ref, w_off, vec_ref, b_off, bb, sq, skv):
    """PyTorch nn.MultiheadAttention forward (no mask), bb fused batch elements.

    aw_ref rows [w_off .. w_off+3] hold W_q, W_k, W_v, W_out (each (E, E),
    pre-transposed for right-multiplication, bf16); vec_ref rows
    [b_off .. b_off+3] hold the matching f32 biases.
    xq: (bb*sq, E) f32, xkv: (bb*skv, E) f32.
    """
    bq = vec_ref[b_off + 0:b_off + 1, :]
    bk = vec_ref[b_off + 1:b_off + 2, :]
    bv = vec_ref[b_off + 2:b_off + 3, :]
    bo = vec_ref[b_off + 3:b_off + 4, :]

    q = jnp.dot(xq.astype(jnp.bfloat16), aw_ref[w_off + 0],
                preferred_element_type=jnp.float32) + bq
    k = jnp.dot(xkv.astype(jnp.bfloat16), aw_ref[w_off + 1],
                preferred_element_type=jnp.float32) + bk
    v = jnp.dot(xkv.astype(jnp.bfloat16), aw_ref[w_off + 2],
                preferred_element_type=jnp.float32) + bv
    q = q * (1.0 / math.sqrt(HEAD_DIM))

    wo = aw_ref[w_off + 3]                       # (E, E) bf16
    q16 = q.astype(jnp.bfloat16)
    k16 = k.astype(jnp.bfloat16)
    v16 = v.astype(jnp.bfloat16)

    outs = []
    for b in range(bb):                          # static unroll over fused batch
        qr = q16[b * sq:(b + 1) * sq, :]
        kr = k16[b * skv:(b + 1) * skv, :]
        vr = v16[b * skv:(b + 1) * skv, :]
        o_b = jnp.zeros((sq, D_MODEL), jnp.float32)
        for h in range(NHEAD):                   # static unroll, NHEAD == 4
            lo, hi = h * HEAD_DIM, (h + 1) * HEAD_DIM
            s = lax.dot_general(qr[:, lo:hi], kr[:, lo:hi],
                                (((1,), (1,)), ((), ())),
                                preferred_element_type=jnp.float32)
            p = _softmax_last(s).astype(jnp.bfloat16)
            ctx = jnp.dot(p, vr[:, lo:hi], preferred_element_type=jnp.float32)
            # Fold the output projection per head (no lane-axis concatenate).
            o_b = o_b + jnp.dot(ctx.astype(jnp.bfloat16), wo[lo:hi, :],
                                preferred_element_type=jnp.float32)
        outs.append(o_b)
    o = outs[0] if bb == 1 else jnp.concatenate(outs, axis=0)   # (bb*sq, E)
    return o + bo


def _ffn_residual_norm(x, w1, b1, w2, b2, gamma, beta):
    h = jnp.dot(x.astype(jnp.bfloat16), w1, preferred_element_type=jnp.float32) + b1
    h = jnp.maximum(h, 0.0)
    ff = jnp.dot(h.astype(jnp.bfloat16), w2, preferred_element_type=jnp.float32) + b2
    return _layernorm(x + ff, gamma, beta)


# ----------------------------------------------------------------------------
# The fused whole-model Pallas kernel (bb batch elements per grid program).
# ----------------------------------------------------------------------------
def _transformer_kernel(src_ref, tgt_ref, pe_src_ref, pe_tgt_ref,
                        emb_w_ref, attn_w_ref, ffn_w1_ref, ffn_w2_ref,
                        fc_w_ref, vec128_ref, vec256_ref, out_ref,
                        *, bb, s_len, t_len):
    scale = float(math.sqrt(D_MODEL))

    def vrow(off):
        return vec128_ref[off:off + 1, :]

    # ---- embeddings * sqrt(d_model) + positional encoding (dropout == id) ----
    x = (jnp.dot(src_ref[0].astype(jnp.bfloat16), emb_w_ref[0],
                 preferred_element_type=jnp.float32) + vrow(OFF_SEMB_B))
    x = x * scale + pe_src_ref[...]                      # (bb*S, E)
    y = (jnp.dot(tgt_ref[0].astype(jnp.bfloat16), emb_w_ref[1],
                 preferred_element_type=jnp.float32) + vrow(OFF_TEMB_B))
    y = y * scale + pe_tgt_ref[...]                      # (bb*T, E)

    # ---- encoder stack (post-norm, ReLU feed-forward) ----
    for l in range(N_ENC):                               # static unroll
        sa = _mha(x, x, attn_w_ref, ATT_ENC + 4 * l,
                  vec128_ref, OFF_ENC_AB + 4 * l, bb, s_len, s_len)
        x = _layernorm(x + sa, vrow(OFF_ENC_LNW + 2 * l), vrow(OFF_ENC_LNB + 2 * l))
        x = _ffn_residual_norm(
            x,
            ffn_w1_ref[FF_ENC + l],
            vec256_ref[OFF_ENC_B1 + l:OFF_ENC_B1 + l + 1, :],
            ffn_w2_ref[FF_ENC + l],
            vrow(OFF_ENC_B2 + l),
            vrow(OFF_ENC_LNW + 2 * l + 1), vrow(OFF_ENC_LNB + 2 * l + 1))
    memory = x

    # ---- decoder stack (self-attn, cross-attn over memory, FFN; post-norm) ----
    # NOTE: the reference forward() passes no tgt_mask, so no causal mask here.
    for l in range(N_DEC):                               # static unroll
        sa = _mha(y, y, attn_w_ref, ATT_DEC_SA + 4 * l,
                  vec128_ref, OFF_DEC_SAB + 4 * l, bb, t_len, t_len)
        y = _layernorm(y + sa, vrow(OFF_DEC_LNW + 3 * l), vrow(OFF_DEC_LNB + 3 * l))
        ca = _mha(y, memory, attn_w_ref, ATT_DEC_CA + 4 * l,
                  vec128_ref, OFF_DEC_CAB + 4 * l, bb, t_len, s_len)
        y = _layernorm(y + ca, vrow(OFF_DEC_LNW + 3 * l + 1),
                       vrow(OFF_DEC_LNB + 3 * l + 1))
        y = _ffn_residual_norm(
            y,
            ffn_w1_ref[FF_DEC + l],
            vec256_ref[OFF_DEC_B1 + l:OFF_DEC_B1 + l + 1, :],
            ffn_w2_ref[FF_DEC + l],
            vrow(OFF_DEC_B2 + l),
            vrow(OFF_DEC_LNW + 3 * l + 2), vrow(OFF_DEC_LNB + 3 * l + 2))

    # ---- final projection (lane-dense, zero-padded to 128 lanes) ----
    out = (jnp.dot(y.astype(jnp.bfloat16), fc_w_ref[...],
                   preferred_element_type=jnp.float32) + vrow(OFF_FC_B))
    out_ref[0] = out.astype(out_ref.dtype)


# ----------------------------------------------------------------------------
# Positional-encoding table (same formula as PositionalEncoding.__init__).
# ----------------------------------------------------------------------------
def _positional_encoding(length, d_model):
    position = jnp.arange(length, dtype=jnp.float32)[:, None]
    div_term = jnp.exp(jnp.arange(0, d_model, 2, dtype=jnp.float32)
                       * (-math.log(10000.0) / d_model))
    pe = jnp.zeros((length, d_model), jnp.float32)
    pe = pe.at[:, 0::2].set(jnp.sin(position * div_term))
    pe = pe.at[:, 1::2].set(jnp.cos(position * div_term))
    return pe


# ----------------------------------------------------------------------------
# Full forward pass: one fused pallas_call over a (G,) parallel grid, each
# program batch-fusing BB = B // G elements.
# Inputs use the PyTorch layout: src (S, B, input_dim), tgt (T, B, output_dim).
# ----------------------------------------------------------------------------
def full_transformer_forward(params, src, tgt):
    S, B, I = src.shape
    T, Bt, O = tgt.shape
    assert B == Bt and I == INPUT_DIM and O == OUTPUT_DIM

    # Two parallel programs when possible (feeds both v7x TensorCores); each
    # program batch-fuses BB elements so MXU weight pushes serve BB*S rows.
    G = 2 if (B % 2 == 0 and B >= 2) else 1
    BB = B // G

    # Lane-dense (128-wide) zero-padded inputs, batch-major, grouped per program.
    src_p = jnp.pad(src, ((0, 0), (0, 0), (0, PAD - I)))
    tgt_p = jnp.pad(tgt, ((0, 0), (0, 0), (0, PAD - O)))
    src_b = jnp.transpose(src_p, (1, 0, 2)).reshape(G, BB * S, PAD)
    tgt_b = jnp.transpose(tgt_p, (1, 0, 2)).reshape(G, BB * T, PAD)

    pe_src = jnp.tile(_positional_encoding(S, D_MODEL), (BB, 1))   # (BB*S, E)
    pe_tgt = jnp.tile(_positional_encoding(T, D_MODEL), (BB, 1))   # (BB*T, E)

    consts = [pe_src, pe_tgt,
              params["emb_w"], params["attn_w"],
              params["ffn_w1"], params["ffn_w2"],
              params["fc_w"], params["vec128"], params["vec256"]]

    def _const_spec(arr):
        nd = arr.ndim
        return pl.BlockSpec(arr.shape, lambda g, _nd=nd: (0,) * _nd)

    kernel = functools.partial(_transformer_kernel, bb=BB, s_len=S, t_len=T)

    out_b = pl.pallas_call(
        kernel,
        out_shape=jax.ShapeDtypeStruct((G, BB * T, PAD), jnp.float32),
        grid=(G,),
        in_specs=([pl.BlockSpec((1, BB * S, PAD), lambda g: (g, 0, 0)),
                   pl.BlockSpec((1, BB * T, PAD), lambda g: (g, 0, 0))]
                  + [_const_spec(a) for a in consts]),
        out_specs=pl.BlockSpec((1, BB * T, PAD), lambda g: (g, 0, 0)),
        compiler_params=pltpu.CompilerParams(
            dimension_semantics=("parallel",)),
    )(src_b, tgt_b, *consts)

    # (G, BB*T, PAD) -> (B, T, PAD) -> slice real lanes -> PyTorch (T, B, O).
    out = out_b.reshape(B, T, PAD)[..., :OUTPUT_DIM]
    return jnp.transpose(out, (1, 0, 2))


# ----------------------------------------------------------------------------
# Deterministic synthetic parameters in "natural" (PyTorch-like, pre-transposed
# for x @ W) shapes, plus packing into the kernel's fused/stacked bf16 layout.
# ----------------------------------------------------------------------------
def init_params(key):
    ks = list(jax.random.split(key, 24))
    it = iter(ks)

    def nrm(shape, scale=0.05):
        return (scale * jax.random.normal(next(it), shape)).astype(jnp.float32)

    p = {}
    p["semb_w"] = nrm((INPUT_DIM, D_MODEL));  p["semb_b"] = nrm((1, D_MODEL))
    p["temb_w"] = nrm((OUTPUT_DIM, D_MODEL)); p["temb_b"] = nrm((1, D_MODEL))

    # Encoder layers: attention weights stacked as rows [q, k, v, out] per layer.
    p["enc_aw"] = nrm((N_ENC * 4, D_MODEL, D_MODEL))
    p["enc_ab"] = nrm((N_ENC * 4, D_MODEL))
    p["enc_w1"] = nrm((N_ENC, D_MODEL, DIM_FF)); p["enc_b1"] = nrm((N_ENC, DIM_FF))
    p["enc_w2"] = nrm((N_ENC, DIM_FF, D_MODEL)); p["enc_b2"] = nrm((N_ENC, D_MODEL))
    p["enc_lnw"] = jnp.ones((N_ENC * 2, D_MODEL), jnp.float32)
    p["enc_lnb"] = jnp.zeros((N_ENC * 2, D_MODEL), jnp.float32)

    # Decoder layers: self-attn + cross-attn + FFN + 3 LayerNorms per layer.
    p["dec_saw"] = nrm((N_DEC * 4, D_MODEL, D_MODEL))
    p["dec_sab"] = nrm((N_DEC * 4, D_MODEL))
    p["dec_caw"] = nrm((N_DEC * 4, D_MODEL, D_MODEL))
    p["dec_cab"] = nrm((N_DEC * 4, D_MODEL))
    p["dec_w1"] = nrm((N_DEC, D_MODEL, DIM_FF)); p["dec_b1"] = nrm((N_DEC, DIM_FF))
    p["dec_w2"] = nrm((N_DEC, DIM_FF, D_MODEL)); p["dec_b2"] = nrm((N_DEC, D_MODEL))
    p["dec_lnw"] = jnp.ones((N_DEC * 3, D_MODEL), jnp.float32)
    p["dec_lnb"] = jnp.zeros((N_DEC * 3, D_MODEL), jnp.float32)

    p["fc_w"] = nrm((D_MODEL, OUTPUT_DIM)); p["fc_b"] = nrm((1, OUTPUT_DIM))
    return p


def pack_params(p):
    """Pack natural-shape f32 params into the kernel layout.

    Weight matrices (MXU operands) -> bf16; biases / LayerNorm affine -> f32,
    packed into two stacked slabs (vec128: (51,128), vec256: (4,256)).
    Sub-128 feature dims are zero-padded to 128 lanes.
    """
    bf16 = jnp.bfloat16
    emb_w = jnp.stack([
        jnp.pad(p["semb_w"], ((0, PAD - INPUT_DIM), (0, 0))),
        jnp.pad(p["temb_w"], ((0, PAD - OUTPUT_DIM), (0, 0))),
    ]).astype(bf16)                                                # (2, PAD, E)
    attn_w = jnp.concatenate(
        [p["enc_aw"], p["dec_saw"], p["dec_caw"]], axis=0).astype(bf16)  # (24,E,E)
    ffn_w1 = jnp.concatenate([p["enc_w1"], p["dec_w1"]], axis=0).astype(bf16)
    ffn_w2 = jnp.concatenate([p["enc_w2"], p["dec_w2"]], axis=0).astype(bf16)
    fc_w = jnp.pad(p["fc_w"], ((0, 0), (0, PAD - OUTPUT_DIM))).astype(bf16)

    vec128 = jnp.concatenate([
        p["semb_b"],                                               # OFF_SEMB_B
        p["temb_b"],                                               # OFF_TEMB_B
        jnp.pad(p["fc_b"], ((0, 0), (0, PAD - OUTPUT_DIM))),       # OFF_FC_B
        p["enc_ab"],                                               # OFF_ENC_AB
        p["dec_sab"],                                              # OFF_DEC_SAB
        p["dec_cab"],                                              # OFF_DEC_CAB
        p["enc_b2"],                                               # OFF_ENC_B2
        p["dec_b2"],                                               # OFF_DEC_B2
        p["enc_lnw"],                                              # OFF_ENC_LNW
        p["enc_lnb"],                                              # OFF_ENC_LNB
        p["dec_lnw"],                                              # OFF_DEC_LNW
        p["dec_lnb"],                                              # OFF_DEC_LNB
    ], axis=0).astype(jnp.float32)                                 # (51, 128)
    assert vec128.shape[0] == N_VEC128
    vec256 = jnp.concatenate([p["enc_b1"], p["dec_b1"]], axis=0).astype(jnp.float32)

    return dict(emb_w=emb_w, attn_w=attn_w, ffn_w1=ffn_w1, ffn_w2=ffn_w2,
                fc_w=fc_w, vec128=vec128, vec256=vec256)


if __name__ == "__main__":
    key = jax.random.PRNGKey(0)
    kp, ksrc, ktgt = jax.random.split(key, 3)
    params = pack_params(init_params(kp))

    S, T, B = 8, 8, 4   # src length, tgt length, batch (PyTorch seq-first layout)
    src = jax.random.normal(ksrc, (S, B, INPUT_DIM), dtype=jnp.float32)
    tgt = jax.random.normal(ktgt, (T, B, OUTPUT_DIM), dtype=jnp.float32)

    out = jax.jit(full_transformer_forward)(params, src, tgt)
    out = jax.block_until_ready(out)
    assert out.shape == (T, B, OUTPUT_DIM) and out.dtype == jnp.float32
    assert bool(jnp.all(jnp.isfinite(out)))
    print("KERNEL_OK")
</pallas_src>

<mosaic_0001>
module attributes {stable_mosaic.version = 11 : i64} {
  func.func @_transformer_kernel(%arg0: i32, %arg1: memref<1x16x128xf32, #tpu.memory_space<vmem>>, %arg2: memref<1x16x128xf32, #tpu.memory_space<vmem>>, %arg3: memref<16x128xf32, #tpu.memory_space<vmem>>, %arg4: memref<16x128xf32, #tpu.memory_space<vmem>>, %arg5: memref<2x128x128xbf16, #tpu.memory_space<vmem>>, %arg6: memref<24x128x128xbf16, #tpu.memory_space<vmem>>, %arg7: memref<4x128x256xbf16, #tpu.memory_space<vmem>>, %arg8: memref<4x256x128xbf16, #tpu.memory_space<vmem>>, %arg9: memref<128x128xbf16, #tpu.memory_space<vmem>>, %arg10: memref<51x128xf32, #tpu.memory_space<vmem>>, %arg11: memref<4x256xf32, #tpu.memory_space<vmem>>, %arg12: memref<1x16x128xf32, #tpu.memory_space<vmem>>) attributes {dimension_semantics = [#tpu.dimension_semantics<parallel>], iteration_bounds = array<i64: 2>, scalar_prefetch = 0 : i64, scratch_operands = 0 : i64, tpu.core_type = #tpu.core_type<tc>, window_params = [{transform_indices = @transform_0, window_bounds = array<i64: 1, 16, 128>}, {transform_indices = @transform_1, window_bounds = array<i64: 1, 16, 128>}, {pipeline_mode = #tpu.pipeline_mode<synchronous>, transform_indices = @transform_2, window_bounds = array<i64: 16, 128>}, {pipeline_mode = #tpu.pipeline_mode<synchronous>, transform_indices = @transform_3, window_bounds = array<i64: 16, 128>}, {pipeline_mode = #tpu.pipeline_mode<synchronous>, transform_indices = @transform_4, window_bounds = array<i64: 2, 128, 128>}, {pipeline_mode = #tpu.pipeline_mode<synchronous>, transform_indices = @transform_5, window_bounds = array<i64: 24, 128, 128>}, {pipeline_mode = #tpu.pipeline_mode<synchronous>, transform_indices = @transform_6, window_bounds = array<i64: 4, 128, 256>}, {pipeline_mode = #tpu.pipeline_mode<synchronous>, transform_indices = @transform_7, window_bounds = array<i64: 4, 256, 128>}, {pipeline_mode = #tpu.pipeline_mode<synchronous>, transform_indices = @transform_8, window_bounds = array<i64: 128, 128>}, {pipeline_mode = #tpu.pipeline_mode<synchronous>, transform_indices = @transform_9, window_bounds = array<i64: 51, 128>}, {pipeline_mode = #tpu.pipeline_mode<synchronous>, transform_indices = @transform_10, window_bounds = array<i64: 4, 256>}, {transform_indices = @transform_11, window_bounds = array<i64: 1, 16, 128>}]} {
    %c0 = arith.constant 0 : index
    %c0_0 = arith.constant 0 : index
    %c0_1 = arith.constant 0 : index
    %0 = vector.load %arg1[%c0, %c0_0, %c0_1] : memref<1x16x128xf32, #tpu.memory_space<vmem>>, vector<1x16x128xf32>
    %1 = vector.shape_cast %0 : vector<1x16x128xf32> to vector<16x128xf32>
    %2 = arith.truncf %1 : vector<16x128xf32> to vector<16x128xbf16>
    %c0_2 = arith.constant 0 : index
    %c0_3 = arith.constant 0 : index
    %c0_4 = arith.constant 0 : index
    %3 = vector.load %arg5[%c0_2, %c0_3, %c0_4] : memref<2x128x128xbf16, #tpu.memory_space<vmem>>, vector<1x128x128xbf16>
    %4 = vector.shape_cast %3 : vector<1x128x128xbf16> to vector<128x128xbf16>
    %cst = arith.constant dense<0.000000e+00> : vector<16x128xf32>
    %5 = tpu.matmul %2, %4, %cst {dimension_numbers = #tpu.dot_dimension_numbers<[1], [0], [0], [1], [0, 0, 1, 1], [], []>} : vector<16x128xbf16>, vector<128x128xbf16>, vector<16x128xf32> -> vector<16x128xf32>
    %c0_5 = arith.constant 0 : index
    %c0_6 = arith.constant 0 : index
    %6 = vector.load %arg10[%c0_5, %c0_6] : memref<51x128xf32, #tpu.memory_space<vmem>>, vector<1x128xf32>
    %7 = vector.broadcast %6 : vector<1x128xf32> to vector<16x128xf32>
    %8 = arith.addf %5, %7 : vector<16x128xf32>
    %cst_7 = arith.constant 11.3137083 : f32
    %9 = vector.broadcast %cst_7 : f32 to vector<16x128xf32>
    %10 = arith.mulf %8, %9 : vector<16x128xf32>
    %c0_8 = arith.constant 0 : index
    %c0_9 = arith.constant 0 : index
    %11 = vector.load %arg3[%c0_8, %c0_9] : memref<16x128xf32, #tpu.memory_space<vmem>>, vector<16x128xf32>
    %12 = arith.addf %10, %11 : vector<16x128xf32>
    %c0_10 = arith.constant 0 : index
    %c0_11 = arith.constant 0 : index
    %c0_12 = arith.constant 0 : index
    %13 = vector.load %arg2[%c0_10, %c0_11, %c0_12] : memref<1x16x128xf32, #tpu.memory_space<vmem>>, vector<1x16x128xf32>
    %14 = vector.shape_cast %13 : vector<1x16x128xf32> to vector<16x128xf32>
    %15 = arith.truncf %14 : vector<16x128xf32> to vector<16x128xbf16>
    %c1 = arith.constant 1 : index
    %c0_13 = arith.constant 0 : index
    %c0_14 = arith.constant 0 : index
    %16 = vector.load %arg5[%c1, %c0_13, %c0_14] : memref<2x128x128xbf16, #tpu.memory_space<vmem>>, vector<1x128x128xbf16>
    %17 = vector.shape_cast %16 : vector<1x128x128xbf16> to vector<128x128xbf16>
    %cst_15 = arith.constant dense<0.000000e+00> : vector<16x128xf32>
    %18 = tpu.matmul %15, %17, %cst_15 {dimension_numbers = #tpu.dot_dimension_numbers<[1], [0], [0], [1], [0, 0, 1, 1], [], []>} : vector<16x128xbf16>, vector<128x128xbf16>, vector<16x128xf32> -> vector<16x128xf32>
    %c1_16 = arith.constant 1 : index
    %c0_17 = arith.constant 0 : index
    %19 = vector.load %arg10[%c1_16, %c0_17] : memref<51x128xf32, #tpu.memory_space<vmem>>, vector<1x128xf32>
    %20 = vector.broadcast %19 : vector<1x128xf32> to vector<16x128xf32>
    %21 = arith.addf %18, %20 : vector<16x128xf32>
    %cst_18 = arith.constant 11.3137083 : f32
    %22 = vector.broadcast %cst_18 : f32 to vector<16x128xf32>
    %23 = arith.mulf %21, %22 : vector<16x128xf32>
    %c0_19 = arith.constant 0 : index
    %c0_20 = arith.constant 0 : index
    %24 = vector.load %arg4[%c0_19, %c0_20] : memref<16x128xf32, #tpu.memory_space<vmem>>, vector<16x128xf32>
    %25 = arith.addf %23, %24 : vector<16x128xf32>
    %c3 = arith.constant 3 : index
    %c0_21 = arith.constant 0 : index
    %26 = vector.load %arg10[%c3, %c0_21] : memref<51x128xf32, #tpu.memory_space<vmem>>, vector<1x128xf32>
    %c4 = arith.constant 4 : index
    %c0_22 = arith.constant 0 : index
    %27 = vector.load %arg10[%c4, %c0_22] : memref<51x128xf32, #tpu.memory_space<vmem>>, vector<1x128xf32>
    %c5 = arith.constant 5 : index
    %c0_23 = arith.constant 0 : index
    %28 = vector.load %arg10[%c5, %c0_23] : memref<51x128xf32, #tpu.memory_space<vmem>>, vector<1x128xf32>
    %c6 = arith.constant 6 : index
    %c0_24 = arith.constant 0 : index
    %29 = vector.load %arg10[%c6, %c0_24] : memref<51x128xf32, #tpu.memory_space<vmem>>, vector<1x128xf32>
    %30 = arith.truncf %12 : vector<16x128xf32> to vector<16x128xbf16>
    %c0_25 = arith.constant 0 : index
    %c0_26 = arith.constant 0 : index
    %c0_27 = arith.constant 0 : index
    %31 = vector.load %arg6[%c0_25, %c0_26, %c0_27] : memref<24x128x128xbf16, #tpu.memory_space<vmem>>, vector<1x128x128xbf16>
    %32 = vector.shape_cast %31 : vector<1x128x128xbf16> to vector<128x128xbf16>
    %cst_28 = arith.constant dense<0.000000e+00> : vector<16x128xf32>
    %33 = tpu.matmul %30, %32, %cst_28 {dimension_numbers = #tpu.dot_dimension_numbers<[1], [0], [0], [1], [0, 0, 1, 1], [], []>} : vector<16x128xbf16>, vector<128x128xbf16>, vector<16x128xf32> -> vector<16x128xf32>
    %34 = vector.broadcast %26 : vector<1x128xf32> to vector<16x128xf32>
    %35 = arith.addf %33, %34 : vector<16x128xf32>
    %36 = arith.truncf %12 : vector<16x128xf32> to vector<16x128xbf16>
    %c1_29 = arith.constant 1 : index
    %c0_30 = arith.constant 0 : index
    %c0_31 = arith.constant 0 : index
    %37 = vector.load %arg6[%c1_29, %c0_30, %c0_31] : memref<24x128x128xbf16, #tpu.memory_space<vmem>>, vector<1x128x128xbf16>
    %38 = vector.shape_cast %37 : vector<1x128x128xbf16> to vector<128x128xbf16>
    %cst_32 = arith.constant dense<0.000000e+00> : vector<16x128xf32>
    %39 = tpu.matmul %36, %38, %cst_32 {dimension_numbers = #tpu.dot_dimension_numbers<[1], [0], [0], [1], [0, 0, 1, 1], [], []>} : vector<16x128xbf16>, vector<128x128xbf16>, vector<16x128xf32> -> vector<16x128xf32>
    %40 = vector.broadcast %27 : vector<1x128xf32> to vector<16x128xf32>
    %41 = arith.addf %39, %40 : vector<16x128xf32>
    %42 = arith.truncf %12 : vector<16x128xf32> to vector<16x128xbf16>
    %c2 = arith.constant 2 : index
    %c0_33 = arith.constant 0 : index
    %c0_34 = arith.constant 0 : index
    %43 = vector.load %arg6[%c2, %c0_33, %c0_34] : memref<24x128x128xbf16, #tpu.memory_space<vmem>>, vector<1x128x128xbf16>
    %44 = vector.shape_cast %43 : vector<1x128x128xbf16> to vector<128x128xbf16>
    %cst_35 = arith.constant dense<0.000000e+00> : vector<16x128xf32>
    %45 = tpu.matmul %42, %44, %cst_35 {dimension_numbers = #tpu.dot_dimension_numbers<[1], [0], [0], [1], [0, 0, 1, 1], [], []>} : vector<16x128xbf16>, vector<128x128xbf16>, vector<16x128xf32> -> vector<16x128xf32>
    %46 = vector.broadcast %28 : vector<1x128xf32> to vector<16x128xf32>
    %47 = arith.addf %45, %46 : vector<16x128xf32>
    %cst_36 = arith.constant 0.176776692 : f32
    %48 = vector.broadcast %cst_36 : f32 to vector<16x128xf32>
    %49 = arith.mulf %35, %48 : vector<16x128xf32>
    %c3_37 = arith.constant 3 : index
    %c0_38 = arith.constant 0 : index
    %c0_39 = arith.constant 0 : index
    %50 = vector.load %arg6[%c3_37, %c0_38, %c0_39] : memref<24x128x128xbf16, #tpu.memory_space<vmem>>, vector<1x128x128xbf16>
    %51 = vector.shape_cast %50 : vector<1x128x128xbf16> to vector<128x128xbf16>
    %52 = arith.truncf %49 : vector<16x128xf32> to vector<16x128xbf16>
    %53 = arith.truncf %41 : vector<16x128xf32> to vector<16x128xbf16>
    %54 = arith.truncf %47 : vector<16x128xf32> to vector<16x128xbf16>
    %55 = vector.extract_strided_slice %52 {offsets = [0, 0], sizes = [8, 128], strides = [1, 1]} : vector<16x128xbf16> to vector<8x128xbf16>
    %56 = vector.extract_strided_slice %53 {offsets = [0, 0], sizes = [8, 128], strides = [1, 1]} : vector<16x128xbf16> to vector<8x128xbf16>
    %57 = vector.extract_strided_slice %54 {offsets = [0, 0], sizes = [8, 128], strides = [1, 1]} : vector<16x128xbf16> to vector<8x128xbf16>
    %cst_40 = arith.constant 0.000000e+00 : f32
    %58 = vector.broadcast %cst_40 : f32 to vector<8x128xf32>
    %59 = vector.extract_strided_slice %55 {offsets = [0, 0], sizes = [8, 32], strides = [1, 1]} : vector<8x128xbf16> to vector<8x32xbf16>
    %60 = vector.extract_strided_slice %56 {offsets = [0, 0], sizes = [8, 32], strides = [1, 1]} : vector<8x128xbf16> to vector<8x32xbf16>
    %cst_41 = arith.constant dense<0.000000e+00> : vector<8x8xf32>
    %61 = tpu.matmul %59, %60, %cst_41 {dimension_numbers = #tpu.dot_dimension_numbers<[1], [1], [0], [0], [0, 0, 1, 0], [], []>} : vector<8x32xbf16>, vector<8x32xbf16>, vector<8x8xf32> -> vector<8x8xf32>
    %cst_42 = arith.constant dense<0xFF800000> : vector<8xf32>
    %62 = vector.multi_reduction <maximumf>, %61, %cst_42 [1] : vector<8x8xf32> to vector<8xf32>
    %63 = vector.shape_cast %62 : vector<8xf32> to vector<8x1xf32>
    %64 = vector.broadcast %63 : vector<8x1xf32> to vector<8x8xf32>
    %65 = arith.subf %61, %64 : vector<8x8xf32>
    %66 = math.exp %65 : vector<8x8xf32>
    %cst_43 = arith.constant dense<0.000000e+00> : vector<8xf32>
    %67 = vector.multi_reduction <add>, %66, %cst_43 [1] : vector<8x8xf32> to vector<8xf32>
    %68 = vector.shape_cast %67 : vector<8xf32> to vector<8x1xf32>
    %69 = tpu.reciprocal %68 {approx = true} : vector<8x1xf32> -> vector<8x1xf32>
    %70 = vector.broadcast %69 : vector<8x1xf32> to vector<8x8xf32>
    %71 = arith.mulf %66, %70 : vector<8x8xf32>
    %72 = arith.truncf %71 : vector<8x8xf32> to vector<8x8xbf16>
    %73 = vector.extract_strided_slice %57 {offsets = [0, 0], sizes = [8, 32], strides = [1, 1]} : vector<8x128xbf16> to vector<8x32xbf16>
    %cst_44 = arith.constant dense<0.000000e+00> : vector<8x32xf32>
    %74 = tpu.matmul %72, %73, %cst_44 {dimension_numbers = #tpu.dot_dimension_numbers<[1], [0], [0], [1], [0, 0, 1, 1], [], []>} : vector<8x8xbf16>, vector<8x32xbf16>, vector<8x32xf32> -> vector<8x32xf32>
    %75 = arith.truncf %74 : vector<8x32xf32> to vector<8x32xbf16>
    %76 = vector.extract_strided_slice %51 {offsets = [0, 0], sizes = [32, 128], strides = [1, 1]} : vector<128x128xbf16> to vector<32x128xbf16>
    %cst_45 = arith.constant dense<0.000000e+00> : vector<8x128xf32>
    %77 = tpu.matmul %75, %76, %cst_45 {dimension_numbers = #tpu.dot_dimension_numbers<[1], [0], [0], [1], [0, 0, 1, 1], [], []>} : vector<8x32xbf16>, vector<32x128xbf16>, vector<8x128xf32> -> vector<8x128xf32>
    %78 = arith.addf %58, %77 : vector<8x128xf32>
    %79 = vector.extract_strided_slice %55 {offsets = [0, 32], sizes = [8, 32], strides = [1, 1]} : vector<8x128xbf16> to vector<8x32xbf16>
    %80 = vector.extract_strided_slice %56 {offsets = [0, 32], sizes = [8, 32], strides = [1, 1]} : vector<8x128xbf16> to vector<8x32xbf16>
    %cst_46 = arith.constant dense<0.000000e+00> : vector<8x8xf32>
    %81 = tpu.matmul %79, %80, %cst_46 {dimension_numbers = #tpu.dot_dimension_numbers<[1], [1], [0], [0], [0, 0, 1, 0], [], []>} : vector<8x32xbf16>, vector<8x32xbf16>, vector<8x8xf32> -> vector<8x8xf32>
    %cst_47 = arith.constant dense<0xFF800000> : vector<8xf32>
    %82 = vector.multi_reduction <maximumf>, %81, %cst_47 [1] : vector<8x8xf32> to vector<8xf32>
    %83 = vector.shape_cast %82 : vector<8xf32> to vector<8x1xf32>
    %84 = vector.broadcast %83 : vector<8x1xf32> to vector<8x8xf32>
    %85 = arith.subf %81, %84 : vector<8x8xf32>
    %86 = math.exp %85 : vector<8x8xf32>
    %cst_48 = arith.constant dense<0.000000e+00> : vector<8xf32>
    %87 = vector.multi_reduction <add>, %86, %cst_48 [1] : vector<8x8xf32> to vector<8xf32>
    %88 = vector.shape_cast %87 : vector<8xf32> to vector<8x1xf32>
    %89 = tpu.reciprocal %88 {approx = true} : vector<8x1xf32> -> vector<8x1xf32>
    %90 = vector.broadcast %89 : vector<8x1xf32> to vector<8x8xf32>
    %91 = arith.mulf %86, %90 : vector<8x8xf32>
    %92 = arith.truncf %91 : vector<8x8xf32> to vector<8x8xbf16>
    %93 = vector.extract_strided_slice %57 {offsets = [0, 32], sizes = [8, 32], strides = [1, 1]} : vector<8x128xbf16> to vector<8x32xbf16>
    %cst_49 = arith.constant dense<0.000000e+00> : vector<8x32xf32>
    %94 = tpu.matmul %92, %93, %cst_49 {dimension_numbers = #tpu.dot_dimension_numbers<[1], [0], [0], [1], [0, 0, 1, 1], [], []>} : vector<8x8xbf16>, vector<8x32xbf16>, vector<8x32xf32> -> vector<8x32xf32>
    %95 = arith.truncf %94 : vector<8x32xf32> to vector<8x32xbf16>
    %96 = vector.extract_strided_slice %51 {offsets = [32, 0], sizes = [32, 128], strides = [1, 1]} : vector<128x128xbf16> to vector<32x128xbf16>
    %cst_50 = arith.constant dense<0.000000e+00> : vector<8x128xf32>
    %97 = tpu.matmul %95, %96, %cst_50 {dimension_numbers = #tpu.dot_dimension_numbers<[1], [0], [0], [1], [0, 0, 1, 1], [], []>} : vector<8x32xbf16>, vector<32x128xbf16>, vector<8x128xf32> -> vector<8x128xf32>
    %98 = arith.addf %78, %97 : vector<8x128xf32>
    %99 = vector.extract_strided_slice %55 {offsets = [0, 64], sizes = [8, 32], strides = [1, 1]} : vector<8x128xbf16> to vector<8x32xbf16>
    %100 = vector.extract_strided_slice %56 {offsets = [0, 64], sizes = [8, 32], strides = [1, 1]} : vector<8x128xbf16> to vector<8x32xbf16>
    %cst_51 = arith.constant dense<0.000000e+00> : vector<8x8xf32>
    %101 = tpu.matmul %99, %100, %cst_51 {dimension_numbers = #tpu.dot_dimension_numbers<[1], [1], [0], [0], [0, 0, 1, 0], [], []>} : vector<8x32xbf16>, vector<8x32xbf16>, vector<8x8xf32> -> vector<8x8xf32>
    %cst_52 = arith.constant dense<0xFF800000> : vector<8xf32>
    %102 = vector.multi_reduction <maximumf>, %101, %cst_52 [1] : vector<8x8xf32> to vector<8xf32>
    %103 = vector.shape_cast %102 : vector<8xf32> to vector<8x1xf32>
    %104 = vector.broadcast %103 : vector<8x1xf32> to vector<8x8xf32>
    %105 = arith.subf %101, %104 : vector<8x8xf32>
    %106 = math.exp %105 : vector<8x8xf32>
    %cst_53 = arith.constant dense<0.000000e+00> : vector<8xf32>
    %107 = vector.multi_reduction <add>, %106, %cst_53 [1] : vector<8x8xf32> to vector<8xf32>
    %108 = vector.shape_cast %107 : vector<8xf32> to vector<8x1xf32>
    %109 = tpu.reciprocal %108 {approx = true} : vector<8x1xf32> -> vector<8x1xf32>
    %110 = vector.broadcast %109 : vector<8x1xf32> to vector<8x8xf32>
    %111 = arith.mulf %106, %110 : vector<8x8xf32>
    %112 = arith.truncf %111 : vector<8x8xf32> to vector<8x8xbf16>
    %113 = vector.extract_strided_slice %57 {offsets = [0, 64], sizes = [8, 32], strides = [1, 1]} : vector<8x128xbf16> to vector<8x32xbf16>
    %cst_54 = arith.constant dense<0.000000e+00> : vector<8x32xf32>
    %114 = tpu.matmul %112, %113, %cst_54 {dimension_numbers = #tpu.dot_dimension_numbers<[1], [0], [0], [1], [0, 0, 1, 1], [], []>} : vector<8x8xbf16>, vector<8x32xbf16>, vector<8x32xf32> -> vector<8x32xf32>
    %115 = arith.truncf %114 : vector<8x32xf32> to vector<8x32xbf16>
    %116 = vector.extract_strided_slice %51 {offsets = [64, 0], sizes = [32, 128], strides = [1, 1]} : vector<128x128xbf16> to vector<32x128xbf16>
    %cst_55 = arith.constant dense<0.000000e+00> : vector<8x128xf32>
    %117 = tpu.matmul %115, %116, %cst_55 {dimension_numbers = #tpu.dot_dimension_numbers<[1], [0], [0], [1], [0, 0, 1, 1], [], []>} : vector<8x32xbf16>, vector<32x128xbf16>, vector<8x128xf32> -> vector<8x128xf32>
    %118 = arith.addf %98, %117 : vector<8x128xf32>
    %119 = vector.extract_strided_slice %55 {offsets = [0, 96], sizes = [8, 32], strides = [1, 1]} : vector<8x128xbf16> to vector<8x32xbf16>
    %120 = vector.extract_strided_slice %56 {offsets = [0, 96], sizes = [8, 32], strides = [1, 1]} : vector<8x128xbf16> to vector<8x32xbf16>
    %cst_56 = arith.constant dense<0.000000e+00> : vector<8x8xf32>
    %121 = tpu.matmul %119, %120, %cst_56 {dimension_numbers = #tpu.dot_dimension_numbers<[1], [1], [0], [0], [0, 0, 1, 0], [], []>} : vector<8x32xbf16>, vector<8x32xbf16>, vector<8x8xf32> -> vector<8x8xf32>
    %cst_57 = arith.constant dense<0xFF800000> : vector<8xf32>
    %122 = vector.multi_reduction <maximumf>, %121, %cst_57 [1] : vector<8x8xf32> to vector<8xf32>
    %123 = vector.shape_cast %122 : vector<8xf32> to vector<8x1xf32>
    %124 = vector.broadcast %123 : vector<8x1xf32> to vector<8x8xf32>
    %125 = arith.subf %121, %124 : vector<8x8xf32>
    %126 = math.exp %125 : vector<8x8xf32>
    %cst_58 = arith.constant dense<0.000000e+00> : vector<8xf32>
    %127 = vector.multi_reduction <add>, %126, %cst_58 [1] : vector<8x8xf32> to vector<8xf32>
    %128 = vector.shape_cast %127 : vector<8xf32> to vector<8x1xf32>
    %129 = tpu.reciprocal %128 {approx = true} : vector<8x1xf32> -> vector<8x1xf32>
    %130 = vector.broadcast %129 : vector<8x1xf32> to vector<8x8xf32>
    %131 = arith.mulf %126, %130 : vector<8x8xf32>
    %132 = arith.truncf %131 : vector<8x8xf32> to vector<8x8xbf16>
    %133 = vector.extract_strided_slice %57 {offsets = [0, 96], sizes = [8, 32], strides = [1, 1]} : vector<8x128xbf16> to vector<8x32xbf16>
    %cst_59 = arith.constant dense<0.000000e+00> : vector<8x32xf32>
    %134 = tpu.matmul %132, %133, %cst_59 {dimension_numbers = #tpu.dot_dimension_numbers<[1], [0], [0], [1], [0, 0, 1, 1], [], []>} : vector<8x8xbf16>, vector<8x32xbf16>, vector<8x32xf32> -> vector<8x32xf32>
    %135 = arith.truncf %134 : vector<8x32xf32> to vector<8x32xbf16>
    %136 = vector.extract_strided_slice %51 {offsets = [96, 0], sizes = [32, 128], strides = [1, 1]} : vector<128x128xbf16> to vector<32x128xbf16>
    %cst_60 = arith.constant dense<0.000000e+00> : vector<8x128xf32>
    %137 = tpu.matmul %135, %136, %cst_60 {dimension_numbers = #tpu.dot_dimension_numbers<[1], [0], [0], [1], [0, 0, 1, 1], [], []>} : vector<8x32xbf16>, vector<32x128xbf16>, vector<8x128xf32> -> vector<8x128xf32>
    %138 = arith.addf %118, %137 : vector<8x128xf32>
    %139 = vector.extract_strided_slice %52 {offsets = [8, 0], sizes = [8, 128], strides = [1, 1]} : vector<16x128xbf16> to vector<8x128xbf16>
    %140 = vector.extract_strided_slice %53 {offsets = [8, 0], sizes = [8, 128], strides = [1, 1]} : vector<16x128xbf16> to vector<8x128xbf16>
    %141 = vector.extract_strided_slice %54 {offsets = [8, 0], sizes = [8, 128], strides = [1, 1]} : vector<16x128xbf16> to vector<8x128xbf16>
    %cst_61 = arith.constant 0.000000e+00 : f32
    %142 = vector.broadcast %cst_61 : f32 to vector<8x128xf32>
    %143 = vector.extract_strided_slice %139 {offsets = [0, 0], sizes = [8, 32], strides = [1, 1]} : vector<8x128xbf16> to vector<8x32xbf16>
    %144 = vector.extract_strided_slice %140 {offsets = [0, 0], sizes = [8, 32], strides = [1, 1]} : vector<8x128xbf16> to vector<8x32xbf16>
    %cst_62 = arith.constant dense<0.000000e+00> : vector<8x8xf32>
    %145 = tpu.matmul %143, %144, %cst_62 {dimension_numbers = #tpu.dot_dimension_numbers<[1], [1], [0], [0], [0, 0, 1, 0], [], []>} : vector<8x32xbf16>, vector<8x32xbf16>, vector<8x8xf32> -> vector<8x8xf32>
    %cst_63 = arith.constant dense<0xFF800000> : vector<8xf32>
    %146 = vector.multi_reduction <maximumf>, %145, %cst_63 [1] : vector<8x8xf32> to vector<8xf32>
    %147 = vector.shape_cast %146 : vector<8xf32> to vector<8x1xf32>
    %148 = vector.broadcast %147 : vector<8x1xf32> to vector<8x8xf32>
    %149 = arith.subf %145, %148 : vector<8x8xf32>
    %150 = math.exp %149 : vector<8x8xf32>
    %cst_64 = arith.constant dense<0.000000e+00> : vector<8xf32>
    %151 = vector.multi_reduction <add>, %150, %cst_64 [1] : vector<8x8xf32> to vector<8xf32>
    %152 = vector.shape_cast %151 : vector<8xf32> to vector<8x1xf32>
    %153 = tpu.reciprocal %152 {approx = true} : vector<8x1xf32> -> vector<8x1xf32>
    %154 = vector.broadcast %153 : vector<8x1xf32> to vector<8x8xf32>
    %155 = arith.mulf %150, %154 : vector<8x8xf32>
    %156 = arith.truncf %155 : vector<8x8xf32> to vector<8x8xbf16>
    %157 = vector.extract_strided_slice %141 {offsets = [0, 0], sizes = [8, 32], strides = [1, 1]} : vector<8x128xbf16> to vector<8x32xbf16>
    %cst_65 = arith.constant dense<0.000000e+00> : vector<8x32xf32>
    %158 = tpu.matmul %156, %157, %cst_65 {dimension_numbers = #tpu.dot_dimension_numbers<[1], [0], [0], [1], [0, 0, 1, 1], [], []>} : vector<8x8xbf16>, vector<8x32xbf16>, vector<8x32xf32> -> vector<8x32xf32>
    %159 = arith.truncf %158 : vector<8x32xf32> to vector<8x32xbf16>
    %160 = vector.extract_strided_slice %51 {offsets = [0, 0], sizes = [32, 128], strides = [1, 1]} : vector<128x128xbf16> to vector<32x128xbf16>
    %cst_66 = arith.constant dense<0.000000e+00> : vector<8x128xf32>
    %161 = tpu.matmul %159, %160, %cst_66 {dimension_numbers = #tpu.dot_dimension_numbers<[1], [0], [0], [1], [0, 0, 1, 1], [], []>} : vector<8x32xbf16>, vector<32x128xbf16>, vector<8x128xf32> -> vector<8x128xf32>
    %162 = arith.addf %142, %161 : vector<8x128xf32>
    %163 = vector.extract_strided_slice %139 {offsets = [0, 32], sizes = [8, 32], strides = [1, 1]} : vector<8x128xbf16> to vector<8x32xbf16>
    %164 = vector.extract_strided_slice %140 {offsets = [0, 32], sizes = [8, 32], strides = [1, 1]} : vector<8x128xbf16> to vector<8x32xbf16>
    %cst_67 = arith.constant dense<0.000000e+00> : vector<8x8xf32>
    %165 = tpu.matmul %163, %164, %cst_67 {dimension_numbers = #tpu.dot_dimension_numbers<[1], [1], [0], [0], [0, 0, 1, 0], [], []>} : vector<8x32xbf16>, vector<8x32xbf16>, vector<8x8xf32> -> vector<8x8xf32>
    %cst_68 = arith.constant dense<0xFF800000> : vector<8xf32>
    %166 = vector.multi_reduction <maximumf>, %165, %cst_68 [1] : vector<8x8xf32> to vector<8xf32>
    %167 = vector.shape_cast %166 : vector<8xf32> to vector<8x1xf32>
    %168 = vector.broadcast %167 : vector<8x1xf32> to vector<8x8xf32>
    %169 = arith.subf %165, %168 : vector<8x8xf32>
    %170 = math.exp %169 : vector<8x8xf32>
    %cst_69 = arith.constant dense<0.000000e+00> : vector<8xf32>
    %171 = vector.multi_reduction <add>, %170, %cst_69 [1] : vector<8x8xf32> to vector<8xf32>
    %172 = vector.shape_cast %171 : vector<8xf32> to vector<8x1xf32>
    %173 = tpu.reciprocal %172 {approx = true} : vector<8x1xf32> -> vector<8x1xf32>
    %174 = vector.broadcast %173 : vector<8x1xf32> to vector<8x8xf32>
    %175 = arith.mulf %170, %174 : vector<8x8xf32>
    %176 = arith.truncf %175 : vector<8x8xf32> to vector<8x8xbf16>
    %177 = vector.extract_strided_slice %141 {offsets = [0, 32], sizes = [8, 32], strides = [1, 1]} : vector<8x128xbf16> to vector<8x32xbf16>
    %cst_70 = arith.constant dense<0.000000e+00> : vector<8x32xf32>
    %178 = tpu.matmul %176, %177, %cst_70 {dimension_numbers = #tpu.dot_dimension_numbers<[1], [0], [0], [1], [0, 0, 1, 1], [], []>} : vector<8x8xbf16>, vector<8x32xbf16>, vector<8x32xf32> -> vector<8x32xf32>
    %179 = arith.truncf %178 : vector<8x32xf32> to vector<8x32xbf16>
    %180 = vector.extract_strided_slice %51 {offsets = [32, 0], sizes = [32, 128], strides = [1, 1]} : vector<128x128xbf16> to vector<32x128xbf16>
    %cst_71 = arith.constant dense<0.000000e+00> : vector<8x128xf32>
    %181 = tpu.matmul %179, %180, %cst_71 {dimension_numbers = #tpu.dot_dimension_numbers<[1], [0], [0], [1], [0, 0, 1, 1], [], []>} : vector<8x32xbf16>, vector<32x128xbf16>, vector<8x128xf32> -> vector<8x128xf32>
    %182 = arith.addf %162, %181 : vector<8x128xf32>
    %183 = vector.extract_strided_slice %139 {offsets = [0, 64], sizes = [8, 32], strides = [1, 1]} : vector<8x128xbf16> to vector<8x32xbf16>
    %184 = vector.extract_strided_slice %140 {offsets = [0, 64], sizes = [8, 32], strides = [1, 1]} : vector<8x128xbf16> to vector<8x32xbf16>
    %cst_72 = arith.constant dense<0.000000e+00> : vector<8x8xf32>
    %185 = tpu.matmul %183, %184, %cst_72 {dimension_numbers = #tpu.dot_dimension_numbers<[1], [1], [0], [0], [0, 0, 1, 0], [], []>} : vector<8x32xbf16>, vector<8x32xbf16>, vector<8x8xf32> -> vector<8x8xf32>
    %cst_73 = arith.constant dense<0xFF800000> : vector<8xf32>
    %186 = vector.multi_reduction <maximumf>, %185, %cst_73 [1] : vector<8x8xf32> to vector<8xf32>
    %187 = vector.shape_cast %186 : vector<8xf32> to vector<8x1xf32>
    %188 = vector.broadcast %187 : vector<8x1xf32> to vector<8x8xf32>
    %189 = arith.subf %185, %188 : vector<8x8xf32>
    %190 = math.exp %189 : vector<8x8xf32>
    %cst_74 = arith.constant dense<0.000000e+00> : vector<8xf32>
    %191 = vector.multi_reduction <add>, %190, %cst_74 [1] : vector<8x8xf32> to vector<8xf32>
    %192 = vector.shape_cast %191 : vector<8xf32> to vector<8x1xf32>
    %193 = tpu.reciprocal %192 {approx = true} : vector<8x1xf32> -> vector<8x1xf32>
    %194 = vector.broadcast %193 : vector<8x1xf32> to vector<8x8xf32>
    %195 = arith.mulf %190, %194 : vector<8x8xf32>
    %196 = arith.truncf %195 : vector<8x8xf32> to vector<8x8xbf16>
    %197 = vector.extract_strided_slice %141 {offsets = [0, 64], sizes = [8, 32], strides = [1, 1]} : vector<8x128xbf16> to vector<8x32xbf16>
    %cst_75 = arith.constant dense<0.000000e+00> : vector<8x32xf32>
    %198 = tpu.matmul %196, %197, %cst_75 {dimension_numbers = #tpu.dot_dimension_numbers<[1], [0], [0], [1], [0, 0, 1, 1], [], []>} : vector<8x8xbf16>, vector<8x32xbf16>, vector<8x32xf32> -> vector<8x32xf32>
    %199 = arith.truncf %198 : vector<8x32xf32> to vector<8x32xbf16>
    %200 = vector.extract_strided_slice %51 {offsets = [64, 0], sizes = [32, 128], strides = [1, 1]} : vector<128x128xbf16> to vector<32x128xbf16>
    %cst_76 = arith.constant dense<0.000000e+00> : vector<8x128xf32>
    %201 = tpu.matmul %199, %200, %cst_76 {dimension_numbers = #tpu.dot_dimension_numbers<[1], [0], [0], [1], [0, 0, 1, 1], [], []>} : vector<8x32xbf16>, vector<32x128xbf16>, vector<8x128xf32> -> vector<8x128xf32>
    %202 = arith.addf %182, %201 : vector<8x128xf32>
    %203 = vector.extract_strided_slice %139 {offsets = [0, 96], sizes = [8, 32], strides = [1, 1]} : vector<8x128xbf16> to vector<8x32xbf16>
    %204 = vector.extract_strided_slice %140 {offsets = [0, 96], sizes = [8, 32], strides = [1, 1]} : vector<8x128xbf16> to vector<8x32xbf16>
    %cst_77 = arith.constant dense<0.000000e+00> : vector<8x8xf32>
    %205 = tpu.matmul %203, %204, %cst_77 {dimension_numbers = #tpu.dot_dimension_numbers<[1], [1], [0], [0], [0, 0, 1, 0], [], []>} : vector<8x32xbf16>, vector<8x32xbf16>, vector<8x8xf32> -> vector<8x8xf32>
    %cst_78 = arith.constant dense<0xFF800000> : vector<8xf32>
    %206 = vector.multi_reduction <maximumf>, %205, %cst_78 [1] : vector<8x8xf32> to vector<8xf32>
    %207 = vector.shape_cast %206 : vector<8xf32> to vector<8x1xf32>
    %208 = vector.broadcast %207 : vector<8x1xf32> to vector<8x8xf32>
    %209 = arith.subf %205, %208 : vector<8x8xf32>
    %210 = math.exp %209 : vector<8x8xf32>
    %cst_79 = arith.constant dense<0.000000e+00> : vector<8xf32>
    %211 = vector.multi_reduction <add>, %210, %cst_79 [1] : vector<8x8xf32> to vector<8xf32>
    %212 = vector.shape_cast %211 : vector<8xf32> to vector<8x1xf32>
    %213 = tpu.reciprocal %212 {approx = true} : vector<8x1xf32> -> vector<8x1xf32>
    %214 = vector.broadcast %213 : vector<8x1xf32> to vector<8x8xf32>
    %215 = arith.mulf %210, %214 : vector<8x8xf32>
    %216 = arith.truncf %215 : vector<8x8xf32> to vector<8x8xbf16>
    %217 = vector.extract_strided_slice %141 {offsets = [0, 96], sizes = [8, 32], strides = [1, 1]} : vector<8x128xbf16> to vector<8x32xbf16>
    %cst_80 = arith.constant dense<0.000000e+00> : vector<8x32xf32>
    %218 = tpu.matmul %216, %217, %cst_80 {dimension_numbers = #tpu.dot_dimension_numbers<[1], [0], [0], [1], [0, 0, 1, 1], [], []>} : vector<8x8xbf16>, vector<8x32xbf16>, vector<8x32xf32> -> vector<8x32xf32>
    %219 = arith.truncf %218 : vector<8x32xf32> to vector<8x32xbf16>
    %220 = vector.extract_strided_slice %51 {offsets = [96, 0], sizes = [32, 128], strides = [1, 1]} : vector<128x128xbf16> to vector<32x128xbf16>
    %cst_81 = arith.constant dense<0.000000e+00> : vector<8x128xf32>
    %221 = tpu.matmul %219, %220, %cst_81 {dimension_numbers = #tpu.dot_dimension_numbers<[1], [0], [0], [1], [0, 0, 1, 1], [], []>} : vector<8x32xbf16>, vector<32x128xbf16>, vector<8x128xf32> -> vector<8x128xf32>
    %222 = arith.addf %202, %221 : vector<8x128xf32>
    %223 = tpu.concatenate %138, %222 in 0 : vector<8x128xf32>, vector<8x128xf32> -> vector<16x128xf32>
    %224 = vector.broadcast %29 : vector<1x128xf32> to vector<16x128xf32>
    %225 = arith.addf %223, %224 : vector<16x128xf32>
    %226 = arith.addf %12, %225 : vector<16x128xf32>
    %c31 = arith.constant 31 : index
    %c0_82 = arith.constant 0 : index
    %227 = vector.load %arg10[%c31, %c0_82] : memref<51x128xf32, #tpu.memory_space<vmem>>, vector<1x128xf32>
    %c35 = arith.constant 35 : index
    %c0_83 = arith.constant 0 : index
    %228 = vector.load %arg10[%c35, %c0_83] : memref<51x128xf32, #tpu.memory_space<vmem>>, vector<1x128xf32>
    %cst_84 = arith.constant dense<0.000000e+00> : vector<16xf32>
    %229 = vector.multi_reduction <add>, %226, %cst_84 [1] : vector<16x128xf32> to vector<16xf32>
    %230 = vector.shape_cast %229 : vector<16xf32> to vector<16x1xf32>
    %cst_85 = arith.constant 1.280000e+02 : f32
    %231 = vector.broadcast %cst_85 : f32 to vector<16x1xf32>
    %232 = arith.divf %230, %231 : vector<16x1xf32>
    %233 = vector.broadcast %232 : vector<16x1xf32> to vector<16x128xf32>
    %234 = arith.subf %226, %233 : vector<16x128xf32>
    %235 = arith.mulf %234, %234 : vector<16x128xf32>
    %cst_86 = arith.constant dense<0.000000e+00> : vector<16xf32>
    %236 = vector.multi_reduction <add>, %235, %cst_86 [1] : vector<16x128xf32> to vector<16xf32>
    %237 = vector.shape_cast %236 : vector<16xf32> to vector<16x1xf32>
    %cst_87 = arith.constant 1.280000e+02 : f32
    %238 = vector.broadcast %cst_87 : f32 to vector<16x1xf32>
    %239 = arith.divf %237, %238 : vector<16x1xf32>
    %cst_88 = arith.constant 9.99999974E-6 : f32
    %240 = vector.broadcast %cst_88 : f32 to vector<16x1xf32>
    %241 = arith.addf %239, %240 : vector<16x1xf32>
    %242 = math.rsqrt %241 : vector<16x1xf32>
    %243 = vector.broadcast %242 : vector<16x1xf32> to vector<16x128xf32>
    %244 = arith.mulf %234, %243 : vector<16x128xf32>
    %245 = vector.broadcast %227 : vector<1x128xf32> to vector<16x128xf32>
    %246 = arith.mulf %244, %245 : vector<16x128xf32>
    %247 = vector.broadcast %228 : vector<1x128xf32> to vector<16x128xf32>
    %248 = arith.addf %246, %247 : vector<16x128xf32>
    %c0_89 = arith.constant 0 : index
    %c0_90 = arith.constant 0 : index
    %c0_91 = arith.constant 0 : index
    %249 = vector.load %arg7[%c0_89, %c0_90, %c0_91] : memref<4x128x256xbf16, #tpu.memory_space<vmem>>, vector<1x128x256xbf16>
    %250 = vector.shape_cast %249 : vector<1x128x256xbf16> to vector<128x256xbf16>
    %c0_92 = arith.constant 0 : index
    %c0_93 = arith.constant 0 : index
    %251 = vector.load %arg11[%c0_92, %c0_93] : memref<4x256xf32, #tpu.memory_space<vmem>>, vector<1x256xf32>
    %c0_94 = arith.constant 0 : index
    %c0_95 = arith.constant 0 : index
    %c0_96 = arith.constant 0 : index
    %252 = vector.load %arg8[%c0_94, %c0_95, %c0_96] : memref<4x256x128xbf16, #tpu.memory_space<vmem>>, vector<1x256x128xbf16>
    %253 = vector.shape_cast %252 : vector<1x256x128xbf16> to vector<256x128xbf16>
    %c27 = arith.constant 27 : index
    %c0_97 = arith.constant 0 : index
    %254 = vector.load %arg10[%c27, %c0_97] : memref<51x128xf32, #tpu.memory_space<vmem>>, vector<1x128xf32>
    %c32 = arith.constant 32 : index
    %c0_98 = arith.constant 0 : index
    %255 = vector.load %arg10[%c32, %c0_98] : memref<51x128xf32, #tpu.memory_space<vmem>>, vector<1x128xf32>
    %c36 = arith.constant 36 : index
    %c0_99 = arith.constant 0 : index
    %256 = vector.load %arg10[%c36, %c0_99] : memref<51x128xf32, #tpu.memory_space<vmem>>, vector<1x128xf32>
    %257 = arith.truncf %248 : vector<16x128xf32> to vector<16x128xbf16>
    %cst_100 = arith.constant dense<0.000000e+00> : vector<16x256xf32>
    %258 = tpu.matmul %257, %250, %cst_100 {dimension_numbers = #tpu.dot_dimension_numbers<[1], [0], [0], [1], [0, 0, 1, 1], [], []>} : vector<16x128xbf16>, vector<128x256xbf16>, vector<16x256xf32> -> vector<16x256xf32>
    %259 = vector.broadcast %251 : vector<1x256xf32> to vector<16x256xf32>
    %260 = arith.addf %258, %259 : vector<16x256xf32>
    %cst_101 = arith.constant 0.000000e+00 : f32
    %261 = vector.broadcast %cst_101 : f32 to vector<16x256xf32>
    %262 = arith.maximumf %260, %261 : vector<16x256xf32>
    %263 = arith.truncf %262 : vector<16x256xf32> to vector<16x256xbf16>
    %cst_102 = arith.constant dense<0.000000e+00> : vector<16x128xf32>
    %264 = tpu.matmul %263, %253, %cst_102 {dimension_numbers = #tpu.dot_dimension_numbers<[1], [0], [0], [1], [0, 0, 1, 1], [], []>} : vector<16x256xbf16>, vector<256x128xbf16>, vector<16x128xf32> -> vector<16x128xf32>
    %265 = vector.broadcast %254 : vector<1x128xf32> to vector<16x128xf32>
    %266 = arith.addf %264, %265 : vector<16x128xf32>
    %267 = arith.addf %248, %266 : vector<16x128xf32>
    %cst_103 = arith.constant dense<0.000000e+00> : vector<16xf32>
    %268 = vector.multi_reduction <add>, %267, %cst_103 [1] : vector<16x128xf32> to vector<16xf32>
    %269 = vector.shape_cast %268 : vector<16xf32> to vector<16x1xf32>
    %cst_104 = arith.constant 1.280000e+02 : f32
    %270 = vector.broadcast %cst_104 : f32 to vector<16x1xf32>
    %271 = arith.divf %269, %270 : vector<16x1xf32>
    %272 = vector.broadcast %271 : vector<16x1xf32> to vector<16x128xf32>
    %273 = arith.subf %267, %272 : vector<16x128xf32>
    %274 = arith.mulf %273, %273 : vector<16x128xf32>
    %cst_105 = arith.constant dense<0.000000e+00> : vector<16xf32>
    %275 = vector.multi_reduction <add>, %274, %cst_105 [1] : vector<16x128xf32> to vector<16xf32>
    %276 = vector.shape_cast %275 : vector<16xf32> to vector<16x1xf32>
    %cst_106 = arith.constant 1.280000e+02 : f32
    %277 = vector.broadcast %cst_106 : f32 to vector<16x1xf32>
    %278 = arith.divf %276, %277 : vector<16x1xf32>
    %cst_107 = arith.constant 9.99999974E-6 : f32
    %279 = vector.broadcast %cst_107 : f32 to vector<16x1xf32>
    %280 = arith.addf %278, %279 : vector<16x1xf32>
    %281 = math.rsqrt %280 : vector<16x1xf32>
    %282 = vector.broadcast %281 : vector<16x1xf32> to vector<16x128xf32>
    %283 = arith.mulf %273, %282 : vector<16x128xf32>
    %284 = vector.broadcast %255 : vector<1x128xf32> to vector<16x128xf32>
    %285 = arith.mulf %283, %284 : vector<16x128xf32>
    %286 = vector.broadcast %256 : vector<1x128xf32> to vector<16x128xf32>
    %287 = arith.addf %285, %286 : vector<16x128xf32>
    %c7 = arith.constant 7 : index
    %c0_108 = arith.constant 0 : index
    %288 = vector.load %arg10[%c7, %c0_108] : memref<51x128xf32, #tpu.memory_space<vmem>>, vector<1x128xf32>
    %c8 = arith.constant 8 : index
    %c0_109 = arith.constant 0 : index
    %289 = vector.load %arg10[%c8, %c0_109] : memref<51x128xf32, #tpu.memory_space<vmem>>, vector<1x128xf32>
    %c9 = arith.constant 9 : index
    %c0_110 = arith.constant 0 : index
    %290 = vector.load %arg10[%c9, %c0_110] : memref<51x128xf32, #tpu.memory_space<vmem>>, vector<1x128xf32>
    %c10 = arith.constant 10 : index
    %c0_111 = arith.constant 0 : index
    %291 = vector.load %arg10[%c10, %c0_111] : memref<51x128xf32, #tpu.memory_space<vmem>>, vector<1x128xf32>
    %292 = arith.truncf %287 : vector<16x128xf32> to vector<16x128xbf16>
    %c4_112 = arith.constant 4 : index
    %c0_113 = arith.constant 0 : index
    %c0_114 = arith.constant 0 : index
    %293 = vector.load %arg6[%c4_112, %c0_113, %c0_114] : memref<24x128x128xbf16, #tpu.memory_space<vmem>>, vector<1x128x128xbf16>
    %294 = vector.shape_cast %293 : vector<1x128x128xbf16> to vector<128x128xbf16>
    %cst_115 = arith.constant dense<0.000000e+00> : vector<16x128xf32>
    %295 = tpu.matmul %292, %294, %cst_115 {dimension_numbers = #tpu.dot_dimension_numbers<[1], [0], [0], [1], [0, 0, 1, 1], [], []>} : vector<16x128xbf16>, vector<128x128xbf16>, vector<16x128xf32> -> vector<16x128xf32>
    %296 = vector.broadcast %288 : vector<1x128xf32> to vector<16x128xf32>
    %297 = arith.addf %295, %296 : vector<16x128xf32>
    %298 = arith.truncf %287 : vector<16x128xf32> to vector<16x128xbf16>
    %c5_116 = arith.constant 5 : index
    %c0_117 = arith.constant 0 : index
    %c0_118 = arith.constant 0 : index
    %299 = vector.load %arg6[%c5_116, %c0_117, %c0_118] : memref<24x128x128xbf16, #tpu.memory_space<vmem>>, vector<1x128x128xbf16>
    %300 = vector.shape_cast %299 : vector<1x128x128xbf16> to vector<128x128xbf16>
    %cst_119 = arith.constant dense<0.000000e+00> : vector<16x128xf32>
    %301 = tpu.matmul %298, %300, %cst_119 {dimension_numbers = #tpu.dot_dimension_numbers<[1], [0], [0], [1], [0, 0, 1, 1], [], []>} : vector<16x128xbf16>, vector<128x128xbf16>, vector<16x128xf32> -> vector<16x128xf32>
    %302 = vector.broadcast %289 : vector<1x128xf32> to vector<16x128xf32>
    %303 = arith.addf %301, %302 : vector<16x128xf32>
    %304 = arith.truncf %287 : vector<16x128xf32> to vector<16x128xbf16>
    %c6_120 = arith.constant 6 : index
    %c0_121 = arith.constant 0 : index
    %c0_122 = arith.constant 0 : index
    %305 = vector.load %arg6[%c6_120, %c0_121, %c0_122] : memref<24x128x128xbf16, #tpu.memory_space<vmem>>, vector<1x128x128xbf16>
    %306 = vector.shape_cast %305 : vector<1x128x128xbf16> to vector<128x128xbf16>
    %cst_123 = arith.constant dense<0.000000e+00> : vector<16x128xf32>
    %307 = tpu.matmul %304, %306, %cst_123 {dimension_numbers = #tpu.dot_dimension_numbers<[1], [0], [0], [1], [0, 0, 1, 1], [], []>} : vector<16x128xbf16>, vector<128x128xbf16>, vector<16x128xf32> -> vector<16x128xf32>
    %308 = vector.broadcast %290 : vector<1x128xf32> to vector<16x128xf32>
    %309 = arith.addf %307, %308 : vector<16x128xf32>
    %cst_124 = arith.constant 0.176776692 : f32
    %310 = vector.broadcast %cst_124 : f32 to vector<16x128xf32>
    %311 = arith.mulf %297, %310 : vector<16x128xf32>
    %c7_125 = arith.constant 7 : index
    %c0_126 = arith.constant 0 : index
    %c0_127 = arith.constant 0 : index
    %312 = vector.load %arg6[%c7_125, %c0_126, %c0_127] : memref<24x128x128xbf16, #tpu.memory_space<vmem>>, vector<1x128x128xbf16>
    %313 = vector.shape_cast %312 : vector<1x128x128xbf16> to vector<128x128xbf16>
    %314 = arith.truncf %311 : vector<16x128xf32> to vector<16x128xbf16>
    %315 = arith.truncf %303 : vector<16x128xf32> to vector<16x128xbf16>
    %316 = arith.truncf %309 : vector<16x128xf32> to vector<16x128xbf16>
    %317 = vector.extract_strided_slice %314 {offsets = [0, 0], sizes = [8, 128], strides = [1, 1]} : vector<16x128xbf16> to vector<8x128xbf16>
    %318 = vector.extract_strided_slice %315 {offsets = [0, 0], sizes = [8, 128], strides = [1, 1]} : vector<16x128xbf16> to vector<8x128xbf16>
    %319 = vector.extract_strided_slice %316 {offsets = [0, 0], sizes = [8, 128], strides = [1, 1]} : vector<16x128xbf16> to vector<8x128xbf16>
    %cst_128 = arith.constant 0.000000e+00 : f32
    %320 = vector.broadcast %cst_128 : f32 to vector<8x128xf32>
    %321 = vector.extract_strided_slice %317 {offsets = [0, 0], sizes = [8, 32], strides = [1, 1]} : vector<8x128xbf16> to vector<8x32xbf16>
    %322 = vector.extract_strided_slice %318 {offsets = [0, 0], sizes = [8, 32], strides = [1, 1]} : vector<8x128xbf16> to vector<8x32xbf16>
    %cst_129 = arith.constant dense<0.000000e+00> : vector<8x8xf32>
    %323 = tpu.matmul %321, %322, %cst_129 {dimension_numbers = #tpu.dot_dimension_numbers<[1], [1], [0], [0], [0, 0, 1, 0], [], []>} : vector<8x32xbf16>, vector<8x32xbf16>, vector<8x8xf32> -> vector<8x8xf32>
    %cst_130 = arith.constant dense<0xFF800000> : vector<8xf32>
    %324 = vector.multi_reduction <maximumf>, %323, %cst_130 [1] : vector<8x8xf32> to vector<8xf32>
    %325 = vector.shape_cast %324 : vector<8xf32> to vector<8x1xf32>
    %326 = vector.broadcast %325 : vector<8x1xf32> to vector<8x8xf32>
    %327 = arith.subf %323, %326 : vector<8x8xf32>
    %328 = math.exp %327 : vector<8x8xf32>
    %cst_131 = arith.constant dense<0.000000e+00> : vector<8xf32>
    %329 = vector.multi_reduction <add>, %328, %cst_131 [1] : vector<8x8xf32> to vector<8xf32>
    %330 = vector.shape_cast %329 : vector<8xf32> to vector<8x1xf32>
    %331 = tpu.reciprocal %330 {approx = true} : vector<8x1xf32> -> vector<8x1xf32>
    %332 = vector.broadcast %331 : vector<8x1xf32> to vector<8x8xf32>
    %333 = arith.mulf %328, %332 : vector<8x8xf32>
    %334 = arith.truncf %333 : vector<8x8xf32> to vector<8x8xbf16>
    %335 = vector.extract_strided_slice %319 {offsets = [0, 0], sizes = [8, 32], strides = [1, 1]} : vector<8x128xbf16> to vector<8x32xbf16>
    %cst_132 = arith.constant dense<0.000000e+00> : vector<8x32xf32>
    %336 = tpu.matmul %334, %335, %cst_132 {dimension_numbers = #tpu.dot_dimension_numbers<[1], [0], [0], [1], [0, 0, 1, 1], [], []>} : vector<8x8xbf16>, vector<8x32xbf16>, vector<8x32xf32> -> vector<8x32xf32>
    %337 = arith.truncf %336 : vector<8x32xf32> to vector<8x32xbf16>
    %338 = vector.extract_strided_slice %313 {offsets = [0, 0], sizes = [32, 128], strides = [1, 1]} : vector<128x128xbf16> to vector<32x128xbf16>
    %cst_133 = arith.constant dense<0.000000e+00> : vector<8x128xf32>
    %339 = tpu.matmul %337, %338, %cst_133 {dimension_numbers = #tpu.dot_dimension_numbers<[1], [0], [0], [1], [0, 0, 1, 1], [], []>} : vector<8x32xbf16>, vector<32x128xbf16>, vector<8x128xf32> -> vector<8x128xf32>
    %340 = arith.addf %320, %339 : vector<8x128xf32>
    %341 = vector.extract_strided_slice %317 {offsets = [0, 32], sizes = [8, 32], strides = [1, 1]} : vector<8x128xbf16> to vector<8x32xbf16>
    %342 = vector.extract_strided_slice %318 {offsets = [0, 32], sizes = [8, 32], strides = [1, 1]} : vector<8x128xbf16> to vector<8x32xbf16>
    %cst_134 = arith.constant dense<0.000000e+00> : vector<8x8xf32>
    %343 = tpu.matmul %341, %342, %cst_134 {dimension_numbers = #tpu.dot_dimension_numbers<[1], [1], [0], [0], [0, 0, 1, 0], [], []>} : vector<8x32xbf16>, vector<8x32xbf16>, vector<8x8xf32> -> vector<8x8xf32>
    %cst_135 = arith.constant dense<0xFF800000> : vector<8xf32>
    %344 = vector.multi_reduction <maximumf>, %343, %cst_135 [1] : vector<8x8xf32> to vector<8xf32>
    %345 = vector.shape_cast %344 : vector<8xf32> to vector<8x1xf32>
    %346 = vector.broadcast %345 : vector<8x1xf32> to vector<8x8xf32>
    %347 = arith.subf %343, %346 : vector<8x8xf32>
    %348 = math.exp %347 : vector<8x8xf32>
    %cst_136 = arith.constant dense<0.000000e+00> : vector<8xf32>
    %349 = vector.multi_reduction <add>, %348, %cst_136 [1] : vector<8x8xf32> to vector<8xf32>
    %350 = vector.shape_cast %349 : vector<8xf32> to vector<8x1xf32>
    %351 = tpu.reciprocal %350 {approx = true} : vector<8x1xf32> -> vector<8x1xf32>
    %352 = vector.broadcast %351 : vector<8x1xf32> to vector<8x8xf32>
    %353 = arith.mulf %348, %352 : vector<8x8xf32>
    %354 = arith.truncf %353 : vector<8x8xf32> to vector<8x8xbf16>
    %355 = vector.extract_strided_slice %319 {offsets = [0, 32], sizes = [8, 32], strides = [1, 1]} : vector<8x128xbf16> to vector<8x32xbf16>
    %cst_137 = arith.constant dense<0.000000e+00> : vector<8x32xf32>
    %356 = tpu.matmul %354, %355, %cst_137 {dimension_numbers = #tpu.dot_dimension_numbers<[1], [0], [0], [1], [0, 0, 1, 1], [], []>} : vector<8x8xbf16>, vector<8x32xbf16>, vector<8x32xf32> -> vector<8x32xf32>
    %357 = arith.truncf %356 : vector<8x32xf32> to vector<8x32xbf16>
    %358 = vector.extract_strided_slice %313 {offsets = [32, 0], sizes = [32, 128], strides = [1, 1]} : vector<128x128xbf16> to vector<32x128xbf16>
    %cst_138 = arith.constant dense<0.000000e+00> : vector<8x128xf32>
    %359 = tpu.matmul %357, %358, %cst_138 {dimension_numbers = #tpu.dot_dimension_numbers<[1], [0], [0], [1], [0, 0, 1, 1], [], []>} : vector<8x32xbf16>, vector<32x128xbf16>, vector<8x128xf32> -> vector<8x128xf32>
    %360 = arith.addf %340, %359 : vector<8x128xf32>
    %361 = vector.extract_strided_slice %317 {offsets = [0, 64], sizes = [8, 32], strides = [1, 1]} : vector<8x128xbf16> to vector<8x32xbf16>
    %362 = vector.extract_strided_slice %318 {offsets = [0, 64], sizes = [8, 32], strides = [1, 1]} : vector<8x128xbf16> to vector<8x32xbf16>
    %cst_139 = arith.constant dense<0.000000e+00> : vector<8x8xf32>
    %363 = tpu.matmul %361, %362, %cst_139 {dimension_numbers = #tpu.dot_dimension_numbers<[1], [1], [0], [0], [0, 0, 1, 0], [], []>} : vector<8x32xbf16>, vector<8x32xbf16>, vector<8x8xf32> -> vector<8x8xf32>
    %cst_140 = arith.constant dense<0xFF800000> : vector<8xf32>
    %364 = vector.multi_reduction <maximumf>, %363, %cst_140 [1] : vector<8x8xf32> to vector<8xf32>
    %365 = vector.shape_cast %364 : vector<8xf32> to vector<8x1xf32>
    %366 = vector.broadcast %365 : vector<8x1xf32> to vector<8x8xf32>
    %367 = arith.subf %363, %366 : vector<8x8xf32>
    %368 = math.exp %367 : vector<8x8xf32>
    %cst_141 = arith.constant dense<0.000000e+00> : vector<8xf32>
    %369 = vector.multi_reduction <add>, %368, %cst_141 [1] : vector<8x8xf32> to vector<8xf32>
    %370 = vector.shape_cast %369 : vector<8xf32> to vector<8x1xf32>
    %371 = tpu.reciprocal %370 {approx = true} : vector<8x1xf32> -> vector<8x1xf32>
    %372 = vector.broadcast %371 : vector<8x1xf32> to vector<8x8xf32>
    %373 = arith.mulf %368, %372 : vector<8x8xf32>
    %374 = arith.truncf %373 : vector<8x8xf32> to vector<8x8xbf16>
    %375 = vector.extract_strided_slice %319 {offsets = [0, 64], sizes = [8, 32], strides = [1, 1]} : vector<8x128xbf16> to vector<8x32xbf16>
    %cst_142 = arith.constant dense<0.000000e+00> : vector<8x32xf32>
    %376 = tpu.matmul %374, %375, %cst_142 {dimension_numbers = #tpu.dot_dimension_numbers<[1], [0], [0], [1], [0, 0, 1, 1], [], []>} : vector<8x8xbf16>, vector<8x32xbf16>, vector<8x32xf32> -> vector<8x32xf32>
    %377 = arith.truncf %376 : vector<8x32xf32> to vector<8x32xbf16>
    %378 = vector.extract_strided_slice %313 {offsets = [64, 0], sizes = [32, 128], strides = [1, 1]} : vector<128x128xbf16> to vector<32x128xbf16>
    %cst_143 = arith.constant dense<0.000000e+00> : vector<8x128xf32>
    %379 = tpu.matmul %377, %378, %cst_143 {dimension_numbers = #tpu.dot_dimension_numbers<[1], [0], [0], [1], [0, 0, 1, 1], [], []>} : vector<8x32xbf16>, vector<32x128xbf16>, vector<8x128xf32> -> vector<8x128xf32>
    %380 = arith.addf %360, %379 : vector<8x128xf32>
    %381 = vector.extract_strided_slice %317 {offsets = [0, 96], sizes = [8, 32], strides = [1, 1]} : vector<8x128xbf16> to vector<8x32xbf16>
    %382 = vector.extract_strided_slice %318 {offsets = [0, 96], sizes = [8, 32], strides = [1, 1]} : vector<8x128xbf16> to vector<8x32xbf16>
    %cst_144 = arith.constant dense<0.000000e+00> : vector<8x8xf32>
    %383 = tpu.matmul %381, %382, %cst_144 {dimension_numbers = #tpu.dot_dimension_numbers<[1], [1], [0], [0], [0, 0, 1, 0], [], []>} : vector<8x32xbf16>, vector<8x32xbf16>, vector<8x8xf32> -> vector<8x8xf32>
    %cst_145 = arith.constant dense<0xFF800000> : vector<8xf32>
    %384 = vector.multi_reduction <maximumf>, %383, %cst_145 [1] : vector<8x8xf32> to vector<8xf32>
    %385 = vector.shape_cast %384 : vector<8xf32> to vector<8x1xf32>
    %386 = vector.broadcast %385 : vector<8x1xf32> to vector<8x8xf32>
    %387 = arith.subf %383, %386 : vector<8x8xf32>
    %388 = math.exp %387 : vector<8x8xf32>
    %cst_146 = arith.constant dense<0.000000e+00> : vector<8xf32>
    %389 = vector.multi_reduction <add>, %388, %cst_146 [1] : vector<8x8xf32> to vector<8xf32>
    %390 = vector.shape_cast %389 : vector<8xf32> to vector<8x1xf32>
    %391 = tpu.reciprocal %390 {approx = true} : vector<8x1xf32> -> vector<8x1xf32>
    %392 = vector.broadcast %391 : vector<8x1xf32> to vector<8x8xf32>
    %393 = arith.mulf %388, %392 : vector<8x8xf32>
    %394 = arith.truncf %393 : vector<8x8xf32> to vector<8x8xbf16>
    %395 = vector.extract_strided_slice %319 {offsets = [0, 96], sizes = [8, 32], strides = [1, 1]} : vector<8x128xbf16> to vector<8x32xbf16>
    %cst_147 = arith.constant dense<0.000000e+00> : vector<8x32xf32>
    %396 = tpu.matmul %394, %395, %cst_147 {dimension_numbers = #tpu.dot_dimension_numbers<[1], [0], [0], [1], [0, 0, 1, 1], [], []>} : vector<8x8xbf16>, vector<8x32xbf16>, vector<8x32xf32> -> vector<8x32xf32>
    %397 = arith.truncf %396 : vector<8x32xf32> to vector<8x32xbf16>
    %398 = vector.extract_strided_slice %313 {offsets = [96, 0], sizes = [32, 128], strides = [1, 1]} : vector<128x128xbf16> to vector<32x128xbf16>
    %cst_148 = arith.constant dense<0.000000e+00> : vector<8x128xf32>
    %399 = tpu.matmul %397, %398, %cst_148 {dimension_numbers = #tpu.dot_dimension_numbers<[1], [0], [0], [1], [0, 0, 1, 1], [], []>} : vector<8x32xbf16>, vector<32x128xbf16>, vector<8x128xf32> -> vector<8x128xf32>
    %400 = arith.addf %380, %399 : vector<8x128xf32>
    %401 = vector.extract_strided_slice %314 {offsets = [8, 0], sizes = [8, 128], strides = [1, 1]} : vector<16x128xbf16> to vector<8x128xbf16>
    %402 = vector.extract_strided_slice %315 {offsets = [8, 0], sizes = [8, 128], strides = [1, 1]} : vector<16x128xbf16> to vector<8x128xbf16>
    %403 = vector.extract_strided_slice %316 {offsets = [8, 0], sizes = [8, 128], strides = [1, 1]} : vector<16x128xbf16> to vector<8x128xbf16>
    %cst_149 = arith.constant 0.000000e+00 : f32
    %404 = vector.broadcast %cst_149 : f32 to vector<8x128xf32>
    %405 = vector.extract_strided_slice %401 {offsets = [0, 0], sizes = [8, 32], strides = [1, 1]} : vector<8x128xbf16> to vector<8x32xbf16>
    %406 = vector.extract_strided_slice %402 {offsets = [0, 0], sizes = [8, 32], strides = [1, 1]} : vector<8x128xbf16> to vector<8x32xbf16>
    %cst_150 = arith.constant dense<0.000000e+00> : vector<8x8xf32>
    %407 = tpu.matmul %405, %406, %cst_150 {dimension_numbers = #tpu.dot_dimension_numbers<[1], [1], [0], [0], [0, 0, 1, 0], [], []>} : vector<8x32xbf16>, vector<8x32xbf16>, vector<8x8xf32> -> vector<8x8xf32>
    %cst_151 = arith.constant dense<0xFF800000> : vector<8xf32>
    %408 = vector.multi_reduction <maximumf>, %407, %cst_151 [1] : vector<8x8xf32> to vector<8xf32>
    %409 = vector.shape_cast %408 : vector<8xf32> to vector<8x1xf32>
    %410 = vector.broadcast %409 : vector<8x1xf32> to vector<8x8xf32>
    %411 = arith.subf %407, %410 : vector<8x8xf32>
    %412 = math.exp %411 : vector<8x8xf32>
    %cst_152 = arith.constant dense<0.000000e+00> : vector<8xf32>
    %413 = vector.multi_reduction <add>, %412, %cst_152 [1] : vector<8x8xf32> to vector<8xf32>
    %414 = vector.shape_cast %413 : vector<8xf32> to vector<8x1xf32>
    %415 = tpu.reciprocal %414 {approx = true} : vector<8x1xf32> -> vector<8x1xf32>
    %416 = vector.broadcast %415 : vector<8x1xf32> to vector<8x8xf32>
    %417 = arith.mulf %412, %416 : vector<8x8xf32>
    %418 = arith.truncf %417 : vector<8x8xf32> to vector<8x8xbf16>
    %419 = vector.extract_strided_slice %403 {offsets = [0, 0], sizes = [8, 32], strides = [1, 1]} : vector<8x128xbf16> to vector<8x32xbf16>
    %cst_153 = arith.constant dense<0.000000e+00> : vector<8x32xf32>
    %420 = tpu.matmul %418, %419, %cst_153 {dimension_numbers = #tpu.dot_dimension_numbers<[1], [0], [0], [1], [0, 0, 1, 1], [], []>} : vector<8x8xbf16>, vector<8x32xbf16>, vector<8x32xf32> -> vector<8x32xf32>
    %421 = arith.truncf %420 : vector<8x32xf32> to vector<8x32xbf16>
    %422 = vector.extract_strided_slice %313 {offsets = [0, 0], sizes = [32, 128], strides = [1, 1]} : vector<128x128xbf16> to vector<32x128xbf16>
    %cst_154 = arith.constant dense<0.000000e+00> : vector<8x128xf32>
    %423 = tpu.matmul %421, %422, %cst_154 {dimension_numbers = #tpu.dot_dimension_numbers<[1], [0], [0], [1], [0, 0, 1, 1], [], []>} : vector<8x32xbf16>, vector<32x128xbf16>, vector<8x128xf32> -> vector<8x128xf32>
    %424 = arith.addf %404, %423 : vector<8x128xf32>
    %425 = vector.extract_strided_slice %401 {offsets = [0, 32], sizes = [8, 32], strides = [1, 1]} : vector<8x128xbf16> to vector<8x32xbf16>
    %426 = vector.extract_strided_slice %402 {offsets = [0, 32], sizes = [8, 32], strides = [1, 1]} : vector<8x128xbf16> to vector<8x32xbf16>
    %cst_155 = arith.constant dense<0.000000e+00> : vector<8x8xf32>
    %427 = tpu.matmul %425, %426, %cst_155 {dimension_numbers = #tpu.dot_dimension_numbers<[1], [1], [0], [0], [0, 0, 1, 0], [], []>} : vector<8x32xbf16>, vector<8x32xbf16>, vector<8x8xf32> -> vector<8x8xf32>
    %cst_156 = arith.constant dense<0xFF800000> : vector<8xf32>
    %428 = vector.multi_reduction <maximumf>, %427, %cst_156 [1] : vector<8x8xf32> to vector<8xf32>
    %429 = vector.shape_cast %428 : vector<8xf32> to vector<8x1xf32>
    %430 = vector.broadcast %429 : vector<8x1xf32> to vector<8x8xf32>
    %431 = arith.subf %427, %430 : vector<8x8xf32>
    %432 = math.exp %431 : vector<8x8xf32>
    %cst_157 = arith.constant dense<0.000000e+00> : vector<8xf32>
    %433 = vector.multi_reduction <add>, %432, %cst_157 [1] : vector<8x8xf32> to vector<8xf32>
    %434 = vector.shape_cast %433 : vector<8xf32> to vector<8x1xf32>
    %435 = tpu.reciprocal %434 {approx = true} : vector<8x1xf32> -> vector<8x1xf32>
    %436 = vector.broadcast %435 : vector<8x1xf32> to vector<8x8xf32>
    %437 = arith.mulf %432, %436 : vector<8x8xf32>
    %438 = arith.truncf %437 : vector<8x8xf32> to vector<8x8xbf16>
    %439 = vector.extract_strided_slice %403 {offsets = [0, 32], sizes = [8, 32], strides = [1, 1]} : vector<8x128xbf16> to vector<8x32xbf16>
    %cst_158 = arith.constant dense<0.000000e+00> : vector<8x32xf32>
    %440 = tpu.matmul %438, %439, %cst_158 {dimension_numbers = #tpu.dot_dimension_numbers<[1], [0], [0], [1], [0, 0, 1, 1], [], []>} : vector<8x8xbf16>, vector<8x32xbf16>, vector<8x32xf32> -> vector<8x32xf32>
    %441 = arith.truncf %440 : vector<8x32xf32> to vector<8x32xbf16>
    %442 = vector.extract_strided_slice %313 {offsets = [32, 0], sizes = [32, 128], strides = [1, 1]} : vector<128x128xbf16> to vector<32x128xbf16>
    %cst_159 = arith.constant dense<0.000000e+00> : vector<8x128xf32>
    %443 = tpu.matmul %441, %442, %cst_159 {dimension_numbers = #tpu.dot_dimension_numbers<[1], [0], [0], [1], [0, 0, 1, 1], [], []>} : vector<8x32xbf16>, vector<32x128xbf16>, vector<8x128xf32> -> vector<8x128xf32>
    %444 = arith.addf %424, %443 : vector<8x128xf32>
    %445 = vector.extract_strided_slice %401 {offsets = [0, 64], sizes = [8, 32], strides = [1, 1]} : vector<8x128xbf16> to vector<8x32xbf16>
    %446 = vector.extract_strided_slice %402 {offsets = [0, 64], sizes = [8, 32], strides = [1, 1]} : vector<8x128xbf16> to vector<8x32xbf16>
    %cst_160 = arith.constant dense<0.000000e+00> : vector<8x8xf32>
    %447 = tpu.matmul %445, %446, %cst_160 {dimension_numbers = #tpu.dot_dimension_numbers<[1], [1], [0], [0], [0, 0, 1, 0], [], []>} : vector<8x32xbf16>, vector<8x32xbf16>, vector<8x8xf32> -> vector<8x8xf32>
    %cst_161 = arith.constant dense<0xFF800000> : vector<8xf32>
    %448 = vector.multi_reduction <maximumf>, %447, %cst_161 [1] : vector<8x8xf32> to vector<8xf32>
    %449 = vector.shape_cast %448 : vector<8xf32> to vector<8x1xf32>
    %450 = vector.broadcast %449 : vector<8x1xf32> to vector<8x8xf32>
    %451 = arith.subf %447, %450 : vector<8x8xf32>
    %452 = math.exp %451 : vector<8x8xf32>
    %cst_162 = arith.constant dense<0.000000e+00> : vector<8xf32>
    %453 = vector.multi_reduction <add>, %452, %cst_162 [1] : vector<8x8xf32> to vector<8xf32>
    %454 = vector.shape_cast %453 : vector<8xf32> to vector<8x1xf32>
    %455 = tpu.reciprocal %454 {approx = true} : vector<8x1xf32> -> vector<8x1xf32>
    %456 = vector.broadcast %455 : vector<8x1xf32> to vector<8x8xf32>
    %457 = arith.mulf %452, %456 : vector<8x8xf32>
    %458 = arith.truncf %457 : vector<8x8xf32> to vector<8x8xbf16>
    %459 = vector.extract_strided_slice %403 {offsets = [0, 64], sizes = [8, 32], strides = [1, 1]} : vector<8x128xbf16> to vector<8x32xbf16>
    %cst_163 = arith.constant dense<0.000000e+00> : vector<8x32xf32>
    %460 = tpu.matmul %458, %459, %cst_163 {dimension_numbers = #tpu.dot_dimension_numbers<[1], [0], [0], [1], [0, 0, 1, 1], [], []>} : vector<8x8xbf16>, vector<8x32xbf16>, vector<8x32xf32> -> vector<8x32xf32>
    %461 = arith.truncf %460 : vector<8x32xf32> to vector<8x32xbf16>
    %462 = vector.extract_strided_slice %313 {offsets = [64, 0], sizes = [32, 128], strides = [1, 1]} : vector<128x128xbf16> to vector<32x128xbf16>
    %cst_164 = arith.constant dense<0.000000e+00> : vector<8x128xf32>
    %463 = tpu.matmul %461, %462, %cst_164 {dimension_numbers = #tpu.dot_dimension_numbers<[1], [0], [0], [1], [0, 0, 1, 1], [], []>} : vector<8x32xbf16>, vector<32x128xbf16>, vector<8x128xf32> -> vector<8x128xf32>
    %464 = arith.addf %444, %463 : vector<8x128xf32>
    %465 = vector.extract_strided_slice %401 {offsets = [0, 96], sizes = [8, 32], strides = [1, 1]} : vector<8x128xbf16> to vector<8x32xbf16>
    %466 = vector.extract_strided_slice %402 {offsets = [0, 96], sizes = [8, 32], strides = [1, 1]} : vector<8x128xbf16> to vector<8x32xbf16>
    %cst_165 = arith.constant dense<0.000000e+00> : vector<8x8xf32>
    %467 = tpu.matmul %465, %466, %cst_165 {dimension_numbers = #tpu.dot_dimension_numbers<[1], [1], [0], [0], [0, 0, 1, 0], [], []>} : vector<8x32xbf16>, vector<8x32xbf16>, vector<8x8xf32> -> vector<8x8xf32>
    %cst_166 = arith.constant dense<0xFF800000> : vector<8xf32>
    %468 = vector.multi_reduction <maximumf>, %467, %cst_166 [1] : vector<8x8xf32> to vector<8xf32>
    %469 = vector.shape_cast %468 : vector<8xf32> to vector<8x1xf32>
    %470 = vector.broadcast %469 : vector<8x1xf32> to vector<8x8xf32>
    %471 = arith.subf %467, %470 : vector<8x8xf32>
    %472 = math.exp %471 : vector<8x8xf32>
    %cst_167 = arith.constant dense<0.000000e+00> : vector<8xf32>
    %473 = vector.multi_reduction <add>, %472, %cst_167 [1] : vector<8x8xf32> to vector<8xf32>
    %474 = vector.shape_cast %473 : vector<8xf32> to vector<8x1xf32>
    %475 = tpu.reciprocal %474 {approx = true} : vector<8x1xf32> -> vector<8x1xf32>
    %476 = vector.broadcast %475 : vector<8x1xf32> to vector<8x8xf32>
    %477 = arith.mulf %472, %476 : vector<8x8xf32>
    %478 = arith.truncf %477 : vector<8x8xf32> to vector<8x8xbf16>
    %479 = vector.extract_strided_slice %403 {offsets = [0, 96], sizes = [8, 32], strides = [1, 1]} : vector<8x128xbf16> to vector<8x32xbf16>
    %cst_168 = arith.constant dense<0.000000e+00> : vector<8x32xf32>
    %480 = tpu.matmul %478, %479, %cst_168 {dimension_numbers = #tpu.dot_dimension_numbers<[1], [0], [0], [1], [0, 0, 1, 1], [], []>} : vector<8x8xbf16>, vector<8x32xbf16>, vector<8x32xf32> -> vector<8x32xf32>
    %481 = arith.truncf %480 : vector<8x32xf32> to vector<8x32xbf16>
    %482 = vector.extract_strided_slice %313 {offsets = [96, 0], sizes = [32, 128], strides = [1, 1]} : vector<128x128xbf16> to vector<32x128xbf16>
    %cst_169 = arith.constant dense<0.000000e+00> : vector<8x128xf32>
    %483 = tpu.matmul %481, %482, %cst_169 {dimension_numbers = #tpu.dot_dimension_numbers<[1], [0], [0], [1], [0, 0, 1, 1], [], []>} : vector<8x32xbf16>, vector<32x128xbf16>, vector<8x128xf32> -> vector<8x128xf32>
    %484 = arith.addf %464, %483 : vector<8x128xf32>
    %485 = tpu.concatenate %400, %484 in 0 : vector<8x128xf32>, vector<8x128xf32> -> vector<16x128xf32>
    %486 = vector.broadcast %291 : vector<1x128xf32> to vector<16x128xf32>
    %487 = arith.addf %485, %486 : vector<16x128xf32>
    %488 = arith.addf %287, %487 : vector<16x128xf32>
    %c33 = arith.constant 33 : index
    %c0_170 = arith.constant 0 : index
    %489 = vector.load %arg10[%c33, %c0_170] : memref<51x128xf32, #tpu.memory_space<vmem>>, vector<1x128xf32>
    %c37 = arith.constant 37 : index
    %c0_171 = arith.constant 0 : index
    %490 = vector.load %arg10[%c37, %c0_171] : memref<51x128xf32, #tpu.memory_space<vmem>>, vector<1x128xf32>
    %cst_172 = arith.constant dense<0.000000e+00> : vector<16xf32>
    %491 = vector.multi_reduction <add>, %488, %cst_172 [1] : vector<16x128xf32> to vector<16xf32>
    %492 = vector.shape_cast %491 : vector<16xf32> to vector<16x1xf32>
    %cst_173 = arith.constant 1.280000e+02 : f32
    %493 = vector.broadcast %cst_173 : f32 to vector<16x1xf32>
    %494 = arith.divf %492, %493 : vector<16x1xf32>
    %495 = vector.broadcast %494 : vector<16x1xf32> to vector<16x128xf32>
    %496 = arith.subf %488, %495 : vector<16x128xf32>
    %497 = arith.mulf %496, %496 : vector<16x128xf32>
    %cst_174 = arith.constant dense<0.000000e+00> : vector<16xf32>
    %498 = vector.multi_reduction <add>, %497, %cst_174 [1] : vector<16x128xf32> to vector<16xf32>
    %499 = vector.shape_cast %498 : vector<16xf32> to vector<16x1xf32>
    %cst_175 = arith.constant 1.280000e+02 : f32
    %500 = vector.broadcast %cst_175 : f32 to vector<16x1xf32>
    %501 = arith.divf %499, %500 : vector<16x1xf32>
    %cst_176 = arith.constant 9.99999974E-6 : f32
    %502 = vector.broadcast %cst_176 : f32 to vector<16x1xf32>
    %503 = arith.addf %501, %502 : vector<16x1xf32>
    %504 = math.rsqrt %503 : vector<16x1xf32>
    %505 = vector.broadcast %504 : vector<16x1xf32> to vector<16x128xf32>
    %506 = arith.mulf %496, %505 : vector<16x128xf32>
    %507 = vector.broadcast %489 : vector<1x128xf32> to vector<16x128xf32>
    %508 = arith.mulf %506, %507 : vector<16x128xf32>
    %509 = vector.broadcast %490 : vector<1x128xf32> to vector<16x128xf32>
    %510 = arith.addf %508, %509 : vector<16x128xf32>
    %c1_177 = arith.constant 1 : index
    %c0_178 = arith.constant 0 : index
    %c0_179 = arith.constant 0 : index
    %511 = vector.load %arg7[%c1_177, %c0_178, %c0_179] : memref<4x128x256xbf16, #tpu.memory_space<vmem>>, vector<1x128x256xbf16>
    %512 = vector.shape_cast %511 : vector<1x128x256xbf16> to vector<128x256xbf16>
    %c1_180 = arith.constant 1 : index
    %c0_181 = arith.constant 0 : index
    %513 = vector.load %arg11[%c1_180, %c0_181] : memref<4x256xf32, #tpu.memory_space<vmem>>, vector<1x256xf32>
    %c1_182 = arith.constant 1 : index
    %c0_183 = arith.constant 0 : index
    %c0_184 = arith.constant 0 : index
    %514 = vector.load %arg8[%c1_182, %c0_183, %c0_184] : memref<4x256x128xbf16, #tpu.memory_space<vmem>>, vector<1x256x128xbf16>
    %515 = vector.shape_cast %514 : vector<1x256x128xbf16> to vector<256x128xbf16>
    %c28 = arith.constant 28 : index
    %c0_185 = arith.constant 0 : index
    %516 = vector.load %arg10[%c28, %c0_185] : memref<51x128xf32, #tpu.memory_space<vmem>>, vector<1x128xf32>
    %c34 = arith.constant 34 : index
    %c0_186 = arith.constant 0 : index
    %517 = vector.load %arg10[%c34, %c0_186] : memref<51x128xf32, #tpu.memory_space<vmem>>, vector<1x128xf32>
    %c38 = arith.constant 38 : index
    %c0_187 = arith.constant 0 : index
    %518 = vector.load %arg10[%c38, %c0_187] : memref<51x128xf32, #tpu.memory_space<vmem>>, vector<1x128xf32>
    %519 = arith.truncf %510 : vector<16x128xf32> to vector<16x128xbf16>
    %cst_188 = arith.constant dense<0.000000e+00> : vector<16x256xf32>
    %520 = tpu.matmul %519, %512, %cst_188 {dimension_numbers = #tpu.dot_dimension_numbers<[1], [0], [0], [1], [0, 0, 1, 1], [], []>} : vector<16x128xbf16>, vector<128x256xbf16>, vector<16x256xf32> -> vector<16x256xf32>
    %521 = vector.broadcast %513 : vector<1x256xf32> to vector<16x256xf32>
    %522 = arith.addf %520, %521 : vector<16x256xf32>
    %cst_189 = arith.constant 0.000000e+00 : f32
    %523 = vector.broadcast %cst_189 : f32 to vector<16x256xf32>
    %524 = arith.maximumf %522, %523 : vector<16x256xf32>
    %525 = arith.truncf %524 : vector<16x256xf32> to vector<16x256xbf16>
    %cst_190 = arith.constant dense<0.000000e+00> : vector<16x128xf32>
    %526 = tpu.matmul %525, %515, %cst_190 {dimension_numbers = #tpu.dot_dimension_numbers<[1], [0], [0], [1], [0, 0, 1, 1], [], []>} : vector<16x256xbf16>, vector<256x128xbf16>, vector<16x128xf32> -> vector<16x128xf32>
    %527 = vector.broadcast %516 : vector<1x128xf32> to vector<16x128xf32>
    %528 = arith.addf %526, %527 : vector<16x128xf32>
    %529 = arith.addf %510, %528 : vector<16x128xf32>
    %cst_191 = arith.constant dense<0.000000e+00> : vector<16xf32>
    %530 = vector.multi_reduction <add>, %529, %cst_191 [1] : vector<16x128xf32> to vector<16xf32>
    %531 = vector.shape_cast %530 : vector<16xf32> to vector<16x1xf32>
    %cst_192 = arith.constant 1.280000e+02 : f32
    %532 = vector.broadcast %cst_192 : f32 to vector<16x1xf32>
    %533 = arith.divf %531, %532 : vector<16x1xf32>
    %534 = vector.broadcast %533 : vector<16x1xf32> to vector<16x128xf32>
    %535 = arith.subf %529, %534 : vector<16x128xf32>
    %536 = arith.mulf %535, %535 : vector<16x128xf32>
    %cst_193 = arith.constant dense<0.000000e+00> : vector<16xf32>
    %537 = vector.multi_reduction <add>, %536, %cst_193 [1] : vector<16x128xf32> to vector<16xf32>
    %538 = vector.shape_cast %537 : vector<16xf32> to vector<16x1xf32>
    %cst_194 = arith.constant 1.280000e+02 : f32
    %539 = vector.broadcast %cst_194 : f32 to vector<16x1xf32>
    %540 = arith.divf %538, %539 : vector<16x1xf32>
    %cst_195 = arith.constant 9.99999974E-6 : f32
    %541 = vector.broadcast %cst_195 : f32 to vector<16x1xf32>
    %542 = arith.addf %540, %541 : vector<16x1xf32>
    %543 = math.rsqrt %542 : vector<16x1xf32>
    %544 = vector.broadcast %543 : vector<16x1xf32> to vector<16x128xf32>
    %545 = arith.mulf %535, %544 : vector<16x128xf32>
    %546 = vector.broadcast %517 : vector<1x128xf32> to vector<16x128xf32>
    %547 = arith.mulf %545, %546 : vector<16x128xf32>
    %548 = vector.broadcast %518 : vector<1x128xf32> to vector<16x128xf32>
    %549 = arith.addf %547, %548 : vector<16x128xf32>
    %c11 = arith.constant 11 : index
    %c0_196 = arith.constant 0 : index
    %550 = vector.load %arg10[%c11, %c0_196] : memref<51x128xf32, #tpu.memory_space<vmem>>, vector<1x128xf32>
    %c12 = arith.constant 12 : index
    %c0_197 = arith.constant 0 : index
    %551 = vector.load %arg10[%c12, %c0_197] : memref<51x128xf32, #tpu.memory_space<vmem>>, vector<1x128xf32>
    %c13 = arith.constant 13 : index
    %c0_198 = arith.constant 0 : index
    %552 = vector.load %arg10[%c13, %c0_198] : memref<51x128xf32, #tpu.memory_space<vmem>>, vector<1x128xf32>
    %c14 = arith.constant 14 : index
    %c0_199 = arith.constant 0 : index
    %553 = vector.load %arg10[%c14, %c0_199] : memref<51x128xf32, #tpu.memory_space<vmem>>, vector<1x128xf32>
    %554 = arith.truncf %25 : vector<16x128xf32> to vector<16x128xbf16>
    %c8_200 = arith.constant 8 : index
    %c0_201 = arith.constant 0 : index
    %c0_202 = arith.constant 0 : index
    %555 = vector.load %arg6[%c8_200, %c0_201, %c0_202] : memref<24x128x128xbf16, #tpu.memory_space<vmem>>, vector<1x128x128xbf16>
    %556 = vector.shape_cast %555 : vector<1x128x128xbf16> to vector<128x128xbf16>
    %cst_203 = arith.constant dense<0.000000e+00> : vector<16x128xf32>
    %557 = tpu.matmul %554, %556, %cst_203 {dimension_numbers = #tpu.dot_dimension_numbers<[1], [0], [0], [1], [0, 0, 1, 1], [], []>} : vector<16x128xbf16>, vector<128x128xbf16>, vector<16x128xf32> -> vector<16x128xf32>
    %558 = vector.broadcast %550 : vector<1x128xf32> to vector<16x128xf32>
    %559 = arith.addf %557, %558 : vector<16x128xf32>
    %560 = arith.truncf %25 : vector<16x128xf32> to vector<16x128xbf16>
    %c9_204 = arith.constant 9 : index
    %c0_205 = arith.constant 0 : index
    %c0_206 = arith.constant 0 : index
    %561 = vector.load %arg6[%c9_204, %c0_205, %c0_206] : memref<24x128x128xbf16, #tpu.memory_space<vmem>>, vector<1x128x128xbf16>
    %562 = vector.shape_cast %561 : vector<1x128x128xbf16> to vector<128x128xbf16>
    %cst_207 = arith.constant dense<0.000000e+00> : vector<16x128xf32>
    %563 = tpu.matmul %560, %562, %cst_207 {dimension_numbers = #tpu.dot_dimension_numbers<[1], [0], [0], [1], [0, 0, 1, 1], [], []>} : vector<16x128xbf16>, vector<128x128xbf16>, vector<16x128xf32> -> vector<16x128xf32>
    %564 = vector.broadcast %551 : vector<1x128xf32> to vector<16x128xf32>
    %565 = arith.addf %563, %564 : vector<16x128xf32>
    %566 = arith.truncf %25 : vector<16x128xf32> to vector<16x128xbf16>
    %c10_208 = arith.constant 10 : index
    %c0_209 = arith.constant 0 : index
    %c0_210 = arith.constant 0 : index
    %567 = vector.load %arg6[%c10_208, %c0_209, %c0_210] : memref<24x128x128xbf16, #tpu.memory_space<vmem>>, vector<1x128x128xbf16>
    %568 = vector.shape_cast %567 : vector<1x128x128xbf16> to vector<128x128xbf16>
    %cst_211 = arith.constant dense<0.000000e+00> : vector<16x128xf32>
    %569 = tpu.matmul %566, %568, %cst_211 {dimension_numbers = #tpu.dot_dimension_numbers<[1], [0], [0], [1], [0, 0, 1, 1], [], []>} : vector<16x128xbf16>, vector<128x128xbf16>, vector<16x128xf32> -> vector<16x128xf32>
    %570 = vector.broadcast %552 : vector<1x128xf32> to vector<16x128xf32>
    %571 = arith.addf %569, %570 : vector<16x128xf32>
    %cst_212 = arith.constant 0.176776692 : f32
    %572 = vector.broadcast %cst_212 : f32 to vector<16x128xf32>
    %573 = arith.mulf %559, %572 : vector<16x128xf32>
    %c11_213 = arith.constant 11 : index
    %c0_214 = arith.constant 0 : index
    %c0_215 = arith.constant 0 : index
    %574 = vector.load %arg6[%c11_213, %c0_214, %c0_215] : memref<24x128x128xbf16, #tpu.memory_space<vmem>>, vector<1x128x128xbf16>
    %575 = vector.shape_cast %574 : vector<1x128x128xbf16> to vector<128x128xbf16>
    %576 = arith.truncf %573 : vector<16x128xf32> to vector<16x128xbf16>
    %577 = arith.truncf %565 : vector<16x128xf32> to vector<16x128xbf16>
    %578 = arith.truncf %571 : vector<16x128xf32> to vector<16x128xbf16>
    %579 = vector.extract_strided_slice %576 {offsets = [0, 0], sizes = [8, 128], strides = [1, 1]} : vector<16x128xbf16> to vector<8x128xbf16>
    %580 = vector.extract_strided_slice %577 {offsets = [0, 0], sizes = [8, 128], strides = [1, 1]} : vector<16x128xbf16> to vector<8x128xbf16>
    %581 = vector.extract_strided_slice %578 {offsets = [0, 0], sizes = [8, 128], strides = [1, 1]} : vector<16x128xbf16> to vector<8x128xbf16>
    %cst_216 = arith.constant 0.000000e+00 : f32
    %582 = vector.broadcast %cst_216 : f32 to vector<8x128xf32>
    %583 = vector.extract_strided_slice %579 {offsets = [0, 0], sizes = [8, 32], strides = [1, 1]} : vector<8x128xbf16> to vector<8x32xbf16>
    %584 = vector.extract_strided_slice %580 {offsets = [0, 0], sizes = [8, 32], strides = [1, 1]} : vector<8x128xbf16> to vector<8x32xbf16>
    %cst_217 = arith.constant dense<0.000000e+00> : vector<8x8xf32>
    %585 = tpu.matmul %583, %584, %cst_217 {dimension_numbers = #tpu.dot_dimension_numbers<[1], [1], [0], [0], [0, 0, 1, 0], [], []>} : vector<8x32xbf16>, vector<8x32xbf16>, vector<8x8xf32> -> vector<8x8xf32>
    %cst_218 = arith.constant dense<0xFF800000> : vector<8xf32>
    %586 = vector.multi_reduction <maximumf>, %585, %cst_218 [1] : vector<8x8xf32> to vector<8xf32>
    %587 = vector.shape_cast %586 : vector<8xf32> to vector<8x1xf32>
    %588 = vector.broadcast %587 : vector<8x1xf32> to vector<8x8xf32>
    %589 = arith.subf %585, %588 : vector<8x8xf32>
    %590 = math.exp %589 : vector<8x8xf32>
    %cst_219 = arith.constant dense<0.000000e+00> : vector<8xf32>
    %591 = vector.multi_reduction <add>, %590, %cst_219 [1] : vector<8x8xf32> to vector<8xf32>
    %592 = vector.shape_cast %591 : vector<8xf32> to vector<8x1xf32>
    %593 = tpu.reciprocal %592 {approx = true} : vector<8x1xf32> -> vector<8x1xf32>
    %594 = vector.broadcast %593 : vector<8x1xf32> to vector<8x8xf32>
    %595 = arith.mulf %590, %594 : vector<8x8xf32>
    %596 = arith.truncf %595 : vector<8x8xf32> to vector<8x8xbf16>
    %597 = vector.extract_strided_slice %581 {offsets = [0, 0], sizes = [8, 32], strides = [1, 1]} : vector<8x128xbf16> to vector<8x32xbf16>
    %cst_220 = arith.constant dense<0.000000e+00> : vector<8x32xf32>
    %598 = tpu.matmul %596, %597, %cst_220 {dimension_numbers = #tpu.dot_dimension_numbers<[1], [0], [0], [1], [0, 0, 1, 1], [], []>} : vector<8x8xbf16>, vector<8x32xbf16>, vector<8x32xf32> -> vector<8x32xf32>
    %599 = arith.truncf %598 : vector<8x32xf32> to vector<8x32xbf16>
    %600 = vector.extract_strided_slice %575 {offsets = [0, 0], sizes = [32, 128], strides = [1, 1]} : vector<128x128xbf16> to vector<32x128xbf16>
    %cst_221 = arith.constant dense<0.000000e+00> : vector<8x128xf32>
    %601 = tpu.matmul %599, %600, %cst_221 {dimension_numbers = #tpu.dot_dimension_numbers<[1], [0], [0], [1], [0, 0, 1, 1], [], []>} : vector<8x32xbf16>, vector<32x128xbf16>, vector<8x128xf32> -> vector<8x128xf32>
    %602 = arith.addf %582, %601 : vector<8x128xf32>
    %603 = vector.extract_strided_slice %579 {offsets = [0, 32], sizes = [8, 32], strides = [1, 1]} : vector<8x128xbf16> to vector<8x32xbf16>
    %604 = vector.extract_strided_slice %580 {offsets = [0, 32], sizes = [8, 32], strides = [1, 1]} : vector<8x128xbf16> to vector<8x32xbf16>
    %cst_222 = arith.constant dense<0.000000e+00> : vector<8x8xf32>
    %605 = tpu.matmul %603, %604, %cst_222 {dimension_numbers = #tpu.dot_dimension_numbers<[1], [1], [0], [0], [0, 0, 1, 0], [], []>} : vector<8x32xbf16>, vector<8x32xbf16>, vector<8x8xf32> -> vector<8x8xf32>
    %cst_223 = arith.constant dense<0xFF800000> : vector<8xf32>
    %606 = vector.multi_reduction <maximumf>, %605, %cst_223 [1] : vector<8x8xf32> to vector<8xf32>
    %607 = vector.shape_cast %606 : vector<8xf32> to vector<8x1xf32>
    %608 = vector.broadcast %607 : vector<8x1xf32> to vector<8x8xf32>
    %609 = arith.subf %605, %608 : vector<8x8xf32>
    %610 = math.exp %609 : vector<8x8xf32>
    %cst_224 = arith.constant dense<0.000000e+00> : vector<8xf32>
    %611 = vector.multi_reduction <add>, %610, %cst_224 [1] : vector<8x8xf32> to vector<8xf32>
    %612 = vector.shape_cast %611 : vector<8xf32> to vector<8x1xf32>
    %613 = tpu.reciprocal %612 {approx = true} : vector<8x1xf32> -> vector<8x1xf32>
    %614 = vector.broadcast %613 : vector<8x1xf32> to vector<8x8xf32>
    %615 = arith.mulf %610, %614 : vector<8x8xf32>
    %616 = arith.truncf %615 : vector<8x8xf32> to vector<8x8xbf16>
    %617 = vector.extract_strided_slice %581 {offsets = [0, 32], sizes = [8, 32], strides = [1, 1]} : vector<8x128xbf16> to vector<8x32xbf16>
    %cst_225 = arith.constant dense<0.000000e+00> : vector<8x32xf32>
    %618 = tpu.matmul %616, %617, %cst_225 {dimension_numbers = #tpu.dot_dimension_numbers<[1], [0], [0], [1], [0, 0, 1, 1], [], []>} : vector<8x8xbf16>, vector<8x32xbf16>, vector<8x32xf32> -> vector<8x32xf32>
    %619 = arith.truncf %618 : vector<8x32xf32> to vector<8x32xbf16>
    %620 = vector.extract_strided_slice %575 {offsets = [32, 0], sizes = [32, 128], strides = [1, 1]} : vector<128x128xbf16> to vector<32x128xbf16>
    %cst_226 = arith.constant dense<0.000000e+00> : vector<8x128xf32>
    %621 = tpu.matmul %619, %620, %cst_226 {dimension_numbers = #tpu.dot_dimension_numbers<[1], [0], [0], [1], [0, 0, 1, 1], [], []>} : vector<8x32xbf16>, vector<32x128xbf16>, vector<8x128xf32> -> vector<8x128xf32>
    %622 = arith.addf %602, %621 : vector<8x128xf32>
    %623 = vector.extract_strided_slice %579 {offsets = [0, 64], sizes = [8, 32], strides = [1, 1]} : vector<8x128xbf16> to vector<8x32xbf16>
    %624 = vector.extract_strided_slice %580 {offsets = [0, 64], sizes = [8, 32], strides = [1, 1]} : vector<8x128xbf16> to vector<8x32xbf16>
    %cst_227 = arith.constant dense<0.000000e+00> : vector<8x8xf32>
    %625 = tpu.matmul %623, %624, %cst_227 {dimension_numbers = #tpu.dot_dimension_numbers<[1], [1], [0], [0], [0, 0, 1, 0], [], []>} : vector<8x32xbf16>, vector<8x32xbf16>, vector<8x8xf32> -> vector<8x8xf32>
    %cst_228 = arith.constant dense<0xFF800000> : vector<8xf32>
    %626 = vector.multi_reduction <maximumf>, %625, %cst_228 [1] : vector<8x8xf32> to vector<8xf32>
    %627 = vector.shape_cast %626 : vector<8xf32> to vector<8x1xf32>
    %628 = vector.broadcast %627 : vector<8x1xf32> to vector<8x8xf32>
    %629 = arith.subf %625, %628 : vector<8x8xf32>
    %630 = math.exp %629 : vector<8x8xf32>
    %cst_229 = arith.constant dense<0.000000e+00> : vector<8xf32>
    %631 = vector.multi_reduction <add>, %630, %cst_229 [1] : vector<8x8xf32> to vector<8xf32>
    %632 = vector.shape_cast %631 : vector<8xf32> to vector<8x1xf32>
    %633 = tpu.reciprocal %632 {approx = true} : vector<8x1xf32> -> vector<8x1xf32>
    %634 = vector.broadcast %633 : vector<8x1xf32> to vector<8x8xf32>
    %635 = arith.mulf %630, %634 : vector<8x8xf32>
    %636 = arith.truncf %635 : vector<8x8xf32> to vector<8x8xbf16>
    %637 = vector.extract_strided_slice %581 {offsets = [0, 64], sizes = [8, 32], strides = [1, 1]} : vector<8x128xbf16> to vector<8x32xbf16>
    %cst_230 = arith.constant dense<0.000000e+00> : vector<8x32xf32>
    %638 = tpu.matmul %636, %637, %cst_230 {dimension_numbers = #tpu.dot_dimension_numbers<[1], [0], [0], [1], [0, 0, 1, 1], [], []>} : vector<8x8xbf16>, vector<8x32xbf16>, vector<8x32xf32> -> vector<8x32xf32>
    %639 = arith.truncf %638 : vector<8x32xf32> to vector<8x32xbf16>
    %640 = vector.extract_strided_slice %575 {offsets = [64, 0], sizes = [32, 128], strides = [1, 1]} : vector<128x128xbf16> to vector<32x128xbf16>
    %cst_231 = arith.constant dense<0.000000e+00> : vector<8x128xf32>
    %641 = tpu.matmul %639, %640, %cst_231 {dimension_numbers = #tpu.dot_dimension_numbers<[1], [0], [0], [1], [0, 0, 1, 1], [], []>} : vector<8x32xbf16>, vector<32x128xbf16>, vector<8x128xf32> -> vector<8x128xf32>
    %642 = arith.addf %622, %641 : vector<8x128xf32>
    %643 = vector.extract_strided_slice %579 {offsets = [0, 96], sizes = [8, 32], strides = [1, 1]} : vector<8x128xbf16> to vector<8x32xbf16>
    %644 = vector.extract_strided_slice %580 {offsets = [0, 96], sizes = [8, 32], strides = [1, 1]} : vector<8x128xbf16> to vector<8x32xbf16>
    %cst_232 = arith.constant dense<0.000000e+00> : vector<8x8xf32>
    %645 = tpu.matmul %643, %644, %cst_232 {dimension_numbers = #tpu.dot_dimension_numbers<[1], [1], [0], [0], [0, 0, 1, 0], [], []>} : vector<8x32xbf16>, vector<8x32xbf16>, vector<8x8xf32> -> vector<8x8xf32>
    %cst_233 = arith.constant dense<0xFF800000> : vector<8xf32>
    %646 = vector.multi_reduction <maximumf>, %645, %cst_233 [1] : vector<8x8xf32> to vector<8xf32>
    %647 = vector.shape_cast %646 : vector<8xf32> to vector<8x1xf32>
    %648 = vector.broadcast %647 : vector<8x1xf32> to vector<8x8xf32>
    %649 = arith.subf %645, %648 : vector<8x8xf32>
    %650 = math.exp %649 : vector<8x8xf32>
    %cst_234 = arith.constant dense<0.000000e+00> : vector<8xf32>
    %651 = vector.multi_reduction <add>, %650, %cst_234 [1] : vector<8x8xf32> to vector<8xf32>
    %652 = vector.shape_cast %651 : vector<8xf32> to vector<8x1xf32>
    %653 = tpu.reciprocal %652 {approx = true} : vector<8x1xf32> -> vector<8x1xf32>
    %654 = vector.broadcast %653 : vector<8x1xf32> to vector<8x8xf32>
    %655 = arith.mulf %650, %654 : vector<8x8xf32>
    %656 = arith.truncf %655 : vector<8x8xf32> to vector<8x8xbf16>
    %657 = vector.extract_strided_slice %581 {offsets = [0, 96], sizes = [8, 32], strides = [1, 1]} : vector<8x128xbf16> to vector<8x32xbf16>
    %cst_235 = arith.constant dense<0.000000e+00> : vector<8x32xf32>
    %658 = tpu.matmul %656, %657, %cst_235 {dimension_numbers = #tpu.dot_dimension_numbers<[1], [0], [0], [1], [0, 0, 1, 1], [], []>} : vector<8x8xbf16>, vector<8x32xbf16>, vector<8x32xf32> -> vector<8x32xf32>
    %659 = arith.truncf %658 : vector<8x32xf32> to vector<8x32xbf16>
    %660 = vector.extract_strided_slice %575 {offsets = [96, 0], sizes = [32, 128], strides = [1, 1]} : vector<128x128xbf16> to vector<32x128xbf16>
    %cst_236 = arith.constant dense<0.000000e+00> : vector<8x128xf32>
    %661 = tpu.matmul %659, %660, %cst_236 {dimension_numbers = #tpu.dot_dimension_numbers<[1], [0], [0], [1], [0, 0, 1, 1], [], []>} : vector<8x32xbf16>, vector<32x128xbf16>, vector<8x128xf32> -> vector<8x128xf32>
    %662 = arith.addf %642, %661 : vector<8x128xf32>
    %663 = vector.extract_strided_slice %576 {offsets = [8, 0], sizes = [8, 128], strides = [1, 1]} : vector<16x128xbf16> to vector<8x128xbf16>
    %664 = vector.extract_strided_slice %577 {offsets = [8, 0], sizes = [8, 128], strides = [1, 1]} : vector<16x128xbf16> to vector<8x128xbf16>
    %665 = vector.extract_strided_slice %578 {offsets = [8, 0], sizes = [8, 128], strides = [1, 1]} : vector<16x128xbf16> to vector<8x128xbf16>
    %cst_237 = arith.constant 0.000000e+00 : f32
    %666 = vector.broadcast %cst_237 : f32 to vector<8x128xf32>
    %667 = vector.extract_strided_slice %663 {offsets = [0, 0], sizes = [8, 32], strides = [1, 1]} : vector<8x128xbf16> to vector<8x32xbf16>
    %668 = vector.extract_strided_slice %664 {offsets = [0, 0], sizes = [8, 32], strides = [1, 1]} : vector<8x128xbf16> to vector<8x32xbf16>
    %cst_238 = arith.constant dense<0.000000e+00> : vector<8x8xf32>
    %669 = tpu.matmul %667, %668, %cst_238 {dimension_numbers = #tpu.dot_dimension_numbers<[1], [1], [0], [0], [0, 0, 1, 0], [], []>} : vector<8x32xbf16>, vector<8x32xbf16>, vector<8x8xf32> -> vector<8x8xf32>
    %cst_239 = arith.constant dense<0xFF800000> : vector<8xf32>
    %670 = vector.multi_reduction <maximumf>, %669, %cst_239 [1] : vector<8x8xf32> to vector<8xf32>
    %671 = vector.shape_cast %670 : vector<8xf32> to vector<8x1xf32>
    %672 = vector.broadcast %671 : vector<8x1xf32> to vector<8x8xf32>
    %673 = arith.subf %669, %672 : vector<8x8xf32>
    %674 = math.exp %673 : vector<8x8xf32>
    %cst_240 = arith.constant dense<0.000000e+00> : vector<8xf32>
    %675 = vector.multi_reduction <add>, %674, %cst_240 [1] : vector<8x8xf32> to vector<8xf32>
    %676 = vector.shape_cast %675 : vector<8xf32> to vector<8x1xf32>
    %677 = tpu.reciprocal %676 {approx = true} : vector<8x1xf32> -> vector<8x1xf32>
    %678 = vector.broadcast %677 : vector<8x1xf32> to vector<8x8xf32>
    %679 = arith.mulf %674, %678 : vector<8x8xf32>
    %680 = arith.truncf %679 : vector<8x8xf32> to vector<8x8xbf16>
    %681 = vector.extract_strided_slice %665 {offsets = [0, 0], sizes = [8, 32], strides = [1, 1]} : vector<8x128xbf16> to vector<8x32xbf16>
    %cst_241 = arith.constant dense<0.000000e+00> : vector<8x32xf32>
    %682 = tpu.matmul %680, %681, %cst_241 {dimension_numbers = #tpu.dot_dimension_numbers<[1], [0], [0], [1], [0, 0, 1, 1], [], []>} : vector<8x8xbf16>, vector<8x32xbf16>, vector<8x32xf32> -> vector<8x32xf32>
    %683 = arith.truncf %682 : vector<8x32xf32> to vector<8x32xbf16>
    %684 = vector.extract_strided_slice %575 {offsets = [0, 0], sizes = [32, 128], strides = [1, 1]} : vector<128x128xbf16> to vector<32x128xbf16>
    %cst_242 = arith.constant dense<0.000000e+00> : vector<8x128xf32>
    %685 = tpu.matmul %683, %684, %cst_242 {dimension_numbers = #tpu.dot_dimension_numbers<[1], [0], [0], [1], [0, 0, 1, 1], [], []>} : vector<8x32xbf16>, vector<32x128xbf16>, vector<8x128xf32> -> vector<8x128xf32>
    %686 = arith.addf %666, %685 : vector<8x128xf32>
    %687 = vector.extract_strided_slice %663 {offsets = [0, 32], sizes = [8, 32], strides = [1, 1]} : vector<8x128xbf16> to vector<8x32xbf16>
    %688 = vector.extract_strided_slice %664 {offsets = [0, 32], sizes = [8, 32], strides = [1, 1]} : vector<8x128xbf16> to vector<8x32xbf16>
    %cst_243 = arith.constant dense<0.000000e+00> : vector<8x8xf32>
    %689 = tpu.matmul %687, %688, %cst_243 {dimension_numbers = #tpu.dot_dimension_numbers<[1], [1], [0], [0], [0, 0, 1, 0], [], []>} : vector<8x32xbf16>, vector<8x32xbf16>, vector<8x8xf32> -> vector<8x8xf32>
    %cst_244 = arith.constant dense<0xFF800000> : vector<8xf32>
    %690 = vector.multi_reduction <maximumf>, %689, %cst_244 [1] : vector<8x8xf32> to vector<8xf32>
    %691 = vector.shape_cast %690 : vector<8xf32> to vector<8x1xf32>
    %692 = vector.broadcast %691 : vector<8x1xf32> to vector<8x8xf32>
    %693 = arith.subf %689, %692 : vector<8x8xf32>
    %694 = math.exp %693 : vector<8x8xf32>
    %cst_245 = arith.constant dense<0.000000e+00> : vector<8xf32>
    %695 = vector.multi_reduction <add>, %694, %cst_245 [1] : vector<8x8xf32> to vector<8xf32>
    %696 = vector.shape_cast %695 : vector<8xf32> to vector<8x1xf32>
    %697 = tpu.reciprocal %696 {approx = true} : vector<8x1xf32> -> vector<8x1xf32>
    %698 = vector.broadcast %697 : vector<8x1xf32> to vector<8x8xf32>
    %699 = arith.mulf %694, %698 : vector<8x8xf32>
    %700 = arith.truncf %699 : vector<8x8xf32> to vector<8x8xbf16>
    %701 = vector.extract_strided_slice %665 {offsets = [0, 32], sizes = [8, 32], strides = [1, 1]} : vector<8x128xbf16> to vector<8x32xbf16>
    %cst_246 = arith.constant dense<0.000000e+00> : vector<8x32xf32>
    %702 = tpu.matmul %700, %701, %cst_246 {dimension_numbers = #tpu.dot_dimension_numbers<[1], [0], [0], [1], [0, 0, 1, 1], [], []>} : vector<8x8xbf16>, vector<8x32xbf16>, vector<8x32xf32> -> vector<8x32xf32>
    %703 = arith.truncf %702 : vector<8x32xf32> to vector<8x32xbf16>
    %704 = vector.extract_strided_slice %575 {offsets = [32, 0], sizes = [32, 128], strides = [1, 1]} : vector<128x128xbf16> to vector<32x128xbf16>
    %cst_247 = arith.constant dense<0.000000e+00> : vector<8x128xf32>
    %705 = tpu.matmul %703, %704, %cst_247 {dimension_numbers = #tpu.dot_dimension_numbers<[1], [0], [0], [1], [0, 0, 1, 1], [], []>} : vector<8x32xbf16>, vector<32x128xbf16>, vector<8x128xf32> -> vector<8x128xf32>
    %706 = arith.addf %686, %705 : vector<8x128xf32>
    %707 = vector.extract_strided_slice %663 {offsets = [0, 64], sizes = [8, 32], strides = [1, 1]} : vector<8x128xbf16> to vector<8x32xbf16>
    %708 = vector.extract_strided_slice %664 {offsets = [0, 64], sizes = [8, 32], strides = [1, 1]} : vector<8x128xbf16> to vector<8x32xbf16>
    %cst_248 = arith.constant dense<0.000000e+00> : vector<8x8xf32>
    %709 = tpu.matmul %707, %708, %cst_248 {dimension_numbers = #tpu.dot_dimension_numbers<[1], [1], [0], [0], [0, 0, 1, 0], [], []>} : vector<8x32xbf16>, vector<8x32xbf16>, vector<8x8xf32> -> vector<8x8xf32>
    %cst_249 = arith.constant dense<0xFF800000> : vector<8xf32>
    %710 = vector.multi_reduction <maximumf>, %709, %cst_249 [1] : vector<8x8xf32> to vector<8xf32>
    %711 = vector.shape_cast %710 : vector<8xf32> to vector<8x1xf32>
    %712 = vector.broadcast %711 : vector<8x1xf32> to vector<8x8xf32>
    %713 = arith.subf %709, %712 : vector<8x8xf32>
    %714 = math.exp %713 : vector<8x8xf32>
    %cst_250 = arith.constant dense<0.000000e+00> : vector<8xf32>
    %715 = vector.multi_reduction <add>, %714, %cst_250 [1] : vector<8x8xf32> to vector<8xf32>
    %716 = vector.shape_cast %715 : vector<8xf32> to vector<8x1xf32>
    %717 = tpu.reciprocal %716 {approx = true} : vector<8x1xf32> -> vector<8x1xf32>
    %718 = vector.broadcast %717 : vector<8x1xf32> to vector<8x8xf32>
    %719 = arith.mulf %714, %718 : vector<8x8xf32>
    %720 = arith.truncf %719 : vector<8x8xf32> to vector<8x8xbf16>
    %721 = vector.extract_strided_slice %665 {offsets = [0, 64], sizes = [8, 32], strides = [1, 1]} : vector<8x128xbf16> to vector<8x32xbf16>
    %cst_251 = arith.constant dense<0.000000e+00> : vector<8x32xf32>
    %722 = tpu.matmul %720, %721, %cst_251 {dimension_numbers = #tpu.dot_dimension_numbers<[1], [0], [0], [1], [0, 0, 1, 1], [], []>} : vector<8x8xbf16>, vector<8x32xbf16>, vector<8x32xf32> -> vector<8x32xf32>
    %723 = arith.truncf %722 : vector<8x32xf32> to vector<8x32xbf16>
    %724 = vector.extract_strided_slice %575 {offsets = [64, 0], sizes = [32, 128], strides = [1, 1]} : vector<128x128xbf16> to vector<32x128xbf16>
    %cst_252 = arith.constant dense<0.000000e+00> : vector<8x128xf32>
    %725 = tpu.matmul %723, %724, %cst_252 {dimension_numbers = #tpu.dot_dimension_numbers<[1], [0], [0], [1], [0, 0, 1, 1], [], []>} : vector<8x32xbf16>, vector<32x128xbf16>, vector<8x128xf32> -> vector<8x128xf32>
    %726 = arith.addf %706, %725 : vector<8x128xf32>
    %727 = vector.extract_strided_slice %663 {offsets = [0, 96], sizes = [8, 32], strides = [1, 1]} : vector<8x128xbf16> to vector<8x32xbf16>
    %728 = vector.extract_strided_slice %664 {offsets = [0, 96], sizes = [8, 32], strides = [1, 1]} : vector<8x128xbf16> to vector<8x32xbf16>
    %cst_253 = arith.constant dense<0.000000e+00> : vector<8x8xf32>
    %729 = tpu.matmul %727, %728, %cst_253 {dimension_numbers = #tpu.dot_dimension_numbers<[1], [1], [0], [0], [0, 0, 1, 0], [], []>} : vector<8x32xbf16>, vector<8x32xbf16>, vector<8x8xf32> -> vector<8x8xf32>
    %cst_254 = arith.constant dense<0xFF800000> : vector<8xf32>
    %730 = vector.multi_reduction <maximumf>, %729, %cst_254 [1] : vector<8x8xf32> to vector<8xf32>
    %731 = vector.shape_cast %730 : vector<8xf32> to vector<8x1xf32>
    %732 = vector.broadcast %731 : vector<8x1xf32> to vector<8x8xf32>
    %733 = arith.subf %729, %732 : vector<8x8xf32>
    %734 = math.exp %733 : vector<8x8xf32>
    %cst_255 = arith.constant dense<0.000000e+00> : vector<8xf32>
    %735 = vector.multi_reduction <add>, %734, %cst_255 [1] : vector<8x8xf32> to vector<8xf32>
    %736 = vector.shape_cast %735 : vector<8xf32> to vector<8x1xf32>
    %737 = tpu.reciprocal %736 {approx = true} : vector<8x1xf32> -> vector<8x1xf32>
    %738 = vector.broadcast %737 : vector<8x1xf32> to vector<8x8xf32>
    %739 = arith.mulf %734, %738 : vector<8x8xf32>
    %740 = arith.truncf %739 : vector<8x8xf32> to vector<8x8xbf16>
    %741 = vector.extract_strided_slice %665 {offsets = [0, 96], sizes = [8, 32], strides = [1, 1]} : vector<8x128xbf16> to vector<8x32xbf16>
    %cst_256 = arith.constant dense<0.000000e+00> : vector<8x32xf32>
    %742 = tpu.matmul %740, %741, %cst_256 {dimension_numbers = #tpu.dot_dimension_numbers<[1], [0], [0], [1], [0, 0, 1, 1], [], []>} : vector<8x8xbf16>, vector<8x32xbf16>, vector<8x32xf32> -> vector<8x32xf32>
    %743 = arith.truncf %742 : vector<8x32xf32> to vector<8x32xbf16>
    %744 = vector.extract_strided_slice %575 {offsets = [96, 0], sizes = [32, 128], strides = [1, 1]} : vector<128x128xbf16> to vector<32x128xbf16>
    %cst_257 = arith.constant dense<0.000000e+00> : vector<8x128xf32>
    %745 = tpu.matmul %743, %744, %cst_257 {dimension_numbers = #tpu.dot_dimension_numbers<[1], [0], [0], [1], [0, 0, 1, 1], [], []>} : vector<8x32xbf16>, vector<32x128xbf16>, vector<8x128xf32> -> vector<8x128xf32>
    %746 = arith.addf %726, %745 : vector<8x128xf32>
    %747 = tpu.concatenate %662, %746 in 0 : vector<8x128xf32>, vector<8x128xf32> -> vector<16x128xf32>
    %748 = vector.broadcast %553 : vector<1x128xf32> to vector<16x128xf32>
    %749 = arith.addf %747, %748 : vector<16x128xf32>
    %750 = arith.addf %25, %749 : vector<16x128xf32>
    %c39 = arith.constant 39 : index
    %c0_258 = arith.constant 0 : index
    %751 = vector.load %arg10[%c39, %c0_258] : memref<51x128xf32, #tpu.memory_space<vmem>>, vector<1x128xf32>
    %c45 = arith.constant 45 : index
    %c0_259 = arith.constant 0 : index
    %752 = vector.load %arg10[%c45, %c0_259] : memref<51x128xf32, #tpu.memory_space<vmem>>, vector<1x128xf32>
    %cst_260 = arith.constant dense<0.000000e+00> : vector<16xf32>
    %753 = vector.multi_reduction <add>, %750, %cst_260 [1] : vector<16x128xf32> to vector<16xf32>
    %754 = vector.shape_cast %753 : vector<16xf32> to vector<16x1xf32>
    %cst_261 = arith.constant 1.280000e+02 : f32
    %755 = vector.broadcast %cst_261 : f32 to vector<16x1xf32>
    %756 = arith.divf %754, %755 : vector<16x1xf32>
    %757 = vector.broadcast %756 : vector<16x1xf32> to vector<16x128xf32>
    %758 = arith.subf %750, %757 : vector<16x128xf32>
    %759 = arith.mulf %758, %758 : vector<16x128xf32>
    %cst_262 = arith.constant dense<0.000000e+00> : vector<16xf32>
    %760 = vector.multi_reduction <add>, %759, %cst_262 [1] : vector<16x128xf32> to vector<16xf32>
    %761 = vector.shape_cast %760 : vector<16xf32> to vector<16x1xf32>
    %cst_263 = arith.constant 1.280000e+02 : f32
    %762 = vector.broadcast %cst_263 : f32 to vector<16x1xf32>
    %763 = arith.divf %761, %762 : vector<16x1xf32>
    %cst_264 = arith.constant 9.99999974E-6 : f32
    %764 = vector.broadcast %cst_264 : f32 to vector<16x1xf32>
    %765 = arith.addf %763, %764 : vector<16x1xf32>
    %766 = math.rsqrt %765 : vector<16x1xf32>
    %767 = vector.broadcast %766 : vector<16x1xf32> to vector<16x128xf32>
    %768 = arith.mulf %758, %767 : vector<16x128xf32>
    %769 = vector.broadcast %751 : vector<1x128xf32> to vector<16x128xf32>
    %770 = arith.mulf %768, %769 : vector<16x128xf32>
    %771 = vector.broadcast %752 : vector<1x128xf32> to vector<16x128xf32>
    %772 = arith.addf %770, %771 : vector<16x128xf32>
    %c19 = arith.constant 19 : index
    %c0_265 = arith.constant 0 : index
    %773 = vector.load %arg10[%c19, %c0_265] : memref<51x128xf32, #tpu.memory_space<vmem>>, vector<1x128xf32>
    %c20 = arith.constant 20 : index
    %c0_266 = arith.constant 0 : index
    %774 = vector.load %arg10[%c20, %c0_266] : memref<51x128xf32, #tpu.memory_space<vmem>>, vector<1x128xf32>
    %c21 = arith.constant 21 : index
    %c0_267 = arith.constant 0 : index
    %775 = vector.load %arg10[%c21, %c0_267] : memref<51x128xf32, #tpu.memory_space<vmem>>, vector<1x128xf32>
    %c22 = arith.constant 22 : index
    %c0_268 = arith.constant 0 : index
    %776 = vector.load %arg10[%c22, %c0_268] : memref<51x128xf32, #tpu.memory_space<vmem>>, vector<1x128xf32>
    %777 = arith.truncf %772 : vector<16x128xf32> to vector<16x128xbf16>
    %c16 = arith.constant 16 : index
    %c0_269 = arith.constant 0 : index
    %c0_270 = arith.constant 0 : index
    %778 = vector.load %arg6[%c16, %c0_269, %c0_270] : memref<24x128x128xbf16, #tpu.memory_space<vmem>>, vector<1x128x128xbf16>
    %779 = vector.shape_cast %778 : vector<1x128x128xbf16> to vector<128x128xbf16>
    %cst_271 = arith.constant dense<0.000000e+00> : vector<16x128xf32>
    %780 = tpu.matmul %777, %779, %cst_271 {dimension_numbers = #tpu.dot_dimension_numbers<[1], [0], [0], [1], [0, 0, 1, 1], [], []>} : vector<16x128xbf16>, vector<128x128xbf16>, vector<16x128xf32> -> vector<16x128xf32>
    %781 = vector.broadcast %773 : vector<1x128xf32> to vector<16x128xf32>
    %782 = arith.addf %780, %781 : vector<16x128xf32>
    %783 = arith.truncf %549 : vector<16x128xf32> to vector<16x128xbf16>
    %c17 = arith.constant 17 : index
    %c0_272 = arith.constant 0 : index
    %c0_273 = arith.constant 0 : index
    %784 = vector.load %arg6[%c17, %c0_272, %c0_273] : memref<24x128x128xbf16, #tpu.memory_space<vmem>>, vector<1x128x128xbf16>
    %785 = vector.shape_cast %784 : vector<1x128x128xbf16> to vector<128x128xbf16>
    %cst_274 = arith.constant dense<0.000000e+00> : vector<16x128xf32>
    %786 = tpu.matmul %783, %785, %cst_274 {dimension_numbers = #tpu.dot_dimension_numbers<[1], [0], [0], [1], [0, 0, 1, 1], [], []>} : vector<16x128xbf16>, vector<128x128xbf16>, vector<16x128xf32> -> vector<16x128xf32>
    %787 = vector.broadcast %774 : vector<1x128xf32> to vector<16x128xf32>
    %788 = arith.addf %786, %787 : vector<16x128xf32>
    %789 = arith.truncf %549 : vector<16x128xf32> to vector<16x128xbf16>
    %c18 = arith.constant 18 : index
    %c0_275 = arith.constant 0 : index
    %c0_276 = arith.constant 0 : index
    %790 = vector.load %arg6[%c18, %c0_275, %c0_276] : memref<24x128x128xbf16, #tpu.memory_space<vmem>>, vector<1x128x128xbf16>
    %791 = vector.shape_cast %790 : vector<1x128x128xbf16> to vector<128x128xbf16>
    %cst_277 = arith.constant dense<0.000000e+00> : vector<16x128xf32>
    %792 = tpu.matmul %789, %791, %cst_277 {dimension_numbers = #tpu.dot_dimension_numbers<[1], [0], [0], [1], [0, 0, 1, 1], [], []>} : vector<16x128xbf16>, vector<128x128xbf16>, vector<16x128xf32> -> vector<16x128xf32>
    %793 = vector.broadcast %775 : vector<1x128xf32> to vector<16x128xf32>
    %794 = arith.addf %792, %793 : vector<16x128xf32>
    %cst_278 = arith.constant 0.176776692 : f32
    %795 = vector.broadcast %cst_278 : f32 to vector<16x128xf32>
    %796 = arith.mulf %782, %795 : vector<16x128xf32>
    %c19_279 = arith.constant 19 : index
    %c0_280 = arith.constant 0 : index
    %c0_281 = arith.constant 0 : index
    %797 = vector.load %arg6[%c19_279, %c0_280, %c0_281] : memref<24x128x128xbf16, #tpu.memory_space<vmem>>, vector<1x128x128xbf16>
    %798 = vector.shape_cast %797 : vector<1x128x128xbf16> to vector<128x128xbf16>
    %799 = arith.truncf %796 : vector<16x128xf32> to vector<16x128xbf16>
    %800 = arith.truncf %788 : vector<16x128xf32> to vector<16x128xbf16>
    %801 = arith.truncf %794 : vector<16x128xf32> to vector<16x128xbf16>
    %802 = vector.extract_strided_slice %799 {offsets = [0, 0], sizes = [8, 128], strides = [1, 1]} : vector<16x128xbf16> to vector<8x128xbf16>
    %803 = vector.extract_strided_slice %800 {offsets = [0, 0], sizes = [8, 128], strides = [1, 1]} : vector<16x128xbf16> to vector<8x128xbf16>
    %804 = vector.extract_strided_slice %801 {offsets = [0, 0], sizes = [8, 128], strides = [1, 1]} : vector<16x128xbf16> to vector<8x128xbf16>
    %cst_282 = arith.constant 0.000000e+00 : f32
    %805 = vector.broadcast %cst_282 : f32 to vector<8x128xf32>
    %806 = vector.extract_strided_slice %802 {offsets = [0, 0], sizes = [8, 32], strides = [1, 1]} : vector<8x128xbf16> to vector<8x32xbf16>
    %807 = vector.extract_strided_slice %803 {offsets = [0, 0], sizes = [8, 32], strides = [1, 1]} : vector<8x128xbf16> to vector<8x32xbf16>
    %cst_283 = arith.constant dense<0.000000e+00> : vector<8x8xf32>
    %808 = tpu.matmul %806, %807, %cst_283 {dimension_numbers = #tpu.dot_dimension_numbers<[1], [1], [0], [0], [0, 0, 1, 0], [], []>} : vector<8x32xbf16>, vector<8x32xbf16>, vector<8x8xf32> -> vector<8x8xf32>
    %cst_284 = arith.constant dense<0xFF800000> : vector<8xf32>
    %809 = vector.multi_reduction <maximumf>, %808, %cst_284 [1] : vector<8x8xf32> to vector<8xf32>
    %810 = vector.shape_cast %809 : vector<8xf32> to vector<8x1xf32>
    %811 = vector.broadcast %810 : vector<8x1xf32> to vector<8x8xf32>
    %812 = arith.subf %808, %811 : vector<8x8xf32>
    %813 = math.exp %812 : vector<8x8xf32>
    %cst_285 = arith.constant dense<0.000000e+00> : vector<8xf32>
    %814 = vector.multi_reduction <add>, %813, %cst_285 [1] : vector<8x8xf32> to vector<8xf32>
    %815 = vector.shape_cast %814 : vector<8xf32> to vector<8x1xf32>
    %816 = tpu.reciprocal %815 {approx = true} : vector<8x1xf32> -> vector<8x1xf32>
    %817 = vector.broadcast %816 : vector<8x1xf32> to vector<8x8xf32>
    %818 = arith.mulf %813, %817 : vector<8x8xf32>
    %819 = arith.truncf %818 : vector<8x8xf32> to vector<8x8xbf16>
    %820 = vector.extract_strided_slice %804 {offsets = [0, 0], sizes = [8, 32], strides = [1, 1]} : vector<8x128xbf16> to vector<8x32xbf16>
    %cst_286 = arith.constant dense<0.000000e+00> : vector<8x32xf32>
    %821 = tpu.matmul %819, %820, %cst_286 {dimension_numbers = #tpu.dot_dimension_numbers<[1], [0], [0], [1], [0, 0, 1, 1], [], []>} : vector<8x8xbf16>, vector<8x32xbf16>, vector<8x32xf32> -> vector<8x32xf32>
    %822 = arith.truncf %821 : vector<8x32xf32> to vector<8x32xbf16>
    %823 = vector.extract_strided_slice %798 {offsets = [0, 0], sizes = [32, 128], strides = [1, 1]} : vector<128x128xbf16> to vector<32x128xbf16>
    %cst_287 = arith.constant dense<0.000000e+00> : vector<8x128xf32>
    %824 = tpu.matmul %822, %823, %cst_287 {dimension_numbers = #tpu.dot_dimension_numbers<[1], [0], [0], [1], [0, 0, 1, 1], [], []>} : vector<8x32xbf16>, vector<32x128xbf16>, vector<8x128xf32> -> vector<8x128xf32>
    %825 = arith.addf %805, %824 : vector<8x128xf32>
    %826 = vector.extract_strided_slice %802 {offsets = [0, 32], sizes = [8, 32], strides = [1, 1]} : vector<8x128xbf16> to vector<8x32xbf16>
    %827 = vector.extract_strided_slice %803 {offsets = [0, 32], sizes = [8, 32], strides = [1, 1]} : vector<8x128xbf16> to vector<8x32xbf16>
    %cst_288 = arith.constant dense<0.000000e+00> : vector<8x8xf32>
    %828 = tpu.matmul %826, %827, %cst_288 {dimension_numbers = #tpu.dot_dimension_numbers<[1], [1], [0], [0], [0, 0, 1, 0], [], []>} : vector<8x32xbf16>, vector<8x32xbf16>, vector<8x8xf32> -> vector<8x8xf32>
    %cst_289 = arith.constant dense<0xFF800000> : vector<8xf32>
    %829 = vector.multi_reduction <maximumf>, %828, %cst_289 [1] : vector<8x8xf32> to vector<8xf32>
    %830 = vector.shape_cast %829 : vector<8xf32> to vector<8x1xf32>
    %831 = vector.broadcast %830 : vector<8x1xf32> to vector<8x8xf32>
    %832 = arith.subf %828, %831 : vector<8x8xf32>
    %833 = math.exp %832 : vector<8x8xf32>
    %cst_290 = arith.constant dense<0.000000e+00> : vector<8xf32>
    %834 = vector.multi_reduction <add>, %833, %cst_290 [1] : vector<8x8xf32> to vector<8xf32>
    %835 = vector.shape_cast %834 : vector<8xf32> to vector<8x1xf32>
    %836 = tpu.reciprocal %835 {approx = true} : vector<8x1xf32> -> vector<8x1xf32>
    %837 = vector.broadcast %836 : vector<8x1xf32> to vector<8x8xf32>
    %838 = arith.mulf %833, %837 : vector<8x8xf32>
    %839 = arith.truncf %838 : vector<8x8xf32> to vector<8x8xbf16>
    %840 = vector.extract_strided_slice %804 {offsets = [0, 32], sizes = [8, 32], strides = [1, 1]} : vector<8x128xbf16> to vector<8x32xbf16>
    %cst_291 = arith.constant dense<0.000000e+00> : vector<8x32xf32>
    %841 = tpu.matmul %839, %840, %cst_291 {dimension_numbers = #tpu.dot_dimension_numbers<[1], [0], [0], [1], [0, 0, 1, 1], [], []>} : vector<8x8xbf16>, vector<8x32xbf16>, vector<8x32xf32> -> vector<8x32xf32>
    %842 = arith.truncf %841 : vector<8x32xf32> to vector<8x32xbf16>
    %843 = vector.extract_strided_slice %798 {offsets = [32, 0], sizes = [32, 128], strides = [1, 1]} : vector<128x128xbf16> to vector<32x128xbf16>
    %cst_292 = arith.constant dense<0.000000e+00> : vector<8x128xf32>
    %844 = tpu.matmul %842, %843, %cst_292 {dimension_numbers = #tpu.dot_dimension_numbers<[1], [0], [0], [1], [0, 0, 1, 1], [], []>} : vector<8x32xbf16>, vector<32x128xbf16>, vector<8x128xf32> -> vector<8x128xf32>
    %845 = arith.addf %825, %844 : vector<8x128xf32>
    %846 = vector.extract_strided_slice %802 {offsets = [0, 64], sizes = [8, 32], strides = [1, 1]} : vector<8x128xbf16> to vector<8x32xbf16>
    %847 = vector.extract_strided_slice %803 {offsets = [0, 64], sizes = [8, 32], strides = [1, 1]} : vector<8x128xbf16> to vector<8x32xbf16>
    %cst_293 = arith.constant dense<0.000000e+00> : vector<8x8xf32>
    %848 = tpu.matmul %846, %847, %cst_293 {dimension_numbers = #tpu.dot_dimension_numbers<[1], [1], [0], [0], [0, 0, 1, 0], [], []>} : vector<8x32xbf16>, vector<8x32xbf16>, vector<8x8xf32> -> vector<8x8xf32>
    %cst_294 = arith.constant dense<0xFF800000> : vector<8xf32>
    %849 = vector.multi_reduction <maximumf>, %848, %cst_294 [1] : vector<8x8xf32> to vector<8xf32>
    %850 = vector.shape_cast %849 : vector<8xf32> to vector<8x1xf32>
    %851 = vector.broadcast %850 : vector<8x1xf32> to vector<8x8xf32>
    %852 = arith.subf %848, %851 : vector<8x8xf32>
    %853 = math.exp %852 : vector<8x8xf32>
    %cst_295 = arith.constant dense<0.000000e+00> : vector<8xf32>
    %854 = vector.multi_reduction <add>, %853, %cst_295 [1] : vector<8x8xf32> to vector<8xf32>
    %855 = vector.shape_cast %854 : vector<8xf32> to vector<8x1xf32>
    %856 = tpu.reciprocal %855 {approx = true} : vector<8x1xf32> -> vector<8x1xf32>
    %857 = vector.broadcast %856 : vector<8x1xf32> to vector<8x8xf32>
    %858 = arith.mulf %853, %857 : vector<8x8xf32>
    %859 = arith.truncf %858 : vector<8x8xf32> to vector<8x8xbf16>
    %860 = vector.extract_strided_slice %804 {offsets = [0, 64], sizes = [8, 32], strides = [1, 1]} : vector<8x128xbf16> to vector<8x32xbf16>
    %cst_296 = arith.constant dense<0.000000e+00> : vector<8x32xf32>
    %861 = tpu.matmul %859, %860, %cst_296 {dimension_numbers = #tpu.dot_dimension_numbers<[1], [0], [0], [1], [0, 0, 1, 1], [], []>} : vector<8x8xbf16>, vector<8x32xbf16>, vector<8x32xf32> -> vector<8x32xf32>
    %862 = arith.truncf %861 : vector<8x32xf32> to vector<8x32xbf16>
    %863 = vector.extract_strided_slice %798 {offsets = [64, 0], sizes = [32, 128], strides = [1, 1]} : vector<128x128xbf16> to vector<32x128xbf16>
    %cst_297 = arith.constant dense<0.000000e+00> : vector<8x128xf32>
    %864 = tpu.matmul %862, %863, %cst_297 {dimension_numbers = #tpu.dot_dimension_numbers<[1], [0], [0], [1], [0, 0, 1, 1], [], []>} : vector<8x32xbf16>, vector<32x128xbf16>, vector<8x128xf32> -> vector<8x128xf32>
    %865 = arith.addf %845, %864 : vector<8x128xf32>
    %866 = vector.extract_strided_slice %802 {offsets = [0, 96], sizes = [8, 32], strides = [1, 1]} : vector<8x128xbf16> to vector<8x32xbf16>
    %867 = vector.extract_strided_slice %803 {offsets = [0, 96], sizes = [8, 32], strides = [1, 1]} : vector<8x128xbf16> to vector<8x32xbf16>
    %cst_298 = arith.constant dense<0.000000e+00> : vector<8x8xf32>
    %868 = tpu.matmul %866, %867, %cst_298 {dimension_numbers = #tpu.dot_dimension_numbers<[1], [1], [0], [0], [0, 0, 1, 0], [], []>} : vector<8x32xbf16>, vector<8x32xbf16>, vector<8x8xf32> -> vector<8x8xf32>
    %cst_299 = arith.constant dense<0xFF800000> : vector<8xf32>
    %869 = vector.multi_reduction <maximumf>, %868, %cst_299 [1] : vector<8x8xf32> to vector<8xf32>
    %870 = vector.shape_cast %869 : vector<8xf32> to vector<8x1xf32>
    %871 = vector.broadcast %870 : vector<8x1xf32> to vector<8x8xf32>
    %872 = arith.subf %868, %871 : vector<8x8xf32>
    %873 = math.exp %872 : vector<8x8xf32>
    %cst_300 = arith.constant dense<0.000000e+00> : vector<8xf32>
    %874 = vector.multi_reduction <add>, %873, %cst_300 [1] : vector<8x8xf32> to vector<8xf32>
    %875 = vector.shape_cast %874 : vector<8xf32> to vector<8x1xf32>
    %876 = tpu.reciprocal %875 {approx = true} : vector<8x1xf32> -> vector<8x1xf32>
    %877 = vector.broadcast %876 : vector<8x1xf32> to vector<8x8xf32>
    %878 = arith.mulf %873, %877 : vector<8x8xf32>
    %879 = arith.truncf %878 : vector<8x8xf32> to vector<8x8xbf16>
    %880 = vector.extract_strided_slice %804 {offsets = [0, 96], sizes = [8, 32], strides = [1, 1]} : vector<8x128xbf16> to vector<8x32xbf16>
    %cst_301 = arith.constant dense<0.000000e+00> : vector<8x32xf32>
    %881 = tpu.matmul %879, %880, %cst_301 {dimension_numbers = #tpu.dot_dimension_numbers<[1], [0], [0], [1], [0, 0, 1, 1], [], []>} : vector<8x8xbf16>, vector<8x32xbf16>, vector<8x32xf32> -> vector<8x32xf32>
    %882 = arith.truncf %881 : vector<8x32xf32> to vector<8x32xbf16>
    %883 = vector.extract_strided_slice %798 {offsets = [96, 0], sizes = [32, 128], strides = [1, 1]} : vector<128x128xbf16> to vector<32x128xbf16>
    %cst_302 = arith.constant dense<0.000000e+00> : vector<8x128xf32>
    %884 = tpu.matmul %882, %883, %cst_302 {dimension_numbers = #tpu.dot_dimension_numbers<[1], [0], [0], [1], [0, 0, 1, 1], [], []>} : vector<8x32xbf16>, vector<32x128xbf16>, vector<8x128xf32> -> vector<8x128xf32>
    %885 = arith.addf %865, %884 : vector<8x128xf32>
    %886 = vector.extract_strided_slice %799 {offsets = [8, 0], sizes = [8, 128], strides = [1, 1]} : vector<16x128xbf16> to vector<8x128xbf16>
    %887 = vector.extract_strided_slice %800 {offsets = [8, 0], sizes = [8, 128], strides = [1, 1]} : vector<16x128xbf16> to vector<8x128xbf16>
    %888 = vector.extract_strided_slice %801 {offsets = [8, 0], sizes = [8, 128], strides = [1, 1]} : vector<16x128xbf16> to vector<8x128xbf16>
    %cst_303 = arith.constant 0.000000e+00 : f32
    %889 = vector.broadcast %cst_303 : f32 to vector<8x128xf32>
    %890 = vector.extract_strided_slice %886 {offsets = [0, 0], sizes = [8, 32], strides = [1, 1]} : vector<8x128xbf16> to vector<8x32xbf16>
    %891 = vector.extract_strided_slice %887 {offsets = [0, 0], sizes = [8, 32], strides = [1, 1]} : vector<8x128xbf16> to vector<8x32xbf16>
    %cst_304 = arith.constant dense<0.000000e+00> : vector<8x8xf32>
    %892 = tpu.matmul %890, %891, %cst_304 {dimension_numbers = #tpu.dot_dimension_numbers<[1], [1], [0], [0], [0, 0, 1, 0], [], []>} : vector<8x32xbf16>, vector<8x32xbf16>, vector<8x8xf32> -> vector<8x8xf32>
    %cst_305 = arith.constant dense<0xFF800000> : vector<8xf32>
    %893 = vector.multi_reduction <maximumf>, %892, %cst_305 [1] : vector<8x8xf32> to vector<8xf32>
    %894 = vector.shape_cast %893 : vector<8xf32> to vector<8x1xf32>
    %895 = vector.broadcast %894 : vector<8x1xf32> to vector<8x8xf32>
    %896 = arith.subf %892, %895 : vector<8x8xf32>
    %897 = math.exp %896 : vector<8x8xf32>
    %cst_306 = arith.constant dense<0.000000e+00> : vector<8xf32>
    %898 = vector.multi_reduction <add>, %897, %cst_306 [1] : vector<8x8xf32> to vector<8xf32>
    %899 = vector.shape_cast %898 : vector<8xf32> to vector<8x1xf32>
    %900 = tpu.reciprocal %899 {approx = true} : vector<8x1xf32> -> vector<8x1xf32>
    %901 = vector.broadcast %900 : vector<8x1xf32> to vector<8x8xf32>
    %902 = arith.mulf %897, %901 : vector<8x8xf32>
    %903 = arith.truncf %902 : vector<8x8xf32> to vector<8x8xbf16>
    %904 = vector.extract_strided_slice %888 {offsets = [0, 0], sizes = [8, 32], strides = [1, 1]} : vector<8x128xbf16> to vector<8x32xbf16>
    %cst_307 = arith.constant dense<0.000000e+00> : vector<8x32xf32>
    %905 = tpu.matmul %903, %904, %cst_307 {dimension_numbers = #tpu.dot_dimension_numbers<[1], [0], [0], [1], [0, 0, 1, 1], [], []>} : vector<8x8xbf16>, vector<8x32xbf16>, vector<8x32xf32> -> vector<8x32xf32>
    %906 = arith.truncf %905 : vector<8x32xf32> to vector<8x32xbf16>
    %907 = vector.extract_strided_slice %798 {offsets = [0, 0], sizes = [32, 128], strides = [1, 1]} : vector<128x128xbf16> to vector<32x128xbf16>
    %cst_308 = arith.constant dense<0.000000e+00> : vector<8x128xf32>
    %908 = tpu.matmul %906, %907, %cst_308 {dimension_numbers = #tpu.dot_dimension_numbers<[1], [0], [0], [1], [0, 0, 1, 1], [], []>} : vector<8x32xbf16>, vector<32x128xbf16>, vector<8x128xf32> -> vector<8x128xf32>
    %909 = arith.addf %889, %908 : vector<8x128xf32>
    %910 = vector.extract_strided_slice %886 {offsets = [0, 32], sizes = [8, 32], strides = [1, 1]} : vector<8x128xbf16> to vector<8x32xbf16>
    %911 = vector.extract_strided_slice %887 {offsets = [0, 32], sizes = [8, 32], strides = [1, 1]} : vector<8x128xbf16> to vector<8x32xbf16>
    %cst_309 = arith.constant dense<0.000000e+00> : vector<8x8xf32>
    %912 = tpu.matmul %910, %911, %cst_309 {dimension_numbers = #tpu.dot_dimension_numbers<[1], [1], [0], [0], [0, 0, 1, 0], [], []>} : vector<8x32xbf16>, vector<8x32xbf16>, vector<8x8xf32> -> vector<8x8xf32>
    %cst_310 = arith.constant dense<0xFF800000> : vector<8xf32>
    %913 = vector.multi_reduction <maximumf>, %912, %cst_310 [1] : vector<8x8xf32> to vector<8xf32>
    %914 = vector.shape_cast %913 : vector<8xf32> to vector<8x1xf32>
    %915 = vector.broadcast %914 : vector<8x1xf32> to vector<8x8xf32>
    %916 = arith.subf %912, %915 : vector<8x8xf32>
    %917 = math.exp %916 : vector<8x8xf32>
    %cst_311 = arith.constant dense<0.000000e+00> : vector<8xf32>
    %918 = vector.multi_reduction <add>, %917, %cst_311 [1] : vector<8x8xf32> to vector<8xf32>
    %919 = vector.shape_cast %918 : vector<8xf32> to vector<8x1xf32>
    %920 = tpu.reciprocal %919 {approx = true} : vector<8x1xf32> -> vector<8x1xf32>
    %921 = vector.broadcast %920 : vector<8x1xf32> to vector<8x8xf32>
    %922 = arith.mulf %917, %921 : vector<8x8xf32>
    %923 = arith.truncf %922 : vector<8x8xf32> to vector<8x8xbf16>
    %924 = vector.extract_strided_slice %888 {offsets = [0, 32], sizes = [8, 32], strides = [1, 1]} : vector<8x128xbf16> to vector<8x32xbf16>
    %cst_312 = arith.constant dense<0.000000e+00> : vector<8x32xf32>
    %925 = tpu.matmul %923, %924, %cst_312 {dimension_numbers = #tpu.dot_dimension_numbers<[1], [0], [0], [1], [0, 0, 1, 1], [], []>} : vector<8x8xbf16>, vector<8x32xbf16>, vector<8x32xf32> -> vector<8x32xf32>
    %926 = arith.truncf %925 : vector<8x32xf32> to vector<8x32xbf16>
    %927 = vector.extract_strided_slice %798 {offsets = [32, 0], sizes = [32, 128], strides = [1, 1]} : vector<128x128xbf16> to vector<32x128xbf16>
    %cst_313 = arith.constant dense<0.000000e+00> : vector<8x128xf32>
    %928 = tpu.matmul %926, %927, %cst_313 {dimension_numbers = #tpu.dot_dimension_numbers<[1], [0], [0], [1], [0, 0, 1, 1], [], []>} : vector<8x32xbf16>, vector<32x128xbf16>, vector<8x128xf32> -> vector<8x128xf32>
    %929 = arith.addf %909, %928 : vector<8x128xf32>
    %930 = vector.extract_strided_slice %886 {offsets = [0, 64], sizes = [8, 32], strides = [1, 1]} : vector<8x128xbf16> to vector<8x32xbf16>
    %931 = vector.extract_strided_slice %887 {offsets = [0, 64], sizes = [8, 32], strides = [1, 1]} : vector<8x128xbf16> to vector<8x32xbf16>
    %cst_314 = arith.constant dense<0.000000e+00> : vector<8x8xf32>
    %932 = tpu.matmul %930, %931, %cst_314 {dimension_numbers = #tpu.dot_dimension_numbers<[1], [1], [0], [0], [0, 0, 1, 0], [], []>} : vector<8x32xbf16>, vector<8x32xbf16>, vector<8x8xf32> -> vector<8x8xf32>
    %cst_315 = arith.constant dense<0xFF800000> : vector<8xf32>
    %933 = vector.multi_reduction <maximumf>, %932, %cst_315 [1] : vector<8x8xf32> to vector<8xf32>
    %934 = vector.shape_cast %933 : vector<8xf32> to vector<8x1xf32>
    %935 = vector.broadcast %934 : vector<8x1xf32> to vector<8x8xf32>
    %936 = arith.subf %932, %935 : vector<8x8xf32>
    %937 = math.exp %936 : vector<8x8xf32>
    %cst_316 = arith.constant dense<0.000000e+00> : vector<8xf32>
    %938 = vector.multi_reduction <add>, %937, %cst_316 [1] : vector<8x8xf32> to vector<8xf32>
    %939 = vector.shape_cast %938 : vector<8xf32> to vector<8x1xf32>
    %940 = tpu.reciprocal %939 {approx = true} : vector<8x1xf32> -> vector<8x1xf32>
    %941 = vector.broadcast %940 : vector<8x1xf32> to vector<8x8xf32>
    %942 = arith.mulf %937, %941 : vector<8x8xf32>
    %943 = arith.truncf %942 : vector<8x8xf32> to vector<8x8xbf16>
    %944 = vector.extract_strided_slice %888 {offsets = [0, 64], sizes = [8, 32], strides = [1, 1]} : vector<8x128xbf16> to vector<8x32xbf16>
    %cst_317 = arith.constant dense<0.000000e+00> : vector<8x32xf32>
    %945 = tpu.matmul %943, %944, %cst_317 {dimension_numbers = #tpu.dot_dimension_numbers<[1], [0], [0], [1], [0, 0, 1, 1], [], []>} : vector<8x8xbf16>, vector<8x32xbf16>, vector<8x32xf32> -> vector<8x32xf32>
    %946 = arith.truncf %945 : vector<8x32xf32> to vector<8x32xbf16>
    %947 = vector.extract_strided_slice %798 {offsets = [64, 0], sizes = [32, 128], strides = [1, 1]} : vector<128x128xbf16> to vector<32x128xbf16>
    %cst_318 = arith.constant dense<0.000000e+00> : vector<8x128xf32>
    %948 = tpu.matmul %946, %947, %cst_318 {dimension_numbers = #tpu.dot_dimension_numbers<[1], [0], [0], [1], [0, 0, 1, 1], [], []>} : vector<8x32xbf16>, vector<32x128xbf16>, vector<8x128xf32> -> vector<8x128xf32>
    %949 = arith.addf %929, %948 : vector<8x128xf32>
    %950 = vector.extract_strided_slice %886 {offsets = [0, 96], sizes = [8, 32], strides = [1, 1]} : vector<8x128xbf16> to vector<8x32xbf16>
    %951 = vector.extract_strided_slice %887 {offsets = [0, 96], sizes = [8, 32], strides = [1, 1]} : vector<8x128xbf16> to vector<8x32xbf16>
    %cst_319 = arith.constant dense<0.000000e+00> : vector<8x8xf32>
    %952 = tpu.matmul %950, %951, %cst_319 {dimension_numbers = #tpu.dot_dimension_numbers<[1], [1], [0], [0], [0, 0, 1, 0], [], []>} : vector<8x32xbf16>, vector<8x32xbf16>, vector<8x8xf32> -> vector<8x8xf32>
    %cst_320 = arith.constant dense<0xFF800000> : vector<8xf32>
    %953 = vector.multi_reduction <maximumf>, %952, %cst_320 [1] : vector<8x8xf32> to vector<8xf32>
    %954 = vector.shape_cast %953 : vector<8xf32> to vector<8x1xf32>
    %955 = vector.broadcast %954 : vector<8x1xf32> to vector<8x8xf32>
    %956 = arith.subf %952, %955 : vector<8x8xf32>
    %957 = math.exp %956 : vector<8x8xf32>
    %cst_321 = arith.constant dense<0.000000e+00> : vector<8xf32>
    %958 = vector.multi_reduction <add>, %957, %cst_321 [1] : vector<8x8xf32> to vector<8xf32>
    %959 = vector.shape_cast %958 : vector<8xf32> to vector<8x1xf32>
    %960 = tpu.reciprocal %959 {approx = true} : vector<8x1xf32> -> vector<8x1xf32>
    %961 = vector.broadcast %960 : vector<8x1xf32> to vector<8x8xf32>
    %962 = arith.mulf %957, %961 : vector<8x8xf32>
    %963 = arith.truncf %962 : vector<8x8xf32> to vector<8x8xbf16>
    %964 = vector.extract_strided_slice %888 {offsets = [0, 96], sizes = [8, 32], strides = [1, 1]} : vector<8x128xbf16> to vector<8x32xbf16>
    %cst_322 = arith.constant dense<0.000000e+00> : vector<8x32xf32>
    %965 = tpu.matmul %963, %964, %cst_322 {dimension_numbers = #tpu.dot_dimension_numbers<[1], [0], [0], [1], [0, 0, 1, 1], [], []>} : vector<8x8xbf16>, vector<8x32xbf16>, vector<8x32xf32> -> vector<8x32xf32>
    %966 = arith.truncf %965 : vector<8x32xf32> to vector<8x32xbf16>
    %967 = vector.extract_strided_slice %798 {offsets = [96, 0], sizes = [32, 128], strides = [1, 1]} : vector<128x128xbf16> to vector<32x128xbf16>
    %cst_323 = arith.constant dense<0.000000e+00> : vector<8x128xf32>
    %968 = tpu.matmul %966, %967, %cst_323 {dimension_numbers = #tpu.dot_dimension_numbers<[1], [0], [0], [1], [0, 0, 1, 1], [], []>} : vector<8x32xbf16>, vector<32x128xbf16>, vector<8x128xf32> -> vector<8x128xf32>
    %969 = arith.addf %949, %968 : vector<8x128xf32>
    %970 = tpu.concatenate %885, %969 in 0 : vector<8x128xf32>, vector<8x128xf32> -> vector<16x128xf32>
    %971 = vector.broadcast %776 : vector<1x128xf32> to vector<16x128xf32>
    %972 = arith.addf %970, %971 : vector<16x128xf32>
    %973 = arith.addf %772, %972 : vector<16x128xf32>
    %c40 = arith.constant 40 : index
    %c0_324 = arith.constant 0 : index
    %974 = vector.load %arg10[%c40, %c0_324] : memref<51x128xf32, #tpu.memory_space<vmem>>, vector<1x128xf32>
    %c46 = arith.constant 46 : index
    %c0_325 = arith.constant 0 : index
    %975 = vector.load %arg10[%c46, %c0_325] : memref<51x128xf32, #tpu.memory_space<vmem>>, vector<1x128xf32>
    %cst_326 = arith.constant dense<0.000000e+00> : vector<16xf32>
    %976 = vector.multi_reduction <add>, %973, %cst_326 [1] : vector<16x128xf32> to vector<16xf32>
    %977 = vector.shape_cast %976 : vector<16xf32> to vector<16x1xf32>
    %cst_327 = arith.constant 1.280000e+02 : f32
    %978 = vector.broadcast %cst_327 : f32 to vector<16x1xf32>
    %979 = arith.divf %977, %978 : vector<16x1xf32>
    %980 = vector.broadcast %979 : vector<16x1xf32> to vector<16x128xf32>
    %981 = arith.subf %973, %980 : vector<16x128xf32>
    %982 = arith.mulf %981, %981 : vector<16x128xf32>
    %cst_328 = arith.constant dense<0.000000e+00> : vector<16xf32>
    %983 = vector.multi_reduction <add>, %982, %cst_328 [1] : vector<16x128xf32> to vector<16xf32>
    %984 = vector.shape_cast %983 : vector<16xf32> to vector<16x1xf32>
    %cst_329 = arith.constant 1.280000e+02 : f32
    %985 = vector.broadcast %cst_329 : f32 to vector<16x1xf32>
    %986 = arith.divf %984, %985 : vector<16x1xf32>
    %cst_330 = arith.constant 9.99999974E-6 : f32
    %987 = vector.broadcast %cst_330 : f32 to vector<16x1xf32>
    %988 = arith.addf %986, %987 : vector<16x1xf32>
    %989 = math.rsqrt %988 : vector<16x1xf32>
    %990 = vector.broadcast %989 : vector<16x1xf32> to vector<16x128xf32>
    %991 = arith.mulf %981, %990 : vector<16x128xf32>
    %992 = vector.broadcast %974 : vector<1x128xf32> to vector<16x128xf32>
    %993 = arith.mulf %991, %992 : vector<16x128xf32>
    %994 = vector.broadcast %975 : vector<1x128xf32> to vector<16x128xf32>
    %995 = arith.addf %993, %994 : vector<16x128xf32>
    %c2_331 = arith.constant 2 : index
    %c0_332 = arith.constant 0 : index
    %c0_333 = arith.constant 0 : index
    %996 = vector.load %arg7[%c2_331, %c0_332, %c0_333] : memref<4x128x256xbf16, #tpu.memory_space<vmem>>, vector<1x128x256xbf16>
    %997 = vector.shape_cast %996 : vector<1x128x256xbf16> to vector<128x256xbf16>
    %c2_334 = arith.constant 2 : index
    %c0_335 = arith.constant 0 : index
    %998 = vector.load %arg11[%c2_334, %c0_335] : memref<4x256xf32, #tpu.memory_space<vmem>>, vector<1x256xf32>
    %c2_336 = arith.constant 2 : index
    %c0_337 = arith.constant 0 : index
    %c0_338 = arith.constant 0 : index
    %999 = vector.load %arg8[%c2_336, %c0_337, %c0_338] : memref<4x256x128xbf16, #tpu.memory_space<vmem>>, vector<1x256x128xbf16>
    %1000 = vector.shape_cast %999 : vector<1x256x128xbf16> to vector<256x128xbf16>
    %c29 = arith.constant 29 : index
    %c0_339 = arith.constant 0 : index
    %1001 = vector.load %arg10[%c29, %c0_339] : memref<51x128xf32, #tpu.memory_space<vmem>>, vector<1x128xf32>
    %c41 = arith.constant 41 : index
    %c0_340 = arith.constant 0 : index
    %1002 = vector.load %arg10[%c41, %c0_340] : memref<51x128xf32, #tpu.memory_space<vmem>>, vector<1x128xf32>
    %c47 = arith.constant 47 : index
    %c0_341 = arith.constant 0 : index
    %1003 = vector.load %arg10[%c47, %c0_341] : memref<51x128xf32, #tpu.memory_space<vmem>>, vector<1x128xf32>
    %1004 = arith.truncf %995 : vector<16x128xf32> to vector<16x128xbf16>
    %cst_342 = arith.constant dense<0.000000e+00> : vector<16x256xf32>
    %1005 = tpu.matmul %1004, %997, %cst_342 {dimension_numbers = #tpu.dot_dimension_numbers<[1], [0], [0], [1], [0, 0, 1, 1], [], []>} : vector<16x128xbf16>, vector<128x256xbf16>, vector<16x256xf32> -> vector<16x256xf32>
    %1006 = vector.broadcast %998 : vector<1x256xf32> to vector<16x256xf32>
    %1007 = arith.addf %1005, %1006 : vector<16x256xf32>
    %cst_343 = arith.constant 0.000000e+00 : f32
    %1008 = vector.broadcast %cst_343 : f32 to vector<16x256xf32>
    %1009 = arith.maximumf %1007, %1008 : vector<16x256xf32>
    %1010 = arith.truncf %1009 : vector<16x256xf32> to vector<16x256xbf16>
    %cst_344 = arith.constant dense<0.000000e+00> : vector<16x128xf32>
    %1011 = tpu.matmul %1010, %1000, %cst_344 {dimension_numbers = #tpu.dot_dimension_numbers<[1], [0], [0], [1], [0, 0, 1, 1], [], []>} : vector<16x256xbf16>, vector<256x128xbf16>, vector<16x128xf32> -> vector<16x128xf32>
    %1012 = vector.broadcast %1001 : vector<1x128xf32> to vector<16x128xf32>
    %1013 = arith.addf %1011, %1012 : vector<16x128xf32>
    %1014 = arith.addf %995, %1013 : vector<16x128xf32>
    %cst_345 = arith.constant dense<0.000000e+00> : vector<16xf32>
    %1015 = vector.multi_reduction <add>, %1014, %cst_345 [1] : vector<16x128xf32> to vector<16xf32>
    %1016 = vector.shape_cast %1015 : vector<16xf32> to vector<16x1xf32>
    %cst_346 = arith.constant 1.280000e+02 : f32
    %1017 = vector.broadcast %cst_346 : f32 to vector<16x1xf32>
    %1018 = arith.divf %1016, %1017 : vector<16x1xf32>
    %1019 = vector.broadcast %1018 : vector<16x1xf32> to vector<16x128xf32>
    %1020 = arith.subf %1014, %1019 : vector<16x128xf32>
    %1021 = arith.mulf %1020, %1020 : vector<16x128xf32>
    %cst_347 = arith.constant dense<0.000000e+00> : vector<16xf32>
    %1022 = vector.multi_reduction <add>, %1021, %cst_347 [1] : vector<16x128xf32> to vector<16xf32>
    %1023 = vector.shape_cast %1022 : vector<16xf32> to vector<16x1xf32>
    %cst_348 = arith.constant 1.280000e+02 : f32
    %1024 = vector.broadcast %cst_348 : f32 to vector<16x1xf32>
    %1025 = arith.divf %1023, %1024 : vector<16x1xf32>
    %cst_349 = arith.constant 9.99999974E-6 : f32
    %1026 = vector.broadcast %cst_349 : f32 to vector<16x1xf32>
    %1027 = arith.addf %1025, %1026 : vector<16x1xf32>
    %1028 = math.rsqrt %1027 : vector<16x1xf32>
    %1029 = vector.broadcast %1028 : vector<16x1xf32> to vector<16x128xf32>
    %1030 = arith.mulf %1020, %1029 : vector<16x128xf32>
    %1031 = vector.broadcast %1002 : vector<1x128xf32> to vector<16x128xf32>
    %1032 = arith.mulf %1030, %1031 : vector<16x128xf32>
    %1033 = vector.broadcast %1003 : vector<1x128xf32> to vector<16x128xf32>
    %1034 = arith.addf %1032, %1033 : vector<16x128xf32>
    %c15 = arith.constant 15 : index
    %c0_350 = arith.constant 0 : index
    %1035 = vector.load %arg10[%c15, %c0_350] : memref<51x128xf32, #tpu.memory_space<vmem>>, vector<1x128xf32>
    %c16_351 = arith.constant 16 : index
    %c0_352 = arith.constant 0 : index
    %1036 = vector.load %arg10[%c16_351, %c0_352] : memref<51x128xf32, #tpu.memory_space<vmem>>, vector<1x128xf32>
    %c17_353 = arith.constant 17 : index
    %c0_354 = arith.constant 0 : index
    %1037 = vector.load %arg10[%c17_353, %c0_354] : memref<51x128xf32, #tpu.memory_space<vmem>>, vector<1x128xf32>
    %c18_355 = arith.constant 18 : index
    %c0_356 = arith.constant 0 : index
    %1038 = vector.load %arg10[%c18_355, %c0_356] : memref<51x128xf32, #tpu.memory_space<vmem>>, vector<1x128xf32>
    %1039 = arith.truncf %1034 : vector<16x128xf32> to vector<16x128xbf16>
    %c12_357 = arith.constant 12 : index
    %c0_358 = arith.constant 0 : index
    %c0_359 = arith.constant 0 : index
    %1040 = vector.load %arg6[%c12_357, %c0_358, %c0_359] : memref<24x128x128xbf16, #tpu.memory_space<vmem>>, vector<1x128x128xbf16>
    %1041 = vector.shape_cast %1040 : vector<1x128x128xbf16> to vector<128x128xbf16>
    %cst_360 = arith.constant dense<0.000000e+00> : vector<16x128xf32>
    %1042 = tpu.matmul %1039, %1041, %cst_360 {dimension_numbers = #tpu.dot_dimension_numbers<[1], [0], [0], [1], [0, 0, 1, 1], [], []>} : vector<16x128xbf16>, vector<128x128xbf16>, vector<16x128xf32> -> vector<16x128xf32>
    %1043 = vector.broadcast %1035 : vector<1x128xf32> to vector<16x128xf32>
    %1044 = arith.addf %1042, %1043 : vector<16x128xf32>
    %1045 = arith.truncf %1034 : vector<16x128xf32> to vector<16x128xbf16>
    %c13_361 = arith.constant 13 : index
    %c0_362 = arith.constant 0 : index
    %c0_363 = arith.constant 0 : index
    %1046 = vector.load %arg6[%c13_361, %c0_362, %c0_363] : memref<24x128x128xbf16, #tpu.memory_space<vmem>>, vector<1x128x128xbf16>
    %1047 = vector.shape_cast %1046 : vector<1x128x128xbf16> to vector<128x128xbf16>
    %cst_364 = arith.constant dense<0.000000e+00> : vector<16x128xf32>
    %1048 = tpu.matmul %1045, %1047, %cst_364 {dimension_numbers = #tpu.dot_dimension_numbers<[1], [0], [0], [1], [0, 0, 1, 1], [], []>} : vector<16x128xbf16>, vector<128x128xbf16>, vector<16x128xf32> -> vector<16x128xf32>
    %1049 = vector.broadcast %1036 : vector<1x128xf32> to vector<16x128xf32>
    %1050 = arith.addf %1048, %1049 : vector<16x128xf32>
    %1051 = arith.truncf %1034 : vector<16x128xf32> to vector<16x128xbf16>
    %c14_365 = arith.constant 14 : index
    %c0_366 = arith.constant 0 : index
    %c0_367 = arith.constant 0 : index
    %1052 = vector.load %arg6[%c14_365, %c0_366, %c0_367] : memref<24x128x128xbf16, #tpu.memory_space<vmem>>, vector<1x128x128xbf16>
    %1053 = vector.shape_cast %1052 : vector<1x128x128xbf16> to vector<128x128xbf16>
    %cst_368 = arith.constant dense<0.000000e+00> : vector<16x128xf32>
    %1054 = tpu.matmul %1051, %1053, %cst_368 {dimension_numbers = #tpu.dot_dimension_numbers<[1], [0], [0], [1], [0, 0, 1, 1], [], []>} : vector<16x128xbf16>, vector<128x128xbf16>, vector<16x128xf32> -> vector<16x128xf32>
    %1055 = vector.broadcast %1037 : vector<1x128xf32> to vector<16x128xf32>
    %1056 = arith.addf %1054, %1055 : vector<16x128xf32>
    %cst_369 = arith.constant 0.176776692 : f32
    %1057 = vector.broadcast %cst_369 : f32 to vector<16x128xf32>
    %1058 = arith.mulf %1044, %1057 : vector<16x128xf32>
    %c15_370 = arith.constant 15 : index
    %c0_371 = arith.constant 0 : index
    %c0_372 = arith.constant 0 : index
    %1059 = vector.load %arg6[%c15_370, %c0_371, %c0_372] : memref<24x128x128xbf16, #tpu.memory_space<vmem>>, vector<1x128x128xbf16>
    %1060 = vector.shape_cast %1059 : vector<1x128x128xbf16> to vector<128x128xbf16>
    %1061 = arith.truncf %1058 : vector<16x128xf32> to vector<16x128xbf16>
    %1062 = arith.truncf %1050 : vector<16x128xf32> to vector<16x128xbf16>
    %1063 = arith.truncf %1056 : vector<16x128xf32> to vector<16x128xbf16>
    %1064 = vector.extract_strided_slice %1061 {offsets = [0, 0], sizes = [8, 128], strides = [1, 1]} : vector<16x128xbf16> to vector<8x128xbf16>
    %1065 = vector.extract_strided_slice %1062 {offsets = [0, 0], sizes = [8, 128], strides = [1, 1]} : vector<16x128xbf16> to vector<8x128xbf16>
    %1066 = vector.extract_strided_slice %1063 {offsets = [0, 0], sizes = [8, 128], strides = [1, 1]} : vector<16x128xbf16> to vector<8x128xbf16>
    %cst_373 = arith.constant 0.000000e+00 : f32
    %1067 = vector.broadcast %cst_373 : f32 to vector<8x128xf32>
    %1068 = vector.extract_strided_slice %1064 {offsets = [0, 0], sizes = [8, 32], strides = [1, 1]} : vector<8x128xbf16> to vector<8x32xbf16>
    %1069 = vector.extract_strided_slice %1065 {offsets = [0, 0], sizes = [8, 32], strides = [1, 1]} : vector<8x128xbf16> to vector<8x32xbf16>
    %cst_374 = arith.constant dense<0.000000e+00> : vector<8x8xf32>
    %1070 = tpu.matmul %1068, %1069, %cst_374 {dimension_numbers = #tpu.dot_dimension_numbers<[1], [1], [0], [0], [0, 0, 1, 0], [], []>} : vector<8x32xbf16>, vector<8x32xbf16>, vector<8x8xf32> -> vector<8x8xf32>
    %cst_375 = arith.constant dense<0xFF800000> : vector<8xf32>
    %1071 = vector.multi_reduction <maximumf>, %1070, %cst_375 [1] : vector<8x8xf32> to vector<8xf32>
    %1072 = vector.shape_cast %1071 : vector<8xf32> to vector<8x1xf32>
    %1073 = vector.broadcast %1072 : vector<8x1xf32> to vector<8x8xf32>
    %1074 = arith.subf %1070, %1073 : vector<8x8xf32>
    %1075 = math.exp %1074 : vector<8x8xf32>
    %cst_376 = arith.constant dense<0.000000e+00> : vector<8xf32>
    %1076 = vector.multi_reduction <add>, %1075, %cst_376 [1] : vector<8x8xf32> to vector<8xf32>
    %1077 = vector.shape_cast %1076 : vector<8xf32> to vector<8x1xf32>
    %1078 = tpu.reciprocal %1077 {approx = true} : vector<8x1xf32> -> vector<8x1xf32>
    %1079 = vector.broadcast %1078 : vector<8x1xf32> to vector<8x8xf32>
    %1080 = arith.mulf %1075, %1079 : vector<8x8xf32>
    %1081 = arith.truncf %1080 : vector<8x8xf32> to vector<8x8xbf16>
    %1082 = vector.extract_strided_slice %1066 {offsets = [0, 0], sizes = [8, 32], strides = [1, 1]} : vector<8x128xbf16> to vector<8x32xbf16>
    %cst_377 = arith.constant dense<0.000000e+00> : vector<8x32xf32>
    %1083 = tpu.matmul %1081, %1082, %cst_377 {dimension_numbers = #tpu.dot_dimension_numbers<[1], [0], [0], [1], [0, 0, 1, 1], [], []>} : vector<8x8xbf16>, vector<8x32xbf16>, vector<8x32xf32> -> vector<8x32xf32>
    %1084 = arith.truncf %1083 : vector<8x32xf32> to vector<8x32xbf16>
    %1085 = vector.extract_strided_slice %1060 {offsets = [0, 0], sizes = [32, 128], strides = [1, 1]} : vector<128x128xbf16> to vector<32x128xbf16>
    %cst_378 = arith.constant dense<0.000000e+00> : vector<8x128xf32>
    %1086 = tpu.matmul %1084, %1085, %cst_378 {dimension_numbers = #tpu.dot_dimension_numbers<[1], [0], [0], [1], [0, 0, 1, 1], [], []>} : vector<8x32xbf16>, vector<32x128xbf16>, vector<8x128xf32> -> vector<8x128xf32>
    %1087 = arith.addf %1067, %1086 : vector<8x128xf32>
    %1088 = vector.extract_strided_slice %1064 {offsets = [0, 32], sizes = [8, 32], strides = [1, 1]} : vector<8x128xbf16> to vector<8x32xbf16>
    %1089 = vector.extract_strided_slice %1065 {offsets = [0, 32], sizes = [8, 32], strides = [1, 1]} : vector<8x128xbf16> to vector<8x32xbf16>
    %cst_379 = arith.constant dense<0.000000e+00> : vector<8x8xf32>
    %1090 = tpu.matmul %1088, %1089, %cst_379 {dimension_numbers = #tpu.dot_dimension_numbers<[1], [1], [0], [0], [0, 0, 1, 0], [], []>} : vector<8x32xbf16>, vector<8x32xbf16>, vector<8x8xf32> -> vector<8x8xf32>
    %cst_380 = arith.constant dense<0xFF800000> : vector<8xf32>
    %1091 = vector.multi_reduction <maximumf>, %1090, %cst_380 [1] : vector<8x8xf32> to vector<8xf32>
    %1092 = vector.shape_cast %1091 : vector<8xf32> to vector<8x1xf32>
    %1093 = vector.broadcast %1092 : vector<8x1xf32> to vector<8x8xf32>
    %1094 = arith.subf %1090, %1093 : vector<8x8xf32>
    %1095 = math.exp %1094 : vector<8x8xf32>
    %cst_381 = arith.constant dense<0.000000e+00> : vector<8xf32>
    %1096 = vector.multi_reduction <add>, %1095, %cst_381 [1] : vector<8x8xf32> to vector<8xf32>
    %1097 = vector.shape_cast %1096 : vector<8xf32> to vector<8x1xf32>
    %1098 = tpu.reciprocal %1097 {approx = true} : vector<8x1xf32> -> vector<8x1xf32>
    %1099 = vector.broadcast %1098 : vector<8x1xf32> to vector<8x8xf32>
    %1100 = arith.mulf %1095, %1099 : vector<8x8xf32>
    %1101 = arith.truncf %1100 : vector<8x8xf32> to vector<8x8xbf16>
    %1102 = vector.extract_strided_slice %1066 {offsets = [0, 32], sizes = [8, 32], strides = [1, 1]} : vector<8x128xbf16> to vector<8x32xbf16>
    %cst_382 = arith.constant dense<0.000000e+00> : vector<8x32xf32>
    %1103 = tpu.matmul %1101, %1102, %cst_382 {dimension_numbers = #tpu.dot_dimension_numbers<[1], [0], [0], [1], [0, 0, 1, 1], [], []>} : vector<8x8xbf16>, vector<8x32xbf16>, vector<8x32xf32> -> vector<8x32xf32>
    %1104 = arith.truncf %1103 : vector<8x32xf32> to vector<8x32xbf16>
    %1105 = vector.extract_strided_slice %1060 {offsets = [32, 0], sizes = [32, 128], strides = [1, 1]} : vector<128x128xbf16> to vector<32x128xbf16>
    %cst_383 = arith.constant dense<0.000000e+00> : vector<8x128xf32>
    %1106 = tpu.matmul %1104, %1105, %cst_383 {dimension_numbers = #tpu.dot_dimension_numbers<[1], [0], [0], [1], [0, 0, 1, 1], [], []>} : vector<8x32xbf16>, vector<32x128xbf16>, vector<8x128xf32> -> vector<8x128xf32>
    %1107 = arith.addf %1087, %1106 : vector<8x128xf32>
    %1108 = vector.extract_strided_slice %1064 {offsets = [0, 64], sizes = [8, 32], strides = [1, 1]} : vector<8x128xbf16> to vector<8x32xbf16>
    %1109 = vector.extract_strided_slice %1065 {offsets = [0, 64], sizes = [8, 32], strides = [1, 1]} : vector<8x128xbf16> to vector<8x32xbf16>
    %cst_384 = arith.constant dense<0.000000e+00> : vector<8x8xf32>
    %1110 = tpu.matmul %1108, %1109, %cst_384 {dimension_numbers = #tpu.dot_dimension_numbers<[1], [1], [0], [0], [0, 0, 1, 0], [], []>} : vector<8x32xbf16>, vector<8x32xbf16>, vector<8x8xf32> -> vector<8x8xf32>
    %cst_385 = arith.constant dense<0xFF800000> : vector<8xf32>
    %1111 = vector.multi_reduction <maximumf>, %1110, %cst_385 [1] : vector<8x8xf32> to vector<8xf32>
    %1112 = vector.shape_cast %1111 : vector<8xf32> to vector<8x1xf32>
    %1113 = vector.broadcast %1112 : vector<8x1xf32> to vector<8x8xf32>
    %1114 = arith.subf %1110, %1113 : vector<8x8xf32>
    %1115 = math.exp %1114 : vector<8x8xf32>
    %cst_386 = arith.constant dense<0.000000e+00> : vector<8xf32>
    %1116 = vector.multi_reduction <add>, %1115, %cst_386 [1] : vector<8x8xf32> to vector<8xf32>
    %1117 = vector.shape_cast %1116 : vector<8xf32> to vector<8x1xf32>
    %1118 = tpu.reciprocal %1117 {approx = true} : vector<8x1xf32> -> vector<8x1xf32>
    %1119 = vector.broadcast %1118 : vector<8x1xf32> to vector<8x8xf32>
    %1120 = arith.mulf %1115, %1119 : vector<8x8xf32>
    %1121 = arith.truncf %1120 : vector<8x8xf32> to vector<8x8xbf16>
    %1122 = vector.extract_strided_slice %1066 {offsets = [0, 64], sizes = [8, 32], strides = [1, 1]} : vector<8x128xbf16> to vector<8x32xbf16>
    %cst_387 = arith.constant dense<0.000000e+00> : vector<8x32xf32>
    %1123 = tpu.matmul %1121, %1122, %cst_387 {dimension_numbers = #tpu.dot_dimension_numbers<[1], [0], [0], [1], [0, 0, 1, 1], [], []>} : vector<8x8xbf16>, vector<8x32xbf16>, vector<8x32xf32> -> vector<8x32xf32>
    %1124 = arith.truncf %1123 : vector<8x32xf32> to vector<8x32xbf16>
    %1125 = vector.extract_strided_slice %1060 {offsets = [64, 0], sizes = [32, 128], strides = [1, 1]} : vector<128x128xbf16> to vector<32x128xbf16>
    %cst_388 = arith.constant dense<0.000000e+00> : vector<8x128xf32>
    %1126 = tpu.matmul %1124, %1125, %cst_388 {dimension_numbers = #tpu.dot_dimension_numbers<[1], [0], [0], [1], [0, 0, 1, 1], [], []>} : vector<8x32xbf16>, vector<32x128xbf16>, vector<8x128xf32> -> vector<8x128xf32>
    %1127 = arith.addf %1107, %1126 : vector<8x128xf32>
    %1128 = vector.extract_strided_slice %1064 {offsets = [0, 96], sizes = [8, 32], strides = [1, 1]} : vector<8x128xbf16> to vector<8x32xbf16>
    %1129 = vector.extract_strided_slice %1065 {offsets = [0, 96], sizes = [8, 32], strides = [1, 1]} : vector<8x128xbf16> to vector<8x32xbf16>
    %cst_389 = arith.constant dense<0.000000e+00> : vector<8x8xf32>
    %1130 = tpu.matmul %1128, %1129, %cst_389 {dimension_numbers = #tpu.dot_dimension_numbers<[1], [1], [0], [0], [0, 0, 1, 0], [], []>} : vector<8x32xbf16>, vector<8x32xbf16>, vector<8x8xf32> -> vector<8x8xf32>
    %cst_390 = arith.constant dense<0xFF800000> : vector<8xf32>
    %1131 = vector.multi_reduction <maximumf>, %1130, %cst_390 [1] : vector<8x8xf32> to vector<8xf32>
    %1132 = vector.shape_cast %1131 : vector<8xf32> to vector<8x1xf32>
    %1133 = vector.broadcast %1132 : vector<8x1xf32> to vector<8x8xf32>
    %1134 = arith.subf %1130, %1133 : vector<8x8xf32>
    %1135 = math.exp %1134 : vector<8x8xf32>
    %cst_391 = arith.constant dense<0.000000e+00> : vector<8xf32>
    %1136 = vector.multi_reduction <add>, %1135, %cst_391 [1] : vector<8x8xf32> to vector<8xf32>
    %1137 = vector.shape_cast %1136 : vector<8xf32> to vector<8x1xf32>
    %1138 = tpu.reciprocal %1137 {approx = true} : vector<8x1xf32> -> vector<8x1xf32>
    %1139 = vector.broadcast %1138 : vector<8x1xf32> to vector<8x8xf32>
    %1140 = arith.mulf %1135, %1139 : vector<8x8xf32>
    %1141 = arith.truncf %1140 : vector<8x8xf32> to vector<8x8xbf16>
    %1142 = vector.extract_strided_slice %1066 {offsets = [0, 96], sizes = [8, 32], strides = [1, 1]} : vector<8x128xbf16> to vector<8x32xbf16>
    %cst_392 = arith.constant dense<0.000000e+00> : vector<8x32xf32>
    %1143 = tpu.matmul %1141, %1142, %cst_392 {dimension_numbers = #tpu.dot_dimension_numbers<[1], [0], [0], [1], [0, 0, 1, 1], [], []>} : vector<8x8xbf16>, vector<8x32xbf16>, vector<8x32xf32> -> vector<8x32xf32>
    %1144 = arith.truncf %1143 : vector<8x32xf32> to vector<8x32xbf16>
    %1145 = vector.extract_strided_slice %1060 {offsets = [96, 0], sizes = [32, 128], strides = [1, 1]} : vector<128x128xbf16> to vector<32x128xbf16>
    %cst_393 = arith.constant dense<0.000000e+00> : vector<8x128xf32>
    %1146 = tpu.matmul %1144, %1145, %cst_393 {dimension_numbers = #tpu.dot_dimension_numbers<[1], [0], [0], [1], [0, 0, 1, 1], [], []>} : vector<8x32xbf16>, vector<32x128xbf16>, vector<8x128xf32> -> vector<8x128xf32>
    %1147 = arith.addf %1127, %1146 : vector<8x128xf32>
    %1148 = vector.extract_strided_slice %1061 {offsets = [8, 0], sizes = [8, 128], strides = [1, 1]} : vector<16x128xbf16> to vector<8x128xbf16>
    %1149 = vector.extract_strided_slice %1062 {offsets = [8, 0], sizes = [8, 128], strides = [1, 1]} : vector<16x128xbf16> to vector<8x128xbf16>
    %1150 = vector.extract_strided_slice %1063 {offsets = [8, 0], sizes = [8, 128], strides = [1, 1]} : vector<16x128xbf16> to vector<8x128xbf16>
    %cst_394 = arith.constant 0.000000e+00 : f32
    %1151 = vector.broadcast %cst_394 : f32 to vector<8x128xf32>
    %1152 = vector.extract_strided_slice %1148 {offsets = [0, 0], sizes = [8, 32], strides = [1, 1]} : vector<8x128xbf16> to vector<8x32xbf16>
    %1153 = vector.extract_strided_slice %1149 {offsets = [0, 0], sizes = [8, 32], strides = [1, 1]} : vector<8x128xbf16> to vector<8x32xbf16>
    %cst_395 = arith.constant dense<0.000000e+00> : vector<8x8xf32>
    %1154 = tpu.matmul %1152, %1153, %cst_395 {dimension_numbers = #tpu.dot_dimension_numbers<[1], [1], [0], [0], [0, 0, 1, 0], [], []>} : vector<8x32xbf16>, vector<8x32xbf16>, vector<8x8xf32> -> vector<8x8xf32>
    %cst_396 = arith.constant dense<0xFF800000> : vector<8xf32>
    %1155 = vector.multi_reduction <maximumf>, %1154, %cst_396 [1] : vector<8x8xf32> to vector<8xf32>
    %1156 = vector.shape_cast %1155 : vector<8xf32> to vector<8x1xf32>
    %1157 = vector.broadcast %1156 : vector<8x1xf32> to vector<8x8xf32>
    %1158 = arith.subf %1154, %1157 : vector<8x8xf32>
    %1159 = math.exp %1158 : vector<8x8xf32>
    %cst_397 = arith.constant dense<0.000000e+00> : vector<8xf32>
    %1160 = vector.multi_reduction <add>, %1159, %cst_397 [1] : vector<8x8xf32> to vector<8xf32>
    %1161 = vector.shape_cast %1160 : vector<8xf32> to vector<8x1xf32>
    %1162 = tpu.reciprocal %1161 {approx = true} : vector<8x1xf32> -> vector<8x1xf32>
    %1163 = vector.broadcast %1162 : vector<8x1xf32> to vector<8x8xf32>
    %1164 = arith.mulf %1159, %1163 : vector<8x8xf32>
    %1165 = arith.truncf %1164 : vector<8x8xf32> to vector<8x8xbf16>
    %1166 = vector.extract_strided_slice %1150 {offsets = [0, 0], sizes = [8, 32], strides = [1, 1]} : vector<8x128xbf16> to vector<8x32xbf16>
    %cst_398 = arith.constant dense<0.000000e+00> : vector<8x32xf32>
    %1167 = tpu.matmul %1165, %1166, %cst_398 {dimension_numbers = #tpu.dot_dimension_numbers<[1], [0], [0], [1], [0, 0, 1, 1], [], []>} : vector<8x8xbf16>, vector<8x32xbf16>, vector<8x32xf32> -> vector<8x32xf32>
    %1168 = arith.truncf %1167 : vector<8x32xf32> to vector<8x32xbf16>
    %1169 = vector.extract_strided_slice %1060 {offsets = [0, 0], sizes = [32, 128], strides = [1, 1]} : vector<128x128xbf16> to vector<32x128xbf16>
    %cst_399 = arith.constant dense<0.000000e+00> : vector<8x128xf32>
    %1170 = tpu.matmul %1168, %1169, %cst_399 {dimension_numbers = #tpu.dot_dimension_numbers<[1], [0], [0], [1], [0, 0, 1, 1], [], []>} : vector<8x32xbf16>, vector<32x128xbf16>, vector<8x128xf32> -> vector<8x128xf32>
    %1171 = arith.addf %1151, %1170 : vector<8x128xf32>
    %1172 = vector.extract_strided_slice %1148 {offsets = [0, 32], sizes = [8, 32], strides = [1, 1]} : vector<8x128xbf16> to vector<8x32xbf16>
    %1173 = vector.extract_strided_slice %1149 {offsets = [0, 32], sizes = [8, 32], strides = [1, 1]} : vector<8x128xbf16> to vector<8x32xbf16>
    %cst_400 = arith.constant dense<0.000000e+00> : vector<8x8xf32>
    %1174 = tpu.matmul %1172, %1173, %cst_400 {dimension_numbers = #tpu.dot_dimension_numbers<[1], [1], [0], [0], [0, 0, 1, 0], [], []>} : vector<8x32xbf16>, vector<8x32xbf16>, vector<8x8xf32> -> vector<8x8xf32>
    %cst_401 = arith.constant dense<0xFF800000> : vector<8xf32>
    %1175 = vector.multi_reduction <maximumf>, %1174, %cst_401 [1] : vector<8x8xf32> to vector<8xf32>
    %1176 = vector.shape_cast %1175 : vector<8xf32> to vector<8x1xf32>
    %1177 = vector.broadcast %1176 : vector<8x1xf32> to vector<8x8xf32>
    %1178 = arith.subf %1174, %1177 : vector<8x8xf32>
    %1179 = math.exp %1178 : vector<8x8xf32>
    %cst_402 = arith.constant dense<0.000000e+00> : vector<8xf32>
    %1180 = vector.multi_reduction <add>, %1179, %cst_402 [1] : vector<8x8xf32> to vector<8xf32>
    %1181 = vector.shape_cast %1180 : vector<8xf32> to vector<8x1xf32>
    %1182 = tpu.reciprocal %1181 {approx = true} : vector<8x1xf32> -> vector<8x1xf32>
    %1183 = vector.broadcast %1182 : vector<8x1xf32> to vector<8x8xf32>
    %1184 = arith.mulf %1179, %1183 : vector<8x8xf32>
    %1185 = arith.truncf %1184 : vector<8x8xf32> to vector<8x8xbf16>
    %1186 = vector.extract_strided_slice %1150 {offsets = [0, 32], sizes = [8, 32], strides = [1, 1]} : vector<8x128xbf16> to vector<8x32xbf16>
    %cst_403 = arith.constant dense<0.000000e+00> : vector<8x32xf32>
    %1187 = tpu.matmul %1185, %1186, %cst_403 {dimension_numbers = #tpu.dot_dimension_numbers<[1], [0], [0], [1], [0, 0, 1, 1], [], []>} : vector<8x8xbf16>, vector<8x32xbf16>, vector<8x32xf32> -> vector<8x32xf32>
    %1188 = arith.truncf %1187 : vector<8x32xf32> to vector<8x32xbf16>
    %1189 = vector.extract_strided_slice %1060 {offsets = [32, 0], sizes = [32, 128], strides = [1, 1]} : vector<128x128xbf16> to vector<32x128xbf16>
    %cst_404 = arith.constant dense<0.000000e+00> : vector<8x128xf32>
    %1190 = tpu.matmul %1188, %1189, %cst_404 {dimension_numbers = #tpu.dot_dimension_numbers<[1], [0], [0], [1], [0, 0, 1, 1], [], []>} : vector<8x32xbf16>, vector<32x128xbf16>, vector<8x128xf32> -> vector<8x128xf32>
    %1191 = arith.addf %1171, %1190 : vector<8x128xf32>
    %1192 = vector.extract_strided_slice %1148 {offsets = [0, 64], sizes = [8, 32], strides = [1, 1]} : vector<8x128xbf16> to vector<8x32xbf16>
    %1193 = vector.extract_strided_slice %1149 {offsets = [0, 64], sizes = [8, 32], strides = [1, 1]} : vector<8x128xbf16> to vector<8x32xbf16>
    %cst_405 = arith.constant dense<0.000000e+00> : vector<8x8xf32>
    %1194 = tpu.matmul %1192, %1193, %cst_405 {dimension_numbers = #tpu.dot_dimension_numbers<[1], [1], [0], [0], [0, 0, 1, 0], [], []>} : vector<8x32xbf16>, vector<8x32xbf16>, vector<8x8xf32> -> vector<8x8xf32>
    %cst_406 = arith.constant dense<0xFF800000> : vector<8xf32>
    %1195 = vector.multi_reduction <maximumf>, %1194, %cst_406 [1] : vector<8x8xf32> to vector<8xf32>
    %1196 = vector.shape_cast %1195 : vector<8xf32> to vector<8x1xf32>
    %1197 = vector.broadcast %1196 : vector<8x1xf32> to vector<8x8xf32>
    %1198 = arith.subf %1194, %1197 : vector<8x8xf32>
    %1199 = math.exp %1198 : vector<8x8xf32>
    %cst_407 = arith.constant dense<0.000000e+00> : vector<8xf32>
    %1200 = vector.multi_reduction <add>, %1199, %cst_407 [1] : vector<8x8xf32> to vector<8xf32>
    %1201 = vector.shape_cast %1200 : vector<8xf32> to vector<8x1xf32>
    %1202 = tpu.reciprocal %1201 {approx = true} : vector<8x1xf32> -> vector<8x1xf32>
    %1203 = vector.broadcast %1202 : vector<8x1xf32> to vector<8x8xf32>
    %1204 = arith.mulf %1199, %1203 : vector<8x8xf32>
    %1205 = arith.truncf %1204 : vector<8x8xf32> to vector<8x8xbf16>
    %1206 = vector.extract_strided_slice %1150 {offsets = [0, 64], sizes = [8, 32], strides = [1, 1]} : vector<8x128xbf16> to vector<8x32xbf16>
    %cst_408 = arith.constant dense<0.000000e+00> : vector<8x32xf32>
    %1207 = tpu.matmul %1205, %1206, %cst_408 {dimension_numbers = #tpu.dot_dimension_numbers<[1], [0], [0], [1], [0, 0, 1, 1], [], []>} : vector<8x8xbf16>, vector<8x32xbf16>, vector<8x32xf32> -> vector<8x32xf32>
    %1208 = arith.truncf %1207 : vector<8x32xf32> to vector<8x32xbf16>
    %1209 = vector.extract_strided_slice %1060 {offsets = [64, 0], sizes = [32, 128], strides = [1, 1]} : vector<128x128xbf16> to vector<32x128xbf16>
    %cst_409 = arith.constant dense<0.000000e+00> : vector<8x128xf32>
    %1210 = tpu.matmul %1208, %1209, %cst_409 {dimension_numbers = #tpu.dot_dimension_numbers<[1], [0], [0], [1], [0, 0, 1, 1], [], []>} : vector<8x32xbf16>, vector<32x128xbf16>, vector<8x128xf32> -> vector<8x128xf32>
    %1211 = arith.addf %1191, %1210 : vector<8x128xf32>
    %1212 = vector.extract_strided_slice %1148 {offsets = [0, 96], sizes = [8, 32], strides = [1, 1]} : vector<8x128xbf16> to vector<8x32xbf16>
    %1213 = vector.extract_strided_slice %1149 {offsets = [0, 96], sizes = [8, 32], strides = [1, 1]} : vector<8x128xbf16> to vector<8x32xbf16>
    %cst_410 = arith.constant dense<0.000000e+00> : vector<8x8xf32>
    %1214 = tpu.matmul %1212, %1213, %cst_410 {dimension_numbers = #tpu.dot_dimension_numbers<[1], [1], [0], [0], [0, 0, 1, 0], [], []>} : vector<8x32xbf16>, vector<8x32xbf16>, vector<8x8xf32> -> vector<8x8xf32>
    %cst_411 = arith.constant dense<0xFF800000> : vector<8xf32>
    %1215 = vector.multi_reduction <maximumf>, %1214, %cst_411 [1] : vector<8x8xf32> to vector<8xf32>
    %1216 = vector.shape_cast %1215 : vector<8xf32> to vector<8x1xf32>
    %1217 = vector.broadcast %1216 : vector<8x1xf32> to vector<8x8xf32>
    %1218 = arith.subf %1214, %1217 : vector<8x8xf32>
    %1219 = math.exp %1218 : vector<8x8xf32>
    %cst_412 = arith.constant dense<0.000000e+00> : vector<8xf32>
    %1220 = vector.multi_reduction <add>, %1219, %cst_412 [1] : vector<8x8xf32> to vector<8xf32>
    %1221 = vector.shape_cast %1220 : vector<8xf32> to vector<8x1xf32>
    %1222 = tpu.reciprocal %1221 {approx = true} : vector<8x1xf32> -> vector<8x1xf32>
    %1223 = vector.broadcast %1222 : vector<8x1xf32> to vector<8x8xf32>
    %1224 = arith.mulf %1219, %1223 : vector<8x8xf32>
    %1225 = arith.truncf %1224 : vector<8x8xf32> to vector<8x8xbf16>
    %1226 = vector.extract_strided_slice %1150 {offsets = [0, 96], sizes = [8, 32], strides = [1, 1]} : vector<8x128xbf16> to vector<8x32xbf16>
    %cst_413 = arith.constant dense<0.000000e+00> : vector<8x32xf32>
    %1227 = tpu.matmul %1225, %1226, %cst_413 {dimension_numbers = #tpu.dot_dimension_numbers<[1], [0], [0], [1], [0, 0, 1, 1], [], []>} : vector<8x8xbf16>, vector<8x32xbf16>, vector<8x32xf32> -> vector<8x32xf32>
    %1228 = arith.truncf %1227 : vector<8x32xf32> to vector<8x32xbf16>
    %1229 = vector.extract_strided_slice %1060 {offsets = [96, 0], sizes = [32, 128], strides = [1, 1]} : vector<128x128xbf16> to vector<32x128xbf16>
    %cst_414 = arith.constant dense<0.000000e+00> : vector<8x128xf32>
    %1230 = tpu.matmul %1228, %1229, %cst_414 {dimension_numbers = #tpu.dot_dimension_numbers<[1], [0], [0], [1], [0, 0, 1, 1], [], []>} : vector<8x32xbf16>, vector<32x128xbf16>, vector<8x128xf32> -> vector<8x128xf32>
    %1231 = arith.addf %1211, %1230 : vector<8x128xf32>
    %1232 = tpu.concatenate %1147, %1231 in 0 : vector<8x128xf32>, vector<8x128xf32> -> vector<16x128xf32>
    %1233 = vector.broadcast %1038 : vector<1x128xf32> to vector<16x128xf32>
    %1234 = arith.addf %1232, %1233 : vector<16x128xf32>
    %1235 = arith.addf %1034, %1234 : vector<16x128xf32>
    %c42 = arith.constant 42 : index
    %c0_415 = arith.constant 0 : index
    %1236 = vector.load %arg10[%c42, %c0_415] : memref<51x128xf32, #tpu.memory_space<vmem>>, vector<1x128xf32>
    %c48 = arith.constant 48 : index
    %c0_416 = arith.constant 0 : index
    %1237 = vector.load %arg10[%c48, %c0_416] : memref<51x128xf32, #tpu.memory_space<vmem>>, vector<1x128xf32>
    %cst_417 = arith.constant dense<0.000000e+00> : vector<16xf32>
    %1238 = vector.multi_reduction <add>, %1235, %cst_417 [1] : vector<16x128xf32> to vector<16xf32>
    %1239 = vector.shape_cast %1238 : vector<16xf32> to vector<16x1xf32>
    %cst_418 = arith.constant 1.280000e+02 : f32
    %1240 = vector.broadcast %cst_418 : f32 to vector<16x1xf32>
    %1241 = arith.divf %1239, %1240 : vector<16x1xf32>
    %1242 = vector.broadcast %1241 : vector<16x1xf32> to vector<16x128xf32>
    %1243 = arith.subf %1235, %1242 : vector<16x128xf32>
    %1244 = arith.mulf %1243, %1243 : vector<16x128xf32>
    %cst_419 = arith.constant dense<0.000000e+00> : vector<16xf32>
    %1245 = vector.multi_reduction <add>, %1244, %cst_419 [1] : vector<16x128xf32> to vector<16xf32>
    %1246 = vector.shape_cast %1245 : vector<16xf32> to vector<16x1xf32>
    %cst_420 = arith.constant 1.280000e+02 : f32
    %1247 = vector.broadcast %cst_420 : f32 to vector<16x1xf32>
    %1248 = arith.divf %1246, %1247 : vector<16x1xf32>
    %cst_421 = arith.constant 9.99999974E-6 : f32
    %1249 = vector.broadcast %cst_421 : f32 to vector<16x1xf32>
    %1250 = arith.addf %1248, %1249 : vector<16x1xf32>
    %1251 = math.rsqrt %1250 : vector<16x1xf32>
    %1252 = vector.broadcast %1251 : vector<16x1xf32> to vector<16x128xf32>
    %1253 = arith.mulf %1243, %1252 : vector<16x128xf32>
    %1254 = vector.broadcast %1236 : vector<1x128xf32> to vector<16x128xf32>
    %1255 = arith.mulf %1253, %1254 : vector<16x128xf32>
    %1256 = vector.broadcast %1237 : vector<1x128xf32> to vector<16x128xf32>
    %1257 = arith.addf %1255, %1256 : vector<16x128xf32>
    %c23 = arith.constant 23 : index
    %c0_422 = arith.constant 0 : index
    %1258 = vector.load %arg10[%c23, %c0_422] : memref<51x128xf32, #tpu.memory_space<vmem>>, vector<1x128xf32>
    %c24 = arith.constant 24 : index
    %c0_423 = arith.constant 0 : index
    %1259 = vector.load %arg10[%c24, %c0_423] : memref<51x128xf32, #tpu.memory_space<vmem>>, vector<1x128xf32>
    %c25 = arith.constant 25 : index
    %c0_424 = arith.constant 0 : index
    %1260 = vector.load %arg10[%c25, %c0_424] : memref<51x128xf32, #tpu.memory_space<vmem>>, vector<1x128xf32>
    %c26 = arith.constant 26 : index
    %c0_425 = arith.constant 0 : index
    %1261 = vector.load %arg10[%c26, %c0_425] : memref<51x128xf32, #tpu.memory_space<vmem>>, vector<1x128xf32>
    %1262 = arith.truncf %1257 : vector<16x128xf32> to vector<16x128xbf16>
    %c20_426 = arith.constant 20 : index
    %c0_427 = arith.constant 0 : index
    %c0_428 = arith.constant 0 : index
    %1263 = vector.load %arg6[%c20_426, %c0_427, %c0_428] : memref<24x128x128xbf16, #tpu.memory_space<vmem>>, vector<1x128x128xbf16>
    %1264 = vector.shape_cast %1263 : vector<1x128x128xbf16> to vector<128x128xbf16>
    %cst_429 = arith.constant dense<0.000000e+00> : vector<16x128xf32>
    %1265 = tpu.matmul %1262, %1264, %cst_429 {dimension_numbers = #tpu.dot_dimension_numbers<[1], [0], [0], [1], [0, 0, 1, 1], [], []>} : vector<16x128xbf16>, vector<128x128xbf16>, vector<16x128xf32> -> vector<16x128xf32>
    %1266 = vector.broadcast %1258 : vector<1x128xf32> to vector<16x128xf32>
    %1267 = arith.addf %1265, %1266 : vector<16x128xf32>
    %1268 = arith.truncf %549 : vector<16x128xf32> to vector<16x128xbf16>
    %c21_430 = arith.constant 21 : index
    %c0_431 = arith.constant 0 : index
    %c0_432 = arith.constant 0 : index
    %1269 = vector.load %arg6[%c21_430, %c0_431, %c0_432] : memref<24x128x128xbf16, #tpu.memory_space<vmem>>, vector<1x128x128xbf16>
    %1270 = vector.shape_cast %1269 : vector<1x128x128xbf16> to vector<128x128xbf16>
    %cst_433 = arith.constant dense<0.000000e+00> : vector<16x128xf32>
    %1271 = tpu.matmul %1268, %1270, %cst_433 {dimension_numbers = #tpu.dot_dimension_numbers<[1], [0], [0], [1], [0, 0, 1, 1], [], []>} : vector<16x128xbf16>, vector<128x128xbf16>, vector<16x128xf32> -> vector<16x128xf32>
    %1272 = vector.broadcast %1259 : vector<1x128xf32> to vector<16x128xf32>
    %1273 = arith.addf %1271, %1272 : vector<16x128xf32>
    %1274 = arith.truncf %549 : vector<16x128xf32> to vector<16x128xbf16>
    %c22_434 = arith.constant 22 : index
    %c0_435 = arith.constant 0 : index
    %c0_436 = arith.constant 0 : index
    %1275 = vector.load %arg6[%c22_434, %c0_435, %c0_436] : memref<24x128x128xbf16, #tpu.memory_space<vmem>>, vector<1x128x128xbf16>
    %1276 = vector.shape_cast %1275 : vector<1x128x128xbf16> to vector<128x128xbf16>
    %cst_437 = arith.constant dense<0.000000e+00> : vector<16x128xf32>
    %1277 = tpu.matmul %1274, %1276, %cst_437 {dimension_numbers = #tpu.dot_dimension_numbers<[1], [0], [0], [1], [0, 0, 1, 1], [], []>} : vector<16x128xbf16>, vector<128x128xbf16>, vector<16x128xf32> -> vector<16x128xf32>
    %1278 = vector.broadcast %1260 : vector<1x128xf32> to vector<16x128xf32>
    %1279 = arith.addf %1277, %1278 : vector<16x128xf32>
    %cst_438 = arith.constant 0.176776692 : f32
    %1280 = vector.broadcast %cst_438 : f32 to vector<16x128xf32>
    %1281 = arith.mulf %1267, %1280 : vector<16x128xf32>
    %c23_439 = arith.constant 23 : index
    %c0_440 = arith.constant 0 : index
    %c0_441 = arith.constant 0 : index
    %1282 = vector.load %arg6[%c23_439, %c0_440, %c0_441] : memref<24x128x128xbf16, #tpu.memory_space<vmem>>, vector<1x128x128xbf16>
    %1283 = vector.shape_cast %1282 : vector<1x128x128xbf16> to vector<128x128xbf16>
    %1284 = arith.truncf %1281 : vector<16x128xf32> to vector<16x128xbf16>
    %1285 = arith.truncf %1273 : vector<16x128xf32> to vector<16x128xbf16>
    %1286 = arith.truncf %1279 : vector<16x128xf32> to vector<16x128xbf16>
    %1287 = vector.extract_strided_slice %1284 {offsets = [0, 0], sizes = [8, 128], strides = [1, 1]} : vector<16x128xbf16> to vector<8x128xbf16>
    %1288 = vector.extract_strided_slice %1285 {offsets = [0, 0], sizes = [8, 128], strides = [1, 1]} : vector<16x128xbf16> to vector<8x128xbf16>
    %1289 = vector.extract_strided_slice %1286 {offsets = [0, 0], sizes = [8, 128], strides = [1, 1]} : vector<16x128xbf16> to vector<8x128xbf16>
    %cst_442 = arith.constant 0.000000e+00 : f32
    %1290 = vector.broadcast %cst_442 : f32 to vector<8x128xf32>
    %1291 = vector.extract_strided_slice %1287 {offsets = [0, 0], sizes = [8, 32], strides = [1, 1]} : vector<8x128xbf16> to vector<8x32xbf16>
    %1292 = vector.extract_strided_slice %1288 {offsets = [0, 0], sizes = [8, 32], strides = [1, 1]} : vector<8x128xbf16> to vector<8x32xbf16>
    %cst_443 = arith.constant dense<0.000000e+00> : vector<8x8xf32>
    %1293 = tpu.matmul %1291, %1292, %cst_443 {dimension_numbers = #tpu.dot_dimension_numbers<[1], [1], [0], [0], [0, 0, 1, 0], [], []>} : vector<8x32xbf16>, vector<8x32xbf16>, vector<8x8xf32> -> vector<8x8xf32>
    %cst_444 = arith.constant dense<0xFF800000> : vector<8xf32>
    %1294 = vector.multi_reduction <maximumf>, %1293, %cst_444 [1] : vector<8x8xf32> to vector<8xf32>
    %1295 = vector.shape_cast %1294 : vector<8xf32> to vector<8x1xf32>
    %1296 = vector.broadcast %1295 : vector<8x1xf32> to vector<8x8xf32>
    %1297 = arith.subf %1293, %1296 : vector<8x8xf32>
    %1298 = math.exp %1297 : vector<8x8xf32>
    %cst_445 = arith.constant dense<0.000000e+00> : vector<8xf32>
    %1299 = vector.multi_reduction <add>, %1298, %cst_445 [1] : vector<8x8xf32> to vector<8xf32>
    %1300 = vector.shape_cast %1299 : vector<8xf32> to vector<8x1xf32>
    %1301 = tpu.reciprocal %1300 {approx = true} : vector<8x1xf32> -> vector<8x1xf32>
    %1302 = vector.broadcast %1301 : vector<8x1xf32> to vector<8x8xf32>
    %1303 = arith.mulf %1298, %1302 : vector<8x8xf32>
    %1304 = arith.truncf %1303 : vector<8x8xf32> to vector<8x8xbf16>
    %1305 = vector.extract_strided_slice %1289 {offsets = [0, 0], sizes = [8, 32], strides = [1, 1]} : vector<8x128xbf16> to vector<8x32xbf16>
    %cst_446 = arith.constant dense<0.000000e+00> : vector<8x32xf32>
    %1306 = tpu.matmul %1304, %1305, %cst_446 {dimension_numbers = #tpu.dot_dimension_numbers<[1], [0], [0], [1], [0, 0, 1, 1], [], []>} : vector<8x8xbf16>, vector<8x32xbf16>, vector<8x32xf32> -> vector<8x32xf32>
    %1307 = arith.truncf %1306 : vector<8x32xf32> to vector<8x32xbf16>
    %1308 = vector.extract_strided_slice %1283 {offsets = [0, 0], sizes = [32, 128], strides = [1, 1]} : vector<128x128xbf16> to vector<32x128xbf16>
    %cst_447 = arith.constant dense<0.000000e+00> : vector<8x128xf32>
    %1309 = tpu.matmul %1307, %1308, %cst_447 {dimension_numbers = #tpu.dot_dimension_numbers<[1], [0], [0], [1], [0, 0, 1, 1], [], []>} : vector<8x32xbf16>, vector<32x128xbf16>, vector<8x128xf32> -> vector<8x128xf32>
    %1310 = arith.addf %1290, %1309 : vector<8x128xf32>
    %1311 = vector.extract_strided_slice %1287 {offsets = [0, 32], sizes = [8, 32], strides = [1, 1]} : vector<8x128xbf16> to vector<8x32xbf16>
    %1312 = vector.extract_strided_slice %1288 {offsets = [0, 32], sizes = [8, 32], strides = [1, 1]} : vector<8x128xbf16> to vector<8x32xbf16>
    %cst_448 = arith.constant dense<0.000000e+00> : vector<8x8xf32>
    %1313 = tpu.matmul %1311, %1312, %cst_448 {dimension_numbers = #tpu.dot_dimension_numbers<[1], [1], [0], [0], [0, 0, 1, 0], [], []>} : vector<8x32xbf16>, vector<8x32xbf16>, vector<8x8xf32> -> vector<8x8xf32>
    %cst_449 = arith.constant dense<0xFF800000> : vector<8xf32>
    %1314 = vector.multi_reduction <maximumf>, %1313, %cst_449 [1] : vector<8x8xf32> to vector<8xf32>
    %1315 = vector.shape_cast %1314 : vector<8xf32> to vector<8x1xf32>
    %1316 = vector.broadcast %1315 : vector<8x1xf32> to vector<8x8xf32>
    %1317 = arith.subf %1313, %1316 : vector<8x8xf32>
    %1318 = math.exp %1317 : vector<8x8xf32>
    %cst_450 = arith.constant dense<0.000000e+00> : vector<8xf32>
    %1319 = vector.multi_reduction <add>, %1318, %cst_450 [1] : vector<8x8xf32> to vector<8xf32>
    %1320 = vector.shape_cast %1319 : vector<8xf32> to vector<8x1xf32>
    %1321 = tpu.reciprocal %1320 {approx = true} : vector<8x1xf32> -> vector<8x1xf32>
    %1322 = vector.broadcast %1321 : vector<8x1xf32> to vector<8x8xf32>
    %1323 = arith.mulf %1318, %1322 : vector<8x8xf32>
    %1324 = arith.truncf %1323 : vector<8x8xf32> to vector<8x8xbf16>
    %1325 = vector.extract_strided_slice %1289 {offsets = [0, 32], sizes = [8, 32], strides = [1, 1]} : vector<8x128xbf16> to vector<8x32xbf16>
    %cst_451 = arith.constant dense<0.000000e+00> : vector<8x32xf32>
    %1326 = tpu.matmul %1324, %1325, %cst_451 {dimension_numbers = #tpu.dot_dimension_numbers<[1], [0], [0], [1], [0, 0, 1, 1], [], []>} : vector<8x8xbf16>, vector<8x32xbf16>, vector<8x32xf32> -> vector<8x32xf32>
    %1327 = arith.truncf %1326 : vector<8x32xf32> to vector<8x32xbf16>
    %1328 = vector.extract_strided_slice %1283 {offsets = [32, 0], sizes = [32, 128], strides = [1, 1]} : vector<128x128xbf16> to vector<32x128xbf16>
    %cst_452 = arith.constant dense<0.000000e+00> : vector<8x128xf32>
    %1329 = tpu.matmul %1327, %1328, %cst_452 {dimension_numbers = #tpu.dot_dimension_numbers<[1], [0], [0], [1], [0, 0, 1, 1], [], []>} : vector<8x32xbf16>, vector<32x128xbf16>, vector<8x128xf32> -> vector<8x128xf32>
    %1330 = arith.addf %1310, %1329 : vector<8x128xf32>
    %1331 = vector.extract_strided_slice %1287 {offsets = [0, 64], sizes = [8, 32], strides = [1, 1]} : vector<8x128xbf16> to vector<8x32xbf16>
    %1332 = vector.extract_strided_slice %1288 {offsets = [0, 64], sizes = [8, 32], strides = [1, 1]} : vector<8x128xbf16> to vector<8x32xbf16>
    %cst_453 = arith.constant dense<0.000000e+00> : vector<8x8xf32>
    %1333 = tpu.matmul %1331, %1332, %cst_453 {dimension_numbers = #tpu.dot_dimension_numbers<[1], [1], [0], [0], [0, 0, 1, 0], [], []>} : vector<8x32xbf16>, vector<8x32xbf16>, vector<8x8xf32> -> vector<8x8xf32>
    %cst_454 = arith.constant dense<0xFF800000> : vector<8xf32>
    %1334 = vector.multi_reduction <maximumf>, %1333, %cst_454 [1] : vector<8x8xf32> to vector<8xf32>
    %1335 = vector.shape_cast %1334 : vector<8xf32> to vector<8x1xf32>
    %1336 = vector.broadcast %1335 : vector<8x1xf32> to vector<8x8xf32>
    %1337 = arith.subf %1333, %1336 : vector<8x8xf32>
    %1338 = math.exp %1337 : vector<8x8xf32>
    %cst_455 = arith.constant dense<0.000000e+00> : vector<8xf32>
    %1339 = vector.multi_reduction <add>, %1338, %cst_455 [1] : vector<8x8xf32> to vector<8xf32>
    %1340 = vector.shape_cast %1339 : vector<8xf32> to vector<8x1xf32>
    %1341 = tpu.reciprocal %1340 {approx = true} : vector<8x1xf32> -> vector<8x1xf32>
    %1342 = vector.broadcast %1341 : vector<8x1xf32> to vector<8x8xf32>
    %1343 = arith.mulf %1338, %1342 : vector<8x8xf32>
    %1344 = arith.truncf %1343 : vector<8x8xf32> to vector<8x8xbf16>
    %1345 = vector.extract_strided_slice %1289 {offsets = [0, 64], sizes = [8, 32], strides = [1, 1]} : vector<8x128xbf16> to vector<8x32xbf16>
    %cst_456 = arith.constant dense<0.000000e+00> : vector<8x32xf32>
    %1346 = tpu.matmul %1344, %1345, %cst_456 {dimension_numbers = #tpu.dot_dimension_numbers<[1], [0], [0], [1], [0, 0, 1, 1], [], []>} : vector<8x8xbf16>, vector<8x32xbf16>, vector<8x32xf32> -> vector<8x32xf32>
    %1347 = arith.truncf %1346 : vector<8x32xf32> to vector<8x32xbf16>
    %1348 = vector.extract_strided_slice %1283 {offsets = [64, 0], sizes = [32, 128], strides = [1, 1]} : vector<128x128xbf16> to vector<32x128xbf16>
    %cst_457 = arith.constant dense<0.000000e+00> : vector<8x128xf32>
    %1349 = tpu.matmul %1347, %1348, %cst_457 {dimension_numbers = #tpu.dot_dimension_numbers<[1], [0], [0], [1], [0, 0, 1, 1], [], []>} : vector<8x32xbf16>, vector<32x128xbf16>, vector<8x128xf32> -> vector<8x128xf32>
    %1350 = arith.addf %1330, %1349 : vector<8x128xf32>
    %1351 = vector.extract_strided_slice %1287 {offsets = [0, 96], sizes = [8, 32], strides = [1, 1]} : vector<8x128xbf16> to vector<8x32xbf16>
    %1352 = vector.extract_strided_slice %1288 {offsets = [0, 96], sizes = [8, 32], strides = [1, 1]} : vector<8x128xbf16> to vector<8x32xbf16>
    %cst_458 = arith.constant dense<0.000000e+00> : vector<8x8xf32>
    %1353 = tpu.matmul %1351, %1352, %cst_458 {dimension_numbers = #tpu.dot_dimension_numbers<[1], [1], [0], [0], [0, 0, 1, 0], [], []>} : vector<8x32xbf16>, vector<8x32xbf16>, vector<8x8xf32> -> vector<8x8xf32>
    %cst_459 = arith.constant dense<0xFF800000> : vector<8xf32>
    %1354 = vector.multi_reduction <maximumf>, %1353, %cst_459 [1] : vector<8x8xf32> to vector<8xf32>
    %1355 = vector.shape_cast %1354 : vector<8xf32> to vector<8x1xf32>
    %1356 = vector.broadcast %1355 : vector<8x1xf32> to vector<8x8xf32>
    %1357 = arith.subf %1353, %1356 : vector<8x8xf32>
    %1358 = math.exp %1357 : vector<8x8xf32>
    %cst_460 = arith.constant dense<0.000000e+00> : vector<8xf32>
    %1359 = vector.multi_reduction <add>, %1358, %cst_460 [1] : vector<8x8xf32> to vector<8xf32>
    %1360 = vector.shape_cast %1359 : vector<8xf32> to vector<8x1xf32>
    %1361 = tpu.reciprocal %1360 {approx = true} : vector<8x1xf32> -> vector<8x1xf32>
    %1362 = vector.broadcast %1361 : vector<8x1xf32> to vector<8x8xf32>
    %1363 = arith.mulf %1358, %1362 : vector<8x8xf32>
    %1364 = arith.truncf %1363 : vector<8x8xf32> to vector<8x8xbf16>
    %1365 = vector.extract_strided_slice %1289 {offsets = [0, 96], sizes = [8, 32], strides = [1, 1]} : vector<8x128xbf16> to vector<8x32xbf16>
    %cst_461 = arith.constant dense<0.000000e+00> : vector<8x32xf32>
    %1366 = tpu.matmul %1364, %1365, %cst_461 {dimension_numbers = #tpu.dot_dimension_numbers<[1], [0], [0], [1], [0, 0, 1, 1], [], []>} : vector<8x8xbf16>, vector<8x32xbf16>, vector<8x32xf32> -> vector<8x32xf32>
    %1367 = arith.truncf %1366 : vector<8x32xf32> to vector<8x32xbf16>
    %1368 = vector.extract_strided_slice %1283 {offsets = [96, 0], sizes = [32, 128], strides = [1, 1]} : vector<128x128xbf16> to vector<32x128xbf16>
    %cst_462 = arith.constant dense<0.000000e+00> : vector<8x128xf32>
    %1369 = tpu.matmul %1367, %1368, %cst_462 {dimension_numbers = #tpu.dot_dimension_numbers<[1], [0], [0], [1], [0, 0, 1, 1], [], []>} : vector<8x32xbf16>, vector<32x128xbf16>, vector<8x128xf32> -> vector<8x128xf32>
    %1370 = arith.addf %1350, %1369 : vector<8x128xf32>
    %1371 = vector.extract_strided_slice %1284 {offsets = [8, 0], sizes = [8, 128], strides = [1, 1]} : vector<16x128xbf16> to vector<8x128xbf16>
    %1372 = vector.extract_strided_slice %1285 {offsets = [8, 0], sizes = [8, 128], strides = [1, 1]} : vector<16x128xbf16> to vector<8x128xbf16>
    %1373 = vector.extract_strided_slice %1286 {offsets = [8, 0], sizes = [8, 128], strides = [1, 1]} : vector<16x128xbf16> to vector<8x128xbf16>
    %cst_463 = arith.constant 0.000000e+00 : f32
    %1374 = vector.broadcast %cst_463 : f32 to vector<8x128xf32>
    %1375 = vector.extract_strided_slice %1371 {offsets = [0, 0], sizes = [8, 32], strides = [1, 1]} : vector<8x128xbf16> to vector<8x32xbf16>
    %1376 = vector.extract_strided_slice %1372 {offsets = [0, 0], sizes = [8, 32], strides = [1, 1]} : vector<8x128xbf16> to vector<8x32xbf16>
    %cst_464 = arith.constant dense<0.000000e+00> : vector<8x8xf32>
    %1377 = tpu.matmul %1375, %1376, %cst_464 {dimension_numbers = #tpu.dot_dimension_numbers<[1], [1], [0], [0], [0, 0, 1, 0], [], []>} : vector<8x32xbf16>, vector<8x32xbf16>, vector<8x8xf32> -> vector<8x8xf32>
    %cst_465 = arith.constant dense<0xFF800000> : vector<8xf32>
    %1378 = vector.multi_reduction <maximumf>, %1377, %cst_465 [1] : vector<8x8xf32> to vector<8xf32>
    %1379 = vector.shape_cast %1378 : vector<8xf32> to vector<8x1xf32>
    %1380 = vector.broadcast %1379 : vector<8x1xf32> to vector<8x8xf32>
    %1381 = arith.subf %1377, %1380 : vector<8x8xf32>
    %1382 = math.exp %1381 : vector<8x8xf32>
    %cst_466 = arith.constant dense<0.000000e+00> : vector<8xf32>
    %1383 = vector.multi_reduction <add>, %1382, %cst_466 [1] : vector<8x8xf32> to vector<8xf32>
    %1384 = vector.shape_cast %1383 : vector<8xf32> to vector<8x1xf32>
    %1385 = tpu.reciprocal %1384 {approx = true} : vector<8x1xf32> -> vector<8x1xf32>
    %1386 = vector.broadcast %1385 : vector<8x1xf32> to vector<8x8xf32>
    %1387 = arith.mulf %1382, %1386 : vector<8x8xf32>
    %1388 = arith.truncf %1387 : vector<8x8xf32> to vector<8x8xbf16>
    %1389 = vector.extract_strided_slice %1373 {offsets = [0, 0], sizes = [8, 32], strides = [1, 1]} : vector<8x128xbf16> to vector<8x32xbf16>
    %cst_467 = arith.constant dense<0.000000e+00> : vector<8x32xf32>
    %1390 = tpu.matmul %1388, %1389, %cst_467 {dimension_numbers = #tpu.dot_dimension_numbers<[1], [0], [0], [1], [0, 0, 1, 1], [], []>} : vector<8x8xbf16>, vector<8x32xbf16>, vector<8x32xf32> -> vector<8x32xf32>
    %1391 = arith.truncf %1390 : vector<8x32xf32> to vector<8x32xbf16>
    %1392 = vector.extract_strided_slice %1283 {offsets = [0, 0], sizes = [32, 128], strides = [1, 1]} : vector<128x128xbf16> to vector<32x128xbf16>
    %cst_468 = arith.constant dense<0.000000e+00> : vector<8x128xf32>
    %1393 = tpu.matmul %1391, %1392, %cst_468 {dimension_numbers = #tpu.dot_dimension_numbers<[1], [0], [0], [1], [0, 0, 1, 1], [], []>} : vector<8x32xbf16>, vector<32x128xbf16>, vector<8x128xf32> -> vector<8x128xf32>
    %1394 = arith.addf %1374, %1393 : vector<8x128xf32>
    %1395 = vector.extract_strided_slice %1371 {offsets = [0, 32], sizes = [8, 32], strides = [1, 1]} : vector<8x128xbf16> to vector<8x32xbf16>
    %1396 = vector.extract_strided_slice %1372 {offsets = [0, 32], sizes = [8, 32], strides = [1, 1]} : vector<8x128xbf16> to vector<8x32xbf16>
    %cst_469 = arith.constant dense<0.000000e+00> : vector<8x8xf32>
    %1397 = tpu.matmul %1395, %1396, %cst_469 {dimension_numbers = #tpu.dot_dimension_numbers<[1], [1], [0], [0], [0, 0, 1, 0], [], []>} : vector<8x32xbf16>, vector<8x32xbf16>, vector<8x8xf32> -> vector<8x8xf32>
    %cst_470 = arith.constant dense<0xFF800000> : vector<8xf32>
    %1398 = vector.multi_reduction <maximumf>, %1397, %cst_470 [1] : vector<8x8xf32> to vector<8xf32>
    %1399 = vector.shape_cast %1398 : vector<8xf32> to vector<8x1xf32>
    %1400 = vector.broadcast %1399 : vector<8x1xf32> to vector<8x8xf32>
    %1401 = arith.subf %1397, %1400 : vector<8x8xf32>
    %1402 = math.exp %1401 : vector<8x8xf32>
    %cst_471 = arith.constant dense<0.000000e+00> : vector<8xf32>
    %1403 = vector.multi_reduction <add>, %1402, %cst_471 [1] : vector<8x8xf32> to vector<8xf32>
    %1404 = vector.shape_cast %1403 : vector<8xf32> to vector<8x1xf32>
    %1405 = tpu.reciprocal %1404 {approx = true} : vector<8x1xf32> -> vector<8x1xf32>
    %1406 = vector.broadcast %1405 : vector<8x1xf32> to vector<8x8xf32>
    %1407 = arith.mulf %1402, %1406 : vector<8x8xf32>
    %1408 = arith.truncf %1407 : vector<8x8xf32> to vector<8x8xbf16>
    %1409 = vector.extract_strided_slice %1373 {offsets = [0, 32], sizes = [8, 32], strides = [1, 1]} : vector<8x128xbf16> to vector<8x32xbf16>
    %cst_472 = arith.constant dense<0.000000e+00> : vector<8x32xf32>
    %1410 = tpu.matmul %1408, %1409, %cst_472 {dimension_numbers = #tpu.dot_dimension_numbers<[1], [0], [0], [1], [0, 0, 1, 1], [], []>} : vector<8x8xbf16>, vector<8x32xbf16>, vector<8x32xf32> -> vector<8x32xf32>
    %1411 = arith.truncf %1410 : vector<8x32xf32> to vector<8x32xbf16>
    %1412 = vector.extract_strided_slice %1283 {offsets = [32, 0], sizes = [32, 128], strides = [1, 1]} : vector<128x128xbf16> to vector<32x128xbf16>
    %cst_473 = arith.constant dense<0.000000e+00> : vector<8x128xf32>
    %1413 = tpu.matmul %1411, %1412, %cst_473 {dimension_numbers = #tpu.dot_dimension_numbers<[1], [0], [0], [1], [0, 0, 1, 1], [], []>} : vector<8x32xbf16>, vector<32x128xbf16>, vector<8x128xf32> -> vector<8x128xf32>
    %1414 = arith.addf %1394, %1413 : vector<8x128xf32>
    %1415 = vector.extract_strided_slice %1371 {offsets = [0, 64], sizes = [8, 32], strides = [1, 1]} : vector<8x128xbf16> to vector<8x32xbf16>
    %1416 = vector.extract_strided_slice %1372 {offsets = [0, 64], sizes = [8, 32], strides = [1, 1]} : vector<8x128xbf16> to vector<8x32xbf16>
    %cst_474 = arith.constant dense<0.000000e+00> : vector<8x8xf32>
    %1417 = tpu.matmul %1415, %1416, %cst_474 {dimension_numbers = #tpu.dot_dimension_numbers<[1], [1], [0], [0], [0, 0, 1, 0], [], []>} : vector<8x32xbf16>, vector<8x32xbf16>, vector<8x8xf32> -> vector<8x8xf32>
    %cst_475 = arith.constant dense<0xFF800000> : vector<8xf32>
    %1418 = vector.multi_reduction <maximumf>, %1417, %cst_475 [1] : vector<8x8xf32> to vector<8xf32>
    %1419 = vector.shape_cast %1418 : vector<8xf32> to vector<8x1xf32>
    %1420 = vector.broadcast %1419 : vector<8x1xf32> to vector<8x8xf32>
    %1421 = arith.subf %1417, %1420 : vector<8x8xf32>
    %1422 = math.exp %1421 : vector<8x8xf32>
    %cst_476 = arith.constant dense<0.000000e+00> : vector<8xf32>
    %1423 = vector.multi_reduction <add>, %1422, %cst_476 [1] : vector<8x8xf32> to vector<8xf32>
    %1424 = vector.shape_cast %1423 : vector<8xf32> to vector<8x1xf32>
    %1425 = tpu.reciprocal %1424 {approx = true} : vector<8x1xf32> -> vector<8x1xf32>
    %1426 = vector.broadcast %1425 : vector<8x1xf32> to vector<8x8xf32>
    %1427 = arith.mulf %1422, %1426 : vector<8x8xf32>
    %1428 = arith.truncf %1427 : vector<8x8xf32> to vector<8x8xbf16>
    %1429 = vector.extract_strided_slice %1373 {offsets = [0, 64], sizes = [8, 32], strides = [1, 1]} : vector<8x128xbf16> to vector<8x32xbf16>
    %cst_477 = arith.constant dense<0.000000e+00> : vector<8x32xf32>
    %1430 = tpu.matmul %1428, %1429, %cst_477 {dimension_numbers = #tpu.dot_dimension_numbers<[1], [0], [0], [1], [0, 0, 1, 1], [], []>} : vector<8x8xbf16>, vector<8x32xbf16>, vector<8x32xf32> -> vector<8x32xf32>
    %1431 = arith.truncf %1430 : vector<8x32xf32> to vector<8x32xbf16>
    %1432 = vector.extract_strided_slice %1283 {offsets = [64, 0], sizes = [32, 128], strides = [1, 1]} : vector<128x128xbf16> to vector<32x128xbf16>
    %cst_478 = arith.constant dense<0.000000e+00> : vector<8x128xf32>
    %1433 = tpu.matmul %1431, %1432, %cst_478 {dimension_numbers = #tpu.dot_dimension_numbers<[1], [0], [0], [1], [0, 0, 1, 1], [], []>} : vector<8x32xbf16>, vector<32x128xbf16>, vector<8x128xf32> -> vector<8x128xf32>
    %1434 = arith.addf %1414, %1433 : vector<8x128xf32>
    %1435 = vector.extract_strided_slice %1371 {offsets = [0, 96], sizes = [8, 32], strides = [1, 1]} : vector<8x128xbf16> to vector<8x32xbf16>
    %1436 = vector.extract_strided_slice %1372 {offsets = [0, 96], sizes = [8, 32], strides = [1, 1]} : vector<8x128xbf16> to vector<8x32xbf16>
    %cst_479 = arith.constant dense<0.000000e+00> : vector<8x8xf32>
    %1437 = tpu.matmul %1435, %1436, %cst_479 {dimension_numbers = #tpu.dot_dimension_numbers<[1], [1], [0], [0], [0, 0, 1, 0], [], []>} : vector<8x32xbf16>, vector<8x32xbf16>, vector<8x8xf32> -> vector<8x8xf32>
    %cst_480 = arith.constant dense<0xFF800000> : vector<8xf32>
    %1438 = vector.multi_reduction <maximumf>, %1437, %cst_480 [1] : vector<8x8xf32> to vector<8xf32>
    %1439 = vector.shape_cast %1438 : vector<8xf32> to vector<8x1xf32>
    %1440 = vector.broadcast %1439 : vector<8x1xf32> to vector<8x8xf32>
    %1441 = arith.subf %1437, %1440 : vector<8x8xf32>
    %1442 = math.exp %1441 : vector<8x8xf32>
    %cst_481 = arith.constant dense<0.000000e+00> : vector<8xf32>
    %1443 = vector.multi_reduction <add>, %1442, %cst_481 [1] : vector<8x8xf32> to vector<8xf32>
    %1444 = vector.shape_cast %1443 : vector<8xf32> to vector<8x1xf32>
    %1445 = tpu.reciprocal %1444 {approx = true} : vector<8x1xf32> -> vector<8x1xf32>
    %1446 = vector.broadcast %1445 : vector<8x1xf32> to vector<8x8xf32>
    %1447 = arith.mulf %1442, %1446 : vector<8x8xf32>
    %1448 = arith.truncf %1447 : vector<8x8xf32> to vector<8x8xbf16>
    %1449 = vector.extract_strided_slice %1373 {offsets = [0, 96], sizes = [8, 32], strides = [1, 1]} : vector<8x128xbf16> to vector<8x32xbf16>
    %cst_482 = arith.constant dense<0.000000e+00> : vector<8x32xf32>
    %1450 = tpu.matmul %1448, %1449, %cst_482 {dimension_numbers = #tpu.dot_dimension_numbers<[1], [0], [0], [1], [0, 0, 1, 1], [], []>} : vector<8x8xbf16>, vector<8x32xbf16>, vector<8x32xf32> -> vector<8x32xf32>
    %1451 = arith.truncf %1450 : vector<8x32xf32> to vector<8x32xbf16>
    %1452 = vector.extract_strided_slice %1283 {offsets = [96, 0], sizes = [32, 128], strides = [1, 1]} : vector<128x128xbf16> to vector<32x128xbf16>
    %cst_483 = arith.constant dense<0.000000e+00> : vector<8x128xf32>
    %1453 = tpu.matmul %1451, %1452, %cst_483 {dimension_numbers = #tpu.dot_dimension_numbers<[1], [0], [0], [1], [0, 0, 1, 1], [], []>} : vector<8x32xbf16>, vector<32x128xbf16>, vector<8x128xf32> -> vector<8x128xf32>
    %1454 = arith.addf %1434, %1453 : vector<8x128xf32>
    %1455 = tpu.concatenate %1370, %1454 in 0 : vector<8x128xf32>, vector<8x128xf32> -> vector<16x128xf32>
    %1456 = vector.broadcast %1261 : vector<1x128xf32> to vector<16x128xf32>
    %1457 = arith.addf %1455, %1456 : vector<16x128xf32>
    %1458 = arith.addf %1257, %1457 : vector<16x128xf32>
    %c43 = arith.constant 43 : index
    %c0_484 = arith.constant 0 : index
    %1459 = vector.load %arg10[%c43, %c0_484] : memref<51x128xf32, #tpu.memory_space<vmem>>, vector<1x128xf32>
    %c49 = arith.constant 49 : index
    %c0_485 = arith.constant 0 : index
    %1460 = vector.load %arg10[%c49, %c0_485] : memref<51x128xf32, #tpu.memory_space<vmem>>, vector<1x128xf32>
    %cst_486 = arith.constant dense<0.000000e+00> : vector<16xf32>
    %1461 = vector.multi_reduction <add>, %1458, %cst_486 [1] : vector<16x128xf32> to vector<16xf32>
    %1462 = vector.shape_cast %1461 : vector<16xf32> to vector<16x1xf32>
    %cst_487 = arith.constant 1.280000e+02 : f32
    %1463 = vector.broadcast %cst_487 : f32 to vector<16x1xf32>
    %1464 = arith.divf %1462, %1463 : vector<16x1xf32>
    %1465 = vector.broadcast %1464 : vector<16x1xf32> to vector<16x128xf32>
    %1466 = arith.subf %1458, %1465 : vector<16x128xf32>
    %1467 = arith.mulf %1466, %1466 : vector<16x128xf32>
    %cst_488 = arith.constant dense<0.000000e+00> : vector<16xf32>
    %1468 = vector.multi_reduction <add>, %1467, %cst_488 [1] : vector<16x128xf32> to vector<16xf32>
    %1469 = vector.shape_cast %1468 : vector<16xf32> to vector<16x1xf32>
    %cst_489 = arith.constant 1.280000e+02 : f32
    %1470 = vector.broadcast %cst_489 : f32 to vector<16x1xf32>
    %1471 = arith.divf %1469, %1470 : vector<16x1xf32>
    %cst_490 = arith.constant 9.99999974E-6 : f32
    %1472 = vector.broadcast %cst_490 : f32 to vector<16x1xf32>
    %1473 = arith.addf %1471, %1472 : vector<16x1xf32>
    %1474 = math.rsqrt %1473 : vector<16x1xf32>
    %1475 = vector.broadcast %1474 : vector<16x1xf32> to vector<16x128xf32>
    %1476 = arith.mulf %1466, %1475 : vector<16x128xf32>
    %1477 = vector.broadcast %1459 : vector<1x128xf32> to vector<16x128xf32>
    %1478 = arith.mulf %1476, %1477 : vector<16x128xf32>
    %1479 = vector.broadcast %1460 : vector<1x128xf32> to vector<16x128xf32>
    %1480 = arith.addf %1478, %1479 : vector<16x128xf32>
    %c3_491 = arith.constant 3 : index
    %c0_492 = arith.constant 0 : index
    %c0_493 = arith.constant 0 : index
    %1481 = vector.load %arg7[%c3_491, %c0_492, %c0_493] : memref<4x128x256xbf16, #tpu.memory_space<vmem>>, vector<1x128x256xbf16>
    %1482 = vector.shape_cast %1481 : vector<1x128x256xbf16> to vector<128x256xbf16>
    %c3_494 = arith.constant 3 : index
    %c0_495 = arith.constant 0 : index
    %1483 = vector.load %arg11[%c3_494, %c0_495] : memref<4x256xf32, #tpu.memory_space<vmem>>, vector<1x256xf32>
    %c3_496 = arith.constant 3 : index
    %c0_497 = arith.constant 0 : index
    %c0_498 = arith.constant 0 : index
    %1484 = vector.load %arg8[%c3_496, %c0_497, %c0_498] : memref<4x256x128xbf16, #tpu.memory_space<vmem>>, vector<1x256x128xbf16>
    %1485 = vector.shape_cast %1484 : vector<1x256x128xbf16> to vector<256x128xbf16>
    %c30 = arith.constant 30 : index
    %c0_499 = arith.constant 0 : index
    %1486 = vector.load %arg10[%c30, %c0_499] : memref<51x128xf32, #tpu.memory_space<vmem>>, vector<1x128xf32>
    %c44 = arith.constant 44 : index
    %c0_500 = arith.constant 0 : index
    %1487 = vector.load %arg10[%c44, %c0_500] : memref<51x128xf32, #tpu.memory_space<vmem>>, vector<1x128xf32>
    %c50 = arith.constant 50 : index
    %c0_501 = arith.constant 0 : index
    %1488 = vector.load %arg10[%c50, %c0_501] : memref<51x128xf32, #tpu.memory_space<vmem>>, vector<1x128xf32>
    %1489 = arith.truncf %1480 : vector<16x128xf32> to vector<16x128xbf16>
    %cst_502 = arith.constant dense<0.000000e+00> : vector<16x256xf32>
    %1490 = tpu.matmul %1489, %1482, %cst_502 {dimension_numbers = #tpu.dot_dimension_numbers<[1], [0], [0], [1], [0, 0, 1, 1], [], []>} : vector<16x128xbf16>, vector<128x256xbf16>, vector<16x256xf32> -> vector<16x256xf32>
    %1491 = vector.broadcast %1483 : vector<1x256xf32> to vector<16x256xf32>
    %1492 = arith.addf %1490, %1491 : vector<16x256xf32>
    %cst_503 = arith.constant 0.000000e+00 : f32
    %1493 = vector.broadcast %cst_503 : f32 to vector<16x256xf32>
    %1494 = arith.maximumf %1492, %1493 : vector<16x256xf32>
    %1495 = arith.truncf %1494 : vector<16x256xf32> to vector<16x256xbf16>
    %cst_504 = arith.constant dense<0.000000e+00> : vector<16x128xf32>
    %1496 = tpu.matmul %1495, %1485, %cst_504 {dimension_numbers = #tpu.dot_dimension_numbers<[1], [0], [0], [1], [0, 0, 1, 1], [], []>} : vector<16x256xbf16>, vector<256x128xbf16>, vector<16x128xf32> -> vector<16x128xf32>
    %1497 = vector.broadcast %1486 : vector<1x128xf32> to vector<16x128xf32>
    %1498 = arith.addf %1496, %1497 : vector<16x128xf32>
    %1499 = arith.addf %1480, %1498 : vector<16x128xf32>
    %cst_505 = arith.constant dense<0.000000e+00> : vector<16xf32>
    %1500 = vector.multi_reduction <add>, %1499, %cst_505 [1] : vector<16x128xf32> to vector<16xf32>
    %1501 = vector.shape_cast %1500 : vector<16xf32> to vector<16x1xf32>
    %cst_506 = arith.constant 1.280000e+02 : f32
    %1502 = vector.broadcast %cst_506 : f32 to vector<16x1xf32>
    %1503 = arith.divf %1501, %1502 : vector<16x1xf32>
    %1504 = vector.broadcast %1503 : vector<16x1xf32> to vector<16x128xf32>
    %1505 = arith.subf %1499, %1504 : vector<16x128xf32>
    %1506 = arith.mulf %1505, %1505 : vector<16x128xf32>
    %cst_507 = arith.constant dense<0.000000e+00> : vector<16xf32>
    %1507 = vector.multi_reduction <add>, %1506, %cst_507 [1] : vector<16x128xf32> to vector<16xf32>
    %1508 = vector.shape_cast %1507 : vector<16xf32> to vector<16x1xf32>
    %cst_508 = arith.constant 1.280000e+02 : f32
    %1509 = vector.broadcast %cst_508 : f32 to vector<16x1xf32>
    %1510 = arith.divf %1508, %1509 : vector<16x1xf32>
    %cst_509 = arith.constant 9.99999974E-6 : f32
    %1511 = vector.broadcast %cst_509 : f32 to vector<16x1xf32>
    %1512 = arith.addf %1510, %1511 : vector<16x1xf32>
    %1513 = math.rsqrt %1512 : vector<16x1xf32>
    %1514 = vector.broadcast %1513 : vector<16x1xf32> to vector<16x128xf32>
    %1515 = arith.mulf %1505, %1514 : vector<16x128xf32>
    %1516 = vector.broadcast %1487 : vector<1x128xf32> to vector<16x128xf32>
    %1517 = arith.mulf %1515, %1516 : vector<16x128xf32>
    %1518 = vector.broadcast %1488 : vector<1x128xf32> to vector<16x128xf32>
    %1519 = arith.addf %1517, %1518 : vector<16x128xf32>
    %1520 = arith.truncf %1519 : vector<16x128xf32> to vector<16x128xbf16>
    %c0_510 = arith.constant 0 : index
    %c0_511 = arith.constant 0 : index
    %1521 = vector.load %arg9[%c0_510, %c0_511] : memref<128x128xbf16, #tpu.memory_space<vmem>>, vector<128x128xbf16>
    %cst_512 = arith.constant dense<0.000000e+00> : vector<16x128xf32>
    %1522 = tpu.matmul %1520, %1521, %cst_512 {dimension_numbers = #tpu.dot_dimension_numbers<[1], [0], [0], [1], [0, 0, 1, 1], [], []>} : vector<16x128xbf16>, vector<128x128xbf16>, vector<16x128xf32> -> vector<16x128xf32>
    %c2_513 = arith.constant 2 : index
    %c0_514 = arith.constant 0 : index
    %1523 = vector.load %arg10[%c2_513, %c0_514] : memref<51x128xf32, #tpu.memory_space<vmem>>, vector<1x128xf32>
    %1524 = vector.broadcast %1523 : vector<1x128xf32> to vector<16x128xf32>
    %1525 = arith.addf %1522, %1524 : vector<16x128xf32>
    %c0_515 = arith.constant 0 : index
    %c0_516 = arith.constant 0 : index
    %c0_517 = arith.constant 0 : index
    %1526 = vector.load %arg12[%c0_515, %c0_516, %c0_517] : memref<1x16x128xf32, #tpu.memory_space<vmem>>, vector<1x16x128xf32>
    %1527 = vector.shape_cast %1526 : vector<1x16x128xf32> to vector<16x128xf32>
    %1528 = vector.shape_cast %1525 : vector<16x128xf32> to vector<1x16x128xf32>
    tpu.vector_store %arg12[%c0_515, %c0_516, %c0_517], %1528 {strides = array<i32>} : memref<1x16x128xf32, #tpu.memory_space<vmem>>, vector<1x16x128xf32>,
    return
  }
  func.func @transform_0(%arg0: i32) -> (i32, i32, i32) {
    %c0_i32 = arith.constant 0 : i32
    %c0_i32_0 = arith.constant 0 : i32
    %c0_i32_1 = arith.constant 0 : i32
    return %arg0, %c0_i32, %c0_i32_0 : i32, i32, i32
  }
  func.func @transform_1(%arg0: i32) -> (i32, i32, i32) {
    %c0_i32 = arith.constant 0 : i32
    %c0_i32_0 = arith.constant 0 : i32
    %c0_i32_1 = arith.constant 0 : i32
    return %arg0, %c0_i32, %c0_i32_0 : i32, i32, i32
  }
  func.func @transform_2(%arg0: i32) -> (i32, i32) {
    %c0_i32 = arith.constant 0 : i32
    %c0_i32_0 = arith.constant 0 : i32
    %c0_i32_1 = arith.constant 0 : i32
    return %c0_i32, %c0_i32_0 : i32, i32
  }
  func.func @transform_3(%arg0: i32) -> (i32, i32) {
    %c0_i32 = arith.constant 0 : i32
    %c0_i32_0 = arith.constant 0 : i32
    %c0_i32_1 = arith.constant 0 : i32
    return %c0_i32, %c0_i32_0 : i32, i32
  }
  func.func @transform_4(%arg0: i32) -> (i32, i32, i32) {
    %c0_i32 = arith.constant 0 : i32
    %c0_i32_0 = arith.constant 0 : i32
    %c0_i32_1 = arith.constant 0 : i32
    %c0_i32_2 = arith.constant 0 : i32
    return %c0_i32, %c0_i32_0, %c0_i32_1 : i32, i32, i32
  }
  func.func @transform_5(%arg0: i32) -> (i32, i32, i32) {
    %c0_i32 = arith.constant 0 : i32
    %c0_i32_0 = arith.constant 0 : i32
    %c0_i32_1 = arith.constant 0 : i32
    %c0_i32_2 = arith.constant 0 : i32
    return %c0_i32, %c0_i32_0, %c0_i32_1 : i32, i32, i32
  }
  func.func @transform_6(%arg0: i32) -> (i32, i32, i32) {
    %c0_i32 = arith.constant 0 : i32
    %c0_i32_0 = arith.constant 0 : i32
    %c0_i32_1 = arith.constant 0 : i32
    %c0_i32_2 = arith.constant 0 : i32
    return %c0_i32, %c0_i32_0, %c0_i32_1 : i32, i32, i32
  }
  func.func @transform_7(%arg0: i32) -> (i32, i32, i32) {
    %c0_i32 = arith.constant 0 : i32
    %c0_i32_0 = arith.constant 0 : i32
    %c0_i32_1 = arith.constant 0 : i32
    %c0_i32_2 = arith.constant 0 : i32
    return %c0_i32, %c0_i32_0, %c0_i32_1 : i32, i32, i32
  }
  func.func @transform_8(%arg0: i32) -> (i32, i32) {
    %c0_i32 = arith.constant 0 : i32
    %c0_i32_0 = arith.constant 0 : i32
    %c0_i32_1 = arith.constant 0 : i32
    return %c0_i32, %c0_i32_0 : i32, i32
  }
  func.func @transform_9(%arg0: i32) -> (i32, i32) {
    %c0_i32 = arith.constant 0 : i32
    %c0_i32_0 = arith.constant 0 : i32
    %c0_i32_1 = arith.constant 0 : i32
    return %c0_i32, %c0_i32_0 : i32, i32
  }
  func.func @transform_10(%arg0: i32) -> (i32, i32) {
    %c0_i32 = arith.constant 0 : i32
    %c0_i32_0 = arith.constant 0 : i32
    %c0_i32_1 = arith.constant 0 : i32
    return %c0_i32, %c0_i32_0 : i32, i32
  }
  func.func @transform_11(%arg0: i32) -> (i32, i32, i32) {
    %c0_i32 = arith.constant 0 : i32
    %c0_i32_0 = arith.constant 0 : i32
    %c0_i32_1 = arith.constant 0 : i32
    return %arg0, %c0_i32, %c0_i32_0 : i32, i32, i32
  }
}

</mosaic_0001>

<bundles_post_ra>
// kernel: full_transformer_forward.1
= control target key start
LH: loop header
LB: loop body
LE: loop exit
PB: predicated region body
PF: predicated region fallthrough
CT: control target
= control target key end

     0   :  { %16 = vsyncpa [#allocation3], 0  ;;  %s18181_s0 = inlined_call_operand.vmem [shape: f32[2,16,128], index: 0, kind: input, shape index: {}]   ;;  %s18182_s1 = inlined_call_operand.vmem [shape: f32[2,16,128], index: 1, kind: input, shape index: {}]   ;;  %s18183_s2 = inlined_call_operand.vmem [shape: f32[16,128], index: 2, kind: input, shape index: {}, may-alias: {2,3}]   ;;  %s18184_s3 = inlined_call_operand.vmem [shape: f32[16,128], index: 3, kind: input, shape index: {}, may-alias: {2,3}]   ;;  %s18185_s4 = inlined_call_operand.vmem [shape: bf16[2,128,128], index: 4, kind: input, shape index: {}]   ;;  %s18186_s5 = inlined_call_operand.hbm [shape: bf16[24,128,128], index: 5, kind: input, shape index: {}]   ;;  %s18187_s6 = inlined_call_operand.vmem [shape: bf16[4,128,256], index: 6, kind: input, shape index: {}]   ;;  %s18188_s7 = inlined_call_operand.hbm [shape: bf16[4,256,128], index: 7, kind: input, shape index: {}]   ;;  %s18189_s8 = inlined_call_operand.vmem [shape: bf16[128,128], index: 8, kind: input, shape index: {}]   ;;  %s18190_s9 = inlined_call_operand.hbm [shape: f32[51,128], index: 9, kind: input, shape index: {}]   ;;  %s18191_s10 = inlined_call_operand.hbm [shape: f32[4,256], index: 10, kind: input, shape index: {}]   ;;  %s18192_s11 = inlined_call_operand.vmem [shape: f32[2,16,128], index: 11, kind: output, shape index: {}]  }
   0x1   :  { %17 = vsyncpa [#allocation5], 0 }
   0x2   :  { %18 = vsyncpa [#allocation8], 0  ;;  %s15985_s17 = smov 0  }
   0x3 LB: > { %s15991_s18 = sadd.s32 4294967295, %s15909_s17   ;;  %p12494_p0 = scmp.ge.s32.totalorder %s15909_s17, 1  ;;  %s15909_s17 = sphi %s15985_s17, %s24_s17  }
   0x4   : > { %p296_p1 = scmp.lt.s32.totalorder %s15909_s17, 3  ;;  %p18193_p2 = scmp.eq.s32.totalorder %s15991_s18, 0 }
   0x5   : > { %s15911_s20 = smov [#allocation4]   ;;  %s15912_s22 = smov [#allocation2]  }
   0x6   : > { %p15996_p3 = pnand %p12494_p0, %p296_p1  ;;  %s333_s21 = sshll.u32 %s15911_s20, 4  ;;  %s16000_s21 = int_to_ptr.vmem [resolvable:$true] %s333_s21 }
   0x7   : > { %s317_s23 = sshll.u32 %s15912_s22, 4  ;;  %s15913_s25 = smov [#allocation6]   ;;  %s16004_s23 = int_to_ptr.vmem [resolvable:$true] %s317_s23 }
   0x8   : > { %s18195_s19 = scalar_select %p15996_p3, 1, 0 }
   0x9   : > { %p15128_p4 = pneg %p15996_p3  ;;  %s349_s26 = sshll.u32 %s15913_s25, 4  ;;  %s16012_s26 = int_to_ptr.vmem [resolvable:$true] %s349_s26 }
   0xa   : > { %s15779_s29 = scalar_lea.hbm %s18188_s7, 8192 }
   0xb   : > { %p16008_p5 = pnand %p18193_p2, %p15128_p4  ;;  %p15780_p6 = scmp.ne.s32.totalorder %s18188_s7, %s15779_s29 }
   0xc   : > { %p15786_p10 = scmp.lt.u32.totalorder %s15779_s29, %s18188_s7 }
   0xd   : > { %p16022_p7 = pneg %p16008_p5 }
   0xf   : > { %p15782_p8 = pnand %p16022_p7, %p15780_p6 }
  0x11   : > { %p15783_p9 = pneg %p15782_p8 }
  0x13   : > { %p15788_p11 = pnand %p15786_p10, %p15783_p9 }
  0x15   : > { %15791 = shalt.err (!%p15788_p11)
}
  0x16   : > { %s15792_s16 = scalar_lea.vmem %s16000_s21, 8192  ;;  %p15800_p1 = scmp.lt.s32.totalorder %s16000_s21, %s16000_s21 }
  0x17   : > { %p15793_p12 = scmp.ne.s32.totalorder %s16000_s21, %s15792_s16  ;;  %p15801_p4 = scmp.lt.s32.totalorder %s15792_s16, %s15792_s16 }
  0x19   : > { %p15795_p13 = pnand %p15793_p12, %p16022_p7  ;;  %p15802_p6 = por %p15801_p4, %p15800_p1 }
  0x1b   : > { %p15796_p0 = pneg %p15795_p13 }
  0x1d   : > { %p15803_p8 = pnand %p15802_p6, %p15796_p0 }
  0x1f   : > { %15806 = shalt.err (!%p15803_p8)
}
  0x20   : > { %s15914_s20 = smov 64   ;;  %s15915_s22 = smov 4  }
  0x21   : > { %15134 = dma.hbm_to_vmem [thread:$0]  (!%p16008_p5), %s18188_s7, 8192, %s16000_s21, [#allocation5], %s15914_s20, %s15914_s20, %s15915_s22  }
  0x22   : > { %s15807_s30 = scalar_lea.hbm %s18186_s5, 24576 }
  0x23   : > { %p15808_p9 = scmp.ne.s32.totalorder %s18186_s5, %s15807_s30  ;;  %p15814_p12 = scmp.lt.u32.totalorder %s15807_s30, %s18186_s5 }
  0x25   : > { %p15810_p10 = pnand %p15808_p9, %p16022_p7 }
  0x27   : > { %p15811_p11 = pneg %p15810_p10 }
  0x29   : > { %p15816_p13 = pnand %p15814_p12, %p15811_p11 }
  0x2b   : > { %15819 = shalt.err (!%p15816_p13)
}
  0x2c   : > { %s15820_s21 = scalar_lea.vmem %s16004_s23, 24576  ;;  %p15828_p6 = scmp.lt.s32.totalorder %s16004_s23, %s16004_s23 }
  0x2d   : > { %p15821_p0 = scmp.ne.s32.totalorder %s16004_s23, %s15820_s21  ;;  %p15829_p8 = scmp.lt.s32.totalorder %s15820_s21, %s15820_s21 }
  0x2f   : > { %p15823_p1 = pnand %p15821_p0, %p16022_p7  ;;  %p15830_p9 = por %p15829_p8, %p15828_p6 }
  0x31   : > { %p15824_p4 = pneg %p15823_p1 }
  0x33   : > { %p15831_p10 = pnand %p15830_p9, %p15824_p4 }
  0x35   : > { %15834 = shalt.err (!%p15831_p10)
}
  0x36   : > { %15131 = dma.hbm_to_vmem [thread:$0]  (!%p16008_p5), %s18186_s5, 24576, %s16004_s23, [#allocation3], %s15914_s20, %s15914_s20, %s15915_s22  }
  0x37   : > { %s15835_s30 = scalar_lea.hbm %s18190_s9, 896 }
  0x38   : > { %p15836_p11 = scmp.ne.s32.totalorder %s18190_s9, %s15835_s30  ;;  %p15842_p0 = scmp.lt.u32.totalorder %s15835_s30, %s18190_s9 }
  0x3a   : > { %p15838_p12 = pnand %p15836_p11, %p16022_p7 }
  0x3c   : > { %p15839_p13 = pneg %p15838_p12 }
  0x3e   : > { %p15844_p1 = pnand %p15842_p0, %p15839_p13 }
  0x40   : > { %15847 = shalt.err (!%p15844_p1)
}
  0x41   : > { %s15848_s23 = scalar_lea.vmem %s16012_s26, 896  ;;  %p15856_p9 = scmp.lt.s32.totalorder %s16012_s26, %s16012_s26 }
  0x42   : > { %p15849_p4 = scmp.ne.s32.totalorder %s16012_s26, %s15848_s23  ;;  %p15857_p10 = scmp.lt.s32.totalorder %s15848_s23, %s15848_s23 }
  0x44   : > { %p15851_p6 = pnand %p15849_p4, %p16022_p7  ;;  %p15858_p11 = por %p15857_p10, %p15856_p9 }
  0x46   : > { %p15852_p8 = pneg %p15851_p6 }
  0x48   : > { %p15859_p12 = pnand %p15858_p11, %p15852_p8 }
  0x4a   : > { %15862 = shalt.err (!%p15859_p12)
}
  0x4b   : > { %s15916_s20 = smov 128   ;;  %s15917_s22 = smov 8  }
  0x4c   : > { %15137 = dma.hbm_to_vmem [thread:$0]  (!%p16008_p5), %s18190_s9, 896, %s16012_s26, [#allocation5], %s15916_s20, %s15916_s20, %s15917_s22  }
  0x4d   : > { %s15918_s27 = smov [#allocation7]   ;;  %s15863_s12 = scalar_lea.hbm %s18191_s10, 128 }
  0x4e   : > { %s363_s28 = sshll.u32 %s15918_s27, 4  ;;  %p15864_p13 = scmp.ne.s32.totalorder %s18191_s10, %s15863_s12  ;;  %s364_s28 = int_to_ptr.vmem [resolvable:$true] %s363_s28 }
  0x4f   : > { %p15870_p4 = scmp.lt.u32.totalorder %s15863_s12, %s18191_s10 }
  0x50   : > { %p15866_p0 = pnand %p15864_p13, %p16022_p7 }
  0x52   : > { %p15867_p1 = pneg %p15866_p0 }
  0x54   : > { %p15872_p6 = pnand %p15870_p4, %p15867_p1 }
  0x56   : > { %15875 = shalt.err (!%p15872_p6)
}
  0x57   : > { %s15876_s26 = scalar_lea.vmem %s364_s28, 128  ;;  %p15884_p11 = scmp.lt.s32.totalorder %s364_s28, %s364_s28 }
  0x58   : > { %p15877_p8 = scmp.ne.s32.totalorder %s364_s28, %s15876_s26  ;;  %p15885_p12 = scmp.lt.s32.totalorder %s15876_s26, %s15876_s26 }
  0x5a   : > { %p15879_p9 = pnand %p15877_p8, %p16022_p7  ;;  %p15886_p2 = por %p15885_p12, %p15884_p11 }
  0x5c   : > { %p15880_p10 = pneg %p15879_p9 }
  0x5e   : > { %p15887_p3 = pnand %p15886_p2, %p15880_p10 }
  0x60   : > { %15890 = shalt.err (!%p15887_p3)
}
  0x61   : > { %15140 = dma.hbm_to_vmem [thread:$0]  (!%p16008_p5), %s18191_s10, 128, %s364_s28, [#allocation8]  }
  0x62   : > { %p18198_p13 = scmp.ne.s32.totalorder %s18195_s19, 0 }
  0x63   : > { %p18199_p0 = scmp.eq.s32.totalorder (!%p18198_p13), %s15991_s18, 0 }
  0x64   : > { %392 = sbr.rel (%p18198_p13) target bundleno = 34022 (0x84e6), region = 64 }
  0x6b   : > { %15896 = dma.done.wait (%p18199_p0), [#allocation3], 24576   ;;  %p18200_p7 = pmov %p18199_p0 }
  0x6c   : > { %p18201_p1 = pmov %p18199_p0 }
  0x6d   : > { %15898 = vsyncadd (%p18200_p7), [#allocation3], 4294942720 }
  0x6e   : > { %15900 = dma.done.wait (%p18201_p1), [#allocation5], 9088   ;;  %p18202_p2 = pmov %p18199_p0 }
  0x6f   : > { %p18203_p3 = pmov %p18199_p0 }
  0x70   : > { %15902 = vsyncadd (%p18202_p2), [#allocation5], 4294958208 }
  0x71   : > { %15904 = dma.done.wait (%p18203_p3), [#allocation8], 128   ;;  %p18204_p5 = pmov %p18199_p0 }
  0x72   : > { %v15919_v0 = vmov 0.0   ;;  %vm15920_vm0 = vmmov 0   ;;  %v15171_v1 = vld [vmem:[%s18185_s4] sm:$0xff]   ;;  %v15172_v2 = vld [vmem:[%s18185_s4 + $0x8] sm:$0xff]   ;;  %v15173_v3 = vld [vmem:[%s18185_s4 + $0x10] sm:$0xff]   ;;  %p449_p4 = scmp.lt.s32.totalorder %s15991_s18, 1 }
  0x73   : > { %15906 = vsyncadd (%p18204_p5), [#allocation8], 4294967168  ;;  %13732 = vmatprep.subr.bf16.mxu0 %v15919_v0  ;;  %13748 = vmatprep.mubr.msk.bf16.mxu0 %vm15920_vm0, %v15919_v0  ;;  %v15179_v4 = vld [vmem:[%s18185_s4 + $0x40] sm:$0xff]   ;;  %v15174_v5 = vld [vmem:[%s18185_s4 + $0x18] sm:$0xff]   ;;  %vm1060_vm1 = vcmask 261120   ;;  %vm1123_vm2 = vcmask 1043456  }
  0x74   : > { %13752 = vmatprep.subr.bf16.mxu1 %v15919_v0  ;;  %13768 = vmatprep.mubr.msk.bf16.mxu1 %vm15920_vm0, %v15919_v0  ;;  %v15180_v6 = vld [vmem:[%s18185_s4 + $0x48] sm:$0xff]   ;;  %v15175_v7 = vld [vmem:[%s18185_s4 + $0x20] sm:$0xff]   ;;  %s18206_s18 = smov (!%p449_p4, %s15991_s18), 1  ;;  %v15181_v8 = vld [vmem:[%s18185_s4 + $0x50] sm:$0xff]   ;;  %vm1107_vm3 = vcmask 64512   ;;  %s15922_s12 = smov 64  }
  0x75   : > { %13733 = vmatpush3.bf16.msra.mxu0 %v15171_v1  ;;  %13753 = vmatpush3.bf16.msra.mxu1 %v15179_v4  ;;  %v15176_v9 = vld [vmem:[%s18185_s4 + $0x28] sm:$0xff]   ;;  %s16163_s24 = sshll.u32 %s18206_s18, 4  ;;  %v15182_v10 = vld [vmem:[%s18185_s4 + $0x58] sm:$0xff]   ;;  %v15177_v11 = vld [vmem:[%s18185_s4 + $0x30] sm:$0xff]   ;;  %s15921_s18 = smov 96  }
  0x76   : > { %13734 = vmatprep.subr.bf16.mxu0 %v15919_v0  ;;  %13754 = vmatprep.subr.bf16.mxu1 %v15919_v0  ;;  %s453_s30 = scalar_lea.vmem %s18181_s0, %s16163_s24  ;;  %v15183_v12 = vld [vmem:[%s18185_s4 + $0x60] sm:$0xff]   ;;  %v15178_v13 = vld [vmem:[%s18185_s4 + $0x38] sm:$0xff]   ;;  %v15184_v16 = vld [vmem:[%s18185_s4 + $0x68] sm:$0xff]   ;;  %s458_s13 = scalar_lea.vmem %s18182_s1, %s16163_s24 }
  0x77   : > { %v465_v14 = vld [vmem:[%s453_s30] sm:$0xff]  ;;  %v466_v15 = vld [vmem:[%s453_s30 + $0x8] sm:$0xff]  ;;  %v15185_v19 = vld [vmem:[%s18185_s4 + $0x70] sm:$0xff]   ;;  %s15923_s14 = smov 32   ;;  %s463_s16 = scalar_lea.vmem %s18192_s11, %s16163_s24 }
  0x78   : > { %v15187_v17 = vld [vmem:[#allocation2] sm:$0xff]   ;;  %v467_v18 = vpack.c.bf16 %v466_v15, %v465_v14  ;;  %v15189_v20 = vld [vmem:[#allocation2 + $0x8] sm:$0xff]   ;;  %v15186_v21 = vld [vmem:[%s18185_s4 + $0x78] sm:$0xff]  }
  0x79   : > { %13735 = vmatpush3.bf16.msra.mxu0 %v15172_v2  ;;  %13755 = vmatpush3.bf16.msra.mxu1 %v15180_v6  ;;  %v584_v22 = vld [vmem:[%s458_s13] sm:$0xff]  ;;  %v585_v23 = vld [vmem:[%s458_s13 + $0x8] sm:$0xff]  ;;  %v15191_v24 = vld [vmem:[#allocation2 + $0x10] sm:$0xff]  }
  0x7a   : > { %13736 = vmatprep.subr.bf16.mxu0 %v15919_v0  ;;  %13756 = vmatprep.subr.bf16.mxu1 %v15919_v0  ;;  %v15188_v25 = vld [vmem:[#allocation2 + $0x40] sm:$0xff]   ;;  %v586_v26 = vpack.c.bf16 %v585_v23, %v584_v22  ;;  %v15193_v27 = vld [vmem:[#allocation2 + $0x18] sm:$0xff]   ;;  %v15190_v28 = vld [vmem:[#allocation2 + $0x48] sm:$0xff]  }
  0x7b   : > { %v15195_v29 = vld [vmem:[#allocation2 + $0x20] sm:$0xff]   ;;  %v15192_v30 = vld [vmem:[#allocation2 + $0x50] sm:$0xff]   ;;  %v15197_v31 = vld [vmem:[#allocation2 + $0x28] sm:$0xff]  }
  0x7c   : > { %v15194_v32 = vld [vmem:[#allocation2 + $0x58] sm:$0xff]   ;;  %v15196_v33 = vld [vmem:[#allocation2 + $0x60] sm:$0xff]   ;;  %v15198_v34 = vld [vmem:[#allocation2 + $0x68] sm:$0xff]  }
  0x7d   : > { %13737 = vmatpush3.bf16.msra.mxu0 %v15173_v3  ;;  %13757 = vmatpush3.bf16.msra.mxu1 %v15181_v8  ;;  %v15199_v35 = vld [vmem:[#allocation2 + $0x30] sm:$0xff]   ;;  %v15201_v37 = vld [vmem:[#allocation2 + $0x38] sm:$0xff]   ;;  %v12511_v39 = vld [vmem:[#allocation6] ss:$0 sm:$0xff] }
  0x7e   : > { %13738 = vmatprep.subr.bf16.mxu0 %v15919_v0  ;;  %13758 = vmatprep.subr.bf16.mxu1 %v15919_v0  ;;  %v15200_v36 = vld [vmem:[#allocation2 + $0x70] sm:$0xff]   ;;  %v15202_v38 = vld [vmem:[#allocation2 + $0x78] sm:$0xff]   ;;  %v580_v47 = vld [vmem:[%s18183_s2] sm:$0xff] }
  0x7f   : > { %v581_v48 = vld [vmem:[%s18183_s2 + $0x8] sm:$0xff]  ;;  %v15203_v52 = vld [vmem:[#allocation2 + $0x80] sm:$0xff]   ;;  %v15205_v59 = vld [vmem:[#allocation2 + $0x90] sm:$0xff]  }
  0x80   : > { %v15204_v57 = vld [vmem:[#allocation2 + $0x88] sm:$0xff]   ;;  %v15206_v60 = vld [vmem:[#allocation2 + $0x98] sm:$0xff]   ;;  %v15207_v61 = vld [vmem:[#allocation2 + $0xa0] sm:$0xff]  }
  0x81   : > { %13739 = vmatpush3.bf16.msra.mxu0 %v15174_v5  ;;  %13759 = vmatpush3.bf16.msra.mxu1 %v15182_v10  ;;  %v15208_v62 = vld [vmem:[#allocation2 + $0xa8] sm:$0xff]   ;;  %v15209_v63 = vld [vmem:[#allocation2 + $0xb0] sm:$0xff]   ;;  %v15210_v1 = vld [vmem:[#allocation2 + $0xb8] sm:$0xff]  }
  0x82   : > { %13740 = vmatprep.subr.bf16.mxu0 %v15919_v0  ;;  %13760 = vmatprep.subr.bf16.mxu1 %v15919_v0  ;;  %v12545_v2 = vld [vmem:[#allocation6 + $0x3] ss:$0 sm:$0xff]  ;;  %v12554_v4 = vld [vmem:[#allocation6 + $0x4] ss:$0 sm:$0xff] }
  0x85   : > { %13741 = vmatpush3.bf16.msra.mxu0 %v15175_v7  ;;  %13761 = vmatpush3.bf16.msra.mxu1 %v15183_v12 }
  0x86   : > { %13742 = vmatprep.subr.bf16.mxu0 %v15919_v0  ;;  %13762 = vmatprep.subr.bf16.mxu1 %v15919_v0 }
  0x89   : > { %13743 = vmatpush3.bf16.msra.mxu0 %v15176_v9  ;;  %13763 = vmatpush3.bf16.msra.mxu1 %v15184_v16 }
  0x8a   : > { %13744 = vmatprep.subr.bf16.mxu0 %v15919_v0  ;;  %13764 = vmatprep.subr.bf16.mxu1 %v15919_v0 }
  0x8d   : > { %13745 = vmatpush3.bf16.msra.mxu0 %v15177_v11  ;;  %13765 = vmatpush3.bf16.msra.mxu1 %v15185_v19 }
  0x8e   : > { %13746 = vmatprep.subr.bf16.mxu0 %v15919_v0  ;;  %13766 = vmatprep.subr.bf16.mxu1 %v15919_v0 }
  0x91   : > { %13747 = vmatpush3.bf16.msra.mxu0 %v15178_v13  ;;  %13767 = vmatpush3.bf16.msra.mxu1 %v15186_v21  ;;  %v12563_v21 = vld [vmem:[#allocation6 + $0x5] ss:$0 sm:$0xff] }
  0x92   : > { %13772 = vmatprep.subr.bf16.mxu0 %v15919_v0  ;;  %13792 = vmatprep.subr.bf16.mxu1 %v15919_v0 }
  0x94   : > { %13749 = vmatmul.mubr.bf16.vlgmr.msra.gmra.mrb[0].mxu0 %v467_v18  ;;  %13769 = vmatmul.mubr.bf16.vlgmr.msra.gmra.mrb[0].mxu1 %v586_v26 }
  0x95   : > { %13773 = vmatpush3.bf16.msra.mxu0 %v15187_v17  ;;  %13788 = vmatprep.mubr.msk.bf16.mxu0 %vm15920_vm0, %v15919_v0 }
  0x96   : > { %13774 = vmatprep.subr.bf16.mxu0 %v15919_v0  ;;  %13793 = vmatpush3.bf16.msra.mxu1 %v15188_v25 }
  0x97   : > { %13794 = vmatprep.subr.bf16.mxu1 %v15919_v0  ;;  %13808 = vmatprep.mubr.msk.bf16.mxu1 %vm15920_vm0, %v15919_v0 }
  0x99   : > { %13775 = vmatpush3.bf16.msra.mxu0 %v15189_v20 }
  0x9a   : > { %13776 = vmatprep.subr.bf16.mxu0 %v15919_v0  ;;  %13795 = vmatpush3.bf16.msra.mxu1 %v15190_v28 }
  0x9b   : > { %13796 = vmatprep.subr.bf16.mxu1 %v15919_v0 }
  0x9d   : > { %13777 = vmatpush3.bf16.msra.mxu0 %v15191_v24 }
  0x9e   : > { %13778 = vmatprep.subr.bf16.mxu0 %v15919_v0  ;;  %13797 = vmatpush3.bf16.msra.mxu1 %v15192_v30 }
  0x9f   : > { %13798 = vmatprep.subr.bf16.mxu1 %v15919_v0 }
  0xa1   : > { %13779 = vmatpush3.bf16.msra.mxu0 %v15193_v27 }
  0xa2   : > { %13780 = vmatprep.subr.bf16.mxu0 %v15919_v0  ;;  %13799 = vmatpush3.bf16.msra.mxu1 %v15194_v32 }
  0xa3   : > { %13800 = vmatprep.subr.bf16.mxu1 %v15919_v0 }
  0xa5   : > { %13781 = vmatpush3.bf16.msra.mxu0 %v15195_v29 }
  0xa6   : > { %13782 = vmatprep.subr.bf16.mxu0 %v15919_v0  ;;  %13801 = vmatpush3.bf16.msra.mxu1 %v15196_v33 }
  0xa7   : > { %13802 = vmatprep.subr.bf16.mxu1 %v15919_v0 }
  0xa9   : > { %13783 = vmatpush3.bf16.msra.mxu0 %v15197_v31 }
  0xaa   : > { %13784 = vmatprep.subr.bf16.mxu0 %v15919_v0  ;;  %13803 = vmatpush3.bf16.msra.mxu1 %v15198_v34 }
  0xab   : > { %13804 = vmatprep.subr.bf16.mxu1 %v15919_v0 }
  0xad   : > { %13785 = vmatpush3.bf16.msra.mxu0 %v15199_v35 }
  0xae   : > { %13805 = vmatpush3.bf16.msra.mxu1 %v15200_v36  ;;  %13786 = vmatprep.subr.bf16.mxu0 %v15919_v0 }
  0xaf   : > { %13806 = vmatprep.subr.bf16.mxu1 %v15919_v0 }
  0xb1   : > { %13787 = vmatpush3.bf16.msra.mxu0 %v15201_v37 }
  0xb2   : > { %13807 = vmatpush3.bf16.msra.mxu1 %v15202_v38  ;;  %13812 = vmatprep.subr.bf16.mxu0 %v15919_v0 }
  0xb3   : > { %13832 = vmatprep.subr.bf16.mxu1 %v15919_v0 }
 0x167   : > { %v571_v40 = vpop.f32.mrb[0].mxu0  ;;  %v16235_v54 = vpop.f32.mrb[0].mxu1 }
 0x168   : > { %v572_v41 = vadd.f32 %v12511_v39, %v571_v40  ;;  %v13750_v42 = vpop.f32.mrb[1].mxu0  ;;  %v13770_v55 = vpop.f32.mrb[1].mxu1 }
 0x169   : > { %v574_v43 = vpop.f32.mrb[2].mxu0  ;;  %v16237_v56 = vpop.f32.mrb[2].mxu1 }
 0x16a   : > { %v578_v44 = vmul.f32 11.313708, %v572_v41  ;;  %v575_v45 = vadd.f32 %v12511_v39, %v574_v43  ;;  %v13751_v46 = vpop.f32.mrb[3].mxu0  ;;  %v13771_v58 = vpop.f32.mrb[3].mxu1 }
 0x16c   : > { %v579_v49 = vmul.f32 11.313708, %v575_v45  ;;  %v16229_v50 = vadd.f32 %v580_v47, %v578_v44 }
 0x16e   : > { %v16231_v51 = vadd.f32 %v581_v48, %v579_v49 }
 0x170   : > { %v708_v53 = vpack.c.bf16 %v16231_v51, %v16229_v50 }
 0x172   : > { %13789 = vmatmul.mubr.bf16.vlgmr.msra.gmra.mrb[4].mxu0 %v708_v53  ;;  %13809 = vmatmul.mubr.bf16.vlgmr.msra.gmra.mrb[4].mxu1 %v708_v53 }
 0x173   : > { %13813 = vmatpush3.bf16.msra.mxu0 %v15203_v52  ;;  %13828 = vmatprep.mubr.msk.bf16.mxu0 %vm15920_vm0, %v15919_v0 }
 0x174   : > { %13814 = vmatprep.subr.bf16.mxu0 %v15919_v0  ;;  %13834 = vmatprep.mubr.msk.bf16.mxu1 %vm15920_vm0, %v15919_v0 }
 0x177   : > { %13815 = vmatpush3.bf16.msra.mxu0 %v15204_v57 }
 0x178   : > { %13816 = vmatprep.subr.bf16.mxu0 %v15919_v0 }
 0x17b   : > { %13817 = vmatpush3.bf16.msra.mxu0 %v15205_v59 }
 0x17c   : > { %13818 = vmatprep.subr.bf16.mxu0 %v15919_v0 }
 0x17f   : > { %13819 = vmatpush3.bf16.msra.mxu0 %v15206_v60 }
 0x180   : > { %13820 = vmatprep.subr.bf16.mxu0 %v15919_v0 }
 0x183   : > { %13821 = vmatpush3.bf16.msra.mxu0 %v15207_v61 }
 0x184   : > { %13822 = vmatprep.subr.bf16.mxu0 %v15919_v0 }
 0x187   : > { %13823 = vmatpush3.bf16.msra.mxu0 %v15208_v62 }
 0x188   : > { %13824 = vmatprep.subr.bf16.mxu0 %v15919_v0 }
 0x18b   : > { %13825 = vmatpush3.bf16.msra.mxu0 %v15209_v63 }
 0x18c   : > { %13826 = vmatprep.subr.bf16.mxu0 %v15919_v0 }
 0x18f   : > { %13827 = vmatpush3.bf16.msra.mxu0 %v15210_v1 }
 0x190   : > { %13884 = vmatprep.subr.bf16.mxu0 %v15919_v0 }
 0x192   : > { %13829 = vmatmul.mubr.bf16.vlgmr.msra.gmra.mrb[8].mxu0 %v708_v53 }
 0x193   : > { %13888 = vmatprep.mubr.msk.bf16.mxu0 %vm15920_vm0, %v15919_v0 }
 0x245   : > { %v811_v3 = vpop.f32.mrb[4].mxu0  ;;  %v921_v5 = vpop.f32.mrb[4].mxu1 }
 0x246   : > { %v812_v6 = vadd.f32 %v12545_v2, %v811_v3  ;;  %v13790_v7 = vpop.f32.mrb[5].mxu0  ;;  %v13810_v8 = vpop.f32.mrb[5].mxu1  ;;  %v922_v11 = vadd.f32 %v12554_v4, %v921_v5 }
 0x247   : > { %v814_v9 = vpop.f32.mrb[6].mxu0  ;;  %v924_v10 = vpop.f32.mrb[6].mxu1  ;;  %v16295_v7 = vld [vmem:[#allocation2 + $0xd0] sm:$0xff]  }
 0x248   : > { %v815_v12 = vadd.f32 %v12545_v2, %v814_v9  ;;  %v925_v13 = vadd.f32 %v12554_v4, %v924_v10  ;;  %v13791_v14 = vpop.f32.mrb[7].mxu0  ;;  %v13811_v15 = vpop.f32.mrb[7].mxu1  ;;  %v1038_v16 = vmul.f32 0.17677669, %v812_v6  ;;  %v16299_v9 = vld [vmem:[#allocation2 + $0xd8] sm:$0xff]  }
 0x24a   : > { %v1039_v17 = vmul.f32 0.17677669, %v815_v12  ;;  %v16253_v18 = vpack.c.bf16 %v925_v13, %v922_v11  ;;  %v16306_v11 = vld [vmem:[#allocation2 + $0xc0] sm:$0xff]  }
 0x24c   : > { %v16255_v19 = vpack.c.bf16 %v1039_v17, %v1038_v16  ;;  %1172 = vrot.lane.b32.xlu1 %v16253_v18, %s15921_s18  ;;  %v1065_v20 = vsel %vm1060_vm1, %v16253_v18, 0  ;;  %v16310_v16 = vld [vmem:[#allocation2 + $0xc8] sm:$0xff]  }
 0x24d   : > { %13833 = vmatpush3.bf16.xpose.msra.mxu1 %v1065_v20 }
 0x24e   : > { %13838 = vmatprep.subr.bf16.mxu1 %v15919_v0 }
 0x250   : > { %1169 = vrot.lane.b32.xlu1 %v16255_v19, %s15921_s18 }
 0x254   : > { %13835 = vmatmul.mubr.msk.bf16.vlgmr.msra.gmra.mrb[8].mxu1 %vm1060_vm1, %v16255_v19 }
 0x255   : > { %13840 = vmatprep.mubr.msk.bf16.mxu1 %vm15920_vm0, %v15919_v0 }
 0x265   : > { %v1031_v22 = vpop.f32.mrb[8].mxu0 }
 0x266   : > { %v13830_v23 = vpop.f32.mrb[9].mxu0  ;;  %v1032_v25 = vadd.f32 %v12563_v21, %v1031_v22 }
 0x267   : > { %v1034_v24 = vpop.f32.mrb[10].mxu0 }
 0x268   : > { %v1035_v26 = vadd.f32 %v12563_v21, %v1034_v24  ;;  %v13831_v27 = vpop.f32.mrb[11].mxu0 }
 0x26a   : > { %v16268_v28 = vpack.c.bf16 %v1035_v26, %v1032_v25 }
 0x26c   : > { %v1125_v29 = vsel %vm1123_vm2, %v16268_v28, 0 }
 0x26d   : > { %13839 = vmatpush3.bf16.msra.mxu1 %v1125_v29 }
 0x26e   : > { %13844 = vmatprep.subr.bf16.mxu1 %v15919_v0 }
 0x2be   : > { %v1173_v43 = vpop.permute.xlu1 %1172 }
 0x2bf   : > { %v1178_v45 = vsel %vm1060_vm1, %v1173_v43, 0 }
 0x2c2   : > { %v1170_v46 = vpop.permute.xlu1 %1169 }
 0x327   : > { %v1101_v30 = vpop.f32.mrb[8].mxu1 }
 0x328   : > { %v13836_v31 = vpop.f32.mrb[9].mxu1  ;;  %v1108_v32 = vsel %vm1107_vm3, %v1101_v30, -inf }
 0x329   : > { %1109 = vmax.xlane.f32.xlu0 %v1108_v32  ;;  %v1104_v33 = vpop.f32.mrb[10].mxu1 }
 0x32a   : > { %v13837_v34 = vpop.f32.mrb[11].mxu1 }
 0x3b6   : > { %v1110_v35 = vpop.xlane.xlu0 %1109 }
 0x3b7   : > { %v1111_v36 = vsub.f32 %v1101_v30, %v1110_v35 }
 0x3b9   : > { %v1112_v37 = vmul.f32 1.442695, %v1111_v36 }
 0x3bb   : > { %15547 = vpow2.f32 %v1112_v37 }
 0x3c5   : > { %v15548_v38 = vpop.eup %15547 }
 0x3c6   : > { %v1114_v39 = vsel %vm1107_vm3, %v15548_v38, 0.0 }
 0x3c7   : > { %1115 = vadd.xlane.f32.xlu0 %v1114_v39 }
 0x454   : > { %v1116_v40 = vpop.xlane.xlu0 %1115 }
 0x455   : > { %15549 = vrcp.f32 %v1116_v40 }
 0x45f   : > { %v15550_v41 = vpop.eup %15549 }
 0x460   : > { %v1118_v42 = vmul.f32 %v15550_v41, %v15548_v38 }
 0x462   : > { %v1119_v44 = vpack.c.bf16 %v1118_v42, %v1118_v42 }
 0x464   : > { %13841 = vmatmul.mubr.msk.bf16.vlgmr.msra.gmra.mrb[12].mxu1 %vm1107_vm3, %v1119_v44 }
 0x465   : > { %13845 = vmatpush3.bf16.xpose.msra.mxu1 %v1178_v45  ;;  %13846 = vmatprep.mubr.msk.bf16.mxu1 %vm15920_vm0, %v15919_v0  ;;  %v16335_v45 = vld [vmem:[#allocation2 + $0xe0] sm:$0xff]  }
 0x466   : > { %13850 = vmatprep.subr.bf16.mxu1 %v15919_v0  ;;  %13885 = vmatpush3.bf16.msra.mxu0 %v16335_v45 }
 0x467   : > { %13886 = vmatprep.subr.bf16.mxu0 %v15919_v0 }
 0x46c   : > { %13847 = vmatmul.mubr.msk.bf16.vlgmr.msra.gmra.mrb[16].mxu1 %vm1060_vm1, %v1170_v46 }
 0x46d   : > { %13852 = vmatprep.mubr.msk.bf16.mxu1 %vm15920_vm0, %v15919_v0 }
 0x537   : > { %v1161_v47 = vpop.f32.mrb[12].mxu1 }
 0x538   : > { %v13842_v48 = vpop.f32.mrb[13].mxu1  ;;  %v1167_v17 = vpack.c.bf16 %v1161_v47, %v1161_v47 }
 0x539   : > { %v1164_v49 = vpop.f32.mrb[14].mxu1 }
 0x53a   : > { %v13843_v52 = vpop.f32.mrb[15].mxu1 }
 0x53f   : > { %v1214_v53 = vpop.f32.mrb[16].mxu1 }
 0x540   : > { %v13848_v55 = vpop.f32.mrb[17].mxu1  ;;  %v1220_v57 = vsel %vm1107_vm3, %v1214_v53, -inf }
 0x541   : > { %1221 = vmax.xlane.f32.xlu0 %v1220_v57  ;;  %v1217_v58 = vpop.f32.mrb[18].mxu1  ;;  %v16347_v57 = vld [vmem:[#allocation2 + $0xe8] sm:$0xff]  }
 0x542   : > { %v13849_v59 = vpop.f32.mrb[19].mxu1  ;;  %13887 = vmatpush3.bf16.msra.mxu0 %v16347_v57 }
 0x543   : > { %13898 = vmatprep.subr.bf16.mxu0 %v15919_v0 }
 0x557   : > { %1233 = vrot.lane.b32.xlu0 %v16268_v28, %s15921_s18 }
 0x55b   : > { %1394 = vrot.lane.b32.xlu0 %v16253_v18, %s15922_s12 }
 0x55f   : > { %1392 = vrot.lane.b32.xlu0 %v16255_v19, %s15922_s12 }
 0x5ce   : > { %v1222_v60 = vpop.xlane.xlu0 %1221 }
 0x5cf   : > { %v1223_v61 = vsub.f32 %v1214_v53, %v1222_v60 }
 0x5d1   : > { %v1224_v62 = vmul.f32 1.442695, %v1223_v61 }
 0x5d2   : > { %v1234_v63 = vpop.permute.xlu0 %1233 }
 0x5d3   : > { %15551 = vpow2.f32 %v1224_v62  ;;  %v1239_v1 = vsel %vm1123_vm2, %v1234_v63, 0 }
 0x5d4   : > { %13851 = vmatpush3.bf16.msra.mxu1 %v1239_v1 }
 0x5d5   : > { %13856 = vmatprep.subr.bf16.mxu1 %v15919_v0 }
 0x5d6   : > { %v1395_v20 = vpop.permute.xlu0 %1394 }
 0x5d7   : > { %v1400_v21 = vsel %vm1060_vm1, %v1395_v20, 0 }
 0x5da   : > { %v1393_v23 = vpop.permute.xlu0 %1392 }
 0x5dd   : > { %v15552_v2 = vpop.eup %15551 }
 0x5de   : > { %v1226_v3 = vsel %vm1107_vm3, %v15552_v2, 0.0 }
 0x5df   : > { %1227 = vadd.xlane.f32.xlu1 %v1226_v3 }
 0x5f0   : > { %1454 = vrot.lane.b32.xlu1 %v16268_v28, %s15922_s12 }
 0x66c   : > { %v1228_v4 = vpop.xlane.xlu1 %1227 }
 0x66d   : > { %15553 = vrcp.f32 %v1228_v4 }
 0x670   : > { %v1455_v22 = vpop.permute.xlu1 %1454 }
 0x671   : > { %v1460_v24 = vsel %vm1123_vm2, %v1455_v22, 0  ;;  %v16376_v22 = vld [vmem:[#allocation2 + $0xf8] sm:$0xff]  }
 0x677   : > { %v15554_v5 = vpop.eup %15553 }
 0x678   : > { %v1230_v6 = vmul.f32 %v15554_v5, %v15552_v2  ;;  %v16358_v5 = vrot.slane %v16253_v18, 4 }
 0x67a   : > { %v1231_v8 = vpack.c.bf16 %v1230_v6, %v1230_v6  ;;  %v16363_v6 = vrot.slane %v16255_v19, 4 }
 0x67c   : > { %13853 = vmatmul.mubr.msk.bf16.vlgmr.msra.gmra.mrb[20].mxu1 %vm1107_vm3, %v1231_v8 }
 0x67d   : > { %13857 = vmatpush3.bf16.msra.mxu1 %v16295_v7  ;;  %13860 = vmatprep.mubr.msk.bf16.mxu1 %vm15920_vm0, %v15919_v0 }
 0x67e   : > { %13858 = vmatprep.subr.bf16.mxu1 %v15919_v0 }
 0x681   : > { %13859 = vmatpush3.bf16.msra.mxu1 %v16299_v9 }
 0x682   : > { %13864 = vmatprep.subr.bf16.mxu1 %v15919_v0 }
 0x74f   : > { %v1275_v10 = vpop.f32.mrb[20].mxu1 }
 0x750   : > { %v1281_v12 = vpack.c.bf16 %v1275_v10, %v1275_v10  ;;  %v13854_v13 = vpop.f32.mrb[21].mxu1 }
 0x751   : > { %v1278_v14 = vpop.f32.mrb[22].mxu1 }
 0x752   : > { %v13855_v15 = vpop.f32.mrb[23].mxu1  ;;  %13861 = vmatmul.mubr.msk.bf16.vlgmr.msra.gmra.mrb[24].mxu1 %vm1060_vm1, %v1281_v12 }
 0x753   : > { %13865 = vmatpush3.bf16.msra.mxu1 %v16306_v11  ;;  %13868 = vmatprep.mubr.msk.bf16.mxu1 %vm15920_vm0, %v15919_v0 }
 0x754   : > { %13866 = vmatprep.subr.bf16.mxu1 %v15919_v0 }
 0x757   : > { %13867 = vmatpush3.bf16.msra.mxu1 %v16310_v16 }
 0x758   : > { %13872 = vmatprep.subr.bf16.mxu1 %v15919_v0 }
 0x75a   : > { %13869 = vmatmul.mubr.msk.bf16.vlgmr.msra.gmra.mrb[28].mxu1 %vm1060_vm1, %v1167_v17  ;;  %v16370_v17 = vld [vmem:[#allocation2 + $0xf0] sm:$0xff]  }
 0x75b   : > { %13874 = vmatprep.mubr.msk.bf16.mxu1 %vm15920_vm0, %v15919_v0 }
 0x760   : > { %13873 = vmatpush3.bf16.xpose.msra.mxu1 %v1400_v21 }
 0x761   : > { %13878 = vmatprep.subr.bf16.mxu1 %v15919_v0 }
 0x767   : > { %13875 = vmatmul.mubr.msk.bf16.vlgmr.msra.gmra.mrb[32].mxu1 %vm1060_vm1, %v1393_v23 }
 0x768   : > { %13879 = vmatpush3.bf16.msra.mxu1 %v1460_v24  ;;  %13880 = vmatprep.mubr.msk.bf16.mxu1 %vm15920_vm0, %v15919_v0 }
 0x769   : > { %13892 = vmatprep.subr.bf16.mxu1 %v15919_v0 }
 0x825   : > { %v1331_v25 = vpop.f32.mrb[24].mxu1 }
 0x826   : > { %v13862_v26 = vpop.f32.mrb[25].mxu1 }
 0x827   : > { %v1334_v27 = vpop.f32.mrb[26].mxu1 }
 0x828   : > { %v13863_v29 = vpop.f32.mrb[27].mxu1 }
 0x82d   : > { %v1386_v30 = vpop.f32.mrb[28].mxu1 }
 0x82e   : > { %v16327_v31 = vadd.f32 %v1386_v30, %v1331_v25  ;;  %v13870_v32 = vpop.f32.mrb[29].mxu1  ;;  %v1732_v30 = vsel %vm1060_vm1, %v16358_v5, 0 }
 0x82f   : > { %v1389_v33 = vpop.f32.mrb[30].mxu1 }
 0x830   : > { %v13871_v34 = vpop.f32.mrb[31].mxu1 }
 0x831   : > { %v16401_v34 = vrot.slane %v16268_v28, 4 }
 0x83a   : > { %v1436_v35 = vpop.f32.mrb[32].mxu1 }
 0x83b   : > { %v13876_v36 = vpop.f32.mrb[33].mxu1  ;;  %v1442_v37 = vsel %vm1107_vm3, %v1436_v35, -inf }
 0x83c   : > { %1443 = vmax.xlane.f32.xlu0 %v1442_v37  ;;  %v1439_v38 = vpop.f32.mrb[34].mxu1 }
 0x83d   : > { %v13877_v39 = vpop.f32.mrb[35].mxu1 }
 0x8c9   : > { %v1444_v40 = vpop.xlane.xlu0 %1443 }
 0x8ca   : > { %v1445_v41 = vsub.f32 %v1436_v35, %v1444_v40 }
 0x8cc   : > { %v1446_v42 = vmul.f32 1.442695, %v1445_v41 }
 0x8ce   : > { %15555 = vpow2.f32 %v1446_v42 }
 0x8d8   : > { %v15556_v43 = vpop.eup %15555 }
 0x8d9   : > { %v1448_v44 = vsel %vm1107_vm3, %v15556_v43, 0.0 }
 0x8da   : > { %1449 = vadd.xlane.f32.xlu1 %v1448_v44 }
 0x8eb   : > { %1561 = vrot.lane.b32.xlu1 %v16253_v18, %s15923_s14 }
 0x8ef   : > { %1559 = vrot.lane.b32.xlu1 %v16255_v19, %s15923_s14 }
 0x967   : > { %v1450_v46 = vpop.xlane.xlu1 %1449 }
 0x968   : > { %15557 = vrcp.f32 %v1450_v46 }
 0x96b   : > { %v1562_v49 = vpop.permute.xlu1 %1561 }
 0x96c   : > { %v1567_v53 = vsel %vm1060_vm1, %v1562_v49, 0 }
 0x96f   : > { %v1560_v55 = vpop.permute.xlu1 %1559 }
 0x972   : > { %v15558_v47 = vpop.eup %15557 }
 0x973   : > { %v1452_v48 = vmul.f32 %v15558_v47, %v15556_v43 }
 0x975   : > { %v1453_v52 = vpack.c.bf16 %v1452_v48, %v1452_v48 }
 0x977   : > { %13881 = vmatmul.mubr.msk.bf16.vlgmr.msra.gmra.mrb[36].mxu1 %vm1107_vm3, %v1453_v52 }
 0x978   : > { %13893 = vmatpush3.bf16.xpose.msra.mxu1 %v1567_v53  ;;  %13894 = vmatprep.mubr.msk.bf16.mxu1 %vm15920_vm0, %v15919_v0 }
 0x979   : > { %13904 = vmatprep.subr.bf16.mxu1 %v15919_v0 }
 0x97f   : > { %13895 = vmatmul.mubr.msk.bf16.vlgmr.msra.gmra.mrb[40].mxu1 %vm1060_vm1, %v1560_v55 }
 0x980   : > { %13908 = vmatprep.mubr.msk.bf16.mxu1 %vm15920_vm0, %v15919_v0  ;;  %13905 = vmatpush3.bf16.msra.mxu1 %v16370_v17 }
 0x981   : > { %13906 = vmatprep.subr.bf16.mxu1 %v15919_v0 }
 0x984   : > { %13907 = vmatpush3.bf16.msra.mxu1 %v16376_v22 }
 0x985   : > { %13918 = vmatprep.subr.bf16.mxu1 %v15919_v0 }
 0xa4a   : > { %v1496_v58 = vpop.f32.mrb[36].mxu1 }
 0xa4b   : > { %v1502_v59 = vpack.c.bf16 %v1496_v58, %v1496_v58  ;;  %v13882_v60 = vpop.f32.mrb[37].mxu1 }
 0xa4c   : > { %v1499_v61 = vpop.f32.mrb[38].mxu1 }
 0xa4d   : > { %v13883_v62 = vpop.f32.mrb[39].mxu1  ;;  %13889 = vmatmul.mubr.msk.bf16.vlgmr.msra.gmra.mrb[12].mxu0 %vm1060_vm1, %v1502_v59 }
 0xa4e   : > { %13900 = vmatprep.mubr.msk.bf16.mxu0 %vm15920_vm0, %v15919_v0 }
 0xa52   : > { %v1603_v63 = vpop.f32.mrb[40].mxu1 }
 0xa53   : > { %v13896_v1 = vpop.f32.mrb[41].mxu1  ;;  %v1609_v2 = vsel %vm1107_vm3, %v1603_v63, -inf }
 0xa54   : > { %1610 = vmax.xlane.f32.xlu0 %v1609_v2  ;;  %v1606_v3 = vpop.f32.mrb[42].mxu1 }
 0xa55   : > { %v13897_v4 = vpop.f32.mrb[43].mxu1 }
 0xa6a   : > { %1621 = vrot.lane.b32.xlu0 %v16268_v28, %s15923_s14 }
 0xa6e   : > { %1836 = vrot.lane.b32.xlu0 %v16358_v5, %s15921_s18 }
 0xa72   : > { %1834 = vrot.lane.b32.xlu0 %v16363_v6, %s15921_s18 }
 0xae1   : > { %v1611_v8 = vpop.xlane.xlu0 %1610 }
 0xae2   : > { %v1612_v10 = vsub.f32 %v1603_v63, %v1611_v8 }
 0xae4   : > { %v1613_v12 = vmul.f32 1.442695, %v1612_v10 }
 0xae5   : > { %v1622_v13 = vpop.permute.xlu0 %1621 }
 0xae6   : > { %15559 = vpow2.f32 %v1613_v12  ;;  %v1627_v14 = vsel %vm1123_vm2, %v1622_v13, 0 }
 0xae7   : > { %13899 = vmatpush3.bf16.msra.mxu0 %v1627_v14 }
 0xae8   : > { %13912 = vmatprep.subr.bf16.mxu0 %v15919_v0 }
 0xaf0   : > { %v15560_v18 = vpop.eup %15559 }
 0xaf1   : > { %v1615_v15 = vsel %vm1107_vm3, %v15560_v18, 0.0 }
 0xaf2   : > { %1616 = vadd.xlane.f32.xlu1 %v1615_v15 }
 0xb20   : > { %v1552_v19 = vpop.f32.mrb[12].mxu0 }
 0xb21   : > { %v16373_v20 = vadd.f32 %v1552_v19, %v16327_v31  ;;  %v13890_v21 = vpop.f32.mrb[13].mxu0  ;;  %v1837_v31 = vpop.permute.xlu0 %1836 }
 0xb22   : > { %v1555_v23 = vpop.f32.mrb[14].mxu0  ;;  %v1842_v32 = vsel %vm1060_vm1, %v1837_v31, 0 }
 0xb23   : > { %v13891_v24 = vpop.f32.mrb[15].mxu0 }
 0xb25   : > { %v1835_v33 = vpop.permute.xlu0 %1834 }
 0xb7f   : > { %v1617_v25 = vpop.xlane.xlu1 %1616 }
 0xb80   : > { %15561 = vrcp.f32 %v1617_v25 }
 0xb8a   : > { %v15562_v26 = vpop.eup %15561 }
 0xb8b   : > { %v1619_v27 = vmul.f32 %v15562_v26, %v15560_v18 }
 0xb8d   : > { %v1620_v29 = vpack.c.bf16 %v1619_v27, %v1619_v27 }
 0xb8f   : > { %13901 = vmatmul.mubr.msk.bf16.vlgmr.msra.gmra.mrb[16].mxu0 %vm1107_vm3, %v1620_v29 }
 0xb90   : > { %13913 = vmatpush3.bf16.xpose.msra.mxu0 %v1732_v30  ;;  %13914 = vmatprep.mubr.msk.bf16.mxu0 %vm15920_vm0, %v15919_v0 }
 0xb91   : > { %13924 = vmatprep.subr.bf16.mxu0 %v15919_v0 }
 0xb97   : > { %13915 = vmatmul.mubr.msk.bf16.vlgmr.msra.gmra.mrb[20].mxu0 %vm1060_vm1, %v16363_v6 }
 0xb98   : > { %13925 = vmatpush3.bf16.xpose.msra.mxu0 %v1842_v32  ;;  %13926 = vmatprep.mubr.msk.bf16.mxu0 %vm15920_vm0, %v15919_v0 }
 0xb99   : > { %13936 = vmatprep.subr.bf16.mxu0 %v15919_v0 }
 0xb9f   : > { %13927 = vmatmul.mubr.msk.bf16.vlgmr.msra.gmra.mrb[24].mxu0 %vm1060_vm1, %v1835_v33 }
 0xba0   : > { %13937 = vmatpush3.bf16.msra.mxu0 %v16295_v7  ;;  %13940 = vmatprep.mubr.msk.bf16.mxu0 %vm15920_vm0, %v15919_v0  ;;  %v1791_v7 = vsel %vm1123_vm2, %v16401_v34, 0 }
 0xba1   : > { %13938 = vmatprep.subr.bf16.mxu0 %v15919_v0 }
 0xba4   : > { %13939 = vmatpush3.bf16.msra.mxu0 %v16299_v9 }
 0xba5   : > { %13952 = vmatprep.subr.bf16.mxu0 %v15919_v0 }
 0xc62   : > { %v1663_v35 = vpop.f32.mrb[16].mxu0 }
 0xc63   : > { %v1669_v36 = vpack.c.bf16 %v1663_v35, %v1663_v35  ;;  %v13902_v37 = vpop.f32.mrb[17].mxu0 }
 0xc64   : > { %v1666_v38 = vpop.f32.mrb[18].mxu0 }
 0xc65   : > { %v13903_v39 = vpop.f32.mrb[19].mxu0  ;;  %13909 = vmatmul.mubr.msk.bf16.vlgmr.msra.gmra.mrb[44].mxu1 %vm1060_vm1, %v1669_v36 }
 0xc66   : > { %13919 = vmatpush3.bf16.msra.mxu1 %v1791_v7  ;;  %13920 = vmatprep.mubr.msk.bf16.mxu1 %vm15920_vm0, %v15919_v0 }
 0xc67   : > { %13930 = vmatprep.subr.bf16.mxu1 %v15919_v0 }
 0xc6a   : > { %v1768_v9 = vpop.f32.mrb[20].mxu0 }
 0xc6b   : > { %v13916_v40 = vpop.f32.mrb[21].mxu0  ;;  %v1774_v28 = vsel %vm1107_vm3, %v1768_v9, -inf }
 0xc6c   : > { %1775 = vmax.xlane.f32.xlu0 %v1774_v28  ;;  %v1771_v41 = vpop.f32.mrb[22].mxu0 }
 0xc6d   : > { %v13917_v42 = vpop.f32.mrb[23].mxu0 }
 0xc72   : > { %v1878_v43 = vpop.f32.mrb[24].mxu0 }
 0xc73   : > { %v13928_v44 = vpop.f32.mrb[25].mxu0  ;;  %v1884_v46 = vsel %vm1107_vm3, %v1878_v43, -inf }
 0xc74   : > { %1885 = vmax.xlane.f32.xlu1 %v1884_v46  ;;  %v1881_v47 = vpop.f32.mrb[26].mxu0 }
 0xc75   : > { %v13929_v48 = vpop.f32.mrb[27].mxu0 }
 0xc82   : > { %2033 = vrot.lane.b32.xlu0 %v16358_v5, %s15922_s12 }
 0xcf9   : > { %v1776_v49 = vpop.xlane.xlu0 %1775 }
 0xcfa   : > { %v1777_v52 = vsub.f32 %v1768_v9, %v1776_v49 }
 0xcfc   : > { %v1778_v53 = vmul.f32 1.442695, %v1777_v52 }
 0xcfe   : > { %15563 = vpow2.f32 %v1778_v53 }
 0xd01   : > { %v1886_v55 = vpop.xlane.xlu1 %1885 }
 0xd02   : > { %v1887_v58 = vsub.f32 %v1878_v43, %v1886_v55 }
 0xd04   : > { %v1888_v59 = vmul.f32 1.442695, %v1887_v58 }
 0xd06   : > { %15565 = vpow2.f32 %v1888_v59 }
 0xd08   : > { %v15564_v60 = vpop.eup %15563 }
 0xd09   : > { %v1780_v61 = vsel %vm1107_vm3, %v15564_v60, 0.0 }
 0xd0a   : > { %1781 = vadd.xlane.f32.xlu1 %v1780_v61 }
 0xd10   : > { %v15566_v62 = vpop.eup %15565 }
 0xd11   : > { %v1890_v63 = vsel %vm1107_vm3, %v15566_v62, 0.0 }
 0xd12   : > { %1891 = vadd.xlane.f32.xlu1 %v1890_v63 }
 0xd23   : > { %1896 = vrot.lane.b32.xlu1 %v16401_v34, %s15921_s18 }
 0xd27   : > { %2031 = vrot.lane.b32.xlu1 %v16363_v6, %s15922_s12 }
 0xd38   : > { %v1719_v1 = vpop.f32.mrb[44].mxu1 }
 0xd39   : > { %v16420_v2 = vadd.f32 %v1719_v1, %v16373_v20  ;;  %v13910_v3 = vpop.f32.mrb[45].mxu1 }
 0xd3a   : > { %v1722_v4 = vpop.f32.mrb[46].mxu1 }
 0xd3b   : > { %v13911_v8 = vpop.f32.mrb[47].mxu1 }
 0xd97   : > { %v1782_v10 = vpop.xlane.xlu1 %1781 }
 0xd98   : > { %15567 = vrcp.f32 %v1782_v10 }
 0xd9f   : > { %v1892_v12 = vpop.xlane.xlu1 %1891 }
 0xda0   : > { %15569 = vrcp.f32 %v1892_v12 }
 0xda2   : > { %v15568_v13 = vpop.eup %15567 }
 0xda3   : > { %v1784_v14 = vmul.f32 %v15568_v13, %v15564_v60  ;;  %v1897_v18 = vpop.permute.xlu1 %1896 }
 0xda4   : > { %v1902_v19 = vsel %vm1123_vm2, %v1897_v18, 0 }
 0xda5   : > { %v1785_v15 = vpack.c.bf16 %v1784_v14, %v1784_v14 }
 0xda7   : > { %13921 = vmatmul.mubr.msk.bf16.vlgmr.msra.gmra.mrb[48].mxu1 %vm1107_vm3, %v1785_v15  ;;  %v2032_v36 = vpop.permute.xlu1 %2031 }
 0xda8   : > { %13931 = vmatpush3.bf16.msra.mxu1 %v1902_v19  ;;  %13932 = vmatprep.mubr.msk.bf16.mxu1 %vm15920_vm0, %v15919_v0 }
 0xda9   : > { %13944 = vmatprep.subr.bf16.mxu1 %v15919_v0 }
 0xdaa   : > { %v15570_v20 = vpop.eup %15569 }
 0xdab   : > { %v1894_v21 = vmul.f32 %v15570_v20, %v15566_v62 }
 0xdad   : > { %v1895_v23 = vpack.c.bf16 %v1894_v21, %v1894_v21 }
 0xdaf   : > { %13933 = vmatmul.mubr.msk.bf16.vlgmr.msra.gmra.mrb[52].mxu1 %vm1107_vm3, %v1895_v23  ;;  %v12604_v23 = vld [vmem:[#allocation6 + $0x6] ss:$0 sm:$0xff] }
 0xdb0   : > { %13945 = vmatpush3.bf16.msra.mxu1 %v16306_v11  ;;  %13948 = vmatprep.mubr.msk.bf16.mxu1 %vm15920_vm0, %v15919_v0  ;;  %v2034_v11 = vpop.permute.xlu0 %2033 }
 0xdb1   : > { %13946 = vmatprep.subr.bf16.mxu1 %v15919_v0  ;;  %v2039_v35 = vsel %vm1060_vm1, %v2034_v11, 0 }
 0xdb4   : > { %13947 = vmatpush3.bf16.msra.mxu1 %v16310_v16 }
 0xdb5   : > { %13958 = vmatprep.subr.bf16.mxu1 %v15919_v0 }
 0xe7a   : > { %v1827_v24 = vpop.f32.mrb[48].mxu1 }
 0xe7b   : > { %v1833_v25 = vpack.c.bf16 %v1827_v24, %v1827_v24  ;;  %v13922_v26 = vpop.f32.mrb[49].mxu1 }
 0xe7c   : > { %v1830_v27 = vpop.f32.mrb[50].mxu1 }
 0xe7d   : > { %v13923_v29 = vpop.f32.mrb[51].mxu1  ;;  %13949 = vmatmul.mubr.msk.bf16.vlgmr.msra.gmra.mrb[56].mxu1 %vm1060_vm1, %v1833_v25  ;;  %v2345_v25 = vadd.f32 %v12604_v23, %v16420_v2 }
 0xe7e   : > { %13960 = vmatprep.mubr.msk.bf16.mxu1 %vm15920_vm0, %v15919_v0 }
 0xe7f   : > { %v2347_v27 = vadd.f32 %v2345_v25, %v16229_v50 }
 0xe82   : > { %v1938_v30 = vpop.f32.mrb[52].mxu1 }
 0xe83   : > { %v1944_v31 = vpack.c.bf16 %v1938_v30, %v1938_v30  ;;  %v13934_v32 = vpop.f32.mrb[53].mxu1 }
 0xe84   : > { %v1941_v33 = vpop.f32.mrb[54].mxu1 }
 0xe85   : > { %v13935_v16 = vpop.f32.mrb[55].mxu1  ;;  %13941 = vmatmul.mubr.msk.bf16.vlgmr.msra.gmra.mrb[28].mxu0 %vm1060_vm1, %v1944_v31 }
 0xe86   : > { %13953 = vmatpush3.bf16.xpose.msra.mxu0 %v2039_v35  ;;  %13954 = vmatprep.mubr.msk.bf16.mxu0 %vm15920_vm0, %v15919_v0 }
 0xe87   : > { %13964 = vmatprep.subr.bf16.mxu0 %v15919_v0 }
 0xe8d   : > { %13955 = vmatmul.mubr.msk.bf16.vlgmr.msra.gmra.mrb[32].mxu0 %vm1060_vm1, %v2032_v36 }
 0xe8e   : > { %13965 = vmatpush3.bf16.msra.mxu0 %v16335_v45  ;;  %13968 = vmatprep.mubr.msk.bf16.mxu0 %vm15920_vm0, %v15919_v0 }
 0xe8f   : > { %13966 = vmatprep.subr.bf16.mxu0 %v15919_v0 }
 0xe92   : > { %13967 = vmatpush3.bf16.msra.mxu0 %v16347_v57 }
 0xe93   : > { %13978 = vmatprep.subr.bf16.mxu0 %v15919_v0 }
 0xf50   : > { %v2025_v37 = vpop.f32.mrb[56].mxu1 }
 0xf51   : > { %v13950_v38 = vpop.f32.mrb[57].mxu1 }
 0xf52   : > { %v2028_v39 = vpop.f32.mrb[58].mxu1 }
 0xf53   : > { %v13951_v7 = vpop.f32.mrb[59].mxu1 }
 0xf58   : > { %v1982_v9 = vpop.f32.mrb[28].mxu0 }
 0xf59   : > { %v16449_v40 = vadd.f32 %v2025_v37, %v1982_v9  ;;  %v13942_v28 = vpop.f32.mrb[29].mxu0 }
 0xf5a   : > { %v1985_v41 = vpop.f32.mrb[30].mxu0 }
 0xf5b   : > { %v13943_v42 = vpop.f32.mrb[31].mxu0 }
 0xf60   : > { %v2075_v45 = vpop.f32.mrb[32].mxu0 }
 0xf61   : > { %v13956_v43 = vpop.f32.mrb[33].mxu0  ;;  %v2081_v44 = vsel %vm1107_vm3, %v2075_v45, -inf }
 0xf62   : > { %2082 = vmax.xlane.f32.xlu1 %v2081_v44  ;;  %v2078_v46 = vpop.f32.mrb[34].mxu0 }
 0xf63   : > { %v13957_v47 = vpop.f32.mrb[35].mxu0 }
 0xf64   : > { %v15219_v47 = vld [vmem:[%s18187_s6] ss:$8 sps:$4 sm:$0xff]  }
 0xf73   : > { %2093 = vrot.lane.b32.xlu1 %v16401_v34, %s15922_s12 }
 0xf77   : > { %2186 = vrot.lane.b32.xlu1 %v16363_v6, %s15923_s14 }
 0xfef   : > { %v2083_v57 = vpop.xlane.xlu1 %2082 }
 0xff0   : > { %v2084_v48 = vsub.f32 %v2075_v45, %v2083_v57  ;;  %v15221_v57 = vld [vmem:[%s18187_s6 + $0x4] ss:$8 sps:$4 sm:$0xff]  }
 0xff2   : > { %v2085_v49 = vmul.f32 1.442695, %v2084_v48  ;;  %v15224_v48 = vld [vmem:[%s18187_s6 + $0x14] ss:$8 sps:$4 sm:$0xff]  }
 0xff3   : > { %v2094_v52 = vpop.permute.xlu1 %2093 }
 0xff4   : > { %15571 = vpow2.f32 %v2085_v49  ;;  %v2099_v53 = vsel %vm1123_vm2, %v2094_v52, 0  ;;  %v15227_v49 = vld [vmem:[%s18187_s6 + $0x24] ss:$8 sps:$4 sm:$0xff]   ;;  %v15225_v52 = vld [vmem:[%s18187_s6 + $0x20] ss:$8 sps:$4 sm:$0xff]  }
 0xff5   : > { %13959 = vmatpush3.bf16.msra.mxu1 %v2099_v53 }
 0xff6   : > { %13972 = vmatprep.subr.bf16.mxu1 %v15919_v0 }
 0xff7   : > { %v2187_v1 = vpop.permute.xlu1 %2186 }
 0xffe   : > { %v15572_v55 = vpop.eup %15571 }
 0xfff   : > { %v2087_v58 = vsel %vm1107_vm3, %v15572_v55, 0.0 }
0x1000   : > { %2088 = vadd.xlane.f32.xlu0 %v2087_v58 }
0x1016   : > { %2188 = vrot.lane.b32.xlu0 %v16358_v5, %s15923_s14 }
0x108d   : > { %v2089_v59 = vpop.xlane.xlu0 %2088 }
0x108e   : > { %15573 = vrcp.f32 %v2089_v59 }
0x1091   : > { %v2189_v61 = vpop.permute.xlu0 %2188 }
0x1092   : > { %v2194_v63 = vsel %vm1060_vm1, %v2189_v61, 0  ;;  %v15233_v61 = vld [vmem:[%s18187_s6 + $0x44] ss:$8 sps:$4 sm:$0xff]  }
0x1098   : > { %v15574_v6 = vpop.eup %15573 }
0x1099   : > { %v2091_v60 = vmul.f32 %v15574_v6, %v15572_v55  ;;  %v15230_v6 = vld [vmem:[%s18187_s6 + $0x34] ss:$8 sps:$4 sm:$0xff]  }
0x109b   : > { %v2092_v62 = vpack.c.bf16 %v2091_v60, %v2091_v60  ;;  %v15228_v60 = vld [vmem:[%s18187_s6 + $0x30] ss:$8 sps:$4 sm:$0xff]  }
0x109d   : > { %13961 = vmatmul.mubr.msk.bf16.vlgmr.msra.gmra.mrb[60].mxu1 %vm1107_vm3, %v2092_v62  ;;  %v15231_v62 = vld [vmem:[%s18187_s6 + $0x40] ss:$8 sps:$4 sm:$0xff]  }
0x109e   : > { %13973 = vmatpush3.bf16.xpose.msra.mxu1 %v2194_v63  ;;  %13974 = vmatprep.mubr.msk.bf16.mxu1 %vm15920_vm0, %v15919_v0  ;;  %v15236_v63 = vld [vmem:[%s18187_s6 + $0x54] ss:$8 sps:$4 sm:$0xff]  }
0x109f   : > { %13984 = vmatprep.subr.bf16.mxu1 %v15919_v0 }
0x10a5   : > { %13975 = vmatmul.mubr.msk.bf16.vlgmr.msra.gmra.mrb[64].mxu1 %vm1060_vm1, %v2187_v1  ;;  %v15924_v1 = vmov 0  }
0x10a6   : > { %13985 = vmatpush3.bf16.msra.mxu1 %v16370_v17  ;;  %13988 = vmatprep.mubr.msk.bf16.mxu1 %vm15920_vm0, %v15919_v0 }
0x10a7   : > { %13986 = vmatprep.subr.bf16.mxu1 %v15919_v0 }
0x10aa   : > { %13987 = vmatpush3.bf16.msra.mxu1 %v16376_v22 }
0x1170   : > { %v2135_v5 = vpop.f32.mrb[60].mxu1 }
0x1171   : > { %v2141_v3 = vpack.c.bf16 %v2135_v5, %v2135_v5  ;;  %v13962_v4 = vpop.f32.mrb[61].mxu1  ;;  %v15234_v5 = vld [vmem:[%s18187_s6 + $0x50] ss:$8 sps:$4 sm:$0xff]  }
0x1172   : > { %v2138_v8 = vpop.f32.mrb[62].mxu1  ;;  %v15237_v4 = vld [vmem:[%s18187_s6 + $0x60] ss:$8 sps:$4 sm:$0xff]  }
0x1173   : > { %v13963_v10 = vpop.f32.mrb[63].mxu1  ;;  %13969 = vmatmul.mubr.msk.bf16.vlgmr.msra.gmra.mrb[36].mxu0 %vm1060_vm1, %v2141_v3  ;;  %v15239_v3 = vld [vmem:[%s18187_s6 + $0x64] ss:$8 sps:$4 sm:$0xff]   ;;  %v15242_v8 = vld [vmem:[%s18187_s6 + $0x74] ss:$8 sps:$4 sm:$0xff]  }
0x1174   : > { %13980 = vmatprep.mubr.msk.bf16.mxu0 %vm15920_vm0, %v15919_v0  ;;  %v15240_v10 = vld [vmem:[%s18187_s6 + $0x70] ss:$8 sps:$4 sm:$0xff]  }
0x1178   : > { %v2230_v12 = vpop.f32.mrb[64].mxu1 }
0x1179   : > { %v13976_v13 = vpop.f32.mrb[65].mxu1  ;;  %v2236_v17 = vsel %vm1107_vm3, %v2230_v12, -inf }
0x117a   : > { %2237 = vmax.xlane.f32.xlu1 %v2236_v17  ;;  %v2233_v14 = vpop.f32.mrb[66].mxu1  ;;  %v15244_v13 = vld [vmem:[#allocation4] sm:$0xff]   ;;  %v15245_v17 = vld [vmem:[#allocation4 + $0x48] sm:$0xff]  }
0x117b   : > { %v13977_v18 = vpop.f32.mrb[67].mxu1  ;;  %v15246_v14 = vld [vmem:[#allocation4 + $0x8] sm:$0xff]  }
0x117c   : > { %v15247_v18 = vld [vmem:[#allocation4 + $0x50] sm:$0xff]  }
0x118b   : > { %2248 = vrot.lane.b32.xlu1 %v16401_v34, %s15923_s14 }
0x1207   : > { %v2238_v22 = vpop.xlane.xlu1 %2237 }
0x1208   : > { %v2239_v15 = vsub.f32 %v2230_v12, %v2238_v22  ;;  %v15243_v12 = vld [vmem:[#allocation4 + $0x40] sm:$0xff]   ;;  %v15248_v22 = vld [vmem:[#allocation4 + $0x10] sm:$0xff]  }
0x1209   : > { %13220 = vmatprep.subr.bf16.mxu1 %v15243_v12 }
0x120a   : > { %v2240_v19 = vmul.f32 1.442695, %v2239_v15  ;;  %v15249_v15 = vld [vmem:[#allocation4 + $0x58] sm:$0xff]  }
0x120b   : > { %v2249_v20 = vpop.permute.xlu1 %2248 }
0x120c   : > { %15575 = vpow2.f32 %v2240_v19  ;;  %v2254_v21 = vsel %vm1123_vm2, %v2249_v20, 0  ;;  %v15250_v19 = vld [vmem:[#allocation4 + $0x18] sm:$0xff]   ;;  %v15251_v20 = vld [vmem:[#allocation4 + $0x60] sm:$0xff]  }
0x120d   : > { %13979 = vmatpush3.bf16.msra.mxu0 %v2254_v21  ;;  %v15252_v21 = vld [vmem:[#allocation4 + $0x20] sm:$0xff]  }
0x120e   : > { %2530 = vmatprep.subr.bf16.mxu0 %v15221_v57 }
0x1216   : > { %v15576_v24 = vpop.eup %15575 }
0x1217   : > { %v2242_v26 = vsel %vm1107_vm3, %v15576_v24, 0.0 }
0x1218   : > { %2243 = vadd.xlane.f32.xlu0 %v2242_v26 }
0x121c   : > { %2351 = vadd.xlane.f32.xlu0 %v2347_v27 }
0x1246   : > { %v2179_v29 = vpop.f32.mrb[36].mxu0 }
0x1247   : > { %v2185_v34 = vadd.f32 %v2179_v29, %v16449_v40  ;;  %v13970_v11 = vpop.f32.mrb[37].mxu0 }
0x1248   : > { %v2182_v30 = vpop.f32.mrb[38].mxu0 }
0x1249   : > { %v13971_v31 = vpop.f32.mrb[39].mxu0 }
0x124a   : > { %v12605_v31 = vld [vmem:[#allocation6 + $0x1f] ss:$0 sm:$0xff] }
0x12a5   : > { %v2244_v32 = vpop.xlane.xlu0 %2243 }
0x12a6   : > { %15577 = vrcp.f32 %v2244_v32 }
0x12a9   : > { %v2352_v50 = vpop.xlane.xlu0 %2351 }
0x12aa   : > { %v2356_v9 = vmul.f32 0.0078125, %v2352_v50  ;;  %v15255_v50 = vld [vmem:[#allocation4 + $0x70] sm:$0xff]  }
0x12ac   : > { %v16486_v44 = vsub.f32 %v2347_v27, %v2356_v9  ;;  %v15257_v9 = vld [vmem:[#allocation4 + $0x78] sm:$0xff]  }
0x12ae   : > { %v2360_v46 = vmul.f32 %v16486_v44, %v16486_v44 }
0x12b0   : > { %v15578_v33 = vpop.eup %15577 }
0x12b1   : > { %v2246_v35 = vmul.f32 %v15578_v33, %v15576_v24 }
0x12b3   : > { %v2247_v16 = vpack.c.bf16 %v2246_v35, %v2246_v35 }
0x12b5   : > { %13981 = vmatmul.mubr.msk.bf16.vlgmr.msra.gmra.mrb[40].mxu0 %vm1107_vm3, %v2247_v16  ;;  %v12606_v16 = vld [vmem:[#allocation6 + $0x23] ss:$0 sm:$0xff] }
0x12b6   : > { %2531 = vmatpush1.bf16.msra.mxu0 %v15219_v47  ;;  %2562 = vmatprep.mubr.bf16.mxu0 %v15924_v1 }
0x12b7   : > { %2532 = vmatprep.subr.bf16.mxu0 %v15224_v48 }
0x1388   : > { %v2290_v2 = vpop.f32.mrb[40].mxu0 }
0x1389   : > { %v2296_v36 = vpack.c.bf16 %v2290_v2, %v2290_v2  ;;  %v13982_v37 = vpop.f32.mrb[41].mxu0 }
0x138a   : > { %v2293_v38 = vpop.f32.mrb[42].mxu0 }
0x138b   : > { %v13983_v39 = vpop.f32.mrb[43].mxu0  ;;  %13989 = vmatmul.mubr.msk.bf16.vlgmr.msra.gmra.mrb[68].mxu1 %vm1060_vm1, %v2296_v36 }
0x138c   : > { %13221 = vmatpush3.bf16.msra.mxu1 %v15244_v13  ;;  %v15254_v39 = vld [vmem:[#allocation4 + $0x28] sm:$0xff]  }
0x138d   : > { %13222 = vmatprep.subr.bf16.mxu1 %v15245_v17 }
0x1390   : > { %13223 = vmatpush3.bf16.msra.mxu1 %v15246_v14 }
0x1391   : > { %13224 = vmatprep.subr.bf16.mxu1 %v15247_v18 }
0x1394   : > { %13225 = vmatpush3.bf16.msra.mxu1 %v15248_v22  ;;  %v15259_v22 = vld [vmem:[#allocation2 + $0x100] sm:$0xff]  }
0x1395   : > { %13226 = vmatprep.subr.bf16.mxu1 %v15249_v15  ;;  %v15260_v15 = vld [vmem:[#allocation2 + $0x140] sm:$0xff]  }
0x1398   : > { %13227 = vmatpush3.bf16.msra.mxu1 %v15250_v19  ;;  %v15261_v19 = vld [vmem:[#allocation2 + $0x108] sm:$0xff]  }
0x1399   : > { %13228 = vmatprep.subr.bf16.mxu1 %v15251_v20 }
0x139c   : > { %13229 = vmatpush3.bf16.msra.mxu1 %v15252_v21 }
0x145e   : > { %v2334_v7 = vpop.f32.mrb[68].mxu1 }
0x145f   : > { %v2340_v40 = vadd.f32 %v2334_v7, %v2185_v34  ;;  %v13990_v28 = vpop.f32.mrb[69].mxu1  ;;  %v15256_v7 = vld [vmem:[#allocation4 + $0x30] sm:$0xff]  }
0x1460   : > { %v2337_v41 = vpop.f32.mrb[70].mxu1  ;;  %v2440_v28 = vlaneseq }
0x1461   : > { %v13991_v42 = vpop.f32.mrb[71].mxu1  ;;  %v2346_v45 = vadd.f32 %v12604_v23, %v2340_v40  ;;  %v15253_v23 = vld [vmem:[#allocation4 + $0x68] sm:$0xff]   ;;  %v15258_v40 = vld [vmem:[#allocation4 + $0x38] sm:$0xff]  }
0x1462   : > { %13230 = vmatprep.subr.bf16.mxu1 %v15253_v23  ;;  %v2441_v41 = vshrl.u32 %v2440_v28, 7 }
0x1463   : > { %v2348_v43 = vadd.f32 %v2346_v45, %v16231_v51  ;;  %v15222_v51 = vld [vmem:[%s18187_s6 + $0x10] ss:$8 sps:$4 sm:$0xff]   ;;  %13231 = vmatpush3.bf16.msra.mxu1 %v15254_v39 }
0x1464   : > { %2533 = vmatpush1.bf16.msra.mxu0 %v15222_v51  ;;  %13232 = vmatprep.subr.bf16.mxu1 %v15255_v50  ;;  %v16544_v42 = vsub.s32 0, %v2441_v41  ;;  %v2402_v45 = vld [vmem:[#allocation7] ss:$4 sm:$0x3] }
0x1465   : > { %2353 = vadd.xlane.f32.xlu0 %v2348_v43  ;;  %2534 = vmatprep.subr.bf16.mxu0 %v15227_v49  ;;  %v15274_v39 = vld [vmem:[#allocation2 + $0x178] sm:$0xff]  }
0x1467   : > { %13233 = vmatpush3.bf16.msra.mxu1 %v15256_v7 }
0x1468   : > { %2535 = vmatpush1.bf16.msra.mxu0 %v15225_v52  ;;  %13234 = vmatprep.subr.bf16.mxu1 %v15257_v9 }
0x1469   : > { %2362 = vadd.xlane.f32.xlu0 %v2360_v46  ;;  %2536 = vmatprep.subr.bf16.mxu0 %v15230_v6 }
0x146b   : > { %13235 = vmatpush3.bf16.msra.mxu1 %v15258_v40 }
0x146c   : > { %2537 = vmatpush1.bf16.msra.mxu0 %v15228_v60  ;;  %14012 = vmatprep.subr.bf16.mxu1 %v15919_v0 }
0x146d   : > { %2538 = vmatprep.subr.bf16.mxu0 %v15233_v61 }
0x1470   : > { %2539 = vmatpush1.bf16.msra.mxu0 %v15231_v62 }
0x1471   : > { %2540 = vmatprep.subr.bf16.mxu0 %v15236_v63 }
0x1474   : > { %2541 = vmatpush1.bf16.msra.mxu0 %v15234_v5 }
0x1475   : > { %2542 = vmatprep.subr.bf16.mxu0 %v15239_v3  ;;  %v12623_v3 = vld [vmem:[#allocation6 + $0x1b] ss:$0 sm:$0xff] }
0x1478   : > { %2543 = vmatpush1.bf16.msra.mxu0 %v15237_v4 }
0x1479   : > { %2544 = vmatprep.subr.bf16.mxu0 %v15242_v8 }
0x147c   : > { %2545 = vmatpush1.bf16.msra.mxu0 %v15240_v10 }
0x147d   : > { %13992 = vmatprep.subr.bf16.mxu0 %v15919_v0 }
0x14f2   : > { %v2354_v53 = vpop.xlane.xlu0 %2353 }
0x14f3   : > { %v2357_v55 = vmul.f32 0.0078125, %v2354_v53 }
0x14f5   : > { %v2359_v58 = vsub.f32 %v2348_v43, %v2357_v55  ;;  %v16546_v43 = vsub.s32 1, %v2441_v41 }
0x14f6   : > { %v2363_v24 = vpop.xlane.xlu0 %2362 }
0x14f7   : > { %v2361_v59 = vmul.f32 %v2359_v58, %v2359_v58  ;;  %v2366_v25 = vmul.f32 0.0078125, %v2363_v24  ;;  %v2447_v46 = vrot.slane %v2402_v45, %v16546_v43 }
0x14f9   : > { %2364 = vadd.xlane.f32.xlu1 %v2361_v59  ;;  %v2368_v26 = vadd.f32 1e-05, %v2366_v25 }
0x14fb   : > { %15579 = vrsqrt.f32 %v2368_v26 }
0x1505   : > { %v15580_v11 = vpop.eup %15579 }
0x1506   : > { %v2372_v30 = vmul.f32 %v15580_v11, %v16486_v44  ;;  %v2443_v44 = vrot.slane %v2402_v45, %v16544_v42  ;;  %v15263_v11 = vld [vmem:[#allocation2 + $0x110] sm:$0xff]  }
0x1508   : > { %v2378_v35 = vmul.f32 %v12605_v31, %v2372_v30  ;;  %v15264_v30 = vld [vmem:[#allocation2 + $0x150] sm:$0xff]  }
0x150a   : > { %v2384_v36 = vadd.f32 %v12606_v16, %v2378_v35  ;;  %v15268_v35 = vld [vmem:[#allocation2 + $0x160] sm:$0xff]  }
0x1586   : > { %v2365_v27 = vpop.xlane.xlu1 %2364 }
0x1587   : > { %v2367_v29 = vmul.f32 0.0078125, %v2365_v27 }
0x1589   : > { %v2369_v34 = vadd.f32 1e-05, %v2367_v29 }
0x158b   : > { %15581 = vrsqrt.f32 %v2369_v34  ;;  %v15262_v34 = vld [vmem:[#allocation2 + $0x148] sm:$0xff]  }
0x1595   : > { %v15582_v32 = vpop.eup %15581 }
0x1596   : > { %v2373_v33 = vmul.f32 %v15582_v32, %v2359_v58  ;;  %v15266_v32 = vld [vmem:[#allocation2 + $0x158] sm:$0xff]  }
0x1598   : > { %v2379_v2 = vmul.f32 %v12605_v31, %v2373_v33  ;;  %v15265_v31 = vld [vmem:[#allocation2 + $0x118] sm:$0xff]   ;;  %v15267_v33 = vld [vmem:[#allocation2 + $0x120] sm:$0xff]  }
0x159a   : > { %v2385_v37 = vadd.f32 %v12606_v16, %v2379_v2  ;;  %v15269_v16 = vld [vmem:[#allocation2 + $0x128] sm:$0xff]  }
0x159b   : > { %v15270_v2 = vld [vmem:[#allocation2 + $0x168] sm:$0xff]  }
0x159c   : > { %v2438_v38 = vpack.c.bf16 %v2385_v37, %v2384_v36 }
0x159e   : > { %2563 = vmatmul.mubr.bf16.vlgmr.msra.gmra.mrb[44].mxu0 %v2438_v38  ;;  %v15273_v38 = vld [vmem:[#allocation2 + $0x138] sm:$0xff]  }
0x159f   : > { %14008 = vmatprep.mubr.msk.bf16.mxu0 %vm15920_vm0, %v15919_v0  ;;  %13993 = vmatpush3.bf16.msra.mxu0 %v15259_v22 }
0x15a0   : > { %13994 = vmatprep.subr.bf16.mxu0 %v15919_v0 }
0x15a3   : > { %13995 = vmatpush3.bf16.msra.mxu0 %v15261_v19 }
0x15a4   : > { %13996 = vmatprep.subr.bf16.mxu0 %v15919_v0 }
0x15a7   : > { %13997 = vmatpush3.bf16.msra.mxu0 %v15263_v11 }
0x15a8   : > { %13998 = vmatprep.subr.bf16.mxu0 %v15919_v0 }
0x15ab   : > { %13999 = vmatpush3.bf16.msra.mxu0 %v15265_v31 }
0x15ac   : > { %14000 = vmatprep.subr.bf16.mxu0 %v15919_v0 }
0x15af   : > { %14001 = vmatpush3.bf16.msra.mxu0 %v15267_v33 }
0x15b0   : > { %14002 = vmatprep.subr.bf16.mxu0 %v15919_v0 }
0x15b3   : > { %14003 = vmatpush3.bf16.msra.mxu0 %v15269_v16 }
0x15b4   : > { %14004 = vmatprep.subr.bf16.mxu0 %v15919_v0 }
0x1671   : > { %v2564_v47 = vpop.f32.mrb[44].mxu0 }
0x1672   : > { %v2565_v57 = vadd.f32 %v2564_v47, %v2443_v44  ;;  %v2566_v48 = vpop.f32.mrb[45].mxu0 }
0x1673   : > { %v2567_v51 = vadd.f32 %v2566_v48, %v2447_v46  ;;  %v2568_v49 = vpop.f32.mrb[46].mxu0 }
0x1674   : > { %v2569_v52 = vadd.f32 %v2568_v49, %v2443_v44  ;;  %v2570_v53 = vpop.f32.mrb[47].mxu0  ;;  %v2573_v58 = vmax.f32 %v2565_v57, 0.0 }
0x1675   : > { %v2571_v55 = vadd.f32 %v2570_v53, %v2447_v46  ;;  %v2574_v6 = vmax.f32 %v2567_v51, 0.0  ;;  %v12640_v46 = vld [vmem:[#allocation6 + $0x20] ss:$0 sm:$0xff]  ;;  %v12641_v51 = vld [vmem:[#allocation6 + $0x24] ss:$0 sm:$0xff] }
0x1676   : > { %v2575_v59 = vmax.f32 %v2569_v52, 0.0 }
0x1677   : > { %v2576_v60 = vmax.f32 %v2571_v55, 0.0  ;;  %v15275_v55 = vld [vmem:[#allocation2 + $0x180] sm:$0xff]  }
0x1678   : > { %v2577_v61 = vpack.c.bf16 %v2575_v59, %v2573_v58  ;;  %v15276_v59 = vld [vmem:[#allocation2 + $0x188] sm:$0xff]  }
0x1679   : > { %v2578_v62 = vpack.c.bf16 %v2576_v60, %v2574_v6  ;;  %v15277_v6 = vld [vmem:[#allocation2 + $0x190] sm:$0xff]   ;;  %v15278_v60 = vld [vmem:[#allocation2 + $0x198] sm:$0xff]  }
0x167b   : > { %2711 = vmatprep.mubr.bf16.mxu1 %v2578_v62  ;;  %v15280_v62 = vld [vmem:[#allocation2 + $0x1a8] sm:$0xff]  }
0x167c   : > { %2712 = vmatmul.mubr.bf16.vlgmr.msra.gmra.mrb[72].mxu1 %v2577_v61  ;;  %v15279_v61 = vld [vmem:[#allocation2 + $0x1a0] sm:$0xff]  }
0x167d   : > { %14028 = vmatprep.mubr.msk.bf16.mxu1 %vm15920_vm0, %v15919_v0  ;;  %14013 = vmatpush3.bf16.msra.mxu1 %v15260_v15 }
0x167e   : > { %14014 = vmatprep.subr.bf16.mxu1 %v15919_v0 }
0x1681   : > { %14015 = vmatpush3.bf16.msra.mxu1 %v15262_v34 }
0x1682   : > { %14016 = vmatprep.subr.bf16.mxu1 %v15919_v0 }
0x1685   : > { %14017 = vmatpush3.bf16.msra.mxu1 %v15264_v30 }
0x1686   : > { %14018 = vmatprep.subr.bf16.mxu1 %v15919_v0 }
0x1689   : > { %14019 = vmatpush3.bf16.msra.mxu1 %v15266_v32 }
0x168a   : > { %14020 = vmatprep.subr.bf16.mxu1 %v15919_v0 }
0x168d   : > { %14021 = vmatpush3.bf16.msra.mxu1 %v15268_v35 }
0x168e   : > { %14022 = vmatprep.subr.bf16.mxu1 %v15919_v0 }
0x1691   : > { %14023 = vmatpush3.bf16.msra.mxu1 %v15270_v2 }
0x1692   : > { %14024 = vmatprep.subr.bf16.mxu1 %v15919_v0 }
0x174f   : > { %v13236_v63 = vpop.f32.mrb[72].mxu1 }
0x1750   : > { %v13237_v5 = vpop.f32.mrb[73].mxu1 }
0x1751   : > { %v13238_v4 = vadd.f32 %v13237_v5, %v13236_v63  ;;  %v13239_v8 = vpop.f32.mrb[74].mxu1  ;;  %v15281_v63 = vld [vmem:[#allocation2 + $0x1b0] sm:$0xff]   ;;  %v15282_v5 = vld [vmem:[#allocation2 + $0x1b8] sm:$0xff]  }
0x1752   : > { %v13240_v10 = vpop.f32.mrb[75].mxu1 }
0x1753   : > { %v13241_v12 = vadd.f32 %v13240_v10, %v13239_v8  ;;  %v2714_v13 = vadd.f32 %v13238_v4, %v12623_v3  ;;  %v12651_v8 = vld [vmem:[#allocation6 + $0x8] ss:$0 sm:$0xff] }
0x1755   : > { %v2720_v17 = vadd.f32 %v2714_v13, %v2384_v36  ;;  %v2717_v14 = vadd.f32 %v13241_v12, %v12623_v3  ;;  %v15271_v36 = vld [vmem:[#allocation2 + $0x130] sm:$0xff]   ;;  %v12642_v3 = vld [vmem:[#allocation6 + $0x7] ss:$0 sm:$0xff] }
0x1756   : > { %14005 = vmatpush3.bf16.msra.mxu0 %v15271_v36 }
0x1757   : > { %2722 = vadd.xlane.f32.xlu0 %v2720_v17  ;;  %v2721_v18 = vadd.f32 %v2717_v14, %v2385_v37  ;;  %v15272_v37 = vld [vmem:[#allocation2 + $0x170] sm:$0xff]   ;;  %14006 = vmatprep.subr.bf16.mxu0 %v15919_v0 }
0x1758   : > { %14025 = vmatpush3.bf16.msra.mxu1 %v15272_v37 }
0x1759   : > { %14026 = vmatprep.subr.bf16.mxu1 %v15919_v0 }
0x175a   : > { %14007 = vmatpush3.bf16.msra.mxu0 %v15273_v38 }
0x175b   : > { %2724 = vadd.xlane.f32.xlu0 %v2721_v18  ;;  %14032 = vmatprep.subr.bf16.mxu0 %v15919_v0 }
0x175c   : > { %14027 = vmatpush3.bf16.msra.mxu1 %v15274_v39 }
0x175d   : > { %14052 = vmatprep.subr.bf16.mxu1 %v15919_v0 }
0x17e4   : > { %v2723_v20 = vpop.xlane.xlu0 %2722 }
0x17e5   : > { %v2726_v21 = vmul.f32 0.0078125, %v2723_v20 }
0x17e7   : > { %v2728_v23 = vsub.f32 %v2720_v17, %v2726_v21 }
0x17e8   : > { %v2725_v24 = vpop.xlane.xlu0 %2724 }
0x17e9   : > { %v2727_v25 = vmul.f32 0.0078125, %v2725_v24  ;;  %v2730_v26 = vmul.f32 %v2728_v23, %v2728_v23 }
0x17eb   : > { %2732 = vadd.xlane.f32.xlu0 %v2730_v26  ;;  %v2729_v27 = vsub.f32 %v2721_v18, %v2727_v25 }
0x17ed   : > { %v2731_v29 = vmul.f32 %v2729_v27, %v2729_v27 }
0x17ef   : > { %2734 = vadd.xlane.f32.xlu0 %v2731_v29  ;;  %v12660_v29 = vld [vmem:[#allocation6 + $0x9] ss:$0 sm:$0xff] }
0x1878   : > { %v2733_v50 = vpop.xlane.xlu0 %2732 }
0x1879   : > { %v2736_v7 = vmul.f32 0.0078125, %v2733_v50 }
0x187b   : > { %v2738_v9 = vadd.f32 1e-05, %v2736_v7 }
0x187c   : > { %v2735_v40 = vpop.xlane.xlu0 %2734 }
0x187d   : > { %15583 = vrsqrt.f32 %v2738_v9  ;;  %v2737_v28 = vmul.f32 0.0078125, %v2735_v40 }
0x187f   : > { %v2739_v41 = vadd.f32 1e-05, %v2737_v28 }
0x1881   : > { %15585 = vrsqrt.f32 %v2739_v41 }
0x1887   : > { %v15584_v45 = vpop.eup %15583 }
0x1888   : > { %v2742_v44 = vmul.f32 %v15584_v45, %v2728_v23 }
0x188a   : > { %v2748_v48 = vmul.f32 %v12640_v46, %v2742_v44 }
0x188b   : > { %v15586_v47 = vpop.eup %15585 }
0x188c   : > { %v2743_v57 = vmul.f32 %v15586_v47, %v2729_v27  ;;  %v16568_v52 = vadd.f32 %v12641_v51, %v2748_v48 }
0x188e   : > { %v2749_v49 = vmul.f32 %v12640_v46, %v2743_v57 }
0x1890   : > { %v16570_v53 = vadd.f32 %v12641_v51, %v2749_v49 }
0x1892   : > { %v2760_v58 = vpack.c.bf16 %v16570_v53, %v16568_v52 }
0x1894   : > { %14009 = vmatmul.mubr.bf16.vlgmr.msra.gmra.mrb[48].mxu0 %v2760_v58  ;;  %14029 = vmatmul.mubr.bf16.vlgmr.msra.gmra.mrb[76].mxu1 %v2760_v58 }
0x1895   : > { %14033 = vmatpush3.bf16.msra.mxu0 %v15275_v55  ;;  %14048 = vmatprep.mubr.msk.bf16.mxu0 %vm15920_vm0, %v15919_v0 }
0x1896   : > { %14034 = vmatprep.subr.bf16.mxu0 %v15919_v0  ;;  %14054 = vmatprep.mubr.msk.bf16.mxu1 %vm15920_vm0, %v15919_v0 }
0x1899   : > { %14035 = vmatpush3.bf16.msra.mxu0 %v15276_v59 }
0x189a   : > { %14036 = vmatprep.subr.bf16.mxu0 %v15919_v0 }
0x189d   : > { %14037 = vmatpush3.bf16.msra.mxu0 %v15277_v6 }
0x189e   : > { %14038 = vmatprep.subr.bf16.mxu0 %v15919_v0 }
0x18a1   : > { %14039 = vmatpush3.bf16.msra.mxu0 %v15278_v60 }
0x18a2   : > { %14040 = vmatprep.subr.bf16.mxu0 %v15919_v0 }
0x18a5   : > { %14041 = vmatpush3.bf16.msra.mxu0 %v15279_v61 }
0x18a6   : > { %14042 = vmatprep.subr.bf16.mxu0 %v15919_v0 }
0x18a9   : > { %14043 = vmatpush3.bf16.msra.mxu0 %v15280_v62 }
0x18aa   : > { %14044 = vmatprep.subr.bf16.mxu0 %v15919_v0 }
0x18ad   : > { %14045 = vmatpush3.bf16.msra.mxu0 %v15281_v63 }
0x18ae   : > { %14046 = vmatprep.subr.bf16.mxu0 %v15919_v0 }
0x18b1   : > { %14047 = vmatpush3.bf16.msra.mxu0 %v15282_v5 }
0x18b2   : > { %14076 = vmatprep.subr.bf16.mxu0 %v15919_v0 }
0x18b4   : > { %14049 = vmatmul.mubr.bf16.vlgmr.msra.gmra.mrb[52].mxu0 %v2760_v58 }
0x18b5   : > { %14080 = vmatprep.mubr.msk.bf16.mxu0 %vm15920_vm0, %v15919_v0 }
0x1967   : > { %v2864_v4 = vpop.f32.mrb[48].mxu0  ;;  %v2974_v10 = vpop.f32.mrb[76].mxu1 }
0x1968   : > { %v2865_v12 = vadd.f32 %v12642_v3, %v2864_v4  ;;  %v14010_v13 = vpop.f32.mrb[49].mxu0  ;;  %v14030_v17 = vpop.f32.mrb[77].mxu1  ;;  %v2975_v22 = vadd.f32 %v12651_v8, %v2974_v10 }
0x1969   : > { %v2867_v14 = vpop.f32.mrb[50].mxu0  ;;  %v2977_v18 = vpop.f32.mrb[78].mxu1  ;;  %v16628_v13 = vld [vmem:[#allocation2 + $0x1d0] sm:$0xff]   ;;  %v16631_v17 = vld [vmem:[#allocation2 + $0x1d8] sm:$0xff]  }
0x196a   : > { %v2868_v15 = vadd.f32 %v12642_v3, %v2867_v14  ;;  %v2978_v19 = vadd.f32 %v12651_v8, %v2977_v18  ;;  %v14011_v20 = vpop.f32.mrb[51].mxu0  ;;  %v14031_v21 = vpop.f32.mrb[79].mxu1  ;;  %v3091_v23 = vmul.f32 0.17677669, %v2865_v12  ;;  %14077 = vmatpush3.bf16.msra.mxu0 %v16628_v13 }
0x196b   : > { %14078 = vmatprep.subr.bf16.mxu0 %v15919_v0  ;;  %v16640_v20 = vld [vmem:[#allocation2 + $0x1c8] sm:$0xff]  }
0x196c   : > { %v3092_v24 = vmul.f32 0.17677669, %v2868_v15  ;;  %v16588_v25 = vpack.c.bf16 %v2978_v19, %v2975_v22  ;;  %v16636_v15 = vld [vmem:[#allocation2 + $0x1c0] sm:$0xff]  }
0x196e   : > { %v16590_v26 = vpack.c.bf16 %v3092_v24, %v3091_v23  ;;  %v3117_v27 = vsel %vm1060_vm1, %v16588_v25, 0  ;;  %14079 = vmatpush3.bf16.msra.mxu0 %v16631_v17 }
0x196f   : > { %14053 = vmatpush3.bf16.xpose.msra.mxu1 %v3117_v27  ;;  %14092 = vmatprep.subr.bf16.mxu0 %v15919_v0 }
0x1970   : > { %3219 = vrot.lane.b32.xlu1 %v16590_v26, %s15921_s18  ;;  %14058 = vmatprep.subr.bf16.mxu1 %v15919_v0 }
0x1976   : > { %14055 = vmatmul.mubr.msk.bf16.vlgmr.msra.gmra.mrb[80].mxu1 %vm1060_vm1, %v16590_v26 }
0x1977   : > { %14060 = vmatprep.mubr.msk.bf16.mxu1 %vm15920_vm0, %v15919_v0 }
0x1987   : > { %v3084_v34 = vpop.f32.mrb[52].mxu0 }
0x1988   : > { %v14050_v11 = vpop.f32.mrb[53].mxu0  ;;  %v3085_v31 = vadd.f32 %v12660_v29, %v3084_v34 }
0x1989   : > { %v3087_v30 = vpop.f32.mrb[54].mxu0 }
0x198a   : > { %v3088_v32 = vadd.f32 %v12660_v29, %v3087_v30  ;;  %v14051_v33 = vpop.f32.mrb[55].mxu0 }
0x198c   : > { %v16601_v35 = vpack.c.bf16 %v3088_v32, %v3085_v31 }
0x198e   : > { %v3175_v16 = vsel %vm1123_vm2, %v16601_v35, 0 }
0x198f   : > { %14059 = vmatpush3.bf16.msra.mxu1 %v3175_v16 }
0x1990   : > { %14064 = vmatprep.subr.bf16.mxu1 %v15919_v0 }
0x19e2   : > { %v3220_v48 = vpop.permute.xlu1 %3219 }
0x1a49   : > { %v3153_v2 = vpop.f32.mrb[80].mxu1 }
0x1a4a   : > { %v14056_v36 = vpop.f32.mrb[81].mxu1  ;;  %v3159_v37 = vsel %vm1107_vm3, %v3153_v2, -inf }
0x1a4b   : > { %3160 = vmax.xlane.f32.xlu0 %v3159_v37  ;;  %v3156_v38 = vpop.f32.mrb[82].mxu1 }
0x1a4c   : > { %v14057_v39 = vpop.f32.mrb[83].mxu1 }
0x1ad8   : > { %v3161_v50 = vpop.xlane.xlu0 %3160 }
0x1ad9   : > { %v3162_v7 = vsub.f32 %v3153_v2, %v3161_v50 }
0x1adb   : > { %v3163_v9 = vmul.f32 1.442695, %v3162_v7 }
0x1add   : > { %15587 = vpow2.f32 %v3163_v9 }
0x1ae7   : > { %v15588_v40 = vpop.eup %15587 }
0x1ae8   : > { %v3165_v28 = vsel %vm1107_vm3, %v15588_v40, 0.0 }
0x1ae9   : > { %3166 = vadd.xlane.f32.xlu0 %v3165_v28 }
0x1aff   : > { %3222 = vrot.lane.b32.xlu0 %v16588_v25, %s15921_s18 }
0x1b76   : > { %v3167_v41 = vpop.xlane.xlu0 %3166 }
0x1b77   : > { %15589 = vrcp.f32 %v3167_v41 }
0x1b7a   : > { %v3223_v46 = vpop.permute.xlu0 %3222 }
0x1b7b   : > { %v3228_v57 = vsel %vm1060_vm1, %v3223_v46, 0 }
0x1b81   : > { %v15590_v45 = vpop.eup %15589 }
0x1b82   : > { %v3169_v44 = vmul.f32 %v15590_v45, %v15588_v40 }
0x1b84   : > { %v3170_v47 = vpack.c.bf16 %v3169_v44, %v3169_v44 }
0x1b86   : > { %14061 = vmatmul.mubr.msk.bf16.vlgmr.msra.gmra.mrb[84].mxu1 %vm1107_vm3, %v3170_v47 }
0x1b87   : > { %14065 = vmatpush3.bf16.xpose.msra.mxu1 %v3228_v57  ;;  %14066 = vmatprep.mubr.msk.bf16.mxu1 %vm15920_vm0, %v15919_v0 }
0x1b88   : > { %14070 = vmatprep.subr.bf16.mxu1 %v15919_v0 }
0x1b8e   : > { %14067 = vmatmul.mubr.msk.bf16.vlgmr.msra.gmra.mrb[88].mxu1 %vm1060_vm1, %v3220_v48  ;;  %v16668_v48 = vld [vmem:[#allocation2 + $0x1e0] sm:$0xff]  }
0x1b8f   : > { %14072 = vmatprep.mubr.msk.bf16.mxu1 %vm15920_vm0, %v15919_v0 }
0x1c59   : > { %v3211_v51 = vpop.f32.mrb[84].mxu1 }
0x1c5a   : > { %v14062_v49 = vpop.f32.mrb[85].mxu1  ;;  %v3217_v21 = vpack.c.bf16 %v3211_v51, %v3211_v51 }
0x1c5b   : > { %v3214_v55 = vpop.f32.mrb[86].mxu1 }
0x1c5c   : > { %v14063_v58 = vpop.f32.mrb[87].mxu1 }
0x1c61   : > { %v3264_v59 = vpop.f32.mrb[88].mxu1 }
0x1c62   : > { %v14068_v6 = vpop.f32.mrb[89].mxu1  ;;  %v3270_v60 = vsel %vm1107_vm3, %v3264_v59, -inf }
0x1c63   : > { %3271 = vmax.xlane.f32.xlu0 %v3270_v60  ;;  %v3267_v61 = vpop.f32.mrb[90].mxu1 }
0x1c64   : > { %v14069_v62 = vpop.f32.mrb[91].mxu1 }
0x1c79   : > { %3283 = vrot.lane.b32.xlu0 %v16601_v35, %s15921_s18 }
0x1c7d   : > { %3442 = vrot.lane.b32.xlu0 %v16590_v26, %s15922_s12 }
0x1cf0   : > { %v3272_v63 = vpop.xlane.xlu0 %3271 }
0x1cf1   : > { %v3273_v5 = vsub.f32 %v3264_v59, %v3272_v63  ;;  %v16682_v63 = vld [vmem:[#allocation2 + $0x1e8] sm:$0xff]  }
0x1cf3   : > { %v3274_v3 = vmul.f32 1.442695, %v3273_v5 }
0x1cf4   : > { %v3284_v4 = vpop.permute.xlu0 %3283 }
0x1cf5   : > { %15591 = vpow2.f32 %v3274_v3  ;;  %v3289_v8 = vsel %vm1123_vm2, %v3284_v4, 0 }
0x1cf6   : > { %14071 = vmatpush3.bf16.msra.mxu1 %v3289_v8 }
0x1cf7   : > { %14084 = vmatprep.subr.bf16.mxu1 %v15919_v0 }
0x1cf8   : > { %v3443_v33 = vpop.permute.xlu0 %3442 }
0x1cff   : > { %v15592_v10 = vpop.eup %15591 }
0x1d00   : > { %v3276_v12 = vsel %vm1107_vm3, %v15592_v10, 0.0 }
0x1d01   : > { %3277 = vadd.xlane.f32.xlu1 %v3276_v12 }
0x1d12   : > { %3444 = vrot.lane.b32.xlu1 %v16588_v25, %s15922_s12 }
0x1d8e   : > { %v3278_v14 = vpop.xlane.xlu1 %3277 }
0x1d8f   : > { %15593 = vrcp.f32 %v3278_v14 }
0x1d92   : > { %v3445_v23 = vpop.permute.xlu1 %3444 }
0x1d93   : > { %v3450_v11 = vsel %vm1060_vm1, %v3445_v23, 0 }
0x1d99   : > { %v15594_v18 = vpop.eup %15593 }
0x1d9a   : > { %v3280_v22 = vmul.f32 %v15594_v18, %v15592_v10 }
0x1d9c   : > { %v3281_v19 = vpack.c.bf16 %v3280_v22, %v3280_v22 }
0x1d9e   : > { %14073 = vmatmul.mubr.msk.bf16.vlgmr.msra.gmra.mrb[92].mxu1 %vm1107_vm3, %v3281_v19 }
0x1d9f   : > { %14085 = vmatpush3.bf16.msra.mxu1 %v16636_v15  ;;  %14088 = vmatprep.mubr.msk.bf16.mxu1 %vm15920_vm0, %v15919_v0 }
0x1da0   : > { %14086 = vmatprep.subr.bf16.mxu1 %v15919_v0 }
0x1da3   : > { %14087 = vmatpush3.bf16.msra.mxu1 %v16640_v20 }
0x1da4   : > { %14098 = vmatprep.subr.bf16.mxu1 %v15919_v0 }
0x1da6   : > { %14089 = vmatmul.mubr.msk.bf16.vlgmr.msra.gmra.mrb[96].mxu1 %vm1060_vm1, %v3217_v21  ;;  %v16693_v21 = vrot.slane %v16590_v26, 4 }
0x1da7   : > { %14100 = vmatprep.mubr.msk.bf16.mxu1 %vm15920_vm0, %v15919_v0 }
0x1e71   : > { %v3325_v24 = vpop.f32.mrb[92].mxu1 }
0x1e72   : > { %v3331_v27 = vpack.c.bf16 %v3325_v24, %v3325_v24  ;;  %v14074_v29 = vpop.f32.mrb[93].mxu1 }
0x1e73   : > { %v3328_v34 = vpop.f32.mrb[94].mxu1 }
0x1e74   : > { %v14075_v30 = vpop.f32.mrb[95].mxu1  ;;  %14081 = vmatmul.mubr.msk.bf16.vlgmr.msra.gmra.mrb[56].mxu0 %vm1060_vm1, %v3331_v27 }
0x1e75   : > { %14093 = vmatpush3.bf16.xpose.msra.mxu0 %v3450_v11  ;;  %14094 = vmatprep.mubr.msk.bf16.mxu0 %vm15920_vm0, %v15919_v0 }
0x1e76   : > { %14104 = vmatprep.subr.bf16.mxu0 %v15919_v0 }
0x1e79   : > { %v3436_v31 = vpop.f32.mrb[96].mxu1 }
0x1e7a   : > { %v14090_v32 = vpop.f32.mrb[97].mxu1 }
0x1e7b   : > { %v3439_v16 = vpop.f32.mrb[98].mxu1 }
0x1e7c   : > { %v14091_v2 = vpop.f32.mrb[99].mxu1  ;;  %14095 = vmatmul.mubr.msk.bf16.vlgmr.msra.gmra.mrb[60].mxu0 %vm1060_vm1, %v3443_v33 }
0x1e7d   : > { %14108 = vmatprep.mubr.msk.bf16.mxu0 %vm15920_vm0, %v15919_v0  ;;  %14105 = vmatpush3.bf16.msra.mxu0 %v16668_v48  ;;  %v16711_v2 = vld [vmem:[#allocation2 + $0x1f8] sm:$0xff]  }
0x1e7e   : > { %14106 = vmatprep.subr.bf16.mxu0 %v15919_v0 }
0x1e81   : > { %14107 = vmatpush3.bf16.msra.mxu0 %v16682_v63 }
0x1e82   : > { %14118 = vmatprep.subr.bf16.mxu0 %v15919_v0 }
0x1f47   : > { %v3381_v36 = vpop.f32.mrb[56].mxu0 }
0x1f48   : > { %v16658_v37 = vadd.f32 %v3436_v31, %v3381_v36  ;;  %v14082_v38 = vpop.f32.mrb[57].mxu0  ;;  %v16705_v31 = vld [vmem:[#allocation2 + $0x1f0] sm:$0xff]  }
0x1f49   : > { %v3384_v39 = vpop.f32.mrb[58].mxu0 }
0x1f4a   : > { %v14083_v50 = vpop.f32.mrb[59].mxu0 }
0x1f4f   : > { %v3486_v7 = vpop.f32.mrb[60].mxu0 }
0x1f50   : > { %v14096_v9 = vpop.f32.mrb[61].mxu0  ;;  %v3492_v40 = vsel %vm1107_vm3, %v3486_v7, -inf }
0x1f51   : > { %3493 = vmax.xlane.f32.xlu1 %v3492_v40  ;;  %v3489_v28 = vpop.f32.mrb[62].mxu0 }
0x1f52   : > { %v14097_v41 = vpop.f32.mrb[63].mxu0 }
0x1f53   : > { %v16736_v41 = vrot.slane %v16601_v35, 4 }
0x1f62   : > { %3611 = vrot.lane.b32.xlu1 %v16588_v25, %s15923_s14 }
0x1f66   : > { %3609 = vrot.lane.b32.xlu1 %v16590_v26, %s15923_s14  ;;  %v16701_v26 = vrot.slane %v16588_v25, 4 }
0x1fde   : > { %v3494_v45 = vpop.xlane.xlu1 %3493 }
0x1fdf   : > { %v3495_v44 = vsub.f32 %v3486_v7, %v3494_v45 }
0x1fe1   : > { %v3496_v46 = vmul.f32 1.442695, %v3495_v44 }
0x1fe2   : > { %v3612_v6 = vpop.permute.xlu1 %3611 }
0x1fe3   : > { %15595 = vpow2.f32 %v3496_v46  ;;  %v3617_v61 = vsel %vm1060_vm1, %v3612_v6, 0 }
0x1fe6   : > { %v3610_v62 = vpop.permute.xlu1 %3609 }
0x1fed   : > { %v15596_v47 = vpop.eup %15595 }
0x1fee   : > { %v3498_v57 = vsel %vm1107_vm3, %v15596_v47, 0.0 }
0x1fef   : > { %3499 = vadd.xlane.f32.xlu0 %v3498_v57 }
0x2005   : > { %3504 = vrot.lane.b32.xlu0 %v16601_v35, %s15922_s12 }
0x207c   : > { %v3500_v51 = vpop.xlane.xlu0 %3499 }
0x207d   : > { %15597 = vrcp.f32 %v3500_v51 }
0x2080   : > { %v3505_v49 = vpop.permute.xlu0 %3504 }
0x2081   : > { %v3510_v55 = vsel %vm1123_vm2, %v3505_v49, 0 }
0x2082   : > { %14099 = vmatpush3.bf16.msra.mxu1 %v3510_v55 }
0x2083   : > { %14112 = vmatprep.subr.bf16.mxu1 %v15919_v0 }
0x2087   : > { %v15598_v58 = vpop.eup %15597 }
0x2088   : > { %v3502_v59 = vmul.f32 %v15598_v58, %v15596_v47 }
0x208a   : > { %v3503_v60 = vpack.c.bf16 %v3502_v59, %v3502_v59 }
0x208c   : > { %14101 = vmatmul.mubr.msk.bf16.vlgmr.msra.gmra.mrb[100].mxu1 %vm1107_vm3, %v3503_v60 }
0x208d   : > { %14113 = vmatpush3.bf16.xpose.msra.mxu1 %v3617_v61  ;;  %14114 = vmatprep.mubr.msk.bf16.mxu1 %vm15920_vm0, %v15919_v0 }
0x208e   : > { %14124 = vmatprep.subr.bf16.mxu1 %v15919_v0 }
0x2094   : > { %14115 = vmatmul.mubr.msk.bf16.vlgmr.msra.gmra.mrb[104].mxu1 %vm1060_vm1, %v3610_v62 }
0x2095   : > { %14128 = vmatprep.mubr.msk.bf16.mxu1 %vm15920_vm0, %v15919_v0  ;;  %14125 = vmatpush3.bf16.msra.mxu1 %v16705_v31 }
0x2096   : > { %14126 = vmatprep.subr.bf16.mxu1 %v15919_v0 }
0x2099   : > { %14127 = vmatpush3.bf16.msra.mxu1 %v16711_v2 }
0x209a   : > { %14138 = vmatprep.subr.bf16.mxu1 %v15919_v0 }
0x215f   : > { %v3546_v5 = vpop.f32.mrb[100].mxu1 }
0x2160   : > { %v3552_v3 = vpack.c.bf16 %v3546_v5, %v3546_v5  ;;  %v14102_v4 = vpop.f32.mrb[101].mxu1 }
0x2161   : > { %v3549_v8 = vpop.f32.mrb[102].mxu1 }
0x2162   : > { %v14103_v10 = vpop.f32.mrb[103].mxu1  ;;  %14109 = vmatmul.mubr.msk.bf16.vlgmr.msra.gmra.mrb[64].mxu0 %vm1060_vm1, %v3552_v3 }
0x2163   : > { %14120 = vmatprep.mubr.msk.bf16.mxu0 %vm15920_vm0, %v15919_v0 }
0x2167   : > { %v3653_v12 = vpop.f32.mrb[104].mxu1 }
0x2168   : > { %v14116_v14 = vpop.f32.mrb[105].mxu1  ;;  %v3659_v18 = vsel %vm1107_vm3, %v3653_v12, -inf }
0x2169   : > { %3660 = vmax.xlane.f32.xlu0 %v3659_v18  ;;  %v3656_v22 = vpop.f32.mrb[106].mxu1 }
0x216a   : > { %v14117_v19 = vpop.f32.mrb[107].mxu1 }
0x217f   : > { %3671 = vrot.lane.b32.xlu0 %v16601_v35, %s15923_s14 }
0x2183   : > { %3884 = vrot.lane.b32.xlu0 %v16693_v21, %s15921_s18 }
0x21f6   : > { %v3661_v23 = vpop.xlane.xlu0 %3660 }
0x21f7   : > { %v3662_v24 = vsub.f32 %v3653_v12, %v3661_v23 }
0x21f9   : > { %v3663_v27 = vmul.f32 1.442695, %v3662_v24 }
0x21fa   : > { %v3672_v29 = vpop.permute.xlu0 %3671 }
0x21fb   : > { %15599 = vpow2.f32 %v3663_v27  ;;  %v3677_v34 = vsel %vm1123_vm2, %v3672_v29, 0 }
0x21fc   : > { %14119 = vmatpush3.bf16.msra.mxu0 %v3677_v34 }
0x21fd   : > { %14132 = vmatprep.subr.bf16.mxu0 %v15919_v0 }
0x21fe   : > { %v3885_v28 = vpop.permute.xlu0 %3884 }
0x2205   : > { %v15600_v11 = vpop.eup %15599 }
0x2206   : > { %v3665_v30 = vsel %vm1107_vm3, %v15600_v11, 0.0 }
0x2207   : > { %3666 = vadd.xlane.f32.xlu1 %v3665_v30 }
0x2218   : > { %3886 = vrot.lane.b32.xlu1 %v16701_v26, %s15921_s18 }
0x2235   : > { %v3602_v32 = vpop.f32.mrb[64].mxu0 }
0x2236   : > { %v16708_v33 = vadd.f32 %v3602_v32, %v16658_v37  ;;  %v14110_v16 = vpop.f32.mrb[65].mxu0  ;;  %v3782_v37 = vsel %vm1060_vm1, %v16701_v26, 0 }
0x2237   : > { %v3605_v36 = vpop.f32.mrb[66].mxu0 }
0x2238   : > { %v14111_v38 = vpop.f32.mrb[67].mxu0 }
0x2294   : > { %v3667_v25 = vpop.xlane.xlu1 %3666 }
0x2295   : > { %15601 = vrcp.f32 %v3667_v25 }
0x2298   : > { %v3887_v9 = vpop.permute.xlu1 %3886 }
0x2299   : > { %v3892_v40 = vsel %vm1060_vm1, %v3887_v9, 0 }
0x229f   : > { %v15602_v39 = vpop.eup %15601 }
0x22a0   : > { %v3669_v50 = vmul.f32 %v15602_v39, %v15600_v11 }
0x22a2   : > { %v3670_v7 = vpack.c.bf16 %v3669_v50, %v3669_v50 }
0x22a4   : > { %14121 = vmatmul.mubr.msk.bf16.vlgmr.msra.gmra.mrb[68].mxu0 %vm1107_vm3, %v3670_v7 }
0x22a5   : > { %14133 = vmatpush3.bf16.xpose.msra.mxu0 %v3782_v37  ;;  %14134 = vmatprep.mubr.msk.bf16.mxu0 %vm15920_vm0, %v15919_v0 }
0x22a6   : > { %14144 = vmatprep.subr.bf16.mxu0 %v15919_v0 }
0x22ac   : > { %14135 = vmatmul.mubr.msk.bf16.vlgmr.msra.gmra.mrb[72].mxu0 %vm1060_vm1, %v16693_v21 }
0x22ad   : > { %14145 = vmatpush3.bf16.xpose.msra.mxu0 %v3892_v40  ;;  %14146 = vmatprep.mubr.msk.bf16.mxu0 %vm15920_vm0, %v15919_v0 }
0x22ae   : > { %14156 = vmatprep.subr.bf16.mxu0 %v15919_v0 }
0x22b4   : > { %14147 = vmatmul.mubr.msk.bf16.vlgmr.msra.gmra.mrb[76].mxu0 %vm1060_vm1, %v3885_v28 }
0x22b5   : > { %14157 = vmatpush3.bf16.msra.mxu0 %v16628_v13  ;;  %14160 = vmatprep.mubr.msk.bf16.mxu0 %vm15920_vm0, %v15919_v0  ;;  %v3841_v13 = vsel %vm1123_vm2, %v16736_v41, 0 }
0x22b6   : > { %14158 = vmatprep.subr.bf16.mxu0 %v15919_v0 }
0x22b9   : > { %14159 = vmatpush3.bf16.msra.mxu0 %v16631_v17 }
0x22ba   : > { %14172 = vmatprep.subr.bf16.mxu0 %v15919_v0 }
0x2377   : > { %v3713_v45 = vpop.f32.mrb[68].mxu0 }
0x2378   : > { %v3719_v44 = vpack.c.bf16 %v3713_v45, %v3713_v45  ;;  %v14122_v46 = vpop.f32.mrb[69].mxu0 }
0x2379   : > { %v3716_v47 = vpop.f32.mrb[70].mxu0 }
0x237a   : > { %v14123_v57 = vpop.f32.mrb[71].mxu0  ;;  %14129 = vmatmul.mubr.msk.bf16.vlgmr.msra.gmra.mrb[108].mxu1 %vm1060_vm1, %v3719_v44 }
0x237b   : > { %14139 = vmatpush3.bf16.msra.mxu1 %v3841_v13  ;;  %14140 = vmatprep.mubr.msk.bf16.mxu1 %vm15920_vm0, %v15919_v0 }
0x237c   : > { %14150 = vmatprep.subr.bf16.mxu1 %v15919_v0 }
0x237f   : > { %v3818_v17 = vpop.f32.mrb[72].mxu0 }
0x2380   : > { %v14136_v51 = vpop.f32.mrb[73].mxu0  ;;  %v3824_v35 = vsel %vm1107_vm3, %v3818_v17, -inf }
0x2381   : > { %3825 = vmax.xlane.f32.xlu1 %v3824_v35  ;;  %v3821_v49 = vpop.f32.mrb[74].mxu0 }
0x2382   : > { %v14137_v55 = vpop.f32.mrb[75].mxu0 }
0x2387   : > { %v3928_v58 = vpop.f32.mrb[76].mxu0 }
0x2388   : > { %v14148_v59 = vpop.f32.mrb[77].mxu0  ;;  %v3934_v6 = vsel %vm1107_vm3, %v3928_v58, -inf }
0x2389   : > { %3935 = vmax.xlane.f32.xlu0 %v3934_v6  ;;  %v3931_v60 = vpop.f32.mrb[78].mxu0 }
0x238a   : > { %v14149_v61 = vpop.f32.mrb[79].mxu0 }
0x2392   : > { %3946 = vrot.lane.b32.xlu1 %v16736_v41, %s15921_s18 }
0x2396   : > { %4081 = vrot.lane.b32.xlu1 %v16693_v21, %s15922_s12 }
0x240e   : > { %v3826_v62 = vpop.xlane.xlu1 %3825 }
0x240f   : > { %v3827_v5 = vsub.f32 %v3818_v17, %v3826_v62 }
0x2411   : > { %v3828_v3 = vmul.f32 1.442695, %v3827_v5 }
0x2412   : > { %v3947_v16 = vpop.permute.xlu1 %3946 }
0x2413   : > { %15603 = vpow2.f32 %v3828_v3  ;;  %v3952_v38 = vsel %vm1123_vm2, %v3947_v16, 0  ;;  %v12701_v16 = vld [vmem:[#allocation6 + $0xa] ss:$0 sm:$0xff] }
0x2416   : > { %v3936_v4 = vpop.xlane.xlu0 %3935  ;;  %v4082_v57 = vpop.permute.xlu1 %4081 }
0x2417   : > { %v3937_v8 = vsub.f32 %v3928_v58, %v3936_v4 }
0x2419   : > { %v3938_v10 = vmul.f32 1.442695, %v3937_v8 }
0x241b   : > { %15605 = vpow2.f32 %v3938_v10 }
0x241d   : > { %v15604_v12 = vpop.eup %15603 }
0x241e   : > { %v3830_v14 = vsel %vm1107_vm3, %v15604_v12, 0.0 }
0x241f   : > { %3831 = vadd.xlane.f32.xlu0 %v3830_v14 }
0x2425   : > { %v15606_v18 = vpop.eup %15605 }
0x2426   : > { %v3940_v22 = vsel %vm1107_vm3, %v15606_v18, 0.0 }
0x2427   : > { %3941 = vadd.xlane.f32.xlu0 %v3940_v22 }
0x243d   : > { %4083 = vrot.lane.b32.xlu0 %v16701_v26, %s15922_s12 }
0x244d   : > { %v3769_v19 = vpop.f32.mrb[108].mxu1 }
0x244e   : > { %v16755_v23 = vadd.f32 %v3769_v19, %v16708_v33  ;;  %v14130_v24 = vpop.f32.mrb[109].mxu1 }
0x244f   : > { %v3772_v27 = vpop.f32.mrb[110].mxu1 }
0x2450   : > { %v14131_v29 = vpop.f32.mrb[111].mxu1 }
0x24ac   : > { %v3832_v34 = vpop.xlane.xlu0 %3831 }
0x24ad   : > { %15607 = vrcp.f32 %v3832_v34 }
0x24b4   : > { %v3942_v11 = vpop.xlane.xlu0 %3941 }
0x24b5   : > { %15609 = vrcp.f32 %v3942_v11 }
0x24b7   : > { %v15608_v30 = vpop.eup %15607 }
0x24b8   : > { %v3834_v32 = vmul.f32 %v15608_v30, %v15604_v12 }
0x24ba   : > { %v3835_v36 = vpack.c.bf16 %v3834_v32, %v3834_v32 }
0x24bc   : > { %14141 = vmatmul.mubr.msk.bf16.vlgmr.msra.gmra.mrb[112].mxu1 %vm1107_vm3, %v3835_v36 }
0x24bd   : > { %14151 = vmatpush3.bf16.msra.mxu1 %v3952_v38  ;;  %14152 = vmatprep.mubr.msk.bf16.mxu1 %vm15920_vm0, %v15919_v0 }
0x24be   : > { %14164 = vmatprep.subr.bf16.mxu1 %v15919_v0 }
0x24bf   : > { %v15610_v33 = vpop.eup %15609 }
0x24c0   : > { %v3944_v25 = vmul.f32 %v15610_v33, %v15606_v18 }
0x24c2   : > { %v3945_v39 = vpack.c.bf16 %v3944_v25, %v3944_v25 }
0x24c4   : > { %14153 = vmatmul.mubr.msk.bf16.vlgmr.msra.gmra.mrb[116].mxu1 %vm1107_vm3, %v3945_v39 }
0x24c5   : > { %14165 = vmatpush3.bf16.msra.mxu1 %v16636_v15  ;;  %14168 = vmatprep.mubr.msk.bf16.mxu1 %vm15920_vm0, %v15919_v0  ;;  %v4084_v15 = vpop.permute.xlu0 %4083 }
0x24c6   : > { %14166 = vmatprep.subr.bf16.mxu1 %v15919_v0  ;;  %v4089_v47 = vsel %vm1060_vm1, %v4084_v15, 0 }
0x24c9   : > { %14167 = vmatpush3.bf16.msra.mxu1 %v16640_v20 }
0x24ca   : > { %14178 = vmatprep.subr.bf16.mxu1 %v15919_v0 }
0x258f   : > { %v3877_v50 = vpop.f32.mrb[112].mxu1 }
0x2590   : > { %v3883_v7 = vpack.c.bf16 %v3877_v50, %v3877_v50  ;;  %v14142_v37 = vpop.f32.mrb[113].mxu1 }
0x2591   : > { %v3880_v9 = vpop.f32.mrb[114].mxu1 }
0x2592   : > { %v14143_v40 = vpop.f32.mrb[115].mxu1  ;;  %14169 = vmatmul.mubr.msk.bf16.vlgmr.msra.gmra.mrb[120].mxu1 %vm1060_vm1, %v3883_v7 }
0x2593   : > { %14180 = vmatprep.mubr.msk.bf16.mxu1 %vm15920_vm0, %v15919_v0 }
0x2597   : > { %v3988_v28 = vpop.f32.mrb[116].mxu1 }
0x2598   : > { %v3994_v45 = vpack.c.bf16 %v3988_v28, %v3988_v28  ;;  %v14154_v44 = vpop.f32.mrb[117].mxu1 }
0x2599   : > { %v3991_v46 = vpop.f32.mrb[118].mxu1 }
0x259a   : > { %v14155_v20 = vpop.f32.mrb[119].mxu1  ;;  %14161 = vmatmul.mubr.msk.bf16.vlgmr.msra.gmra.mrb[80].mxu0 %vm1060_vm1, %v3994_v45 }
0x259b   : > { %14173 = vmatpush3.bf16.xpose.msra.mxu0 %v4089_v47  ;;  %14174 = vmatprep.mubr.msk.bf16.mxu0 %vm15920_vm0, %v15919_v0 }
0x259c   : > { %14184 = vmatprep.subr.bf16.mxu0 %v15919_v0 }
0x25a2   : > { %14175 = vmatmul.mubr.msk.bf16.vlgmr.msra.gmra.mrb[84].mxu0 %vm1060_vm1, %v4082_v57 }
0x25a3   : > { %14185 = vmatpush3.bf16.msra.mxu0 %v16668_v48  ;;  %14188 = vmatprep.mubr.msk.bf16.mxu0 %vm15920_vm0, %v15919_v0 }
0x25a4   : > { %14186 = vmatprep.subr.bf16.mxu0 %v15919_v0 }
0x25a7   : > { %14187 = vmatpush3.bf16.msra.mxu0 %v16682_v63 }
0x25a8   : > { %14198 = vmatprep.subr.bf16.mxu0 %v15919_v0 }
0x2665   : > { %v4075_v13 = vpop.f32.mrb[120].mxu1 }
0x2666   : > { %v14170_v17 = vpop.f32.mrb[121].mxu1 }
0x2667   : > { %v4078_v51 = vpop.f32.mrb[122].mxu1 }
0x2668   : > { %v14171_v35 = vpop.f32.mrb[123].mxu1 }
0x266d   : > { %v4032_v49 = vpop.f32.mrb[80].mxu0 }
0x266e   : > { %v16784_v55 = vadd.f32 %v4075_v13, %v4032_v49  ;;  %v14162_v58 = vpop.f32.mrb[81].mxu0 }
0x266f   : > { %v4035_v59 = vpop.f32.mrb[82].mxu0 }
0x2670   : > { %v14163_v6 = vpop.f32.mrb[83].mxu0 }
0x2675   : > { %v4125_v48 = vpop.f32.mrb[84].mxu0 }
0x2676   : > { %v14176_v60 = vpop.f32.mrb[85].mxu0  ;;  %v4131_v61 = vsel %vm1107_vm3, %v4125_v48, -inf }
0x2677   : > { %4132 = vmax.xlane.f32.xlu1 %v4131_v61  ;;  %v4128_v62 = vpop.f32.mrb[86].mxu0 }
0x2678   : > { %v14177_v5 = vpop.f32.mrb[87].mxu0 }
0x2688   : > { %4238 = vrot.lane.b32.xlu1 %v16701_v26, %s15923_s14 }
0x268c   : > { %4236 = vrot.lane.b32.xlu1 %v16693_v21, %s15923_s14 }
0x2704   : > { %v4133_v63 = vpop.xlane.xlu1 %4132 }
0x2705   : > { %v4134_v3 = vsub.f32 %v4125_v48, %v4133_v63 }
0x2707   : > { %v4135_v4 = vmul.f32 1.442695, %v4134_v3 }
0x2708   : > { %v4239_v22 = vpop.permute.xlu1 %4238 }
0x2709   : > { %15611 = vpow2.f32 %v4135_v4  ;;  %v4244_v24 = vsel %vm1060_vm1, %v4239_v22, 0  ;;  %v15291_v4 = vld [vmem:[%s18187_s6 + $0x80] ss:$8 sps:$4 sm:$0xff]  }
0x270c   : > { %v4237_v27 = vpop.permute.xlu1 %4236 }
0x2713   : > { %v15612_v8 = vpop.eup %15611 }
0x2714   : > { %v4137_v10 = vsel %vm1107_vm3, %v15612_v8, 0.0 }
0x2715   : > { %4138 = vadd.xlane.f32.xlu0 %v4137_v10  ;;  %v15296_v10 = vld [vmem:[%s18187_s6 + $0x94] ss:$8 sps:$4 sm:$0xff]  }
0x272b   : > { %4143 = vrot.lane.b32.xlu0 %v16736_v41, %s15922_s12 }
0x27a2   : > { %v4139_v12 = vpop.xlane.xlu0 %4138 }
0x27a3   : > { %15613 = vrcp.f32 %v4139_v12  ;;  %v15299_v12 = vld [vmem:[%s18187_s6 + $0xa4] ss:$8 sps:$4 sm:$0xff]  }
0x27a6   : > { %v4144_v14 = vpop.permute.xlu0 %4143 }
0x27a7   : > { %v4149_v18 = vsel %vm1123_vm2, %v4144_v14, 0  ;;  %v15297_v14 = vld [vmem:[%s18187_s6 + $0xa0] ss:$8 sps:$4 sm:$0xff]  }
0x27a8   : > { %14179 = vmatpush3.bf16.msra.mxu1 %v4149_v18 }
0x27a9   : > { %14192 = vmatprep.subr.bf16.mxu1 %v15919_v0 }
0x27ad   : > { %v15614_v21 = vpop.eup %15613 }
0x27ae   : > { %v4141_v26 = vmul.f32 %v15614_v21, %v15612_v8  ;;  %v15293_v8 = vld [vmem:[%s18187_s6 + $0x84] ss:$8 sps:$4 sm:$0xff]  }
0x27b0   : > { %v4142_v19 = vpack.c.bf16 %v4141_v26, %v4141_v26 }
0x27b2   : > { %14181 = vmatmul.mubr.msk.bf16.vlgmr.msra.gmra.mrb[124].mxu1 %vm1107_vm3, %v4142_v19  ;;  %v15302_v19 = vld [vmem:[%s18187_s6 + $0xb4] ss:$8 sps:$4 sm:$0xff]  }
0x27b3   : > { %14193 = vmatpush3.bf16.xpose.msra.mxu1 %v4244_v24  ;;  %14194 = vmatprep.mubr.msk.bf16.mxu1 %vm15920_vm0, %v15919_v0  ;;  %v15300_v24 = vld [vmem:[%s18187_s6 + $0xb0] ss:$8 sps:$4 sm:$0xff]  }
0x27b4   : > { %14204 = vmatprep.subr.bf16.mxu1 %v15919_v0 }
0x27ba   : > { %14195 = vmatmul.mubr.msk.bf16.vlgmr.msra.gmra.mrb[128].mxu1 %vm1060_vm1, %v4237_v27  ;;  %v15303_v27 = vld [vmem:[%s18187_s6 + $0xc0] ss:$8 sps:$4 sm:$0xff]  }
0x27bb   : > { %14205 = vmatpush3.bf16.msra.mxu1 %v16705_v31  ;;  %14208 = vmatprep.mubr.msk.bf16.mxu1 %vm15920_vm0, %v15919_v0  ;;  %v4395_v31 = vadd.f32 %v12701_v16, %v16755_v23 }
0x27bc   : > { %14206 = vmatprep.subr.bf16.mxu1 %v15919_v0 }
0x27bd   : > { %v4397_v39 = vadd.f32 %v4395_v31, %v16568_v52  ;;  %v15331_v31 = vld [vmem:[#allocation4 + $0xc0] sm:$0xff]  }
0x27bf   : > { %14207 = vmatpush3.bf16.msra.mxu1 %v16711_v2 }
0x27c0   : > { %13325 = vmatprep.subr.bf16.mxu1 %v15331_v31 }
0x2885   : > { %v4185_v29 = vpop.f32.mrb[124].mxu1 }
0x2886   : > { %v4191_v34 = vpack.c.bf16 %v4185_v29, %v4185_v29  ;;  %v14182_v11 = vpop.f32.mrb[125].mxu1  ;;  %v15305_v29 = vld [vmem:[%s18187_s6 + $0xc4] ss:$8 sps:$4 sm:$0xff]  }
0x2887   : > { %v4188_v30 = vpop.f32.mrb[126].mxu1  ;;  %v15306_v11 = vld [vmem:[%s18187_s6 + $0xd0] ss:$8 sps:$4 sm:$0xff]  }
0x2888   : > { %v14183_v32 = vpop.f32.mrb[127].mxu1  ;;  %14189 = vmatmul.mubr.msk.bf16.vlgmr.msra.gmra.mrb[88].mxu0 %vm1060_vm1, %v4191_v34  ;;  %v15308_v34 = vld [vmem:[%s18187_s6 + $0xd4] ss:$8 sps:$4 sm:$0xff]   ;;  %v15311_v30 = vld [vmem:[%s18187_s6 + $0xe4] ss:$8 sps:$4 sm:$0xff]  }
0x2889   : > { %14200 = vmatprep.mubr.msk.bf16.mxu0 %vm15920_vm0, %v15919_v0  ;;  %v15309_v32 = vld [vmem:[%s18187_s6 + $0xe0] ss:$8 sps:$4 sm:$0xff]  }
0x288d   : > { %v4280_v36 = vpop.f32.mrb[128].mxu1 }
0x288e   : > { %v14196_v38 = vpop.f32.mrb[129].mxu1  ;;  %v4286_v33 = vsel %vm1107_vm3, %v4280_v36, -inf }
0x288f   : > { %4287 = vmax.xlane.f32.xlu1 %v4286_v33  ;;  %v4283_v25 = vpop.f32.mrb[130].mxu1  ;;  %v15332_v38 = vld [vmem:[#allocation4 + $0x80] sm:$0xff]   ;;  %v15333_v33 = vld [vmem:[#allocation4 + $0xc8] sm:$0xff]  }
0x2890   : > { %v14197_v2 = vpop.f32.mrb[131].mxu1  ;;  %v15334_v25 = vld [vmem:[#allocation4 + $0x88] sm:$0xff]  }
0x2891   : > { %v15335_v2 = vld [vmem:[#allocation4 + $0xd0] sm:$0xff]  }
0x2893   : > { %4401 = vadd.xlane.f32.xlu1 %v4397_v39 }
0x291c   : > { %v4288_v50 = vpop.xlane.xlu1 %4287 }
0x291d   : > { %v4289_v7 = vsub.f32 %v4280_v36, %v4288_v50  ;;  %v15312_v36 = vld [vmem:[%s18187_s6 + $0xf0] ss:$8 sps:$4 sm:$0xff]  }
0x291e   : > { %v15337_v50 = vld [vmem:[#allocation4 + $0xd8] sm:$0xff]  }
0x291f   : > { %v4290_v37 = vmul.f32 1.442695, %v4289_v7  ;;  %v15338_v7 = vld [vmem:[#allocation4 + $0x98] sm:$0xff]  }
0x2921   : > { %15615 = vpow2.f32 %v4290_v37  ;;  %v15339_v37 = vld [vmem:[#allocation4 + $0xe0] sm:$0xff]  }
0x292b   : > { %v15616_v9 = vpop.eup %15615 }
0x292c   : > { %v4292_v40 = vsel %vm1107_vm3, %v15616_v9, 0.0 }
0x292d   : > { %4293 = vadd.xlane.f32.xlu0 %v4292_v40  ;;  %v15341_v40 = vld [vmem:[#allocation4 + $0xe8] sm:$0xff]  }
0x2943   : > { %4298 = vrot.lane.b32.xlu0 %v16736_v41, %s15923_s14 }
0x295b   : > { %v4229_v23 = vpop.f32.mrb[88].mxu0 }
0x295c   : > { %v4235_v15 = vadd.f32 %v4229_v23, %v16784_v55  ;;  %v14190_v28 = vpop.f32.mrb[89].mxu0  ;;  %v4402_v55 = vpop.xlane.xlu1 %4401  ;;  %v15342_v23 = vld [vmem:[#allocation4 + $0xa8] sm:$0xff]  }
0x295d   : > { %v4232_v45 = vpop.f32.mrb[90].mxu0  ;;  %v4405_v59 = vmul.f32 0.0078125, %v4402_v55 }
0x295e   : > { %v14191_v44 = vpop.f32.mrb[91].mxu0 }
0x295f   : > { %v16822_v63 = vsub.f32 %v4397_v39, %v4405_v59  ;;  %v15336_v39 = vld [vmem:[#allocation4 + $0x90] sm:$0xff]  }
0x2961   : > { %v4409_v3 = vmul.f32 %v16822_v63, %v16822_v63 }
0x29ba   : > { %v4294_v46 = vpop.xlane.xlu0 %4293 }
0x29bb   : > { %15617 = vrcp.f32 %v4294_v46 }
0x29be   : > { %v4299_v52 = vpop.permute.xlu0 %4298 }
0x29bf   : > { %v4304_v47 = vsel %vm1123_vm2, %v4299_v52, 0 }
0x29c0   : > { %14199 = vmatpush3.bf16.msra.mxu0 %v4304_v47 }
0x29c1   : > { %4582 = vmatprep.subr.bf16.mxu0 %v15293_v8 }
0x29c5   : > { %v15618_v20 = vpop.eup %15617 }
0x29c6   : > { %v4296_v57 = vmul.f32 %v15618_v20, %v15616_v9  ;;  %v15340_v9 = vld [vmem:[#allocation4 + $0xa0] sm:$0xff]  }
0x29c8   : > { %v4297_v13 = vpack.c.bf16 %v4296_v57, %v4296_v57  ;;  %v12702_v57 = vld [vmem:[#allocation6 + $0x21] ss:$0 sm:$0xff] }
0x29ca   : > { %14201 = vmatmul.mubr.msk.bf16.vlgmr.msra.gmra.mrb[92].mxu0 %vm1107_vm3, %v4297_v13 }
0x29cb   : > { %4614 = vmatprep.mubr.bf16.mxu0 %v15924_v1  ;;  %4583 = vmatpush1.bf16.msra.mxu0 %v15291_v4  ;;  %v15321_v4 = vld [vmem:[#allocation2 + $0x230] sm:$0xff]  }
0x29cc   : > { %4584 = vmatprep.subr.bf16.mxu0 %v15296_v10 }
0x2a9d   : > { %v4340_v41 = vpop.f32.mrb[92].mxu0 }
0x2a9e   : > { %v4346_v17 = vpack.c.bf16 %v4340_v41, %v4340_v41  ;;  %v14202_v51 = vpop.f32.mrb[93].mxu0 }
0x2a9f   : > { %v4343_v35 = vpop.f32.mrb[94].mxu0  ;;  %v12703_v51 = vld [vmem:[#allocation6 + $0x25] ss:$0 sm:$0xff] }
0x2aa0   : > { %v14203_v49 = vpop.f32.mrb[95].mxu0  ;;  %14209 = vmatmul.mubr.msk.bf16.vlgmr.msra.gmra.mrb[132].mxu1 %vm1060_vm1, %v4346_v17 }
0x2aa1   : > { %13326 = vmatpush3.bf16.msra.mxu1 %v15332_v38 }
0x2aa2   : > { %13327 = vmatprep.subr.bf16.mxu1 %v15333_v33 }
0x2aa5   : > { %13328 = vmatpush3.bf16.msra.mxu1 %v15334_v25 }
0x2aa6   : > { %13329 = vmatprep.subr.bf16.mxu1 %v15335_v2 }
0x2aa9   : > { %13330 = vmatpush3.bf16.msra.mxu1 %v15336_v39 }
0x2aaa   : > { %13331 = vmatprep.subr.bf16.mxu1 %v15337_v50 }
0x2aad   : > { %13332 = vmatpush3.bf16.msra.mxu1 %v15338_v7 }
0x2aae   : > { %13333 = vmatprep.subr.bf16.mxu1 %v15339_v37 }
0x2ab1   : > { %13334 = vmatpush3.bf16.msra.mxu1 %v15340_v9 }
0x2ab2   : > { %13335 = vmatprep.subr.bf16.mxu1 %v15341_v40 }
0x2ab5   : > { %13336 = vmatpush3.bf16.msra.mxu1 %v15342_v23 }
0x2b73   : > { %v4384_v58 = vpop.f32.mrb[132].mxu1 }
0x2b74   : > { %v4390_v6 = vadd.f32 %v4384_v58, %v4235_v15  ;;  %v14210_v48 = vpop.f32.mrb[133].mxu1  ;;  %v15315_v58 = vld [vmem:[#allocation2 + $0x200] sm:$0xff]  }
0x2b75   : > { %v4387_v60 = vpop.f32.mrb[134].mxu1  ;;  %v15317_v48 = vld [vmem:[#allocation2 + $0x210] sm:$0xff]  }
0x2b76   : > { %v4396_v61 = vadd.f32 %v12701_v16, %v4390_v6  ;;  %v14211_v62 = vpop.f32.mrb[135].mxu1  ;;  %v15314_v16 = vld [vmem:[%s18187_s6 + $0xf4] ss:$8 sps:$4 sm:$0xff]   ;;  %v15316_v6 = vld [vmem:[#allocation2 + $0x208] sm:$0xff]  }
0x2b77   : > { %v15318_v60 = vld [vmem:[#allocation2 + $0x218] sm:$0xff]   ;;  %v12536_v62 = vld [vmem:[#allocation6 + $0x1] ss:$0 sm:$0xff] }
0x2b78   : > { %v4398_v5 = vadd.f32 %v4396_v61, %v16570_v53  ;;  %v15294_v53 = vld [vmem:[%s18187_s6 + $0x90] ss:$8 sps:$4 sm:$0xff]   ;;  %v15319_v61 = vld [vmem:[#allocation2 + $0x220] sm:$0xff]  }
0x2b79   : > { %4585 = vmatpush1.bf16.msra.mxu0 %v15294_v53  ;;  %v700_v53 = vld [vmem:[%s18184_s3] sm:$0xff] }
0x2b7a   : > { %4403 = vadd.xlane.f32.xlu1 %v4398_v5  ;;  %4586 = vmatprep.subr.bf16.mxu0 %v15299_v12  ;;  %v701_v12 = vld [vmem:[%s18184_s3 + $0x8] sm:$0xff] }
0x2b7d   : > { %4587 = vmatpush1.bf16.msra.mxu0 %v15297_v14 }
0x2b7e   : > { %4411 = vadd.xlane.f32.xlu1 %v4409_v3  ;;  %4588 = vmatprep.subr.bf16.mxu0 %v15302_v19  ;;  %v695_v3 = vadd.f32 %v12536_v62, %v16237_v56  ;;  %v15326_v19 = vld [vmem:[#allocation2 + $0x298] sm:$0xff]  }
0x2b80   : > { %v699_v10 = vmul.f32 11.313708, %v695_v3 }
0x2b81   : > { %4589 = vmatpush1.bf16.msra.mxu0 %v15300_v24  ;;  %v15327_v24 = vld [vmem:[#allocation2 + $0x2a0] sm:$0xff]  }
0x2b82   : > { %4590 = vmatprep.subr.bf16.mxu0 %v15305_v29  ;;  %v16900_v56 = vadd.f32 %v701_v12, %v699_v10  ;;  %v15329_v29 = vld [vmem:[#allocation2 + $0x2b0] sm:$0xff]  }
0x2b85   : > { %4591 = vmatpush1.bf16.msra.mxu0 %v15303_v27  ;;  %v15328_v27 = vld [vmem:[#allocation2 + $0x2a8] sm:$0xff]  }
0x2b86   : > { %4592 = vmatprep.subr.bf16.mxu0 %v15308_v34  ;;  %v15330_v34 = vld [vmem:[#allocation2 + $0x2b8] sm:$0xff]  }
0x2b89   : > { %4593 = vmatpush1.bf16.msra.mxu0 %v15306_v11  ;;  %v15343_v11 = vld [vmem:[#allocation4 + $0xf0] sm:$0xff]  }
0x2b8a   : > { %4594 = vmatprep.subr.bf16.mxu0 %v15311_v30  ;;  %v15344_v30 = vld [vmem:[#allocation4 + $0xb0] sm:$0xff]   ;;  %13337 = vmatprep.subr.bf16.mxu1 %v15343_v11 }
0x2b8b   : > { %13338 = vmatpush3.bf16.msra.mxu1 %v15344_v30 }
0x2b8d   : > { %4595 = vmatpush1.bf16.msra.mxu0 %v15309_v32  ;;  %v15345_v32 = vld [vmem:[#allocation4 + $0xf8] sm:$0xff]  }
0x2b8e   : > { %4596 = vmatprep.subr.bf16.mxu0 %v15314_v16  ;;  %v15346_v16 = vld [vmem:[#allocation4 + $0xb8] sm:$0xff]   ;;  %13339 = vmatprep.subr.bf16.mxu1 %v15345_v32 }
0x2b8f   : > { %13340 = vmatpush3.bf16.msra.mxu1 %v15346_v16 }
0x2b90   : > { %14232 = vmatprep.subr.bf16.mxu1 %v15919_v0 }
0x2b91   : > { %4597 = vmatpush1.bf16.msra.mxu0 %v15312_v36  ;;  %v4453_v36 = vld [vmem:[#allocation7 + $0x1] ss:$4 sm:$0x3] }
0x2b92   : > { %14212 = vmatprep.subr.bf16.mxu0 %v15919_v0  ;;  %v4495_v31 = vrot.slane %v4453_v36, %v16544_v42  ;;  %v4499_v38 = vrot.slane %v4453_v36, %v16546_v43 }
0x2c07   : > { %v4404_v18 = vpop.xlane.xlu1 %4403 }
0x2c08   : > { %v4406_v21 = vmul.f32 0.0078125, %v4404_v18  ;;  %v15323_v18 = vld [vmem:[#allocation2 + $0x280] sm:$0xff]  }
0x2c0a   : > { %v4408_v26 = vsub.f32 %v4398_v5, %v4406_v21  ;;  %v15320_v5 = vld [vmem:[#allocation2 + $0x228] sm:$0xff]  }
0x2c0b   : > { %v4412_v15 = vpop.xlane.xlu1 %4411 }
0x2c0c   : > { %v4410_v22 = vmul.f32 %v4408_v26, %v4408_v26  ;;  %v4415_v28 = vmul.f32 0.0078125, %v4412_v15 }
0x2c0e   : > { %4413 = vadd.xlane.f32.xlu1 %v4410_v22  ;;  %v4417_v45 = vadd.f32 1e-05, %v4415_v28  ;;  %v15325_v22 = vld [vmem:[#allocation2 + $0x290] sm:$0xff]  }
0x2c10   : > { %15619 = vrsqrt.f32 %v4417_v45 }
0x2c1a   : > { %v15620_v47 = vpop.eup %15619 }
0x2c1b   : > { %v4421_v20 = vmul.f32 %v15620_v47, %v16822_v63  ;;  %v692_v63 = vadd.f32 %v12536_v62, %v16235_v54  ;;  %v15322_v54 = vld [vmem:[#allocation2 + $0x238] sm:$0xff]   ;;  %v15349_v47 = vld [vmem:[#allocation2 + $0x250] sm:$0xff]  }
0x2c1d   : > { %v4427_v17 = vmul.f32 %v12702_v57, %v4421_v20  ;;  %v698_v8 = vmul.f32 11.313708, %v692_v63  ;;  %v15350_v20 = vld [vmem:[#allocation2 + $0x258] sm:$0xff]   ;;  %v12773_v63 = vld [vmem:[#allocation6 + $0xd] ss:$0 sm:$0xff] }
0x2c1f   : > { %v16876_v49 = vadd.f32 %v12703_v51, %v4427_v17  ;;  %v16898_v14 = vadd.f32 %v700_v53, %v698_v8 }
0x2c21   : > { %v16905_v21 = vpack.c.bf16 %v16900_v56, %v16898_v14 }
0x2c9b   : > { %v4414_v44 = vpop.xlane.xlu1 %4413 }
0x2c9c   : > { %v4416_v46 = vmul.f32 0.0078125, %v4414_v44 }
0x2c9e   : > { %v4418_v52 = vadd.f32 1e-05, %v4416_v46  ;;  %v15347_v46 = vld [vmem:[#allocation2 + $0x240] sm:$0xff]  }
0x2ca0   : > { %15621 = vrsqrt.f32 %v4418_v52  ;;  %v15348_v52 = vld [vmem:[#allocation2 + $0x248] sm:$0xff]  }
0x2caa   : > { %v15622_v13 = vpop.eup %15621 }
0x2cab   : > { %v4422_v41 = vmul.f32 %v15622_v13, %v4408_v26  ;;  %v15324_v26 = vld [vmem:[#allocation2 + $0x288] sm:$0xff]  }
0x2cac   : > { %v15352_v13 = vld [vmem:[#allocation2 + $0x268] sm:$0xff]  }
0x2cad   : > { %v4428_v35 = vmul.f32 %v12702_v57, %v4422_v41  ;;  %v15351_v57 = vld [vmem:[#allocation2 + $0x260] sm:$0xff]   ;;  %v12755_v41 = vld [vmem:[#allocation6 + $0xb] ss:$0 sm:$0xff] }
0x2caf   : > { %v16878_v55 = vadd.f32 %v12703_v51, %v4428_v35  ;;  %v15353_v51 = vld [vmem:[#allocation2 + $0x270] sm:$0xff]  }
0x2cb1   : > { %v4490_v59 = vpack.c.bf16 %v16878_v55, %v16876_v49 }
0x2cb3   : > { %4615 = vmatmul.mubr.bf16.vlgmr.msra.gmra.mrb[96].mxu0 %v4490_v59 }
0x2cb4   : > { %14213 = vmatpush3.bf16.msra.mxu0 %v15315_v58  ;;  %14228 = vmatprep.mubr.msk.bf16.mxu0 %vm15920_vm0, %v15919_v0 }
0x2cb5   : > { %14214 = vmatprep.subr.bf16.mxu0 %v15919_v0 }
0x2cb8   : > { %14215 = vmatpush3.bf16.msra.mxu0 %v15316_v6 }
0x2cb9   : > { %14216 = vmatprep.subr.bf16.mxu0 %v15919_v0 }
0x2cbc   : > { %14217 = vmatpush3.bf16.msra.mxu0 %v15317_v48 }
0x2cbd   : > { %14218 = vmatprep.subr.bf16.mxu0 %v15919_v0 }
0x2cc0   : > { %14219 = vmatpush3.bf16.msra.mxu0 %v15318_v60  ;;  %v15354_v60 = vld [vmem:[#allocation2 + $0x278] sm:$0xff]  }
0x2cc1   : > { %14220 = vmatprep.subr.bf16.mxu0 %v15919_v0 }
0x2cc4   : > { %14221 = vmatpush3.bf16.msra.mxu0 %v15319_v61 }
0x2cc5   : > { %14222 = vmatprep.subr.bf16.mxu0 %v15919_v0 }
0x2cc8   : > { %14223 = vmatpush3.bf16.msra.mxu0 %v15320_v5 }
0x2cc9   : > { %14224 = vmatprep.subr.bf16.mxu0 %v15919_v0 }
0x2ccc   : > { %14225 = vmatpush3.bf16.msra.mxu0 %v15321_v4 }
0x2ccd   : > { %14226 = vmatprep.subr.bf16.mxu0 %v15919_v0 }
0x2cd0   : > { %14227 = vmatpush3.bf16.msra.mxu0 %v15322_v54 }
0x2cd1   : > { %14252 = vmatprep.subr.bf16.mxu0 %v15919_v0 }
0x2cd3   : > { %14229 = vmatmul.mubr.bf16.vlgmr.msra.gmra.mrb[100].mxu0 %v16905_v21 }
0x2cd4   : > { %14253 = vmatpush3.bf16.msra.mxu0 %v15323_v18  ;;  %14268 = vmatprep.mubr.msk.bf16.mxu0 %vm15920_vm0, %v15919_v0 }
0x2cd5   : > { %14254 = vmatprep.subr.bf16.mxu0 %v15919_v0 }
0x2cd8   : > { %14255 = vmatpush3.bf16.msra.mxu0 %v15324_v26 }
0x2cd9   : > { %14256 = vmatprep.subr.bf16.mxu0 %v15919_v0 }
0x2cdc   : > { %14257 = vmatpush3.bf16.msra.mxu0 %v15325_v22 }
0x2cdd   : > { %14258 = vmatprep.subr.bf16.mxu0 %v15919_v0 }
0x2ce0   : > { %14259 = vmatpush3.bf16.msra.mxu0 %v15326_v19 }
0x2ce1   : > { %14260 = vmatprep.subr.bf16.mxu0 %v15919_v0 }
0x2ce4   : > { %14261 = vmatpush3.bf16.msra.mxu0 %v15327_v24 }
0x2ce5   : > { %14262 = vmatprep.subr.bf16.mxu0 %v15919_v0 }
0x2ce8   : > { %14263 = vmatpush3.bf16.msra.mxu0 %v15328_v27 }
0x2ce9   : > { %14264 = vmatprep.subr.bf16.mxu0 %v15919_v0 }
0x2cec   : > { %14265 = vmatpush3.bf16.msra.mxu0 %v15329_v29 }
0x2ced   : > { %14266 = vmatprep.subr.bf16.mxu0 %v15919_v0 }
0x2cf0   : > { %14267 = vmatpush3.bf16.msra.mxu0 %v15330_v34 }
0x2cf1   : > { %14296 = vmatprep.subr.bf16.mxu0 %v15919_v0 }
0x2cf3   : > { %14269 = vmatmul.mubr.bf16.vlgmr.msra.gmra.mrb[104].mxu0 %v16905_v21 }
0x2cf4   : > { %14300 = vmatprep.mubr.msk.bf16.mxu0 %vm15920_vm0, %v15919_v0 }
0x2d86   : > { %v4616_v33 = vpop.f32.mrb[96].mxu0 }
0x2d87   : > { %v4617_v25 = vadd.f32 %v4616_v33, %v4495_v31  ;;  %v4618_v2 = vpop.f32.mrb[97].mxu0 }
0x2d88   : > { %v4619_v39 = vadd.f32 %v4618_v2, %v4499_v38  ;;  %v4620_v50 = vpop.f32.mrb[98].mxu0 }
0x2d89   : > { %v4621_v7 = vadd.f32 %v4620_v50, %v4495_v31  ;;  %v4622_v37 = vpop.f32.mrb[99].mxu0  ;;  %v4625_v40 = vmax.f32 %v4617_v25, 0.0 }
0x2d8a   : > { %v4623_v9 = vadd.f32 %v4622_v37, %v4499_v38  ;;  %v4626_v15 = vmax.f32 %v4619_v39, 0.0 }
0x2d8b   : > { %v4627_v23 = vmax.f32 %v4621_v7, 0.0 }
0x2d8c   : > { %v4628_v28 = vmax.f32 %v4623_v9, 0.0 }
0x2d8d   : > { %v4629_v45 = vpack.c.bf16 %v4627_v23, %v4625_v40 }
0x2d8e   : > { %v4630_v44 = vpack.c.bf16 %v4628_v28, %v4626_v15 }
0x2d90   : > { %4763 = vmatprep.mubr.bf16.mxu1 %v4630_v44 }
0x2d91   : > { %4764 = vmatmul.mubr.bf16.vlgmr.msra.gmra.mrb[136].mxu1 %v4629_v45 }
0x2d92   : > { %14233 = vmatpush3.bf16.msra.mxu1 %v15347_v46  ;;  %14248 = vmatprep.mubr.msk.bf16.mxu1 %vm15920_vm0, %v15919_v0 }
0x2d93   : > { %14234 = vmatprep.subr.bf16.mxu1 %v15919_v0 }
0x2d96   : > { %14235 = vmatpush3.bf16.msra.mxu1 %v15348_v52 }
0x2d97   : > { %14236 = vmatprep.subr.bf16.mxu1 %v15919_v0 }
0x2d9a   : > { %14237 = vmatpush3.bf16.msra.mxu1 %v15349_v47 }
0x2d9b   : > { %14238 = vmatprep.subr.bf16.mxu1 %v15919_v0 }
0x2d9e   : > { %14239 = vmatpush3.bf16.msra.mxu1 %v15350_v20 }
0x2d9f   : > { %14240 = vmatprep.subr.bf16.mxu1 %v15919_v0 }
0x2da2   : > { %14241 = vmatpush3.bf16.msra.mxu1 %v15351_v57 }
0x2da3   : > { %14242 = vmatprep.subr.bf16.mxu1 %v15919_v0 }
0x2da6   : > { %v4916_v17 = vpop.f32.mrb[100].mxu0  ;;  %14243 = vmatpush3.bf16.msra.mxu1 %v15352_v13 }
0x2da7   : > { %v4917_v35 = vadd.f32 %v12755_v41, %v4916_v17  ;;  %v14230_v58 = vpop.f32.mrb[101].mxu0  ;;  %14244 = vmatprep.subr.bf16.mxu1 %v15919_v0 }
0x2da8   : > { %v4919_v59 = vpop.f32.mrb[102].mxu0 }
0x2da9   : > { %v4920_v6 = vadd.f32 %v12755_v41, %v4919_v59  ;;  %v14231_v48 = vpop.f32.mrb[103].mxu0  ;;  %v5143_v61 = vmul.f32 0.17677669, %v4917_v35 }
0x2daa   : > { %14245 = vmatpush3.bf16.msra.mxu1 %v15353_v51 }
0x2dab   : > { %v5144_v62 = vmul.f32 0.17677669, %v4920_v6  ;;  %14246 = vmatprep.subr.bf16.mxu1 %v15919_v0 }
0x2dad   : > { %v16934_v5 = vpack.c.bf16 %v5144_v62, %v5143_v61 }
0x2dae   : > { %14247 = vmatpush3.bf16.msra.mxu1 %v15354_v60 }
0x2daf   : > { %14272 = vmatprep.subr.bf16.mxu1 %v15919_v0 }
0x2db1   : > { %14249 = vmatmul.mubr.bf16.vlgmr.msra.gmra.mrb[140].mxu1 %v16905_v21  ;;  %v12764_v21 = vld [vmem:[#allocation6 + $0xc] ss:$0 sm:$0xff] }
0x2db2   : > { %14274 = vmatprep.mubr.msk.bf16.mxu1 %vm15920_vm0, %v15919_v0 }
0x2dc6   : > { %v5136_v3 = vpop.f32.mrb[104].mxu0 }
0x2dc7   : > { %v14270_v4 = vpop.f32.mrb[105].mxu0  ;;  %v5137_v10 = vadd.f32 %v12773_v63, %v5136_v3  ;;  %v16983_v3 = vld [vmem:[#allocation2 + $0x2d8] sm:$0xff]  }
0x2dc8   : > { %v5139_v8 = vpop.f32.mrb[106].mxu0 }
0x2dc9   : > { %v5140_v53 = vadd.f32 %v12773_v63, %v5139_v8  ;;  %v14271_v12 = vpop.f32.mrb[107].mxu0  ;;  %v16980_v63 = vld [vmem:[#allocation2 + $0x2d0] sm:$0xff]  }
0x2dca   : > { %14297 = vmatpush3.bf16.msra.mxu0 %v16980_v63 }
0x2dcb   : > { %v16940_v54 = vpack.c.bf16 %v5140_v53, %v5137_v10  ;;  %14298 = vmatprep.subr.bf16.mxu0 %v15919_v0 }
0x2dcd   : > { %v5227_v38 = vsel %vm1123_vm2, %v16940_v54, 0 }
0x2dce   : > { %14299 = vmatpush3.bf16.msra.mxu0 %v16983_v3 }
0x2dcf   : > { %14312 = vmatprep.subr.bf16.mxu0 %v15919_v0 }
0x2e64   : > { %v13341_v18 = vpop.f32.mrb[136].mxu1 }
0x2e65   : > { %v13342_v26 = vpop.f32.mrb[137].mxu1 }
0x2e66   : > { %v16942_v22 = vadd.f32 %v13342_v26, %v13341_v18  ;;  %v13344_v19 = vpop.f32.mrb[138].mxu1  ;;  %v16990_v18 = vld [vmem:[#allocation2 + $0x2c0] sm:$0xff]  }
0x2e67   : > { %v13345_v24 = vpop.f32.mrb[139].mxu1 }
0x2e68   : > { %v16944_v27 = vadd.f32 %v13345_v24, %v13344_v19  ;;  %v16994_v19 = vld [vmem:[#allocation2 + $0x2c8] sm:$0xff]  }
0x2e84   : > { %v5026_v29 = vpop.f32.mrb[140].mxu1 }
0x2e85   : > { %v14250_v34 = vpop.f32.mrb[141].mxu1  ;;  %v5027_v30 = vadd.f32 %v12764_v21, %v5026_v29 }
0x2e86   : > { %v5029_v11 = vpop.f32.mrb[142].mxu1 }
0x2e87   : > { %v5030_v32 = vadd.f32 %v12764_v21, %v5029_v11  ;;  %v14251_v16 = vpop.f32.mrb[143].mxu1 }
0x2e89   : > { %v16946_v36 = vpack.c.bf16 %v5030_v32, %v5027_v30 }
0x2e8b   : > { %v5169_v31 = vsel %vm1060_vm1, %v16946_v36, 0 }
0x2e8c   : > { %14273 = vmatpush3.bf16.xpose.msra.mxu1 %v5169_v31 }
0x2e8d   : > { %14278 = vmatprep.subr.bf16.mxu1 %v15919_v0 }
0x2e93   : > { %14275 = vmatmul.mubr.msk.bf16.vlgmr.msra.gmra.mrb[144].mxu1 %vm1060_vm1, %v16934_v5 }
0x2e94   : > { %14279 = vmatpush3.bf16.msra.mxu1 %v5227_v38  ;;  %14280 = vmatprep.mubr.msk.bf16.mxu1 %vm15920_vm0, %v15919_v0 }
0x2e95   : > { %14284 = vmatprep.subr.bf16.mxu1 %v15919_v0 }
0x2f66   : > { %v5205_v33 = vpop.f32.mrb[144].mxu1 }
0x2f67   : > { %v14276_v25 = vpop.f32.mrb[145].mxu1  ;;  %v5211_v2 = vsel %vm1107_vm3, %v5205_v33, -inf }
0x2f68   : > { %5212 = vmax.xlane.f32.xlu1 %v5211_v2  ;;  %v5208_v39 = vpop.f32.mrb[146].mxu1 }
0x2f69   : > { %v14277_v50 = vpop.f32.mrb[147].mxu1 }
0x2f79   : > { %5274 = vrot.lane.b32.xlu1 %v16946_v36, %s15921_s18 }
0x2f7d   : > { %5271 = vrot.lane.b32.xlu1 %v16934_v5, %s15921_s18 }
0x2ff5   : > { %v5213_v7 = vpop.xlane.xlu1 %5212 }
0x2ff6   : > { %v5214_v37 = vsub.f32 %v5205_v33, %v5213_v7 }
0x2ff8   : > { %v5215_v9 = vmul.f32 1.442695, %v5214_v37 }
0x2ff9   : > { %v5275_v44 = vpop.permute.xlu1 %5274 }
0x2ffa   : > { %15623 = vpow2.f32 %v5215_v9  ;;  %v5280_v52 = vsel %vm1060_vm1, %v5275_v44, 0 }
0x2ffd   : > { %v5272_v47 = vpop.permute.xlu1 %5271 }
0x3004   : > { %v15624_v40 = vpop.eup %15623 }
0x3005   : > { %v5217_v23 = vsel %vm1107_vm3, %v15624_v40, 0.0 }
0x3006   : > { %5218 = vadd.xlane.f32.xlu0 %v5217_v23 }
0x3093   : > { %v5219_v15 = vpop.xlane.xlu0 %5218 }
0x3094   : > { %15625 = vrcp.f32 %v5219_v15 }
0x309e   : > { %v15626_v28 = vpop.eup %15625 }
0x309f   : > { %v5221_v45 = vmul.f32 %v15626_v28, %v15624_v40 }
0x30a1   : > { %v5222_v46 = vpack.c.bf16 %v5221_v45, %v5221_v45 }
0x30a3   : > { %14281 = vmatmul.mubr.msk.bf16.vlgmr.msra.gmra.mrb[148].mxu1 %vm1107_vm3, %v5222_v46 }
0x30a4   : > { %14285 = vmatpush3.bf16.xpose.msra.mxu1 %v5280_v52  ;;  %14286 = vmatprep.mubr.msk.bf16.mxu1 %vm15920_vm0, %v15919_v0 }
0x30a5   : > { %14290 = vmatprep.subr.bf16.mxu1 %v15919_v0 }
0x30ab   : > { %14287 = vmatmul.mubr.msk.bf16.vlgmr.msra.gmra.mrb[152].mxu1 %vm1060_vm1, %v5272_v47 }
0x30ac   : > { %14292 = vmatprep.mubr.msk.bf16.mxu1 %vm15920_vm0, %v15919_v0 }
0x3176   : > { %v5263_v20 = vpop.f32.mrb[148].mxu1 }
0x3177   : > { %v14282_v57 = vpop.f32.mrb[149].mxu1  ;;  %v5269_v24 = vpack.c.bf16 %v5263_v20, %v5263_v20 }
0x3178   : > { %v5266_v13 = vpop.f32.mrb[150].mxu1 }
0x3179   : > { %v14283_v41 = vpop.f32.mrb[151].mxu1 }
0x317a   : > { %v17024_v41 = vld [vmem:[#allocation2 + $0x2e0] sm:$0xff]  }
0x317e   : > { %v5316_v17 = vpop.f32.mrb[152].mxu1 }
0x317f   : > { %v14288_v51 = vpop.f32.mrb[153].mxu1  ;;  %v5322_v35 = vsel %vm1107_vm3, %v5316_v17, -inf }
0x3180   : > { %5323 = vmax.xlane.f32.xlu1 %v5322_v35  ;;  %v5319_v58 = vpop.f32.mrb[154].mxu1 }
0x3181   : > { %v14289_v59 = vpop.f32.mrb[155].mxu1 }
0x3191   : > { %5494 = vrot.lane.b32.xlu1 %v16934_v5, %s15922_s12 }
0x320d   : > { %v5324_v6 = vpop.xlane.xlu1 %5323 }
0x320e   : > { %v5325_v48 = vsub.f32 %v5316_v17, %v5324_v6 }
0x3210   : > { %v5326_v60 = vmul.f32 1.442695, %v5325_v48 }
0x3211   : > { %v5495_v33 = vpop.permute.xlu1 %5494 }
0x3212   : > { %15627 = vpow2.f32 %v5326_v60  ;;  %v17036_v60 = vld [vmem:[#allocation2 + $0x2e8] sm:$0xff]  }
0x321c   : > { %v15628_v61 = vpop.eup %15627 }
0x321d   : > { %v5328_v62 = vsel %vm1107_vm3, %v15628_v61, 0.0 }
0x321e   : > { %5329 = vadd.xlane.f32.xlu0 %v5328_v62 }
0x3234   : > { %5335 = vrot.lane.b32.xlu0 %v16940_v54, %s15921_s18 }
0x3238   : > { %5496 = vrot.lane.b32.xlu0 %v16946_v36, %s15922_s12 }
0x32ab   : > { %v5330_v4 = vpop.xlane.xlu0 %5329 }
0x32ac   : > { %15629 = vrcp.f32 %v5330_v4 }
0x32af   : > { %v5336_v8 = vpop.permute.xlu0 %5335 }
0x32b0   : > { %v5341_v10 = vsel %vm1123_vm2, %v5336_v8, 0 }
0x32b1   : > { %14291 = vmatpush3.bf16.msra.mxu1 %v5341_v10 }
0x32b2   : > { %14304 = vmatprep.subr.bf16.mxu1 %v15919_v0 }
0x32b3   : > { %v5497_v21 = vpop.permute.xlu0 %5496 }
0x32b4   : > { %v5502_v32 = vsel %vm1060_vm1, %v5497_v21, 0 }
0x32b6   : > { %v15630_v53 = vpop.eup %15629 }
0x32b7   : > { %v5332_v12 = vmul.f32 %v15630_v53, %v15628_v61 }
0x32b9   : > { %v5333_v26 = vpack.c.bf16 %v5332_v12, %v5332_v12 }
0x32bb   : > { %14293 = vmatmul.mubr.msk.bf16.vlgmr.msra.gmra.mrb[156].mxu1 %vm1107_vm3, %v5333_v26 }
0x32bc   : > { %14305 = vmatpush3.bf16.msra.mxu1 %v16990_v18  ;;  %14308 = vmatprep.mubr.msk.bf16.mxu1 %vm15920_vm0, %v15919_v0 }
0x32bd   : > { %14306 = vmatprep.subr.bf16.mxu1 %v15919_v0 }
0x32c0   : > { %14307 = vmatpush3.bf16.msra.mxu1 %v16994_v19 }
0x32c1   : > { %14318 = vmatprep.subr.bf16.mxu1 %v15919_v0 }
0x32c3   : > { %14309 = vmatmul.mubr.msk.bf16.vlgmr.msra.gmra.mrb[160].mxu1 %vm1060_vm1, %v5269_v24 }
0x32c4   : > { %14320 = vmatprep.mubr.msk.bf16.mxu1 %vm15920_vm0, %v15919_v0 }
0x338e   : > { %v5377_v29 = vpop.f32.mrb[156].mxu1 }
0x338f   : > { %v5383_v34 = vpack.c.bf16 %v5377_v29, %v5377_v29  ;;  %v14294_v11 = vpop.f32.mrb[157].mxu1  ;;  %v17047_v29 = vrot.slane %v16934_v5, 4 }
0x3390   : > { %v5380_v30 = vpop.f32.mrb[158].mxu1 }
0x3391   : > { %v14295_v16 = vpop.f32.mrb[159].mxu1  ;;  %14301 = vmatmul.mubr.msk.bf16.vlgmr.msra.gmra.mrb[108].mxu0 %vm1060_vm1, %v5383_v34 }
0x3392   : > { %14313 = vmatpush3.bf16.xpose.msra.mxu0 %v5502_v32  ;;  %14314 = vmatprep.mubr.msk.bf16.mxu0 %vm15920_vm0, %v15919_v0 }
0x3393   : > { %14324 = vmatprep.subr.bf16.mxu0 %v15919_v0 }
0x3396   : > { %v5488_v31 = vpop.f32.mrb[160].mxu1 }
0x3397   : > { %v14310_v38 = vpop.f32.mrb[161].mxu1 }
0x3398   : > { %v5491_v25 = vpop.f32.mrb[162].mxu1 }
0x3399   : > { %v14311_v2 = vpop.f32.mrb[163].mxu1  ;;  %14315 = vmatmul.mubr.msk.bf16.vlgmr.msra.gmra.mrb[112].mxu0 %vm1060_vm1, %v5495_v33  ;;  %v17059_v33 = vld [vmem:[#allocation2 + $0x2f0] sm:$0xff]  }
0x339a   : > { %14328 = vmatprep.mubr.msk.bf16.mxu0 %vm15920_vm0, %v15919_v0  ;;  %14325 = vmatpush3.bf16.msra.mxu0 %v17024_v41 }
0x339b   : > { %14326 = vmatprep.subr.bf16.mxu0 %v15919_v0 }
0x339e   : > { %14327 = vmatpush3.bf16.msra.mxu0 %v17036_v60 }
0x339f   : > { %14338 = vmatprep.subr.bf16.mxu0 %v15919_v0 }
0x3464   : > { %v5433_v39 = vpop.f32.mrb[108].mxu0 }
0x3465   : > { %v17012_v50 = vadd.f32 %v5488_v31, %v5433_v39  ;;  %v14302_v7 = vpop.f32.mrb[109].mxu0 }
0x3466   : > { %v5436_v37 = vpop.f32.mrb[110].mxu0  ;;  %v17065_v7 = vld [vmem:[#allocation2 + $0x2f8] sm:$0xff]  }
0x3467   : > { %v14303_v9 = vpop.f32.mrb[111].mxu0 }
0x346c   : > { %v5538_v40 = vpop.f32.mrb[112].mxu0 }
0x346d   : > { %v14316_v23 = vpop.f32.mrb[113].mxu0  ;;  %v5544_v15 = vsel %vm1107_vm3, %v5538_v40, -inf }
0x346e   : > { %5545 = vmax.xlane.f32.xlu0 %v5544_v15  ;;  %v5541_v28 = vpop.f32.mrb[114].mxu0 }
0x346f   : > { %v14317_v45 = vpop.f32.mrb[115].mxu0 }
0x3484   : > { %5556 = vrot.lane.b32.xlu0 %v16940_v54, %s15922_s12 }
0x3488   : > { %5661 = vrot.lane.b32.xlu0 %v16934_v5, %s15923_s14  ;;  %v17055_v5 = vrot.slane %v16946_v36, 4 }
0x34fb   : > { %v5546_v44 = vpop.xlane.xlu0 %5545 }
0x34fc   : > { %v5547_v46 = vsub.f32 %v5538_v40, %v5546_v44 }
0x34fe   : > { %v5548_v52 = vmul.f32 1.442695, %v5547_v46  ;;  %v17090_v46 = vrot.slane %v16940_v54, 4 }
0x34ff   : > { %v5557_v47 = vpop.permute.xlu0 %5556 }
0x3500   : > { %15631 = vpow2.f32 %v5548_v52  ;;  %v5562_v20 = vsel %vm1123_vm2, %v5557_v47, 0 }
0x3501   : > { %14319 = vmatpush3.bf16.msra.mxu1 %v5562_v20 }
0x3502   : > { %14332 = vmatprep.subr.bf16.mxu1 %v15919_v0 }
0x3503   : > { %v5662_v48 = vpop.permute.xlu0 %5661 }
0x350a   : > { %v15632_v57 = vpop.eup %15631 }
0x350b   : > { %v5550_v13 = vsel %vm1107_vm3, %v15632_v57, 0.0 }
0x350c   : > { %5551 = vadd.xlane.f32.xlu1 %v5550_v13 }
0x351d   : > { %5663 = vrot.lane.b32.xlu1 %v16946_v36, %s15923_s14 }
0x3599   : > { %v5552_v17 = vpop.xlane.xlu1 %5551 }
0x359a   : > { %15633 = vrcp.f32 %v5552_v17 }
0x359d   : > { %v5664_v58 = vpop.permute.xlu1 %5663 }
0x359e   : > { %v5669_v6 = vsel %vm1060_vm1, %v5664_v58, 0 }
0x35a4   : > { %v15634_v51 = vpop.eup %15633 }
0x35a5   : > { %v5554_v35 = vmul.f32 %v15634_v51, %v15632_v57 }
0x35a7   : > { %v5555_v59 = vpack.c.bf16 %v5554_v35, %v5554_v35 }
0x35a9   : > { %14321 = vmatmul.mubr.msk.bf16.vlgmr.msra.gmra.mrb[164].mxu1 %vm1107_vm3, %v5555_v59 }
0x35aa   : > { %14333 = vmatpush3.bf16.xpose.msra.mxu1 %v5669_v6  ;;  %14334 = vmatprep.mubr.msk.bf16.mxu1 %vm15920_vm0, %v15919_v0 }
0x35ab   : > { %14344 = vmatprep.subr.bf16.mxu1 %v15919_v0 }
0x35b1   : > { %14335 = vmatmul.mubr.msk.bf16.vlgmr.msra.gmra.mrb[168].mxu1 %vm1060_vm1, %v5662_v48 }
0x35b2   : > { %14348 = vmatprep.mubr.msk.bf16.mxu1 %vm15920_vm0, %v15919_v0  ;;  %14345 = vmatpush3.bf16.msra.mxu1 %v17059_v33 }
0x35b3   : > { %14346 = vmatprep.subr.bf16.mxu1 %v15919_v0 }
0x35b6   : > { %14347 = vmatpush3.bf16.msra.mxu1 %v17065_v7 }
0x35b7   : > { %14358 = vmatprep.subr.bf16.mxu1 %v15919_v0 }
0x367c   : > { %v5598_v61 = vpop.f32.mrb[164].mxu1 }
0x367d   : > { %v5604_v62 = vpack.c.bf16 %v5598_v61, %v5598_v61  ;;  %v14322_v4 = vpop.f32.mrb[165].mxu1 }
0x367e   : > { %v5601_v8 = vpop.f32.mrb[166].mxu1 }
0x367f   : > { %v14323_v10 = vpop.f32.mrb[167].mxu1  ;;  %14329 = vmatmul.mubr.msk.bf16.vlgmr.msra.gmra.mrb[116].mxu0 %vm1060_vm1, %v5604_v62 }
0x3680   : > { %14340 = vmatprep.mubr.msk.bf16.mxu0 %vm15920_vm0, %v15919_v0 }
0x3684   : > { %v5705_v53 = vpop.f32.mrb[168].mxu1 }
0x3685   : > { %v14336_v12 = vpop.f32.mrb[169].mxu1  ;;  %v5711_v26 = vsel %vm1107_vm3, %v5705_v53, -inf }
0x3686   : > { %5712 = vmax.xlane.f32.xlu0 %v5711_v26  ;;  %v5708_v24 = vpop.f32.mrb[170].mxu1 }
0x3687   : > { %v14337_v21 = vpop.f32.mrb[171].mxu1 }
0x369c   : > { %5723 = vrot.lane.b32.xlu0 %v16940_v54, %s15923_s14 }
0x36a0   : > { %5936 = vrot.lane.b32.xlu0 %v17047_v29, %s15921_s18 }
0x3713   : > { %v5713_v34 = vpop.xlane.xlu0 %5712 }
0x3714   : > { %v5714_v11 = vsub.f32 %v5705_v53, %v5713_v34 }
0x3716   : > { %v5715_v30 = vmul.f32 1.442695, %v5714_v11 }
0x3717   : > { %v5724_v32 = vpop.permute.xlu0 %5723 }
0x3718   : > { %15635 = vpow2.f32 %v5715_v30  ;;  %v5729_v16 = vsel %vm1123_vm2, %v5724_v32, 0 }
0x3719   : > { %14339 = vmatpush3.bf16.msra.mxu0 %v5729_v16 }
0x371a   : > { %14352 = vmatprep.subr.bf16.mxu0 %v15919_v0 }
0x371b   : > { %v5937_v44 = vpop.permute.xlu0 %5936 }
0x3722   : > { %v15636_v31 = vpop.eup %15635 }
0x3723   : > { %v5717_v38 = vsel %vm1107_vm3, %v15636_v31, 0.0 }
0x3724   : > { %5718 = vadd.xlane.f32.xlu1 %v5717_v38 }
0x3735   : > { %5938 = vrot.lane.b32.xlu1 %v17055_v5, %s15921_s18 }
0x3752   : > { %v5654_v25 = vpop.f32.mrb[116].mxu0 }
0x3753   : > { %v17062_v2 = vadd.f32 %v5654_v25, %v17012_v50  ;;  %v14330_v39 = vpop.f32.mrb[117].mxu0  ;;  %v5834_v50 = vsel %vm1060_vm1, %v17055_v5, 0 }
0x3754   : > { %v5657_v37 = vpop.f32.mrb[118].mxu0 }
0x3755   : > { %v14331_v9 = vpop.f32.mrb[119].mxu0 }
0x37b1   : > { %v5719_v36 = vpop.xlane.xlu1 %5718 }
0x37b2   : > { %15637 = vrcp.f32 %v5719_v36 }
0x37b5   : > { %v5939_v28 = vpop.permute.xlu1 %5938 }
0x37b6   : > { %v5944_v45 = vsel %vm1060_vm1, %v5939_v28, 0 }
0x37bc   : > { %v15638_v40 = vpop.eup %15637 }
0x37bd   : > { %v5721_v23 = vmul.f32 %v15638_v40, %v15636_v31 }
0x37bf   : > { %v5722_v15 = vpack.c.bf16 %v5721_v23, %v5721_v23 }
0x37c1   : > { %14341 = vmatmul.mubr.msk.bf16.vlgmr.msra.gmra.mrb[120].mxu0 %vm1107_vm3, %v5722_v15 }
0x37c2   : > { %14353 = vmatpush3.bf16.xpose.msra.mxu0 %v5834_v50  ;;  %14354 = vmatprep.mubr.msk.bf16.mxu0 %vm15920_vm0, %v15919_v0 }
0x37c3   : > { %14364 = vmatprep.subr.bf16.mxu0 %v15919_v0 }
0x37c9   : > { %14355 = vmatmul.mubr.msk.bf16.vlgmr.msra.gmra.mrb[124].mxu0 %vm1060_vm1, %v17047_v29 }
0x37ca   : > { %14365 = vmatpush3.bf16.xpose.msra.mxu0 %v5944_v45  ;;  %14366 = vmatprep.mubr.msk.bf16.mxu0 %vm15920_vm0, %v15919_v0 }
0x37cb   : > { %14376 = vmatprep.subr.bf16.mxu0 %v15919_v0 }
0x37d1   : > { %14367 = vmatmul.mubr.msk.bf16.vlgmr.msra.gmra.mrb[128].mxu0 %vm1060_vm1, %v5937_v44 }
0x37d2   : > { %14377 = vmatpush3.bf16.msra.mxu0 %v16980_v63  ;;  %14380 = vmatprep.mubr.msk.bf16.mxu0 %vm15920_vm0, %v15919_v0  ;;  %v5893_v63 = vsel %vm1123_vm2, %v17090_v46, 0 }
0x37d3   : > { %14378 = vmatprep.subr.bf16.mxu0 %v15919_v0 }
0x37d6   : > { %14379 = vmatpush3.bf16.msra.mxu0 %v16983_v3 }
0x37d7   : > { %14392 = vmatprep.subr.bf16.mxu0 %v15919_v0 }
0x3894   : > { %v5765_v52 = vpop.f32.mrb[120].mxu0 }
0x3895   : > { %v5771_v47 = vpack.c.bf16 %v5765_v52, %v5765_v52  ;;  %v14342_v20 = vpop.f32.mrb[121].mxu0 }
0x3896   : > { %v5768_v57 = vpop.f32.mrb[122].mxu0 }
0x3897   : > { %v14343_v13 = vpop.f32.mrb[123].mxu0  ;;  %14349 = vmatmul.mubr.msk.bf16.vlgmr.msra.gmra.mrb[172].mxu1 %vm1060_vm1, %v5771_v47 }
0x3898   : > { %14359 = vmatpush3.bf16.msra.mxu1 %v5893_v63  ;;  %14360 = vmatprep.mubr.msk.bf16.mxu1 %vm15920_vm0, %v15919_v0 }
0x3899   : > { %14370 = vmatprep.subr.bf16.mxu1 %v15919_v0 }
0x389c   : > { %v5870_v3 = vpop.f32.mrb[124].mxu0 }
0x389d   : > { %v14356_v17 = vpop.f32.mrb[125].mxu0  ;;  %v5876_v54 = vsel %vm1107_vm3, %v5870_v3, -inf }
0x389e   : > { %5877 = vmax.xlane.f32.xlu0 %v5876_v54  ;;  %v5873_v51 = vpop.f32.mrb[126].mxu0 }
0x389f   : > { %v14357_v35 = vpop.f32.mrb[127].mxu0 }
0x38a4   : > { %v5980_v58 = vpop.f32.mrb[128].mxu0 }
0x38a5   : > { %v14368_v59 = vpop.f32.mrb[129].mxu0  ;;  %v5986_v6 = vsel %vm1107_vm3, %v5980_v58, -inf }
0x38a6   : > { %5987 = vmax.xlane.f32.xlu1 %v5986_v6  ;;  %v5983_v48 = vpop.f32.mrb[130].mxu0 }
0x38a7   : > { %v14369_v61 = vpop.f32.mrb[131].mxu0 }
0x38b7   : > { %6135 = vrot.lane.b32.xlu1 %v17055_v5, %s15922_s12 }
0x38bb   : > { %6133 = vrot.lane.b32.xlu1 %v17047_v29, %s15922_s12 }
0x392b   : > { %v5878_v62 = vpop.xlane.xlu0 %5877 }
0x392c   : > { %v5879_v4 = vsub.f32 %v5870_v3, %v5878_v62 }
0x392e   : > { %v5880_v8 = vmul.f32 1.442695, %v5879_v4 }
0x3930   : > { %15639 = vpow2.f32 %v5880_v8 }
0x3933   : > { %v5988_v10 = vpop.xlane.xlu1 %5987 }
0x3934   : > { %v5989_v53 = vsub.f32 %v5980_v58, %v5988_v10 }
0x3936   : > { %v5990_v12 = vmul.f32 1.442695, %v5989_v53 }
0x3938   : > { %15641 = vpow2.f32 %v5990_v12 }
0x393a   : > { %v15640_v26 = vpop.eup %15639 }
0x393b   : > { %v5882_v24 = vsel %vm1107_vm3, %v15640_v26, 0.0 }
0x393c   : > { %5883 = vadd.xlane.f32.xlu0 %v5882_v24 }
0x3942   : > { %v15642_v21 = vpop.eup %15641 }
0x3943   : > { %v5992_v34 = vsel %vm1107_vm3, %v15642_v21, 0.0 }
0x3944   : > { %5993 = vadd.xlane.f32.xlu0 %v5992_v34 }
0x395a   : > { %5998 = vrot.lane.b32.xlu0 %v17090_v46, %s15921_s18 }
0x396a   : > { %v5821_v11 = vpop.f32.mrb[172].mxu1 }
0x396b   : > { %v17109_v30 = vadd.f32 %v5821_v11, %v17062_v2  ;;  %v14350_v32 = vpop.f32.mrb[173].mxu1 }
0x396c   : > { %v5824_v16 = vpop.f32.mrb[174].mxu1 }
0x396d   : > { %v14351_v31 = vpop.f32.mrb[175].mxu1 }
0x39c9   : > { %v5884_v38 = vpop.xlane.xlu0 %5883 }
0x39ca   : > { %15643 = vrcp.f32 %v5884_v38 }
0x39d1   : > { %v5994_v25 = vpop.xlane.xlu0 %5993 }
0x39d2   : > { %15645 = vrcp.f32 %v5994_v25 }
0x39d4   : > { %v15644_v39 = vpop.eup %15643 }
0x39d5   : > { %v5886_v37 = vmul.f32 %v15644_v39, %v15640_v26  ;;  %v5999_v9 = vpop.permute.xlu0 %5998 }
0x39d6   : > { %v6004_v40 = vsel %vm1123_vm2, %v5999_v9, 0 }
0x39d7   : > { %v5887_v36 = vpack.c.bf16 %v5886_v37, %v5886_v37 }
0x39d9   : > { %14361 = vmatmul.mubr.msk.bf16.vlgmr.msra.gmra.mrb[176].mxu1 %vm1107_vm3, %v5887_v36 }
0x39da   : > { %14371 = vmatpush3.bf16.msra.mxu1 %v6004_v40  ;;  %14372 = vmatprep.mubr.msk.bf16.mxu1 %vm15920_vm0, %v15919_v0 }
0x39db   : > { %14384 = vmatprep.subr.bf16.mxu1 %v15919_v0 }
0x39dc   : > { %v15646_v2 = vpop.eup %15645 }
0x39dd   : > { %v5996_v23 = vmul.f32 %v15646_v2, %v15642_v21 }
0x39df   : > { %v5997_v15 = vpack.c.bf16 %v5996_v23, %v5996_v23 }
0x39e1   : > { %14373 = vmatmul.mubr.msk.bf16.vlgmr.msra.gmra.mrb[180].mxu1 %vm1107_vm3, %v5997_v15 }
0x39e2   : > { %14385 = vmatpush3.bf16.msra.mxu1 %v16990_v18  ;;  %14388 = vmatprep.mubr.msk.bf16.mxu1 %vm15920_vm0, %v15919_v0  ;;  %v6136_v18 = vpop.permute.xlu1 %6135 }
0x39e3   : > { %14386 = vmatprep.subr.bf16.mxu1 %v15919_v0  ;;  %v6141_v63 = vsel %vm1060_vm1, %v6136_v18, 0 }
0x39e6   : > { %14387 = vmatpush3.bf16.msra.mxu1 %v16994_v19  ;;  %v6134_v3 = vpop.permute.xlu1 %6133 }
0x39e7   : > { %14398 = vmatprep.subr.bf16.mxu1 %v15919_v0 }
0x3aac   : > { %v5929_v50 = vpop.f32.mrb[176].mxu1 }
0x3aad   : > { %v5935_v28 = vpack.c.bf16 %v5929_v50, %v5929_v50  ;;  %v14362_v45 = vpop.f32.mrb[177].mxu1 }
0x3aae   : > { %v5932_v44 = vpop.f32.mrb[178].mxu1 }
0x3aaf   : > { %v14363_v52 = vpop.f32.mrb[179].mxu1  ;;  %14389 = vmatmul.mubr.msk.bf16.vlgmr.msra.gmra.mrb[184].mxu1 %vm1060_vm1, %v5935_v28  ;;  %v12814_v44 = vld [vmem:[#allocation6 + $0xe] ss:$0 sm:$0xff] }
0x3ab0   : > { %14400 = vmatprep.mubr.msk.bf16.mxu1 %vm15920_vm0, %v15919_v0  ;;  %v6447_v52 = vadd.f32 %v12814_v44, %v17109_v30 }
0x3ab4   : > { %v6040_v47 = vpop.f32.mrb[180].mxu1 }
0x3ab5   : > { %v6046_v20 = vpack.c.bf16 %v6040_v47, %v6040_v47  ;;  %v14374_v57 = vpop.f32.mrb[181].mxu1 }
0x3ab6   : > { %v6043_v13 = vpop.f32.mrb[182].mxu1 }
0x3ab7   : > { %v14375_v19 = vpop.f32.mrb[183].mxu1  ;;  %14381 = vmatmul.mubr.msk.bf16.vlgmr.msra.gmra.mrb[132].mxu0 %vm1060_vm1, %v6046_v20 }
0x3ab8   : > { %14393 = vmatpush3.bf16.xpose.msra.mxu0 %v6141_v63  ;;  %14394 = vmatprep.mubr.msk.bf16.mxu0 %vm15920_vm0, %v15919_v0 }
0x3ab9   : > { %14404 = vmatprep.subr.bf16.mxu0 %v15919_v0 }
0x3abf   : > { %14395 = vmatmul.mubr.msk.bf16.vlgmr.msra.gmra.mrb[136].mxu0 %vm1060_vm1, %v6134_v3 }
0x3ac0   : > { %14405 = vmatpush3.bf16.msra.mxu0 %v17024_v41  ;;  %14408 = vmatprep.mubr.msk.bf16.mxu0 %vm15920_vm0, %v15919_v0 }
0x3ac1   : > { %14406 = vmatprep.subr.bf16.mxu0 %v15919_v0 }
0x3ac4   : > { %14407 = vmatpush3.bf16.msra.mxu0 %v17036_v60 }
0x3ac5   : > { %14418 = vmatprep.subr.bf16.mxu0 %v15919_v0 }
0x3b82   : > { %v6127_v17 = vpop.f32.mrb[184].mxu1 }
0x3b83   : > { %v14390_v54 = vpop.f32.mrb[185].mxu1 }
0x3b84   : > { %v6130_v51 = vpop.f32.mrb[186].mxu1 }
0x3b85   : > { %v14391_v35 = vpop.f32.mrb[187].mxu1 }
0x3b8a   : > { %v6084_v58 = vpop.f32.mrb[132].mxu0 }
0x3b8b   : > { %v17138_v59 = vadd.f32 %v6127_v17, %v6084_v58  ;;  %v14382_v6 = vpop.f32.mrb[133].mxu0 }
0x3b8c   : > { %v6087_v48 = vpop.f32.mrb[134].mxu0 }
0x3b8d   : > { %v14383_v61 = vpop.f32.mrb[135].mxu0 }
0x3b92   : > { %v6177_v41 = vpop.f32.mrb[136].mxu0 }
0x3b93   : > { %v14396_v62 = vpop.f32.mrb[137].mxu0  ;;  %v6183_v4 = vsel %vm1107_vm3, %v6177_v41, -inf }
0x3b94   : > { %6184 = vmax.xlane.f32.xlu0 %v6183_v4  ;;  %v6180_v8 = vpop.f32.mrb[138].mxu0 }
0x3b95   : > { %v14397_v10 = vpop.f32.mrb[139].mxu0 }
0x3b96   : > { %v15363_v10 = vld [vmem:[#allocation2 + $0x440] sm:$0xff]  }
0x3baa   : > { %6195 = vrot.lane.b32.xlu0 %v17090_v46, %s15922_s12 }
0x3bae   : > { %6288 = vrot.lane.b32.xlu0 %v17047_v29, %s15923_s14 }
0x3c21   : > { %v6185_v60 = vpop.xlane.xlu0 %6184 }
0x3c22   : > { %v6186_v53 = vsub.f32 %v6177_v41, %v6185_v60 }
0x3c24   : > { %v6187_v12 = vmul.f32 1.442695, %v6186_v53 }
0x3c25   : > { %v6196_v26 = vpop.permute.xlu0 %6195 }
0x3c26   : > { %15647 = vpow2.f32 %v6187_v12  ;;  %v6201_v24 = vsel %vm1123_vm2, %v6196_v26, 0 }
0x3c27   : > { %14399 = vmatpush3.bf16.msra.mxu1 %v6201_v24 }
0x3c28   : > { %14412 = vmatprep.subr.bf16.mxu1 %v15919_v0 }
0x3c29   : > { %v6289_v25 = vpop.permute.xlu0 %6288 }
0x3c30   : > { %v15648_v21 = vpop.eup %15647 }
0x3c31   : > { %v6189_v34 = vsel %vm1107_vm3, %v15648_v21, 0.0 }
0x3c32   : > { %6190 = vadd.xlane.f32.xlu1 %v6189_v34 }
0x3c43   : > { %6290 = vrot.lane.b32.xlu1 %v17055_v5, %s15923_s14 }
0x3cbf   : > { %v6191_v11 = vpop.xlane.xlu1 %6190 }
0x3cc0   : > { %15649 = vrcp.f32 %v6191_v11 }
0x3cc3   : > { %v6291_v16 = vpop.permute.xlu1 %6290 }
0x3cc4   : > { %v6296_v38 = vsel %vm1060_vm1, %v6291_v16, 0 }
0x3cca   : > { %v15650_v29 = vpop.eup %15649 }
0x3ccb   : > { %v6193_v32 = vmul.f32 %v15650_v29, %v15648_v21 }
0x3ccd   : > { %v6194_v31 = vpack.c.bf16 %v6193_v32, %v6193_v32 }
0x3ccf   : > { %14401 = vmatmul.mubr.msk.bf16.vlgmr.msra.gmra.mrb[188].mxu1 %vm1107_vm3, %v6194_v31 }
0x3cd0   : > { %14413 = vmatpush3.bf16.xpose.msra.mxu1 %v6296_v38  ;;  %14414 = vmatprep.mubr.msk.bf16.mxu1 %vm15920_vm0, %v15919_v0 }
0x3cd1   : > { %14424 = vmatprep.subr.bf16.mxu1 %v15919_v0 }
0x3cd7   : > { %14415 = vmatmul.mubr.msk.bf16.vlgmr.msra.gmra.mrb[192].mxu1 %vm1060_vm1, %v6289_v25 }
0x3cd8   : > { %14425 = vmatpush3.bf16.msra.mxu1 %v17059_v33  ;;  %14428 = vmatprep.mubr.msk.bf16.mxu1 %vm15920_vm0, %v15919_v0  ;;  %v12736_v33 = vld [vmem:[#allocation6 + $0x1c] ss:$0 sm:$0xff] }
0x3cd9   : > { %14426 = vmatprep.subr.bf16.mxu1 %v15919_v0  ;;  %v4766_v40 = vadd.f32 %v16942_v22, %v12736_v33  ;;  %v4769_v28 = vadd.f32 %v16944_v27, %v12736_v33  ;;  %v6449_v22 = vadd.f32 %v6447_v52, %v16898_v14  ;;  %v15370_v33 = vld [vmem:[#allocation2 + $0x478] sm:$0xff]  }
0x3cdb   : > { %v4772_v45 = vadd.f32 %v4766_v40, %v16876_v49  ;;  %v4773_v18 = vadd.f32 %v4769_v28, %v16878_v55  ;;  %v15371_v40 = vld [vmem:[#allocation2 + $0x400] sm:$0xff]  }
0x3cdc   : > { %14427 = vmatpush3.bf16.msra.mxu1 %v17065_v7 }
0x3cdd   : > { %14452 = vmatprep.subr.bf16.mxu1 %v15919_v0 }
0x3da2   : > { %v6237_v5 = vpop.f32.mrb[188].mxu1 }
0x3da3   : > { %v6243_v39 = vpack.c.bf16 %v6237_v5, %v6237_v5  ;;  %v14402_v37 = vpop.f32.mrb[189].mxu1  ;;  %v15364_v5 = vld [vmem:[#allocation2 + $0x448] sm:$0xff]  }
0x3da4   : > { %v6240_v9 = vpop.f32.mrb[190].mxu1  ;;  %v15366_v37 = vld [vmem:[#allocation2 + $0x458] sm:$0xff]  }
0x3da5   : > { %v14403_v36 = vpop.f32.mrb[191].mxu1  ;;  %14409 = vmatmul.mubr.msk.bf16.vlgmr.msra.gmra.mrb[140].mxu0 %vm1060_vm1, %v6243_v39  ;;  %v15365_v39 = vld [vmem:[#allocation2 + $0x450] sm:$0xff]   ;;  %v15368_v9 = vld [vmem:[#allocation2 + $0x468] sm:$0xff]  }
0x3da6   : > { %14420 = vmatprep.mubr.msk.bf16.mxu0 %vm15920_vm0, %v15919_v0  ;;  %v15369_v36 = vld [vmem:[#allocation2 + $0x470] sm:$0xff]  }
0x3daa   : > { %v6332_v2 = vpop.f32.mrb[192].mxu1 }
0x3dab   : > { %v14416_v23 = vpop.f32.mrb[193].mxu1  ;;  %v6338_v15 = vsel %vm1107_vm3, %v6332_v2, -inf }
0x3dac   : > { %6339 = vmax.xlane.f32.xlu1 %v6338_v15  ;;  %v6335_v7 = vpop.f32.mrb[194].mxu1  ;;  %v15373_v23 = vld [vmem:[#allocation2 + $0x410] sm:$0xff]  }
0x3dad   : > { %v14417_v50 = vpop.f32.mrb[195].mxu1 }
0x3db0   : > { %4774 = vadd.xlane.f32.xlu1 %v4772_v45 }
0x3db4   : > { %4776 = vadd.xlane.f32.xlu1 %v4773_v18 }
0x3db8   : > { %6453 = vadd.xlane.f32.xlu1 %v6449_v22 }
0x3e39   : > { %v6340_v47 = vpop.xlane.xlu1 %6339 }
0x3e3a   : > { %v6341_v20 = vsub.f32 %v6332_v2, %v6340_v47  ;;  %v15372_v2 = vld [vmem:[#allocation2 + $0x408] sm:$0xff]  }
0x3e3c   : > { %v6342_v57 = vmul.f32 1.442695, %v6341_v20 }
0x3e3d   : > { %v4775_v49 = vpop.xlane.xlu1 %4774 }
0x3e3e   : > { %15651 = vpow2.f32 %v6342_v57  ;;  %v4778_v53 = vmul.f32 0.0078125, %v4775_v49 }
0x3e40   : > { %v4780_v29 = vsub.f32 %v4772_v45, %v4778_v53 }
0x3e41   : > { %v4777_v27 = vpop.xlane.xlu1 %4776 }
0x3e42   : > { %v4779_v30 = vmul.f32 0.0078125, %v4777_v27  ;;  %v4782_v38 = vmul.f32 %v4780_v29, %v4780_v29 }
0x3e44   : > { %v17175_v55 = vsub.f32 %v4773_v18, %v4779_v30  ;;  %v12754_v30 = vld [vmem:[#allocation6 + $0x26] ss:$0 sm:$0xff] }
0x3e45   : > { %v6454_v24 = vpop.xlane.xlu1 %6453 }
0x3e46   : > { %v4783_v51 = vmul.f32 %v17175_v55, %v17175_v55  ;;  %v6457_v32 = vmul.f32 0.0078125, %v6454_v24 }
0x3e48   : > { %v15652_v13 = vpop.eup %15651  ;;  %v17190_v31 = vsub.f32 %v6449_v22, %v6457_v32  ;;  %v15381_v32 = vld [vmem:[#allocation2 + $0x490] sm:$0xff]  }
0x3e49   : > { %v6344_v63 = vsel %vm1107_vm3, %v15652_v13, 0.0 }
0x3e4a   : > { %6345 = vadd.xlane.f32.xlu0 %v6344_v63  ;;  %v6461_v25 = vmul.f32 %v17190_v31, %v17190_v31 }
0x3e60   : > { %6350 = vrot.lane.b32.xlu0 %v17090_v46, %s15923_s14 }
0x3e78   : > { %v6281_v19 = vpop.f32.mrb[140].mxu0 }
0x3e79   : > { %v6287_v14 = vadd.f32 %v6281_v19, %v17138_v59  ;;  %v14410_v3 = vpop.f32.mrb[141].mxu0 }
0x3e7a   : > { %v6284_v17 = vpop.f32.mrb[142].mxu0 }
0x3e7b   : > { %v14411_v54 = vpop.f32.mrb[143].mxu0 }
0x3e7c   : > { %v15375_v54 = vld [vmem:[#allocation2 + $0x420] sm:$0xff]  }
0x3e7f   : > { %4786 = vadd.xlane.f32.xlu0 %v4783_v51 }
0x3ed7   : > { %v6346_v35 = vpop.xlane.xlu0 %6345 }
0x3ed8   : > { %15653 = vrcp.f32 %v6346_v35  ;;  %v15376_v35 = vld [vmem:[#allocation2 + $0x428] sm:$0xff]  }
0x3edb   : > { %v6351_v58 = vpop.permute.xlu0 %6350 }
0x3edc   : > { %v6356_v46 = vsel %vm1123_vm2, %v6351_v58, 0  ;;  %v15378_v58 = vld [vmem:[#allocation2 + $0x438] sm:$0xff]  }
0x3edd   : > { %14419 = vmatpush3.bf16.msra.mxu0 %v6356_v46 }
0x3ede   : > { %14432 = vmatprep.subr.bf16.mxu0 %v15919_v0 }
0x3ee2   : > { %v15654_v6 = vpop.eup %15653 }
0x3ee3   : > { %v6348_v48 = vmul.f32 %v15654_v6, %v15652_v13  ;;  %v12753_v13 = vld [vmem:[#allocation6 + $0x22] ss:$0 sm:$0xff] }
0x3ee5   : > { %v6349_v61 = vpack.c.bf16 %v6348_v48, %v6348_v48 }
0x3ee7   : > { %14421 = vmatmul.mubr.msk.bf16.vlgmr.msra.gmra.mrb[144].mxu0 %vm1107_vm3, %v6349_v61 }
0x3ee8   : > { %14448 = vmatprep.mubr.msk.bf16.mxu0 %vm15920_vm0, %v15919_v0  ;;  %14433 = vmatpush3.bf16.msra.mxu0 %v15371_v40 }
0x3ee9   : > { %14434 = vmatprep.subr.bf16.mxu0 %v15919_v0 }
0x3eec   : > { %14435 = vmatpush3.bf16.msra.mxu0 %v15372_v2 }
0x3eed   : > { %14436 = vmatprep.subr.bf16.mxu0 %v15919_v0 }
0x3ef0   : > { %14437 = vmatpush3.bf16.msra.mxu0 %v15373_v23 }
0x3ef1   : > { %14438 = vmatprep.subr.bf16.mxu0 %v15919_v0 }
0x3f0c   : > { %v4787_v15 = vpop.xlane.xlu0 %4786 }
0x3f0d   : > { %v4789_v7 = vmul.f32 0.0078125, %v4787_v15  ;;  %v12817_v15 = vld [vmem:[#allocation6 + $0x13] ss:$0 sm:$0xff] }
0x3f0f   : > { %v4791_v50 = vadd.f32 1e-05, %v4789_v7 }
0x3f11   : > { %15655 = vrsqrt.f32 %v4791_v50 }
0x3f1b   : > { %v15656_v20 = vpop.eup %15655 }
0x3f1c   : > { %v4795_v57 = vmul.f32 %v15656_v20, %v17175_v55  ;;  %v15377_v55 = vld [vmem:[#allocation2 + $0x430] sm:$0xff]  }
0x3f1d   : > { %v12835_v20 = vld [vmem:[#allocation6 + $0x15] ss:$0 sm:$0xff] }
0x3f1e   : > { %v4801_v27 = vmul.f32 %v12753_v13, %v4795_v57 }
0x3f20   : > { %v4807_v17 = vadd.f32 %v12754_v30, %v4801_v27 }
0x3fba   : > { %v6392_v59 = vpop.f32.mrb[144].mxu0 }
0x3fbb   : > { %v6398_v41 = vpack.c.bf16 %v6392_v59, %v6392_v59  ;;  %v14422_v62 = vpop.f32.mrb[145].mxu0 }
0x3fbc   : > { %v6395_v4 = vpop.f32.mrb[146].mxu0 }
0x3fbd   : > { %v14423_v8 = vpop.f32.mrb[147].mxu0  ;;  %14429 = vmatmul.mubr.msk.bf16.vlgmr.msra.gmra.mrb[196].mxu1 %vm1060_vm1, %v6398_v41 }
0x3fbe   : > { %14468 = vmatprep.mubr.msk.bf16.mxu1 %vm15920_vm0, %v15919_v0  ;;  %14453 = vmatpush3.bf16.msra.mxu1 %v15363_v10  ;;  %v12815_v8 = vld [vmem:[#allocation6 + $0x27] ss:$0 sm:$0xff] }
0x3fbf   : > { %14454 = vmatprep.subr.bf16.mxu1 %v15919_v0 }
0x3fc2   : > { %14455 = vmatpush3.bf16.msra.mxu1 %v15364_v5  ;;  %v15386_v5 = vld [vmem:[#allocation2 + $0x4b8] sm:$0xff]  }
0x3fc3   : > { %14456 = vmatprep.subr.bf16.mxu1 %v15919_v0 }
0x3fc6   : > { %14457 = vmatpush3.bf16.msra.mxu1 %v15365_v39  ;;  %v12826_v39 = vld [vmem:[#allocation6 + $0x14] ss:$0 sm:$0xff] }
0x3fc7   : > { %14458 = vmatprep.subr.bf16.mxu1 %v15919_v0 }
0x3fca   : > { %14459 = vmatpush3.bf16.msra.mxu1 %v15366_v37 }
0x3fcb   : > { %14460 = vmatprep.subr.bf16.mxu1 %v15919_v0 }
0x4090   : > { %v6436_v60 = vpop.f32.mrb[196].mxu1 }
0x4091   : > { %v6442_v12 = vadd.f32 %v6436_v60, %v6287_v14  ;;  %v14430_v26 = vpop.f32.mrb[197].mxu1  ;;  %v15374_v14 = vld [vmem:[#allocation2 + $0x418] sm:$0xff]  }
0x4092   : > { %v6439_v21 = vpop.f32.mrb[198].mxu1  ;;  %14439 = vmatpush3.bf16.msra.mxu0 %v15374_v14 }
0x4093   : > { %v6448_v34 = vadd.f32 %v12814_v44, %v6442_v12  ;;  %v14431_v11 = vpop.f32.mrb[199].mxu1  ;;  %14440 = vmatprep.subr.bf16.mxu0 %v15919_v0  ;;  %v12816_v12 = vld [vmem:[#allocation6 + $0x2d] ss:$0 sm:$0xff] }
0x4095   : > { %v6450_v16 = vadd.f32 %v6448_v34, %v16900_v56  ;;  %v15367_v56 = vld [vmem:[#allocation2 + $0x460] sm:$0xff]  }
0x4096   : > { %14461 = vmatpush3.bf16.msra.mxu1 %v15367_v56  ;;  %14441 = vmatpush3.bf16.msra.mxu0 %v15375_v54  ;;  %v15379_v34 = vld [vmem:[#allocation2 + $0x480] sm:$0xff]  }
0x4097   : > { %6455 = vadd.xlane.f32.xlu1 %v6450_v16  ;;  %14462 = vmatprep.subr.bf16.mxu1 %v15919_v0 }
0x4098   : > { %14442 = vmatprep.subr.bf16.mxu0 %v15919_v0 }
0x409a   : > { %14463 = vmatpush3.bf16.msra.mxu1 %v15368_v9  ;;  %14443 = vmatpush3.bf16.msra.mxu0 %v15376_v35 }
0x409b   : > { %4784 = vadd.xlane.f32.xlu1 %v4782_v38  ;;  %14464 = vmatprep.subr.bf16.mxu1 %v15919_v0  ;;  %v15384_v38 = vld [vmem:[#allocation2 + $0x4a8] sm:$0xff]  }
0x409c   : > { %14444 = vmatprep.subr.bf16.mxu0 %v15919_v0 }
0x409e   : > { %14465 = vmatpush3.bf16.msra.mxu1 %v15369_v36  ;;  %14445 = vmatpush3.bf16.msra.mxu0 %v15377_v55 }
0x409f   : > { %6463 = vadd.xlane.f32.xlu1 %v6461_v25  ;;  %14466 = vmatprep.subr.bf16.mxu1 %v15919_v0  ;;  %v15385_v25 = vld [vmem:[#allocation2 + $0x4b0] sm:$0xff]  }
0x40a0   : > { %14446 = vmatprep.subr.bf16.mxu0 %v15919_v0 }
0x40a2   : > { %14467 = vmatpush3.bf16.msra.mxu1 %v15370_v33  ;;  %14447 = vmatpush3.bf16.msra.mxu0 %v15378_v58 }
0x40a3   : > { %14492 = vmatprep.subr.bf16.mxu1 %v15919_v0  ;;  %14472 = vmatprep.subr.bf16.mxu0 %v15919_v0 }
0x4124   : > { %v6456_v28 = vpop.xlane.xlu1 %6455 }
0x4125   : > { %v6458_v45 = vmul.f32 0.0078125, %v6456_v28 }
0x4127   : > { %v6460_v44 = vsub.f32 %v6450_v16, %v6458_v45  ;;  %v15382_v16 = vld [vmem:[#allocation2 + $0x498] sm:$0xff]  }
0x4128   : > { %v4785_v52 = vpop.xlane.xlu1 %4784 }
0x4129   : > { %v4788_v18 = vmul.f32 0.0078125, %v4785_v52  ;;  %v6462_v22 = vmul.f32 %v6460_v44, %v6460_v44 }
0x412b   : > { %v4790_v47 = vadd.f32 1e-05, %v4788_v18  ;;  %6465 = vadd.xlane.f32.xlu1 %v6462_v22 }
0x412c   : > { %v6464_v46 = vpop.xlane.xlu1 %6463 }
0x412d   : > { %15657 = vrsqrt.f32 %v4790_v47  ;;  %v6467_v6 = vmul.f32 0.0078125, %v6464_v46 }
0x412f   : > { %v6469_v48 = vadd.f32 1e-05, %v6467_v6 }
0x4131   : > { %15659 = vrsqrt.f32 %v6469_v48 }
0x4137   : > { %v15658_v63 = vpop.eup %15657 }
0x4138   : > { %v4794_v49 = vmul.f32 %v15658_v63, %v4780_v29  ;;  %v15380_v29 = vld [vmem:[#allocation2 + $0x488] sm:$0xff]  }
0x413a   : > { %v4800_v19 = vmul.f32 %v12753_v13, %v4794_v49 }
0x413b   : > { %v15660_v62 = vpop.eup %15659 }
0x413c   : > { %v4806_v3 = vadd.f32 %v12754_v30, %v4800_v19  ;;  %v6473_v4 = vmul.f32 %v15660_v62, %v17190_v31  ;;  %v15383_v31 = vld [vmem:[#allocation2 + $0x4a0] sm:$0xff]  }
0x413e   : > { %v17205_v51 = vpack.c.bf16 %v4807_v17, %v4806_v3  ;;  %v6479_v53 = vmul.f32 %v12815_v8, %v6473_v4 }
0x4140   : > { %14469 = vmatmul.mubr.bf16.vlgmr.msra.gmra.mrb[200].mxu1 %v17205_v51  ;;  %v17216_v24 = vadd.f32 %v12816_v12, %v6479_v53 }
0x4141   : > { %14494 = vmatprep.mubr.msk.bf16.mxu1 %vm15920_vm0, %v15919_v0 }
0x41b8   : > { %v6466_v61 = vpop.xlane.xlu1 %6465 }
0x41b9   : > { %v6468_v59 = vmul.f32 0.0078125, %v6466_v61 }
0x41bb   : > { %v6470_v41 = vadd.f32 1e-05, %v6468_v59 }
0x41bd   : > { %15661 = vrsqrt.f32 %v6470_v41 }
0x41c7   : > { %v15662_v10 = vpop.eup %15661 }
0x41c8   : > { %v6474_v60 = vmul.f32 %v15662_v10, %v6460_v44 }
0x41ca   : > { %v6480_v26 = vmul.f32 %v12815_v8, %v6474_v60 }
0x41cc   : > { %v17218_v21 = vadd.f32 %v12816_v12, %v6480_v26 }
0x41ce   : > { %v6491_v11 = vpack.c.bf16 %v17218_v21, %v17216_v24 }
0x41d0   : > { %14449 = vmatmul.mubr.bf16.vlgmr.msra.gmra.mrb[148].mxu0 %v6491_v11 }
0x41d1   : > { %14473 = vmatpush3.bf16.msra.mxu0 %v15379_v34  ;;  %14488 = vmatprep.mubr.msk.bf16.mxu0 %vm15920_vm0, %v15919_v0 }
0x41d2   : > { %14474 = vmatprep.subr.bf16.mxu0 %v15919_v0 }
0x41d5   : > { %14475 = vmatpush3.bf16.msra.mxu0 %v15380_v29 }
0x41d6   : > { %14476 = vmatprep.subr.bf16.mxu0 %v15919_v0 }
0x41d9   : > { %14477 = vmatpush3.bf16.msra.mxu0 %v15381_v32 }
0x41da   : > { %14478 = vmatprep.subr.bf16.mxu0 %v15919_v0 }
0x41dd   : > { %14479 = vmatpush3.bf16.msra.mxu0 %v15382_v16 }
0x41de   : > { %14480 = vmatprep.subr.bf16.mxu0 %v15919_v0 }
0x41e1   : > { %14481 = vmatpush3.bf16.msra.mxu0 %v15383_v31 }
0x41e2   : > { %14482 = vmatprep.subr.bf16.mxu0 %v15919_v0 }
0x41e5   : > { %14483 = vmatpush3.bf16.msra.mxu0 %v15384_v38 }
0x41e6   : > { %14484 = vmatprep.subr.bf16.mxu0 %v15919_v0 }
0x41e9   : > { %14485 = vmatpush3.bf16.msra.mxu0 %v15385_v25 }
0x41ea   : > { %14486 = vmatprep.subr.bf16.mxu0 %v15919_v0 }
0x41ed   : > { %14487 = vmatpush3.bf16.msra.mxu0 %v15386_v5 }
0x41ee   : > { %14516 = vmatprep.subr.bf16.mxu0 %v15919_v0 }
0x41f0   : > { %14489 = vmatmul.mubr.bf16.vlgmr.msra.gmra.mrb[152].mxu0 %v17205_v51 }
0x41f1   : > { %14520 = vmatprep.mubr.msk.bf16.mxu0 %vm15920_vm0, %v15919_v0 }
0x4213   : > { %v6706_v37 = vpop.f32.mrb[200].mxu1 }
0x4214   : > { %v14470_v56 = vpop.f32.mrb[201].mxu1  ;;  %v6707_v36 = vadd.f32 %v12826_v39, %v6706_v37 }
0x4215   : > { %v6709_v9 = vpop.f32.mrb[202].mxu1 }
0x4216   : > { %v6710_v33 = vadd.f32 %v12826_v39, %v6709_v9  ;;  %v14471_v40 = vpop.f32.mrb[203].mxu1 }
0x4218   : > { %v17235_v2 = vpack.c.bf16 %v6710_v33, %v6707_v36  ;;  %v17275_v36 = vld [vmem:[#allocation2 + $0x4d0] sm:$0xff]   ;;  %v17278_v33 = vld [vmem:[#allocation2 + $0x4d8] sm:$0xff]  }
0x4219   : > { %14517 = vmatpush3.bf16.msra.mxu0 %v17275_v36 }
0x421a   : > { %v6849_v23 = vsel %vm1060_vm1, %v17235_v2, 0  ;;  %14518 = vmatprep.subr.bf16.mxu0 %v15919_v0 }
0x421b   : > { %14493 = vmatpush3.bf16.xpose.msra.mxu1 %v6849_v23 }
0x421c   : > { %14498 = vmatprep.subr.bf16.mxu1 %v15919_v0 }
0x421d   : > { %14519 = vmatpush3.bf16.msra.mxu0 %v17278_v33 }
0x421e   : > { %14532 = vmatprep.subr.bf16.mxu0 %v15919_v0 }
0x42a3   : > { %v6595_v7 = vpop.f32.mrb[148].mxu0 }
0x42a4   : > { %v6596_v50 = vadd.f32 %v12817_v15, %v6595_v7  ;;  %v14450_v28 = vpop.f32.mrb[149].mxu0  ;;  %v17283_v7 = vld [vmem:[#allocation2 + $0x4c0] sm:$0xff]  }
0x42a5   : > { %v6598_v45 = vpop.f32.mrb[150].mxu0  ;;  %v17287_v28 = vld [vmem:[#allocation2 + $0x4c8] sm:$0xff]  }
0x42a6   : > { %v6599_v44 = vadd.f32 %v12817_v15, %v6598_v45  ;;  %v14451_v52 = vpop.f32.mrb[151].mxu0  ;;  %v6823_v18 = vmul.f32 0.17677669, %v6596_v50 }
0x42a8   : > { %v6824_v22 = vmul.f32 0.17677669, %v6599_v44 }
0x42aa   : > { %v17240_v47 = vpack.c.bf16 %v6824_v22, %v6823_v18 }
0x42ac   : > { %6951 = vrot.lane.b32.xlu0 %v17240_v47, %s15921_s18  ;;  %14495 = vmatmul.mubr.msk.bf16.vlgmr.msra.gmra.mrb[204].mxu1 %vm1060_vm1, %v17240_v47 }
0x42ad   : > { %14500 = vmatprep.mubr.msk.bf16.mxu1 %vm15920_vm0, %v15919_v0 }
0x42c3   : > { %v6816_v57 = vpop.f32.mrb[152].mxu0 }
0x42c4   : > { %v14490_v13 = vpop.f32.mrb[153].mxu0  ;;  %v6817_v49 = vadd.f32 %v12835_v20, %v6816_v57 }
0x42c5   : > { %v6819_v63 = vpop.f32.mrb[154].mxu0 }
0x42c6   : > { %v6820_v27 = vadd.f32 %v12835_v20, %v6819_v63  ;;  %v14491_v30 = vpop.f32.mrb[155].mxu0 }
0x42c8   : > { %v17248_v19 = vpack.c.bf16 %v6820_v27, %v6817_v49 }
0x42ca   : > { %v6907_v14 = vsel %vm1123_vm2, %v17248_v19, 0 }
0x42cb   : > { %14499 = vmatpush3.bf16.msra.mxu1 %v6907_v14 }
0x42cc   : > { %14504 = vmatprep.subr.bf16.mxu1 %v15919_v0 }
0x431e   : > { %v6952_v60 = vpop.permute.xlu0 %6951 }
0x437f   : > { %v6885_v3 = vpop.f32.mrb[204].mxu1 }
0x4380   : > { %v14496_v17 = vpop.f32.mrb[205].mxu1  ;;  %v6891_v54 = vsel %vm1107_vm3, %v6885_v3, -inf }
0x4381   : > { %6892 = vmax.xlane.f32.xlu1 %v6891_v54  ;;  %v6888_v35 = vpop.f32.mrb[206].mxu1 }
0x4382   : > { %v14497_v55 = vpop.f32.mrb[207].mxu1 }
0x440e   : > { %v6893_v58 = vpop.xlane.xlu1 %6892 }
0x440f   : > { %v6894_v46 = vsub.f32 %v6885_v3, %v6893_v58 }
0x4411   : > { %v6895_v6 = vmul.f32 1.442695, %v6894_v46 }
0x4413   : > { %15663 = vpow2.f32 %v6895_v6 }
0x441d   : > { %v15664_v48 = vpop.eup %15663 }
0x441e   : > { %v6897_v61 = vsel %vm1107_vm3, %v15664_v48, 0.0 }
0x441f   : > { %6898 = vadd.xlane.f32.xlu1 %v6897_v61 }
0x4430   : > { %6954 = vrot.lane.b32.xlu1 %v17235_v2, %s15921_s18 }
0x44ac   : > { %v6899_v59 = vpop.xlane.xlu1 %6898 }
0x44ad   : > { %15665 = vrcp.f32 %v6899_v59 }
0x44b0   : > { %v6955_v4 = vpop.permute.xlu1 %6954 }
0x44b1   : > { %v6960_v10 = vsel %vm1060_vm1, %v6955_v4, 0 }
0x44b7   : > { %v15666_v41 = vpop.eup %15665 }
0x44b8   : > { %v6901_v62 = vmul.f32 %v15666_v41, %v15664_v48 }
0x44ba   : > { %v6902_v8 = vpack.c.bf16 %v6901_v62, %v6901_v62 }
0x44bc   : > { %14501 = vmatmul.mubr.msk.bf16.vlgmr.msra.gmra.mrb[208].mxu1 %vm1107_vm3, %v6902_v8 }
0x44bd   : > { %14505 = vmatpush3.bf16.xpose.msra.mxu1 %v6960_v10  ;;  %14506 = vmatprep.mubr.msk.bf16.mxu1 %vm15920_vm0, %v15919_v0 }
0x44be   : > { %14510 = vmatprep.subr.bf16.mxu1 %v15919_v0 }
0x44c4   : > { %14507 = vmatmul.mubr.msk.bf16.vlgmr.msra.gmra.mrb[212].mxu1 %vm1060_vm1, %v6952_v60 }
0x44c5   : > { %14512 = vmatprep.mubr.msk.bf16.mxu1 %vm15920_vm0, %v15919_v0 }
0x458f   : > { %v6943_v53 = vpop.f32.mrb[208].mxu1 }
0x4590   : > { %v14502_v12 = vpop.f32.mrb[209].mxu1  ;;  %v6949_v45 = vpack.c.bf16 %v6943_v53, %v6943_v53  ;;  %v17317_v53 = vld [vmem:[#allocation2 + $0x4e0] sm:$0xff]  }
0x4591   : > { %v6946_v26 = vpop.f32.mrb[210].mxu1 }
0x4592   : > { %v14503_v34 = vpop.f32.mrb[211].mxu1 }
0x4597   : > { %v6996_v11 = vpop.f32.mrb[212].mxu1 }
0x4598   : > { %v14508_v29 = vpop.f32.mrb[213].mxu1  ;;  %v7002_v32 = vsel %vm1107_vm3, %v6996_v11, -inf }
0x4599   : > { %7003 = vmax.xlane.f32.xlu1 %v7002_v32  ;;  %v6999_v16 = vpop.f32.mrb[214].mxu1 }
0x459a   : > { %v14509_v31 = vpop.f32.mrb[215].mxu1 }
0x459b   : > { %v17329_v31 = vld [vmem:[#allocation2 + $0x4e8] sm:$0xff]  }
0x45aa   : > { %7015 = vrot.lane.b32.xlu1 %v17248_v19, %s15921_s18 }
0x45ae   : > { %7174 = vrot.lane.b32.xlu1 %v17240_v47, %s15922_s12 }
0x4626   : > { %v7004_v38 = vpop.xlane.xlu1 %7003 }
0x4627   : > { %v7005_v25 = vsub.f32 %v6996_v11, %v7004_v38 }
0x4629   : > { %v7006_v5 = vmul.f32 1.442695, %v7005_v25 }
0x462a   : > { %v7016_v39 = vpop.permute.xlu1 %7015 }
0x462b   : > { %15667 = vpow2.f32 %v7006_v5  ;;  %v7021_v37 = vsel %vm1123_vm2, %v7016_v39, 0 }
0x462c   : > { %14511 = vmatpush3.bf16.msra.mxu1 %v7021_v37 }
0x462d   : > { %14524 = vmatprep.subr.bf16.mxu1 %v15919_v0 }
0x462e   : > { %v7175_v27 = vpop.permute.xlu1 %7174 }
0x4635   : > { %v15668_v56 = vpop.eup %15667 }
0x4636   : > { %v7008_v9 = vsel %vm1107_vm3, %v15668_v56, 0.0 }
0x4637   : > { %7009 = vadd.xlane.f32.xlu0 %v7008_v9 }
0x464d   : > { %7176 = vrot.lane.b32.xlu0 %v17235_v2, %s15922_s12 }
0x46c4   : > { %v7010_v40 = vpop.xlane.xlu0 %7009 }
0x46c5   : > { %15669 = vrcp.f32 %v7010_v40 }
0x46c8   : > { %v7177_v44 = vpop.permute.xlu0 %7176 }
0x46c9   : > { %v7182_v57 = vsel %vm1060_vm1, %v7177_v44, 0 }
0x46cf   : > { %v15670_v23 = vpop.eup %15669 }
0x46d0   : > { %v7012_v15 = vmul.f32 %v15670_v23, %v15668_v56 }
0x46d2   : > { %v7013_v50 = vpack.c.bf16 %v7012_v15, %v7012_v15 }
0x46d4   : > { %14513 = vmatmul.mubr.msk.bf16.vlgmr.msra.gmra.mrb[216].mxu1 %vm1107_vm3, %v7013_v50  ;;  %v17340_v50 = vrot.slane %v17240_v47, 4 }
0x46d5   : > { %14525 = vmatpush3.bf16.msra.mxu1 %v17283_v7  ;;  %14528 = vmatprep.mubr.msk.bf16.mxu1 %vm15920_vm0, %v15919_v0 }
0x46d6   : > { %14526 = vmatprep.subr.bf16.mxu1 %v15919_v0 }
0x46d9   : > { %14527 = vmatpush3.bf16.msra.mxu1 %v17287_v28 }
0x46da   : > { %14538 = vmatprep.subr.bf16.mxu1 %v15919_v0 }
0x46dc   : > { %14529 = vmatmul.mubr.msk.bf16.vlgmr.msra.gmra.mrb[220].mxu1 %vm1060_vm1, %v6949_v45 }
0x46dd   : > { %14540 = vmatprep.mubr.msk.bf16.mxu1 %vm15920_vm0, %v15919_v0 }
0x47a7   : > { %v7057_v52 = vpop.f32.mrb[216].mxu1 }
0x47a8   : > { %v7063_v18 = vpack.c.bf16 %v7057_v52, %v7057_v52  ;;  %v14514_v22 = vpop.f32.mrb[217].mxu1 }
0x47a9   : > { %v7060_v20 = vpop.f32.mrb[218].mxu1 }
0x47aa   : > { %v14515_v13 = vpop.f32.mrb[219].mxu1  ;;  %14521 = vmatmul.mubr.msk.bf16.vlgmr.msra.gmra.mrb[156].mxu0 %vm1060_vm1, %v7063_v18 }
0x47ab   : > { %14533 = vmatpush3.bf16.xpose.msra.mxu0 %v7182_v57  ;;  %14534 = vmatprep.mubr.msk.bf16.mxu0 %vm15920_vm0, %v15919_v0  ;;  %v17352_v13 = vld [vmem:[#allocation2 + $0x4f0] sm:$0xff]  }
0x47ac   : > { %14544 = vmatprep.subr.bf16.mxu0 %v15919_v0 }
0x47af   : > { %v7168_v63 = vpop.f32.mrb[220].mxu1 }
0x47b0   : > { %v14530_v49 = vpop.f32.mrb[221].mxu1 }
0x47b1   : > { %v7171_v30 = vpop.f32.mrb[222].mxu1 }
0x47b2   : > { %v14531_v14 = vpop.f32.mrb[223].mxu1  ;;  %14535 = vmatmul.mubr.msk.bf16.vlgmr.msra.gmra.mrb[160].mxu0 %vm1060_vm1, %v7175_v27  ;;  %v17358_v30 = vld [vmem:[#allocation2 + $0x4f8] sm:$0xff]  }
0x47b3   : > { %14548 = vmatprep.mubr.msk.bf16.mxu0 %vm15920_vm0, %v15919_v0  ;;  %14545 = vmatpush3.bf16.msra.mxu0 %v17317_v53 }
0x47b4   : > { %14546 = vmatprep.subr.bf16.mxu0 %v15919_v0 }
0x47b7   : > { %14547 = vmatpush3.bf16.msra.mxu0 %v17329_v31 }
0x47b8   : > { %14558 = vmatprep.subr.bf16.mxu0 %v15919_v0 }
0x487d   : > { %v7113_v3 = vpop.f32.mrb[156].mxu0 }
0x487e   : > { %v17305_v17 = vadd.f32 %v7168_v63, %v7113_v3  ;;  %v14522_v54 = vpop.f32.mrb[157].mxu0 }
0x487f   : > { %v7116_v35 = vpop.f32.mrb[158].mxu0 }
0x4880   : > { %v14523_v55 = vpop.f32.mrb[159].mxu0 }
0x4885   : > { %v7218_v58 = vpop.f32.mrb[160].mxu0 }
0x4886   : > { %v14536_v46 = vpop.f32.mrb[161].mxu0  ;;  %v7224_v6 = vsel %vm1107_vm3, %v7218_v58, -inf }
0x4887   : > { %7225 = vmax.xlane.f32.xlu1 %v7224_v6  ;;  %v7221_v48 = vpop.f32.mrb[162].mxu0 }
0x4888   : > { %v14537_v61 = vpop.f32.mrb[163].mxu0  ;;  %v17383_v48 = vrot.slane %v17248_v19, 4 }
0x4898   : > { %7236 = vrot.lane.b32.xlu1 %v17248_v19, %s15922_s12 }
0x489c   : > { %7341 = vrot.lane.b32.xlu1 %v17240_v47, %s15923_s14  ;;  %v17348_v47 = vrot.slane %v17235_v2, 4 }
0x4914   : > { %v7226_v59 = vpop.xlane.xlu1 %7225 }
0x4915   : > { %v7227_v41 = vsub.f32 %v7218_v58, %v7226_v59 }
0x4917   : > { %v7228_v62 = vmul.f32 1.442695, %v7227_v41 }
0x4918   : > { %v7237_v4 = vpop.permute.xlu1 %7236 }
0x4919   : > { %15671 = vpow2.f32 %v7228_v62  ;;  %v7242_v8 = vsel %vm1123_vm2, %v7237_v4, 0 }
0x491a   : > { %14539 = vmatpush3.bf16.msra.mxu1 %v7242_v8 }
0x491b   : > { %14552 = vmatprep.subr.bf16.mxu1 %v15919_v0 }
0x491c   : > { %v7342_v16 = vpop.permute.xlu1 %7341 }
0x4923   : > { %v15672_v10 = vpop.eup %15671 }
0x4924   : > { %v7230_v60 = vsel %vm1107_vm3, %v15672_v10, 0.0 }
0x4925   : > { %7231 = vadd.xlane.f32.xlu0 %v7230_v60 }
0x493b   : > { %7343 = vrot.lane.b32.xlu0 %v17235_v2, %s15923_s14 }
0x49b2   : > { %v7232_v12 = vpop.xlane.xlu0 %7231 }
0x49b3   : > { %15673 = vrcp.f32 %v7232_v12 }
0x49b6   : > { %v7344_v11 = vpop.permute.xlu0 %7343 }
0x49b7   : > { %v7349_v32 = vsel %vm1060_vm1, %v7344_v11, 0 }
0x49bd   : > { %v15674_v26 = vpop.eup %15673 }
0x49be   : > { %v7234_v34 = vmul.f32 %v15674_v26, %v15672_v10 }
0x49c0   : > { %v7235_v29 = vpack.c.bf16 %v7234_v34, %v7234_v34 }
0x49c2   : > { %14541 = vmatmul.mubr.msk.bf16.vlgmr.msra.gmra.mrb[224].mxu1 %vm1107_vm3, %v7235_v29 }
0x49c3   : > { %14553 = vmatpush3.bf16.xpose.msra.mxu1 %v7349_v32  ;;  %14554 = vmatprep.mubr.msk.bf16.mxu1 %vm15920_vm0, %v15919_v0 }
0x49c4   : > { %14564 = vmatprep.subr.bf16.mxu1 %v15919_v0 }
0x49ca   : > { %14555 = vmatmul.mubr.msk.bf16.vlgmr.msra.gmra.mrb[228].mxu1 %vm1060_vm1, %v7342_v16 }
0x49cb   : > { %14568 = vmatprep.mubr.msk.bf16.mxu1 %vm15920_vm0, %v15919_v0  ;;  %14565 = vmatpush3.bf16.msra.mxu1 %v17352_v13 }
0x49cc   : > { %14566 = vmatprep.subr.bf16.mxu1 %v15919_v0 }
0x49cf   : > { %14567 = vmatpush3.bf16.msra.mxu1 %v17358_v30 }
0x49d0   : > { %14578 = vmatprep.subr.bf16.mxu1 %v15919_v0 }
0x4a95   : > { %v7278_v38 = vpop.f32.mrb[224].mxu1 }
0x4a96   : > { %v7284_v25 = vpack.c.bf16 %v7278_v38, %v7278_v38  ;;  %v14542_v5 = vpop.f32.mrb[225].mxu1 }
0x4a97   : > { %v7281_v39 = vpop.f32.mrb[226].mxu1 }
0x4a98   : > { %v14543_v37 = vpop.f32.mrb[227].mxu1  ;;  %14549 = vmatmul.mubr.msk.bf16.vlgmr.msra.gmra.mrb[164].mxu0 %vm1060_vm1, %v7284_v25 }
0x4a99   : > { %14560 = vmatprep.mubr.msk.bf16.mxu0 %vm15920_vm0, %v15919_v0 }
0x4a9d   : > { %v7385_v56 = vpop.f32.mrb[228].mxu1 }
0x4a9e   : > { %v14556_v9 = vpop.f32.mrb[229].mxu1  ;;  %v7391_v40 = vsel %vm1107_vm3, %v7385_v56, -inf }
0x4a9f   : > { %7392 = vmax.xlane.f32.xlu1 %v7391_v40  ;;  %v7388_v23 = vpop.f32.mrb[230].mxu1 }
0x4aa0   : > { %v14557_v15 = vpop.f32.mrb[231].mxu1 }
0x4ab0   : > { %7403 = vrot.lane.b32.xlu1 %v17248_v19, %s15923_s14 }
0x4ab4   : > { %7616 = vrot.lane.b32.xlu1 %v17340_v50, %s15921_s18 }
0x4b2c   : > { %v7393_v45 = vpop.xlane.xlu1 %7392 }
0x4b2d   : > { %v7394_v44 = vsub.f32 %v7385_v56, %v7393_v45 }
0x4b2f   : > { %v7395_v52 = vmul.f32 1.442695, %v7394_v44 }
0x4b30   : > { %v7404_v18 = vpop.permute.xlu1 %7403 }
0x4b31   : > { %15675 = vpow2.f32 %v7395_v52  ;;  %v7409_v22 = vsel %vm1123_vm2, %v7404_v18, 0 }
0x4b32   : > { %14559 = vmatpush3.bf16.msra.mxu0 %v7409_v22 }
0x4b33   : > { %14572 = vmatprep.subr.bf16.mxu0 %v15919_v0 }
0x4b34   : > { %v7617_v6 = vpop.permute.xlu1 %7616 }
0x4b3b   : > { %v15676_v20 = vpop.eup %15675 }
0x4b3c   : > { %v7397_v57 = vsel %vm1107_vm3, %v15676_v20, 0.0 }
0x4b3d   : > { %7398 = vadd.xlane.f32.xlu0 %v7397_v57 }
0x4b53   : > { %7618 = vrot.lane.b32.xlu0 %v17348_v47, %s15921_s18 }
0x4b6b   : > { %v7334_v63 = vpop.f32.mrb[164].mxu0 }
0x4b6c   : > { %v17355_v49 = vadd.f32 %v7334_v63, %v17305_v17  ;;  %v14550_v27 = vpop.f32.mrb[165].mxu0  ;;  %v7514_v17 = vsel %vm1060_vm1, %v17348_v47, 0 }
0x4b6d   : > { %v7337_v14 = vpop.f32.mrb[166].mxu0 }
0x4b6e   : > { %v14551_v3 = vpop.f32.mrb[167].mxu0 }
0x4bca   : > { %v7399_v2 = vpop.xlane.xlu0 %7398 }
0x4bcb   : > { %15677 = vrcp.f32 %v7399_v2 }
0x4bce   : > { %v7619_v58 = vpop.permute.xlu0 %7618 }
0x4bcf   : > { %v7624_v46 = vsel %vm1060_vm1, %v7619_v58, 0 }
0x4bd5   : > { %v15678_v54 = vpop.eup %15677 }
0x4bd6   : > { %v7401_v35 = vmul.f32 %v15678_v54, %v15676_v20 }
0x4bd8   : > { %v7402_v55 = vpack.c.bf16 %v7401_v35, %v7401_v35 }
0x4bda   : > { %14561 = vmatmul.mubr.msk.bf16.vlgmr.msra.gmra.mrb[168].mxu0 %vm1107_vm3, %v7402_v55 }
0x4bdb   : > { %14573 = vmatpush3.bf16.xpose.msra.mxu0 %v7514_v17  ;;  %14574 = vmatprep.mubr.msk.bf16.mxu0 %vm15920_vm0, %v15919_v0 }
0x4bdc   : > { %14584 = vmatprep.subr.bf16.mxu0 %v15919_v0 }
0x4be2   : > { %14575 = vmatmul.mubr.msk.bf16.vlgmr.msra.gmra.mrb[172].mxu0 %vm1060_vm1, %v17340_v50 }
0x4be3   : > { %14585 = vmatpush3.bf16.xpose.msra.mxu0 %v7624_v46  ;;  %14586 = vmatprep.mubr.msk.bf16.mxu0 %vm15920_vm0, %v15919_v0 }
0x4be4   : > { %14596 = vmatprep.subr.bf16.mxu0 %v15919_v0 }
0x4bea   : > { %14587 = vmatmul.mubr.msk.bf16.vlgmr.msra.gmra.mrb[176].mxu0 %vm1060_vm1, %v7617_v6 }
0x4beb   : > { %14597 = vmatpush3.bf16.msra.mxu0 %v17275_v36  ;;  %14600 = vmatprep.mubr.msk.bf16.mxu0 %vm15920_vm0, %v15919_v0  ;;  %v7573_v36 = vsel %vm1123_vm2, %v17383_v48, 0 }
0x4bec   : > { %14598 = vmatprep.subr.bf16.mxu0 %v15919_v0 }
0x4bef   : > { %14599 = vmatpush3.bf16.msra.mxu0 %v17278_v33 }
0x4bf0   : > { %14612 = vmatprep.subr.bf16.mxu0 %v15919_v0 }
0x4cad   : > { %v7445_v61 = vpop.f32.mrb[168].mxu0 }
0x4cae   : > { %v7451_v59 = vpack.c.bf16 %v7445_v61, %v7445_v61  ;;  %v14562_v41 = vpop.f32.mrb[169].mxu0 }
0x4caf   : > { %v7448_v62 = vpop.f32.mrb[170].mxu0 }
0x4cb0   : > { %v14563_v4 = vpop.f32.mrb[171].mxu0  ;;  %14569 = vmatmul.mubr.msk.bf16.vlgmr.msra.gmra.mrb[232].mxu1 %vm1060_vm1, %v7451_v59 }
0x4cb1   : > { %14579 = vmatpush3.bf16.msra.mxu1 %v7573_v36  ;;  %14580 = vmatprep.mubr.msk.bf16.mxu1 %vm15920_vm0, %v15919_v0 }
0x4cb2   : > { %14590 = vmatprep.subr.bf16.mxu1 %v15919_v0 }
0x4cb5   : > { %v7550_v33 = vpop.f32.mrb[172].mxu0 }
0x4cb6   : > { %v14576_v8 = vpop.f32.mrb[173].mxu0  ;;  %v7556_v19 = vsel %vm1107_vm3, %v7550_v33, -inf }
0x4cb7   : > { %7557 = vmax.xlane.f32.xlu1 %v7556_v19  ;;  %v7553_v10 = vpop.f32.mrb[174].mxu0 }
0x4cb8   : > { %v14577_v60 = vpop.f32.mrb[175].mxu0 }
0x4cbd   : > { %v7660_v12 = vpop.f32.mrb[176].mxu0 }
0x4cbe   : > { %v14588_v26 = vpop.f32.mrb[177].mxu0  ;;  %v7666_v34 = vsel %vm1107_vm3, %v7660_v12, -inf }
0x4cbf   : > { %7667 = vmax.xlane.f32.xlu0 %v7666_v34  ;;  %v7663_v11 = vpop.f32.mrb[178].mxu0 }
0x4cc0   : > { %v14589_v29 = vpop.f32.mrb[179].mxu0 }
0x4d44   : > { %v7558_v32 = vpop.xlane.xlu1 %7557 }
0x4d45   : > { %v7559_v16 = vsub.f32 %v7550_v33, %v7558_v32 }
0x4d47   : > { %v7560_v38 = vmul.f32 1.442695, %v7559_v16 }
0x4d49   : > { %15679 = vpow2.f32 %v7560_v38 }
0x4d4c   : > { %v7668_v25 = vpop.xlane.xlu0 %7667 }
0x4d4d   : > { %v7669_v5 = vsub.f32 %v7660_v12, %v7668_v25 }
0x4d4f   : > { %v7670_v39 = vmul.f32 1.442695, %v7669_v5 }
0x4d51   : > { %15681 = vpow2.f32 %v7670_v39 }
0x4d53   : > { %v15680_v37 = vpop.eup %15679 }
0x4d54   : > { %v7562_v56 = vsel %vm1107_vm3, %v15680_v37, 0.0 }
0x4d55   : > { %7563 = vadd.xlane.f32.xlu1 %v7562_v56 }
0x4d5b   : > { %v15682_v9 = vpop.eup %15681 }
0x4d5c   : > { %v7672_v40 = vsel %vm1107_vm3, %v15682_v9, 0.0 }
0x4d5d   : > { %7673 = vadd.xlane.f32.xlu0 %v7672_v40 }
0x4d66   : > { %7678 = vrot.lane.b32.xlu1 %v17383_v48, %s15921_s18 }
0x4d6a   : > { %7813 = vrot.lane.b32.xlu1 %v17340_v50, %s15922_s12 }
0x4d73   : > { %7815 = vrot.lane.b32.xlu0 %v17348_v47, %s15922_s12 }
0x4d83   : > { %v7501_v23 = vpop.f32.mrb[232].mxu1 }
0x4d84   : > { %v17402_v15 = vadd.f32 %v7501_v23, %v17355_v49  ;;  %v14570_v45 = vpop.f32.mrb[233].mxu1 }
0x4d85   : > { %v7504_v44 = vpop.f32.mrb[234].mxu1 }
0x4d86   : > { %v14571_v52 = vpop.f32.mrb[235].mxu1 }
0x4de2   : > { %v7564_v18 = vpop.xlane.xlu1 %7563 }
0x4de3   : > { %15683 = vrcp.f32 %v7564_v18 }
0x4de6   : > { %v7679_v63 = vpop.permute.xlu1 %7678 }
0x4de7   : > { %v7684_v14 = vsel %vm1123_vm2, %v7679_v63, 0 }
0x4dea   : > { %v7674_v22 = vpop.xlane.xlu0 %7673  ;;  %v7814_v62 = vpop.permute.xlu1 %7813 }
0x4deb   : > { %15685 = vrcp.f32 %v7674_v22 }
0x4ded   : > { %v15684_v20 = vpop.eup %15683 }
0x4dee   : > { %v7566_v57 = vmul.f32 %v15684_v20, %v15680_v37 }
0x4df0   : > { %v7567_v27 = vpack.c.bf16 %v7566_v57, %v7566_v57 }
0x4df2   : > { %14581 = vmatmul.mubr.msk.bf16.vlgmr.msra.gmra.mrb[236].mxu1 %vm1107_vm3, %v7567_v27 }
0x4df3   : > { %14591 = vmatpush3.bf16.msra.mxu1 %v7684_v14  ;;  %14592 = vmatprep.mubr.msk.bf16.mxu1 %vm15920_vm0, %v15919_v0 }
0x4df4   : > { %14604 = vmatprep.subr.bf16.mxu1 %v15919_v0 }
0x4df5   : > { %v15686_v49 = vpop.eup %15685 }
0x4df6   : > { %v7676_v3 = vmul.f32 %v15686_v49, %v15682_v9 }
0x4df8   : > { %v7677_v2 = vpack.c.bf16 %v7676_v3, %v7676_v3 }
0x4dfa   : > { %14593 = vmatmul.mubr.msk.bf16.vlgmr.msra.gmra.mrb[240].mxu1 %vm1107_vm3, %v7677_v2 }
0x4dfb   : > { %14605 = vmatpush3.bf16.msra.mxu1 %v17283_v7  ;;  %14608 = vmatprep.mubr.msk.bf16.mxu1 %vm15920_vm0, %v15919_v0  ;;  %v7816_v7 = vpop.permute.xlu0 %7815 }
0x4dfc   : > { %14606 = vmatprep.subr.bf16.mxu1 %v15919_v0  ;;  %v7821_v41 = vsel %vm1060_vm1, %v7816_v7, 0 }
0x4dff   : > { %14607 = vmatpush3.bf16.msra.mxu1 %v17287_v28 }
0x4e00   : > { %14618 = vmatprep.subr.bf16.mxu1 %v15919_v0 }
0x4ec5   : > { %v7609_v54 = vpop.f32.mrb[236].mxu1 }
0x4ec6   : > { %v7615_v35 = vpack.c.bf16 %v7609_v54, %v7609_v54  ;;  %v14582_v55 = vpop.f32.mrb[237].mxu1 }
0x4ec7   : > { %v7612_v17 = vpop.f32.mrb[238].mxu1 }
0x4ec8   : > { %v14583_v58 = vpop.f32.mrb[239].mxu1  ;;  %14609 = vmatmul.mubr.msk.bf16.vlgmr.msra.gmra.mrb[244].mxu1 %vm1060_vm1, %v7615_v35  ;;  %v12876_v35 = vld [vmem:[#allocation6 + $0x16] ss:$0 sm:$0xff] }
0x4ec9   : > { %14620 = vmatprep.mubr.msk.bf16.mxu1 %vm15920_vm0, %v15919_v0  ;;  %v8127_v17 = vadd.f32 %v12876_v35, %v17402_v15 }
0x4ecb   : > { %v8129_v7 = vadd.f32 %v8127_v17, %v17216_v24 }
0x4ecd   : > { %v7720_v46 = vpop.f32.mrb[240].mxu1 }
0x4ece   : > { %v7726_v6 = vpack.c.bf16 %v7720_v46, %v7720_v46  ;;  %v14594_v61 = vpop.f32.mrb[241].mxu1 }
0x4ecf   : > { %v7723_v59 = vpop.f32.mrb[242].mxu1 }
0x4ed0   : > { %v14595_v28 = vpop.f32.mrb[243].mxu1  ;;  %14601 = vmatmul.mubr.msk.bf16.vlgmr.msra.gmra.mrb[180].mxu0 %vm1060_vm1, %v7726_v6 }
0x4ed1   : > { %14613 = vmatpush3.bf16.xpose.msra.mxu0 %v7821_v41  ;;  %14614 = vmatprep.mubr.msk.bf16.mxu0 %vm15920_vm0, %v15919_v0 }
0x4ed2   : > { %14624 = vmatprep.subr.bf16.mxu0 %v15919_v0 }
0x4ed8   : > { %14615 = vmatmul.mubr.msk.bf16.vlgmr.msra.gmra.mrb[184].mxu0 %vm1060_vm1, %v7814_v62 }
0x4ed9   : > { %14625 = vmatpush3.bf16.msra.mxu0 %v17317_v53  ;;  %14628 = vmatprep.mubr.msk.bf16.mxu0 %vm15920_vm0, %v15919_v0 }
0x4eda   : > { %14626 = vmatprep.subr.bf16.mxu0 %v15919_v0 }
0x4edd   : > { %14627 = vmatpush3.bf16.msra.mxu0 %v17329_v31 }
0x4ede   : > { %14638 = vmatprep.subr.bf16.mxu0 %v15919_v0 }
0x4f9b   : > { %v7807_v4 = vpop.f32.mrb[244].mxu1 }
0x4f9c   : > { %v14610_v36 = vpop.f32.mrb[245].mxu1 }
0x4f9d   : > { %v7810_v33 = vpop.f32.mrb[246].mxu1 }
0x4f9e   : > { %v14611_v8 = vpop.f32.mrb[247].mxu1 }
0x4fa3   : > { %v7764_v19 = vpop.f32.mrb[180].mxu0 }
0x4fa4   : > { %v17431_v10 = vadd.f32 %v7807_v4, %v7764_v19  ;;  %v14602_v60 = vpop.f32.mrb[181].mxu0 }
0x4fa5   : > { %v7767_v12 = vpop.f32.mrb[182].mxu0 }
0x4fa6   : > { %v14603_v26 = vpop.f32.mrb[183].mxu0 }
0x4fab   : > { %v7857_v53 = vpop.f32.mrb[184].mxu0 }
0x4fac   : > { %v14616_v34 = vpop.f32.mrb[185].mxu0  ;;  %v7863_v11 = vsel %vm1107_vm3, %v7857_v53, -inf }
0x4fad   : > { %7864 = vmax.xlane.f32.xlu1 %v7863_v11  ;;  %v7860_v29 = vpop.f32.mrb[186].mxu0 }
0x4fae   : > { %v14617_v32 = vpop.f32.mrb[187].mxu0 }
0x4fbe   : > { %7970 = vrot.lane.b32.xlu1 %v17348_v47, %s15923_s14 }
0x4fc2   : > { %7968 = vrot.lane.b32.xlu1 %v17340_v50, %s15923_s14 }
0x503a   : > { %v7865_v31 = vpop.xlane.xlu1 %7864 }
0x503b   : > { %v7866_v16 = vsub.f32 %v7857_v53, %v7865_v31 }
0x503d   : > { %v7867_v38 = vmul.f32 1.442695, %v7866_v16  ;;  %v15395_v16 = vld [vmem:[%s18187_s6 + $0x100] ss:$8 sps:$4 sm:$0xff]  }
0x503e   : > { %v7971_v9 = vpop.permute.xlu1 %7970 }
0x503f   : > { %15687 = vpow2.f32 %v7867_v38  ;;  %v7976_v23 = vsel %vm1060_vm1, %v7971_v9, 0  ;;  %v15397_v38 = vld [vmem:[%s18187_s6 + $0x104] ss:$8 sps:$4 sm:$0xff]   ;;  %v15406_v9 = vld [vmem:[%s18187_s6 + $0x134] ss:$8 sps:$4 sm:$0xff]  }
0x5042   : > { %v7969_v45 = vpop.permute.xlu1 %7968 }
0x5049   : > { %v15688_v25 = vpop.eup %15687 }
0x504a   : > { %v7869_v5 = vsel %vm1107_vm3, %v15688_v25, 0.0 }
0x504b   : > { %7870 = vadd.xlane.f32.xlu0 %v7869_v5  ;;  %v15403_v5 = vld [vmem:[%s18187_s6 + $0x124] ss:$8 sps:$4 sm:$0xff]  }
0x5061   : > { %7875 = vrot.lane.b32.xlu0 %v17383_v48, %s15922_s12 }
0x50d8   : > { %v7871_v39 = vpop.xlane.xlu0 %7870 }
0x50d9   : > { %15689 = vrcp.f32 %v7871_v39  ;;  %v15401_v39 = vld [vmem:[%s18187_s6 + $0x120] ss:$8 sps:$4 sm:$0xff]  }
0x50dc   : > { %v7876_v37 = vpop.permute.xlu0 %7875 }
0x50dd   : > { %v7881_v56 = vsel %vm1123_vm2, %v7876_v37, 0 }
0x50de   : > { %14619 = vmatpush3.bf16.msra.mxu1 %v7881_v56 }
0x50df   : > { %14632 = vmatprep.subr.bf16.mxu1 %v15919_v0 }
0x50e3   : > { %v15690_v50 = vpop.eup %15689 }
0x50e4   : > { %v7873_v47 = vmul.f32 %v15690_v50, %v15688_v25  ;;  %v15400_v25 = vld [vmem:[%s18187_s6 + $0x114] ss:$8 sps:$4 sm:$0xff]  }
0x50e6   : > { %v7874_v40 = vpack.c.bf16 %v7873_v47, %v7873_v47 }
0x50e8   : > { %14621 = vmatmul.mubr.msk.bf16.vlgmr.msra.gmra.mrb[248].mxu1 %vm1107_vm3, %v7874_v40  ;;  %v15404_v40 = vld [vmem:[%s18187_s6 + $0x130] ss:$8 sps:$4 sm:$0xff]  }
0x50e9   : > { %14633 = vmatpush3.bf16.xpose.msra.mxu1 %v7976_v23  ;;  %14634 = vmatprep.mubr.msk.bf16.mxu1 %vm15920_vm0, %v15919_v0  ;;  %v15409_v23 = vld [vmem:[%s18187_s6 + $0x144] ss:$8 sps:$4 sm:$0xff]  }
0x50ea   : > { %14644 = vmatprep.subr.bf16.mxu1 %v15919_v0 }
0x50f0   : > { %14635 = vmatmul.mubr.msk.bf16.vlgmr.msra.gmra.mrb[252].mxu1 %vm1060_vm1, %v7969_v45  ;;  %v15407_v45 = vld [vmem:[%s18187_s6 + $0x140] ss:$8 sps:$4 sm:$0xff]  }
0x50f1   : > { %14645 = vmatpush3.bf16.msra.mxu1 %v17352_v13  ;;  %14648 = vmatprep.mubr.msk.bf16.mxu1 %vm15920_vm0, %v15919_v0 }
0x50f2   : > { %14646 = vmatprep.subr.bf16.mxu1 %v15919_v0 }
0x50f5   : > { %14647 = vmatpush3.bf16.msra.mxu1 %v17358_v30 }
0x51bb   : > { %v7917_v44 = vpop.f32.mrb[248].mxu1 }
0x51bc   : > { %v7923_v52 = vpack.c.bf16 %v7917_v44, %v7917_v44  ;;  %v14622_v18 = vpop.f32.mrb[249].mxu1  ;;  %v15412_v44 = vld [vmem:[%s18187_s6 + $0x154] ss:$8 sps:$4 sm:$0xff]  }
0x51bd   : > { %v7920_v22 = vpop.f32.mrb[250].mxu1  ;;  %v15415_v18 = vld [vmem:[%s18187_s6 + $0x164] ss:$8 sps:$4 sm:$0xff]  }
0x51be   : > { %v14623_v20 = vpop.f32.mrb[251].mxu1  ;;  %14629 = vmatmul.mubr.msk.bf16.vlgmr.msra.gmra.mrb[188].mxu0 %vm1060_vm1, %v7923_v52  ;;  %v15410_v52 = vld [vmem:[%s18187_s6 + $0x150] ss:$8 sps:$4 sm:$0xff]   ;;  %v15413_v22 = vld [vmem:[%s18187_s6 + $0x160] ss:$8 sps:$4 sm:$0xff]  }
0x51bf   : > { %14640 = vmatprep.mubr.msk.bf16.mxu0 %vm15920_vm0, %v15919_v0  ;;  %v15418_v20 = vld [vmem:[%s18187_s6 + $0x174] ss:$8 sps:$4 sm:$0xff]  }
0x51c3   : > { %v8012_v57 = vpop.f32.mrb[252].mxu1 }
0x51c4   : > { %v14636_v63 = vpop.f32.mrb[253].mxu1  ;;  %v8018_v13 = vsel %vm1107_vm3, %v8012_v57, -inf }
0x51c5   : > { %8019 = vmax.xlane.f32.xlu0 %v8018_v13  ;;  %v8015_v27 = vpop.f32.mrb[254].mxu1  ;;  %v15419_v63 = vld [vmem:[#allocation4 + $0x140] sm:$0xff]  }
0x51c6   : > { %v14637_v14 = vpop.f32.mrb[255].mxu1  ;;  %v15420_v13 = vld [vmem:[#allocation4 + $0x100] sm:$0xff]   ;;  %v15421_v27 = vld [vmem:[#allocation4 + $0x148] sm:$0xff]   ;;  %13513 = vmatprep.subr.bf16.mxu1 %v15419_v63 }
0x51c7   : > { %v15422_v14 = vld [vmem:[#allocation4 + $0x108] sm:$0xff]  }
0x51db   : > { %8030 = vrot.lane.b32.xlu0 %v17383_v48, %s15923_s14 }
0x5252   : > { %v8020_v30 = vpop.xlane.xlu0 %8019 }
0x5253   : > { %v8021_v49 = vsub.f32 %v8012_v57, %v8020_v30  ;;  %v15416_v57 = vld [vmem:[%s18187_s6 + $0x170] ss:$8 sps:$4 sm:$0xff]  }
0x5254   : > { %v15423_v30 = vld [vmem:[#allocation4 + $0x150] sm:$0xff]  }
0x5255   : > { %v8022_v3 = vmul.f32 1.442695, %v8021_v49  ;;  %v15424_v49 = vld [vmem:[#allocation4 + $0x110] sm:$0xff]  }
0x5256   : > { %v8031_v2 = vpop.permute.xlu0 %8030 }
0x5257   : > { %15691 = vpow2.f32 %v8022_v3  ;;  %v8036_v54 = vsel %vm1123_vm2, %v8031_v2, 0  ;;  %v15425_v3 = vld [vmem:[#allocation4 + $0x158] sm:$0xff]  }
0x5258   : > { %14639 = vmatpush3.bf16.msra.mxu0 %v8036_v54  ;;  %v15426_v2 = vld [vmem:[#allocation4 + $0x118] sm:$0xff]   ;;  %v15427_v54 = vld [vmem:[#allocation4 + $0x160] sm:$0xff]  }
0x5259   : > { %8314 = vmatprep.subr.bf16.mxu0 %v15397_v38 }
0x5261   : > { %v15692_v55 = vpop.eup %15691 }
0x5262   : > { %v8024_v58 = vsel %vm1107_vm3, %v15692_v55, 0.0 }
0x5263   : > { %8025 = vadd.xlane.f32.xlu1 %v8024_v58 }
0x5267   : > { %8133 = vadd.xlane.f32.xlu1 %v8129_v7 }
0x5291   : > { %v7961_v46 = vpop.f32.mrb[188].mxu0 }
0x5292   : > { %v7967_v48 = vadd.f32 %v7961_v46, %v17431_v10  ;;  %v14630_v6 = vpop.f32.mrb[189].mxu0 }
0x5293   : > { %v7964_v61 = vpop.f32.mrb[190].mxu0 }
0x5294   : > { %v14631_v59 = vpop.f32.mrb[191].mxu0 }
0x52f0   : > { %v8026_v41 = vpop.xlane.xlu1 %8025 }
0x52f1   : > { %15693 = vrcp.f32 %v8026_v41  ;;  %v12877_v41 = vld [vmem:[#allocation6 + $0x28] ss:$0 sm:$0xff] }
0x52f4   : > { %v8134_v19 = vpop.xlane.xlu1 %8133 }
0x52f5   : > { %v8137_v60 = vmul.f32 0.0078125, %v8134_v19  ;;  %v15430_v19 = vld [vmem:[#allocation4 + $0x128] sm:$0xff]  }
0x52f7   : > { %v17468_v29 = vsub.f32 %v8129_v7, %v8137_v60  ;;  %v15432_v60 = vld [vmem:[#allocation4 + $0x130] sm:$0xff]  }
0x52f9   : > { %v8141_v31 = vmul.f32 %v17468_v29, %v17468_v29 }
0x52fb   : > { %v15694_v28 = vpop.eup %15693 }
0x52fc   : > { %v8028_v62 = vmul.f32 %v15694_v28, %v15692_v55  ;;  %v15429_v55 = vld [vmem:[#allocation4 + $0x168] sm:$0xff]  }
0x52fe   : > { %v8029_v4 = vpack.c.bf16 %v8028_v62, %v8028_v62 }
0x5300   : > { %14641 = vmatmul.mubr.msk.bf16.vlgmr.msra.gmra.mrb[192].mxu0 %vm1107_vm3, %v8029_v4 }
0x5301   : > { %8346 = vmatprep.mubr.bf16.mxu0 %v15924_v1  ;;  %8315 = vmatpush1.bf16.msra.mxu0 %v15395_v16 }
0x5302   : > { %8316 = vmatprep.subr.bf16.mxu0 %v15400_v25 }
0x53d3   : > { %v8072_v15 = vpop.f32.mrb[192].mxu0 }
0x53d4   : > { %v8078_v36 = vpack.c.bf16 %v8072_v15, %v8072_v15  ;;  %v14642_v33 = vpop.f32.mrb[193].mxu0  ;;  %v12878_v15 = vld [vmem:[#allocation6 + $0x2e] ss:$0 sm:$0xff] }
0x53d5   : > { %v8075_v24 = vpop.f32.mrb[194].mxu0 }
0x53d6   : > { %v14643_v8 = vpop.f32.mrb[195].mxu0  ;;  %14649 = vmatmul.mubr.msk.bf16.vlgmr.msra.gmra.mrb[0].mxu1 %vm1060_vm1, %v8078_v36 }
0x53d7   : > { %13514 = vmatpush3.bf16.msra.mxu1 %v15420_v13 }
0x53d8   : > { %13515 = vmatprep.subr.bf16.mxu1 %v15421_v27  ;;  %v15435_v27 = vld [vmem:[#allocation2 + $0x300] sm:$0xff]  }
0x53db   : > { %13516 = vmatpush3.bf16.msra.mxu1 %v15422_v14  ;;  %v15436_v14 = vld [vmem:[#allocation2 + $0x340] sm:$0xff]  }
0x53dc   : > { %13517 = vmatprep.subr.bf16.mxu1 %v15423_v30  ;;  %v15437_v30 = vld [vmem:[#allocation2 + $0x308] sm:$0xff]  }
0x53df   : > { %13518 = vmatpush3.bf16.msra.mxu1 %v15424_v49 }
0x53e0   : > { %13519 = vmatprep.subr.bf16.mxu1 %v15425_v3 }
0x53e3   : > { %13520 = vmatpush3.bf16.msra.mxu1 %v15426_v2 }
0x53e4   : > { %13521 = vmatprep.subr.bf16.mxu1 %v15427_v54 }
0x54a9   : > { %v8116_v10 = vpop.f32.mrb[0].mxu1 }
0x54aa   : > { %v8122_v12 = vadd.f32 %v8116_v10, %v7967_v48  ;;  %v14650_v26 = vpop.f32.mrb[1].mxu1  ;;  %v15431_v10 = vld [vmem:[#allocation4 + $0x170] sm:$0xff]  }
0x54ab   : > { %v8119_v53 = vpop.f32.mrb[2].mxu1  ;;  %v15434_v26 = vld [vmem:[#allocation4 + $0x138] sm:$0xff]  }
0x54ac   : > { %v8128_v34 = vadd.f32 %v12876_v35, %v8122_v12  ;;  %v14651_v11 = vpop.f32.mrb[3].mxu1  ;;  %v15428_v35 = vld [vmem:[#allocation4 + $0x120] sm:$0xff]   ;;  %v15433_v12 = vld [vmem:[#allocation4 + $0x178] sm:$0xff]  }
0x54ad   : > { %13522 = vmatpush3.bf16.msra.mxu1 %v15428_v35  ;;  %v8185_v53 = vld [vmem:[#allocation7 + $0x2] ss:$4 sm:$0x3] }
0x54ae   : > { %v8130_v32 = vadd.f32 %v8128_v34, %v17218_v21  ;;  %v15398_v21 = vld [vmem:[%s18187_s6 + $0x110] ss:$8 sps:$4 sm:$0xff]   ;;  %13523 = vmatprep.subr.bf16.mxu1 %v15429_v55  ;;  %v8227_v34 = vrot.slane %v8185_v53, %v16544_v42  ;;  %v8231_v11 = vrot.slane %v8185_v53, %v16546_v43 }
0x54af   : > { %8317 = vmatpush1.bf16.msra.mxu0 %v15398_v21 }
0x54b0   : > { %8135 = vadd.xlane.f32.xlu1 %v8130_v32  ;;  %8318 = vmatprep.subr.bf16.mxu0 %v15403_v5 }
0x54b1   : > { %13524 = vmatpush3.bf16.msra.mxu1 %v15430_v19 }
0x54b2   : > { %13525 = vmatprep.subr.bf16.mxu1 %v15431_v10 }
0x54b3   : > { %8319 = vmatpush1.bf16.msra.mxu0 %v15401_v39 }
0x54b4   : > { %8143 = vadd.xlane.f32.xlu1 %v8141_v31  ;;  %8320 = vmatprep.subr.bf16.mxu0 %v15406_v9 }
0x54b5   : > { %13526 = vmatpush3.bf16.msra.mxu1 %v15432_v60 }
0x54b6   : > { %13527 = vmatprep.subr.bf16.mxu1 %v15433_v12 }
0x54b7   : > { %8321 = vmatpush1.bf16.msra.mxu0 %v15404_v40 }
0x54b8   : > { %8322 = vmatprep.subr.bf16.mxu0 %v15409_v23  ;;  %v12911_v23 = vld [vmem:[#allocation6 + $0x1d] ss:$0 sm:$0xff] }
0x54b9   : > { %13528 = vmatpush3.bf16.msra.mxu1 %v15434_v26 }
0x54ba   : > { %14672 = vmatprep.subr.bf16.mxu1 %v15919_v0 }
0x54bb   : > { %8323 = vmatpush1.bf16.msra.mxu0 %v15407_v45 }
0x54bc   : > { %8324 = vmatprep.subr.bf16.mxu0 %v15412_v44 }
0x54bf   : > { %8325 = vmatpush1.bf16.msra.mxu0 %v15410_v52 }
0x54c0   : > { %8326 = vmatprep.subr.bf16.mxu0 %v15415_v18 }
0x54c3   : > { %8327 = vmatpush1.bf16.msra.mxu0 %v15413_v22 }
0x54c4   : > { %8328 = vmatprep.subr.bf16.mxu0 %v15418_v20 }
0x54c7   : > { %8329 = vmatpush1.bf16.msra.mxu0 %v15416_v57 }
0x54c8   : > { %14652 = vmatprep.subr.bf16.mxu0 %v15919_v0 }
0x553d   : > { %v8136_v37 = vpop.xlane.xlu1 %8135 }
0x553e   : > { %v8138_v56 = vmul.f32 0.0078125, %v8136_v37 }
0x5540   : > { %v8140_v50 = vsub.f32 %v8130_v32, %v8138_v56 }
0x5541   : > { %v8144_v17 = vpop.xlane.xlu1 %8143 }
0x5542   : > { %v8142_v47 = vmul.f32 %v8140_v50, %v8140_v50  ;;  %v8147_v58 = vmul.f32 0.0078125, %v8144_v17 }
0x5544   : > { %8145 = vadd.xlane.f32.xlu1 %v8142_v47  ;;  %v8149_v7 = vadd.f32 1e-05, %v8147_v58 }
0x5546   : > { %15695 = vrsqrt.f32 %v8149_v7  ;;  %v15438_v7 = vld [vmem:[#allocation2 + $0x348] sm:$0xff]  }
0x5550   : > { %v15696_v61 = vpop.eup %15695 }
0x5551   : > { %v8153_v59 = vmul.f32 %v15696_v61, %v17468_v29  ;;  %v15442_v61 = vld [vmem:[#allocation2 + $0x358] sm:$0xff]  }
0x5553   : > { %v8159_v4 = vmul.f32 %v12877_v41, %v8153_v59  ;;  %v15443_v59 = vld [vmem:[#allocation2 + $0x320] sm:$0xff]  }
0x5555   : > { %v8165_v33 = vadd.f32 %v12878_v15, %v8159_v4  ;;  %v15447_v4 = vld [vmem:[#allocation2 + $0x330] sm:$0xff]  }
0x55d1   : > { %v8146_v46 = vpop.xlane.xlu1 %8145 }
0x55d2   : > { %v8148_v48 = vmul.f32 0.0078125, %v8146_v46  ;;  %v15439_v46 = vld [vmem:[#allocation2 + $0x310] sm:$0xff]  }
0x55d4   : > { %v8150_v6 = vadd.f32 1e-05, %v8148_v48  ;;  %v15440_v48 = vld [vmem:[#allocation2 + $0x350] sm:$0xff]  }
0x55d6   : > { %15697 = vrsqrt.f32 %v8150_v6  ;;  %v15441_v6 = vld [vmem:[#allocation2 + $0x318] sm:$0xff]  }
0x55e0   : > { %v15698_v28 = vpop.eup %15697 }
0x55e1   : > { %v8154_v62 = vmul.f32 %v15698_v28, %v8140_v50  ;;  %v15445_v28 = vld [vmem:[#allocation2 + $0x328] sm:$0xff]  }
0x55e3   : > { %v8160_v36 = vmul.f32 %v12877_v41, %v8154_v62  ;;  %v15444_v41 = vld [vmem:[#allocation2 + $0x360] sm:$0xff]   ;;  %v15446_v62 = vld [vmem:[#allocation2 + $0x368] sm:$0xff]  }
0x55e5   : > { %v8166_v24 = vadd.f32 %v12878_v15, %v8160_v36  ;;  %v15448_v15 = vld [vmem:[#allocation2 + $0x370] sm:$0xff]   ;;  %v15449_v36 = vld [vmem:[#allocation2 + $0x338] sm:$0xff]  }
0x55e7   : > { %v8222_v8 = vpack.c.bf16 %v8166_v24, %v8165_v33 }
0x55e9   : > { %8347 = vmatmul.mubr.bf16.vlgmr.msra.gmra.mrb[196].mxu0 %v8222_v8 }
0x55ea   : > { %14668 = vmatprep.mubr.msk.bf16.mxu0 %vm15920_vm0, %v15919_v0  ;;  %14653 = vmatpush3.bf16.msra.mxu0 %v15435_v27 }
0x55eb   : > { %14654 = vmatprep.subr.bf16.mxu0 %v15919_v0 }
0x55ee   : > { %14655 = vmatpush3.bf16.msra.mxu0 %v15437_v30 }
0x55ef   : > { %14656 = vmatprep.subr.bf16.mxu0 %v15919_v0 }
0x55f2   : > { %14657 = vmatpush3.bf16.msra.mxu0 %v15439_v46 }
0x55f3   : > { %14658 = vmatprep.subr.bf16.mxu0 %v15919_v0 }
0x55f6   : > { %14659 = vmatpush3.bf16.msra.mxu0 %v15441_v6 }
0x55f7   : > { %14660 = vmatprep.subr.bf16.mxu0 %v15919_v0 }
0x55fa   : > { %14661 = vmatpush3.bf16.msra.mxu0 %v15443_v59 }
0x55fb   : > { %14662 = vmatprep.subr.bf16.mxu0 %v15919_v0 }
0x55fe   : > { %14663 = vmatpush3.bf16.msra.mxu0 %v15445_v28 }
0x55ff   : > { %14664 = vmatprep.subr.bf16.mxu0 %v15919_v0 }
0x5602   : > { %14665 = vmatpush3.bf16.msra.mxu0 %v15447_v4 }
0x5603   : > { %14666 = vmatprep.subr.bf16.mxu0 %v15919_v0 }
0x5606   : > { %14667 = vmatpush3.bf16.msra.mxu0 %v15449_v36 }
0x5607   : > { %14692 = vmatprep.subr.bf16.mxu0 %v15919_v0 }
0x56bc   : > { %v8348_v29 = vpop.f32.mrb[196].mxu0 }
0x56bd   : > { %v8349_v32 = vadd.f32 %v8348_v29, %v8227_v34  ;;  %v8350_v31 = vpop.f32.mrb[197].mxu0 }
0x56be   : > { %v8351_v16 = vadd.f32 %v8350_v31, %v8231_v11  ;;  %v8352_v38 = vpop.f32.mrb[198].mxu0  ;;  %v12929_v31 = vld [vmem:[#allocation6 + $0x2f] ss:$0 sm:$0xff] }
0x56bf   : > { %v8353_v25 = vadd.f32 %v8352_v38, %v8227_v34  ;;  %v8354_v21 = vpop.f32.mrb[199].mxu0  ;;  %v8357_v39 = vmax.f32 %v8349_v32, 0.0  ;;  %v12928_v34 = vld [vmem:[#allocation6 + $0x29] ss:$0 sm:$0xff] }
0x56c0   : > { %v8355_v5 = vadd.f32 %v8354_v21, %v8231_v11  ;;  %v8358_v56 = vmax.f32 %v8351_v16, 0.0  ;;  %v15451_v21 = vld [vmem:[#allocation2 + $0x380] sm:$0xff]  }
0x56c1   : > { %v8359_v37 = vmax.f32 %v8353_v25, 0.0 }
0x56c2   : > { %v8360_v50 = vmax.f32 %v8355_v5, 0.0 }
0x56c3   : > { %v8361_v47 = vpack.c.bf16 %v8359_v37, %v8357_v39  ;;  %v15452_v39 = vld [vmem:[#allocation2 + $0x388] sm:$0xff]   ;;  %v15453_v37 = vld [vmem:[#allocation2 + $0x390] sm:$0xff]  }
0x56c4   : > { %v8362_v9 = vpack.c.bf16 %v8360_v50, %v8358_v56  ;;  %v15454_v56 = vld [vmem:[#allocation2 + $0x398] sm:$0xff]   ;;  %v15455_v50 = vld [vmem:[#allocation2 + $0x3a0] sm:$0xff]  }
0x56c6   : > { %8495 = vmatprep.mubr.bf16.mxu1 %v8362_v9  ;;  %v15457_v9 = vld [vmem:[#allocation2 + $0x3b0] sm:$0xff]  }
0x56c7   : > { %8496 = vmatmul.mubr.bf16.vlgmr.msra.gmra.mrb[4].mxu1 %v8361_v47  ;;  %v15456_v47 = vld [vmem:[#allocation2 + $0x3a8] sm:$0xff]  }
0x56c8   : > { %14688 = vmatprep.mubr.msk.bf16.mxu1 %vm15920_vm0, %v15919_v0  ;;  %14673 = vmatpush3.bf16.msra.mxu1 %v15436_v14 }
0x56c9   : > { %14674 = vmatprep.subr.bf16.mxu1 %v15919_v0 }
0x56cc   : > { %14675 = vmatpush3.bf16.msra.mxu1 %v15438_v7 }
0x56cd   : > { %14676 = vmatprep.subr.bf16.mxu1 %v15919_v0 }
0x56d0   : > { %14677 = vmatpush3.bf16.msra.mxu1 %v15440_v48 }
0x56d1   : > { %14678 = vmatprep.subr.bf16.mxu1 %v15919_v0 }
0x56d4   : > { %14679 = vmatpush3.bf16.msra.mxu1 %v15442_v61 }
0x56d5   : > { %14680 = vmatprep.subr.bf16.mxu1 %v15919_v0 }
0x56d8   : > { %14681 = vmatpush3.bf16.msra.mxu1 %v15444_v41 }
0x56d9   : > { %14682 = vmatprep.subr.bf16.mxu1 %v15919_v0 }
0x56dc   : > { %14683 = vmatpush3.bf16.msra.mxu1 %v15446_v62 }
0x56dd   : > { %14684 = vmatprep.subr.bf16.mxu1 %v15919_v0 }
0x56e0   : > { %14685 = vmatpush3.bf16.msra.mxu1 %v15448_v15 }
0x56e1   : > { %14686 = vmatprep.subr.bf16.mxu1 %v15919_v0 }
0x579a   : > { %v13529_v40 = vpop.f32.mrb[4].mxu1 }
0x579b   : > { %v13530_v45 = vpop.f32.mrb[5].mxu1 }
0x579c   : > { %v13531_v44 = vadd.f32 %v13530_v45, %v13529_v40  ;;  %v13532_v52 = vpop.f32.mrb[6].mxu1  ;;  %v15458_v40 = vld [vmem:[#allocation2 + $0x3b8] sm:$0xff]  }
0x579d   : > { %v13533_v18 = vpop.f32.mrb[7].mxu1 }
0x579e   : > { %v8498_v22 = vadd.f32 %v13531_v44, %v12911_v23  ;;  %v13534_v20 = vadd.f32 %v13533_v18, %v13532_v52  ;;  %v12939_v44 = vld [vmem:[#allocation6 + $0x10] ss:$0 sm:$0xff] }
0x57a0   : > { %v8501_v57 = vadd.f32 %v13534_v20, %v12911_v23  ;;  %v8504_v63 = vadd.f32 %v8498_v22, %v8165_v33  ;;  %v15450_v33 = vld [vmem:[#allocation2 + $0x378] sm:$0xff]   ;;  %v12930_v23 = vld [vmem:[#allocation6 + $0xf] ss:$0 sm:$0xff] }
0x57a1   : > { %14687 = vmatpush3.bf16.msra.mxu1 %v15450_v33 }
0x57a2   : > { %8506 = vadd.xlane.f32.xlu0 %v8504_v63  ;;  %v8505_v13 = vadd.f32 %v8501_v57, %v8166_v24  ;;  %14712 = vmatprep.subr.bf16.mxu1 %v15919_v0 }
0x57a4   : > { %8508 = vadd.xlane.f32.xlu1 %v8505_v13 }
0x582f   : > { %v8507_v49 = vpop.xlane.xlu0 %8506 }
0x5830   : > { %v8510_v3 = vmul.f32 0.0078125, %v8507_v49 }
0x5831   : > { %v8509_v2 = vpop.xlane.xlu1 %8508 }
0x5832   : > { %v8512_v54 = vsub.f32 %v8504_v63, %v8510_v3  ;;  %v8511_v35 = vmul.f32 0.0078125, %v8509_v2 }
0x5834   : > { %v8513_v55 = vsub.f32 %v8505_v13, %v8511_v35  ;;  %v8514_v17 = vmul.f32 %v8512_v54, %v8512_v54 }
0x5836   : > { %8516 = vadd.xlane.f32.xlu1 %v8514_v17  ;;  %v8515_v58 = vmul.f32 %v8513_v55, %v8513_v55  ;;  %v12948_v17 = vld [vmem:[#allocation6 + $0x11] ss:$0 sm:$0xff] }
0x583a   : > { %8518 = vadd.xlane.f32.xlu1 %v8515_v58 }
0x58c3   : > { %v8517_v24 = vpop.xlane.xlu1 %8516 }
0x58c4   : > { %v8520_v8 = vmul.f32 0.0078125, %v8517_v24 }
0x58c6   : > { %v8522_v19 = vadd.f32 1e-05, %v8520_v8 }
0x58c7   : > { %v8519_v10 = vpop.xlane.xlu1 %8518 }
0x58c8   : > { %15699 = vrsqrt.f32 %v8522_v19  ;;  %v8521_v60 = vmul.f32 0.0078125, %v8519_v10 }
0x58ca   : > { %v8523_v12 = vadd.f32 1e-05, %v8521_v60 }
0x58cc   : > { %15701 = vrsqrt.f32 %v8523_v12 }
0x58d2   : > { %v15700_v26 = vpop.eup %15699 }
0x58d3   : > { %v8526_v53 = vmul.f32 %v15700_v26, %v8512_v54 }
0x58d5   : > { %v8532_v32 = vmul.f32 %v12928_v34, %v8526_v53 }
0x58d6   : > { %v15702_v11 = vpop.eup %15701 }
0x58d7   : > { %v8527_v29 = vmul.f32 %v15702_v11, %v8513_v55  ;;  %v17546_v38 = vadd.f32 %v12929_v31, %v8532_v32 }
0x58d9   : > { %v8533_v16 = vmul.f32 %v12928_v34, %v8527_v29 }
0x58db   : > { %v17548_v25 = vadd.f32 %v12929_v31, %v8533_v16 }
0x58dd   : > { %v8544_v5 = vpack.c.bf16 %v17548_v25, %v17546_v38 }
0x58df   : > { %14669 = vmatmul.mubr.bf16.vlgmr.msra.gmra.mrb[200].mxu0 %v8544_v5  ;;  %14689 = vmatmul.mubr.bf16.vlgmr.msra.gmra.mrb[8].mxu1 %v8544_v5 }
0x58e0   : > { %14693 = vmatpush3.bf16.msra.mxu0 %v15451_v21  ;;  %14708 = vmatprep.mubr.msk.bf16.mxu0 %vm15920_vm0, %v15919_v0 }
0x58e1   : > { %14694 = vmatprep.subr.bf16.mxu0 %v15919_v0  ;;  %14714 = vmatprep.mubr.msk.bf16.mxu1 %vm15920_vm0, %v15919_v0 }
0x58e4   : > { %14695 = vmatpush3.bf16.msra.mxu0 %v15452_v39 }
0x58e5   : > { %14696 = vmatprep.subr.bf16.mxu0 %v15919_v0 }
0x58e8   : > { %14697 = vmatpush3.bf16.msra.mxu0 %v15453_v37 }
0x58e9   : > { %14698 = vmatprep.subr.bf16.mxu0 %v15919_v0 }
0x58ec   : > { %14699 = vmatpush3.bf16.msra.mxu0 %v15454_v56 }
0x58ed   : > { %14700 = vmatprep.subr.bf16.mxu0 %v15919_v0 }
0x58f0   : > { %14701 = vmatpush3.bf16.msra.mxu0 %v15455_v50 }
0x58f1   : > { %14702 = vmatprep.subr.bf16.mxu0 %v15919_v0 }
0x58f4   : > { %14703 = vmatpush3.bf16.msra.mxu0 %v15456_v47 }
0x58f5   : > { %14704 = vmatprep.subr.bf16.mxu0 %v15919_v0 }
0x58f8   : > { %14705 = vmatpush3.bf16.msra.mxu0 %v15457_v9 }
0x58f9   : > { %14706 = vmatprep.subr.bf16.mxu0 %v15919_v0 }
0x58fc   : > { %14707 = vmatpush3.bf16.msra.mxu0 %v15458_v40 }
0x58fd   : > { %14736 = vmatprep.subr.bf16.mxu0 %v15919_v0 }
0x58ff   : > { %14709 = vmatmul.mubr.bf16.vlgmr.msra.gmra.mrb[204].mxu0 %v8544_v5 }
0x5900   : > { %14740 = vmatprep.mubr.msk.bf16.mxu0 %vm15920_vm0, %v15919_v0 }
0x59b2   : > { %v8648_v45 = vpop.f32.mrb[200].mxu0  ;;  %v8758_v52 = vpop.f32.mrb[8].mxu1 }
0x59b3   : > { %v8649_v18 = vadd.f32 %v12930_v23, %v8648_v45  ;;  %v14670_v22 = vpop.f32.mrb[201].mxu0  ;;  %v14690_v20 = vpop.f32.mrb[9].mxu1  ;;  %v8759_v13 = vadd.f32 %v12939_v44, %v8758_v52 }
0x59b4   : > { %v8651_v57 = vpop.f32.mrb[202].mxu0  ;;  %v8761_v63 = vpop.f32.mrb[10].mxu1  ;;  %v17609_v22 = vld [vmem:[#allocation2 + $0x3d8] sm:$0xff]  }
0x59b5   : > { %v8652_v27 = vadd.f32 %v12930_v23, %v8651_v57  ;;  %v8762_v14 = vadd.f32 %v12939_v44, %v8761_v63  ;;  %v14671_v30 = vpop.f32.mrb[203].mxu0  ;;  %v14691_v49 = vpop.f32.mrb[11].mxu1  ;;  %v8875_v3 = vmul.f32 0.17677669, %v8649_v18  ;;  %v17606_v18 = vld [vmem:[#allocation2 + $0x3d0] sm:$0xff]  }
0x59b6   : > { %14737 = vmatpush3.bf16.msra.mxu0 %v17606_v18 }
0x59b7   : > { %v8876_v2 = vmul.f32 0.17677669, %v8652_v27  ;;  %v17566_v54 = vpack.c.bf16 %v8762_v14, %v8759_v13  ;;  %14738 = vmatprep.subr.bf16.mxu0 %v15919_v0  ;;  %v17614_v13 = vld [vmem:[#allocation2 + $0x3c0] sm:$0xff]   ;;  %v17618_v14 = vld [vmem:[#allocation2 + $0x3c8] sm:$0xff]  }
0x59b9   : > { %v17568_v35 = vpack.c.bf16 %v8876_v2, %v8875_v3  ;;  %v8901_v55 = vsel %vm1060_vm1, %v17566_v54, 0 }
0x59ba   : > { %14713 = vmatpush3.bf16.xpose.msra.mxu1 %v8901_v55  ;;  %14739 = vmatpush3.bf16.msra.mxu0 %v17609_v22 }
0x59bb   : > { %9003 = vrot.lane.b32.xlu0 %v17568_v35, %s15921_s18  ;;  %14718 = vmatprep.subr.bf16.mxu1 %v15919_v0 }
0x59bc   : > { %14752 = vmatprep.subr.bf16.mxu0 %v15919_v0 }
0x59c1   : > { %14715 = vmatmul.mubr.msk.bf16.vlgmr.msra.gmra.mrb[12].mxu1 %vm1060_vm1, %v17568_v35 }
0x59c2   : > { %14720 = vmatprep.mubr.msk.bf16.mxu1 %vm15920_vm0, %v15919_v0 }
0x59d2   : > { %v8868_v58 = vpop.f32.mrb[204].mxu0 }
0x59d3   : > { %v14710_v7 = vpop.f32.mrb[205].mxu0  ;;  %v8869_v48 = vadd.f32 %v12948_v17, %v8868_v58 }
0x59d4   : > { %v8871_v46 = vpop.f32.mrb[206].mxu0 }
0x59d5   : > { %v8872_v6 = vadd.f32 %v12948_v17, %v8871_v46  ;;  %v14711_v61 = vpop.f32.mrb[207].mxu0 }
0x59d7   : > { %v17579_v59 = vpack.c.bf16 %v8872_v6, %v8869_v48 }
0x59d9   : > { %v8959_v41 = vsel %vm1123_vm2, %v17579_v59, 0 }
0x59da   : > { %14719 = vmatpush3.bf16.msra.mxu1 %v8959_v41 }
0x59db   : > { %14724 = vmatprep.subr.bf16.mxu1 %v15919_v0 }
0x5a2d   : > { %v9004_v29 = vpop.permute.xlu0 %9003 }
0x5a94   : > { %v8937_v28 = vpop.f32.mrb[12].mxu1 }
0x5a95   : > { %v14716_v62 = vpop.f32.mrb[13].mxu1  ;;  %v8943_v4 = vsel %vm1107_vm3, %v8937_v28, -inf }
0x5a96   : > { %8944 = vmax.xlane.f32.xlu1 %v8943_v4  ;;  %v8940_v15 = vpop.f32.mrb[14].mxu1 }
0x5a97   : > { %v14717_v36 = vpop.f32.mrb[15].mxu1 }
0x5b23   : > { %v8945_v33 = vpop.xlane.xlu1 %8944 }
0x5b24   : > { %v8946_v24 = vsub.f32 %v8937_v28, %v8945_v33 }
0x5b26   : > { %v8947_v8 = vmul.f32 1.442695, %v8946_v24 }
0x5b28   : > { %15703 = vpow2.f32 %v8947_v8 }
0x5b32   : > { %v15704_v19 = vpop.eup %15703 }
0x5b33   : > { %v8949_v10 = vsel %vm1107_vm3, %v15704_v19, 0.0 }
0x5b34   : > { %8950 = vadd.xlane.f32.xlu1 %v8949_v10 }
0x5b45   : > { %9006 = vrot.lane.b32.xlu1 %v17566_v54, %s15921_s18 }
0x5bc1   : > { %v8951_v60 = vpop.xlane.xlu1 %8950 }
0x5bc2   : > { %15705 = vrcp.f32 %v8951_v60 }
0x5bc5   : > { %v9007_v53 = vpop.permute.xlu1 %9006 }
0x5bc6   : > { %v9012_v11 = vsel %vm1060_vm1, %v9007_v53, 0 }
0x5bcc   : > { %v15706_v12 = vpop.eup %15705 }
0x5bcd   : > { %v8953_v26 = vmul.f32 %v15706_v12, %v15704_v19 }
0x5bcf   : > { %v8954_v34 = vpack.c.bf16 %v8953_v26, %v8953_v26 }
0x5bd1   : > { %14721 = vmatmul.mubr.msk.bf16.vlgmr.msra.gmra.mrb[16].mxu1 %vm1107_vm3, %v8954_v34 }
0x5bd2   : > { %14725 = vmatpush3.bf16.xpose.msra.mxu1 %v9012_v11  ;;  %14726 = vmatprep.mubr.msk.bf16.mxu1 %vm15920_vm0, %v15919_v0 }
0x5bd3   : > { %14730 = vmatprep.subr.bf16.mxu1 %v15919_v0 }
0x5bd9   : > { %14727 = vmatmul.mubr.msk.bf16.vlgmr.msra.gmra.mrb[20].mxu1 %vm1060_vm1, %v9004_v29 }
0x5bda   : > { %14732 = vmatprep.mubr.msk.bf16.mxu1 %vm15920_vm0, %v15919_v0 }
0x5ca4   : > { %v8995_v32 = vpop.f32.mrb[16].mxu1 }
0x5ca5   : > { %v14722_v31 = vpop.f32.mrb[17].mxu1  ;;  %v9001_v30 = vpack.c.bf16 %v8995_v32, %v8995_v32  ;;  %v17648_v32 = vld [vmem:[#allocation2 + $0x3e0] sm:$0xff]  }
0x5ca6   : > { %v8998_v16 = vpop.f32.mrb[18].mxu1 }
0x5ca7   : > { %v14723_v21 = vpop.f32.mrb[19].mxu1 }
0x5cac   : > { %v9048_v5 = vpop.f32.mrb[20].mxu1 }
0x5cad   : > { %v14728_v39 = vpop.f32.mrb[21].mxu1  ;;  %v9054_v37 = vsel %vm1107_vm3, %v9048_v5, -inf }
0x5cae   : > { %9055 = vmax.xlane.f32.xlu1 %v9054_v37  ;;  %v9051_v56 = vpop.f32.mrb[22].mxu1 }
0x5caf   : > { %v14729_v50 = vpop.f32.mrb[23].mxu1 }
0x5cb0   : > { %v17660_v50 = vld [vmem:[#allocation2 + $0x3e8] sm:$0xff]  }
0x5cbf   : > { %9067 = vrot.lane.b32.xlu1 %v17579_v59, %s15921_s18 }
0x5cc3   : > { %9226 = vrot.lane.b32.xlu1 %v17568_v35, %s15922_s12 }
0x5d3b   : > { %v9056_v47 = vpop.xlane.xlu1 %9055 }
0x5d3c   : > { %v9057_v9 = vsub.f32 %v9048_v5, %v9056_v47 }
0x5d3e   : > { %v9058_v40 = vmul.f32 1.442695, %v9057_v9 }
0x5d3f   : > { %v9068_v23 = vpop.permute.xlu1 %9067 }
0x5d40   : > { %15707 = vpow2.f32 %v9058_v40  ;;  %v9073_v45 = vsel %vm1123_vm2, %v9068_v23, 0 }
0x5d41   : > { %14731 = vmatpush3.bf16.msra.mxu1 %v9073_v45 }
0x5d42   : > { %14744 = vmatprep.subr.bf16.mxu1 %v15919_v0 }
0x5d43   : > { %v9227_v6 = vpop.permute.xlu1 %9226 }
0x5d4a   : > { %v15708_v44 = vpop.eup %15707 }
0x5d4b   : > { %v9060_v52 = vsel %vm1107_vm3, %v15708_v44, 0.0 }
0x5d4c   : > { %9061 = vadd.xlane.f32.xlu0 %v9060_v52 }
0x5d62   : > { %9228 = vrot.lane.b32.xlu0 %v17566_v54, %s15922_s12 }
0x5dd9   : > { %v9062_v20 = vpop.xlane.xlu0 %9061 }
0x5dda   : > { %15709 = vrcp.f32 %v9062_v20 }
0x5ddd   : > { %v9229_v49 = vpop.permute.xlu0 %9228 }
0x5dde   : > { %v9234_v58 = vsel %vm1060_vm1, %v9229_v49, 0 }
0x5de4   : > { %v15710_v57 = vpop.eup %15709 }
0x5de5   : > { %v9064_v63 = vmul.f32 %v15710_v57, %v15708_v44 }
0x5de7   : > { %v9065_v27 = vpack.c.bf16 %v9064_v63, %v9064_v63 }
0x5de9   : > { %14733 = vmatmul.mubr.msk.bf16.vlgmr.msra.gmra.mrb[24].mxu1 %vm1107_vm3, %v9065_v27  ;;  %v17671_v27 = vrot.slane %v17568_v35, 4 }
0x5dea   : > { %14745 = vmatpush3.bf16.msra.mxu1 %v17614_v13  ;;  %14748 = vmatprep.mubr.msk.bf16.mxu1 %vm15920_vm0, %v15919_v0 }
0x5deb   : > { %14746 = vmatprep.subr.bf16.mxu1 %v15919_v0 }
0x5dee   : > { %14747 = vmatpush3.bf16.msra.mxu1 %v17618_v14 }
0x5def   : > { %14758 = vmatprep.subr.bf16.mxu1 %v15919_v0 }
0x5df1   : > { %14749 = vmatmul.mubr.msk.bf16.vlgmr.msra.gmra.mrb[28].mxu1 %vm1060_vm1, %v9001_v30 }
0x5df2   : > { %14760 = vmatprep.mubr.msk.bf16.mxu1 %vm15920_vm0, %v15919_v0 }
0x5ebc   : > { %v9109_v3 = vpop.f32.mrb[24].mxu1 }
0x5ebd   : > { %v9115_v2 = vpack.c.bf16 %v9109_v3, %v9109_v3  ;;  %v14734_v55 = vpop.f32.mrb[25].mxu1 }
0x5ebe   : > { %v9112_v17 = vpop.f32.mrb[26].mxu1 }
0x5ebf   : > { %v14735_v7 = vpop.f32.mrb[27].mxu1  ;;  %14741 = vmatmul.mubr.msk.bf16.vlgmr.msra.gmra.mrb[208].mxu0 %vm1060_vm1, %v9115_v2 }
0x5ec0   : > { %14753 = vmatpush3.bf16.xpose.msra.mxu0 %v9234_v58  ;;  %14754 = vmatprep.mubr.msk.bf16.mxu0 %vm15920_vm0, %v15919_v0  ;;  %v17683_v7 = vld [vmem:[#allocation2 + $0x3f0] sm:$0xff]  }
0x5ec1   : > { %14764 = vmatprep.subr.bf16.mxu0 %v15919_v0 }
0x5ec4   : > { %v9220_v46 = vpop.f32.mrb[28].mxu1 }
0x5ec5   : > { %v14750_v48 = vpop.f32.mrb[29].mxu1 }
0x5ec6   : > { %v9223_v61 = vpop.f32.mrb[30].mxu1 }
0x5ec7   : > { %v14751_v41 = vpop.f32.mrb[31].mxu1  ;;  %14755 = vmatmul.mubr.msk.bf16.vlgmr.msra.gmra.mrb[212].mxu0 %vm1060_vm1, %v9227_v6  ;;  %v17689_v61 = vld [vmem:[#allocation2 + $0x3f8] sm:$0xff]  }
0x5ec8   : > { %14768 = vmatprep.mubr.msk.bf16.mxu0 %vm15920_vm0, %v15919_v0  ;;  %14765 = vmatpush3.bf16.msra.mxu0 %v17648_v32 }
0x5ec9   : > { %14766 = vmatprep.subr.bf16.mxu0 %v15919_v0 }
0x5ecc   : > { %14767 = vmatpush3.bf16.msra.mxu0 %v17660_v50 }
0x5ecd   : > { %14778 = vmatprep.subr.bf16.mxu0 %v15919_v0 }
0x5f92   : > { %v9165_v28 = vpop.f32.mrb[208].mxu0 }
0x5f93   : > { %v17636_v62 = vadd.f32 %v9220_v46, %v9165_v28  ;;  %v14742_v4 = vpop.f32.mrb[209].mxu0 }
0x5f94   : > { %v9168_v15 = vpop.f32.mrb[210].mxu0 }
0x5f95   : > { %v14743_v36 = vpop.f32.mrb[211].mxu0 }
0x5f9a   : > { %v9270_v33 = vpop.f32.mrb[212].mxu0 }
0x5f9b   : > { %v14756_v24 = vpop.f32.mrb[213].mxu0  ;;  %v9276_v8 = vsel %vm1107_vm3, %v9270_v33, -inf }
0x5f9c   : > { %9277 = vmax.xlane.f32.xlu1 %v9276_v8  ;;  %v9273_v19 = vpop.f32.mrb[214].mxu0 }
0x5f9d   : > { %v14757_v10 = vpop.f32.mrb[215].mxu0  ;;  %v17714_v19 = vrot.slane %v17579_v59, 4 }
0x5fad   : > { %9288 = vrot.lane.b32.xlu1 %v17579_v59, %s15922_s12 }
0x5fb1   : > { %9393 = vrot.lane.b32.xlu1 %v17568_v35, %s15923_s14  ;;  %v17679_v35 = vrot.slane %v17566_v54, 4 }
0x6029   : > { %v9278_v60 = vpop.xlane.xlu1 %9277 }
0x602a   : > { %v9279_v12 = vsub.f32 %v9270_v33, %v9278_v60 }
0x602c   : > { %v9280_v26 = vmul.f32 1.442695, %v9279_v12 }
0x602d   : > { %v9289_v53 = vpop.permute.xlu1 %9288 }
0x602e   : > { %15711 = vpow2.f32 %v9280_v26  ;;  %v9294_v34 = vsel %vm1123_vm2, %v9289_v53, 0 }
0x602f   : > { %14759 = vmatpush3.bf16.msra.mxu1 %v9294_v34 }
0x6030   : > { %14772 = vmatprep.subr.bf16.mxu1 %v15919_v0 }
0x6031   : > { %v9394_v56 = vpop.permute.xlu1 %9393 }
0x6038   : > { %v15712_v11 = vpop.eup %15711 }
0x6039   : > { %v9282_v29 = vsel %vm1107_vm3, %v15712_v11, 0.0 }
0x603a   : > { %9283 = vadd.xlane.f32.xlu0 %v9282_v29 }
0x6050   : > { %9395 = vrot.lane.b32.xlu0 %v17566_v54, %s15923_s14 }
0x60c7   : > { %v9284_v31 = vpop.xlane.xlu0 %9283 }
0x60c8   : > { %15713 = vrcp.f32 %v9284_v31 }
0x60cb   : > { %v9396_v5 = vpop.permute.xlu0 %9395 }
0x60cc   : > { %v9401_v37 = vsel %vm1060_vm1, %v9396_v5, 0 }
0x60d2   : > { %v15714_v16 = vpop.eup %15713 }
0x60d3   : > { %v9286_v21 = vmul.f32 %v15714_v16, %v15712_v11 }
0x60d5   : > { %v9287_v39 = vpack.c.bf16 %v9286_v21, %v9286_v21 }
0x60d7   : > { %14761 = vmatmul.mubr.msk.bf16.vlgmr.msra.gmra.mrb[32].mxu1 %vm1107_vm3, %v9287_v39 }
0x60d8   : > { %14773 = vmatpush3.bf16.xpose.msra.mxu1 %v9401_v37  ;;  %14774 = vmatprep.mubr.msk.bf16.mxu1 %vm15920_vm0, %v15919_v0 }
0x60d9   : > { %14784 = vmatprep.subr.bf16.mxu1 %v15919_v0 }
0x60df   : > { %14775 = vmatmul.mubr.msk.bf16.vlgmr.msra.gmra.mrb[36].mxu1 %vm1060_vm1, %v9394_v56 }
0x60e0   : > { %14788 = vmatprep.mubr.msk.bf16.mxu1 %vm15920_vm0, %v15919_v0  ;;  %14785 = vmatpush3.bf16.msra.mxu1 %v17683_v7 }
0x60e1   : > { %14786 = vmatprep.subr.bf16.mxu1 %v15919_v0 }
0x60e4   : > { %14787 = vmatpush3.bf16.msra.mxu1 %v17689_v61 }
0x60e5   : > { %14798 = vmatprep.subr.bf16.mxu1 %v15919_v0 }
0x61aa   : > { %v9330_v47 = vpop.f32.mrb[32].mxu1 }
0x61ab   : > { %v9336_v9 = vpack.c.bf16 %v9330_v47, %v9330_v47  ;;  %v14762_v40 = vpop.f32.mrb[33].mxu1 }
0x61ac   : > { %v9333_v23 = vpop.f32.mrb[34].mxu1 }
0x61ad   : > { %v14763_v45 = vpop.f32.mrb[35].mxu1  ;;  %14769 = vmatmul.mubr.msk.bf16.vlgmr.msra.gmra.mrb[216].mxu0 %vm1060_vm1, %v9336_v9 }
0x61ae   : > { %14780 = vmatprep.mubr.msk.bf16.mxu0 %vm15920_vm0, %v15919_v0 }
0x61b2   : > { %v9437_v44 = vpop.f32.mrb[36].mxu1 }
0x61b3   : > { %v14776_v52 = vpop.f32.mrb[37].mxu1  ;;  %v9443_v20 = vsel %vm1107_vm3, %v9437_v44, -inf }
0x61b4   : > { %9444 = vmax.xlane.f32.xlu1 %v9443_v20  ;;  %v9440_v57 = vpop.f32.mrb[38].mxu1 }
0x61b5   : > { %v14777_v63 = vpop.f32.mrb[39].mxu1 }
0x61c5   : > { %9455 = vrot.lane.b32.xlu1 %v17579_v59, %s15923_s14 }
0x61c9   : > { %9668 = vrot.lane.b32.xlu1 %v17671_v27, %s15921_s18 }
0x6241   : > { %v9445_v30 = vpop.xlane.xlu1 %9444 }
0x6242   : > { %v9446_v49 = vsub.f32 %v9437_v44, %v9445_v30 }
0x6244   : > { %v9447_v3 = vmul.f32 1.442695, %v9446_v49 }
0x6245   : > { %v9456_v2 = vpop.permute.xlu1 %9455 }
0x6246   : > { %15715 = vpow2.f32 %v9447_v3  ;;  %v9461_v55 = vsel %vm1123_vm2, %v9456_v2, 0 }
0x6247   : > { %14779 = vmatpush3.bf16.msra.mxu0 %v9461_v55 }
0x6248   : > { %14792 = vmatprep.subr.bf16.mxu0 %v15919_v0 }
0x6249   : > { %v9669_v8 = vpop.permute.xlu1 %9668 }
0x6250   : > { %v15716_v17 = vpop.eup %15715 }
0x6251   : > { %v9449_v58 = vsel %vm1107_vm3, %v15716_v17, 0.0 }
0x6252   : > { %9450 = vadd.xlane.f32.xlu0 %v9449_v58 }
0x6268   : > { %9670 = vrot.lane.b32.xlu0 %v17679_v35, %s15921_s18 }
0x6280   : > { %v9386_v46 = vpop.f32.mrb[216].mxu0 }
0x6281   : > { %v17686_v48 = vadd.f32 %v9386_v46, %v17636_v62  ;;  %v14770_v6 = vpop.f32.mrb[217].mxu0  ;;  %v9566_v62 = vsel %vm1060_vm1, %v17679_v35, 0 }
0x6282   : > { %v9389_v41 = vpop.f32.mrb[218].mxu0 }
0x6283   : > { %v14771_v28 = vpop.f32.mrb[219].mxu0 }
0x62df   : > { %v9451_v54 = vpop.xlane.xlu0 %9450 }
0x62e0   : > { %15717 = vrcp.f32 %v9451_v54 }
0x62e3   : > { %v9671_v33 = vpop.permute.xlu0 %9670 }
0x62e4   : > { %v9676_v24 = vsel %vm1060_vm1, %v9671_v33, 0 }
0x62ea   : > { %v15718_v4 = vpop.eup %15717 }
0x62eb   : > { %v9453_v15 = vmul.f32 %v15718_v4, %v15716_v17 }
0x62ed   : > { %v9454_v36 = vpack.c.bf16 %v9453_v15, %v9453_v15 }
0x62ef   : > { %14781 = vmatmul.mubr.msk.bf16.vlgmr.msra.gmra.mrb[220].mxu0 %vm1107_vm3, %v9454_v36 }
0x62f0   : > { %14793 = vmatpush3.bf16.xpose.msra.mxu0 %v9566_v62  ;;  %14794 = vmatprep.mubr.msk.bf16.mxu0 %vm15920_vm0, %v15919_v0 }
0x62f1   : > { %14804 = vmatprep.subr.bf16.mxu0 %v15919_v0 }
0x62f7   : > { %14795 = vmatmul.mubr.msk.bf16.vlgmr.msra.gmra.mrb[224].mxu0 %vm1060_vm1, %v17671_v27 }
0x62f8   : > { %14805 = vmatpush3.bf16.xpose.msra.mxu0 %v9676_v24  ;;  %14806 = vmatprep.mubr.msk.bf16.mxu0 %vm15920_vm0, %v15919_v0 }
0x62f9   : > { %14816 = vmatprep.subr.bf16.mxu0 %v15919_v0 }
0x62ff   : > { %14807 = vmatmul.mubr.msk.bf16.vlgmr.msra.gmra.mrb[228].mxu0 %vm1060_vm1, %v9669_v8 }
0x6300   : > { %14817 = vmatpush3.bf16.msra.mxu0 %v17606_v18  ;;  %14820 = vmatprep.mubr.msk.bf16.mxu0 %vm15920_vm0, %v15919_v0  ;;  %v9625_v18 = vsel %vm1123_vm2, %v17714_v19, 0 }
0x6301   : > { %14818 = vmatprep.subr.bf16.mxu0 %v15919_v0 }
0x6304   : > { %14819 = vmatpush3.bf16.msra.mxu0 %v17609_v22 }
0x6305   : > { %14832 = vmatprep.subr.bf16.mxu0 %v15919_v0 }
0x63c2   : > { %v9497_v10 = vpop.f32.mrb[220].mxu0 }
0x63c3   : > { %v9503_v60 = vpack.c.bf16 %v9497_v10, %v9497_v10  ;;  %v14782_v12 = vpop.f32.mrb[221].mxu0 }
0x63c4   : > { %v9500_v26 = vpop.f32.mrb[222].mxu0 }
0x63c5   : > { %v14783_v53 = vpop.f32.mrb[223].mxu0  ;;  %14789 = vmatmul.mubr.msk.bf16.vlgmr.msra.gmra.mrb[40].mxu1 %vm1060_vm1, %v9503_v60 }
0x63c6   : > { %14799 = vmatpush3.bf16.msra.mxu1 %v9625_v18  ;;  %14800 = vmatprep.mubr.msk.bf16.mxu1 %vm15920_vm0, %v15919_v0 }
0x63c7   : > { %14810 = vmatprep.subr.bf16.mxu1 %v15919_v0 }
0x63ca   : > { %v9602_v22 = vpop.f32.mrb[224].mxu0 }
0x63cb   : > { %v14796_v34 = vpop.f32.mrb[225].mxu0  ;;  %v9608_v59 = vsel %vm1107_vm3, %v9602_v22, -inf }
0x63cc   : > { %9609 = vmax.xlane.f32.xlu1 %v9608_v59  ;;  %v9605_v11 = vpop.f32.mrb[226].mxu0 }
0x63cd   : > { %v14797_v29 = vpop.f32.mrb[227].mxu0 }
0x63d2   : > { %v9712_v31 = vpop.f32.mrb[228].mxu0 }
0x63d3   : > { %v14808_v16 = vpop.f32.mrb[229].mxu0  ;;  %v9718_v21 = vsel %vm1107_vm3, %v9712_v31, -inf }
0x63d4   : > { %9719 = vmax.xlane.f32.xlu0 %v9718_v21  ;;  %v9715_v5 = vpop.f32.mrb[230].mxu0 }
0x63d5   : > { %v14809_v39 = vpop.f32.mrb[231].mxu0 }
0x6459   : > { %v9610_v37 = vpop.xlane.xlu1 %9609 }
0x645a   : > { %v9611_v56 = vsub.f32 %v9602_v22, %v9610_v37 }
0x645c   : > { %v9612_v47 = vmul.f32 1.442695, %v9611_v56 }
0x645e   : > { %15719 = vpow2.f32 %v9612_v47 }
0x6461   : > { %v9720_v9 = vpop.xlane.xlu0 %9719 }
0x6462   : > { %v9721_v40 = vsub.f32 %v9712_v31, %v9720_v9 }
0x6464   : > { %v9722_v23 = vmul.f32 1.442695, %v9721_v40 }
0x6466   : > { %15721 = vpow2.f32 %v9722_v23 }
0x6468   : > { %v15720_v45 = vpop.eup %15719 }
0x6469   : > { %v9614_v44 = vsel %vm1107_vm3, %v15720_v45, 0.0 }
0x646a   : > { %9615 = vadd.xlane.f32.xlu0 %v9614_v44 }
0x6470   : > { %v15722_v52 = vpop.eup %15721 }
0x6471   : > { %v9724_v20 = vsel %vm1107_vm3, %v15722_v52, 0.0 }
0x6472   : > { %9725 = vadd.xlane.f32.xlu1 %v9724_v20 }
0x6480   : > { %9730 = vrot.lane.b32.xlu0 %v17714_v19, %s15921_s18 }
0x6483   : > { %9867 = vrot.lane.b32.xlu1 %v17679_v35, %s15922_s12 }
0x6487   : > { %9865 = vrot.lane.b32.xlu1 %v17671_v27, %s15922_s12 }
0x6498   : > { %v9553_v57 = vpop.f32.mrb[40].mxu1 }
0x6499   : > { %v17733_v63 = vadd.f32 %v9553_v57, %v17686_v48  ;;  %v14790_v30 = vpop.f32.mrb[41].mxu1 }
0x649a   : > { %v9556_v49 = vpop.f32.mrb[42].mxu1 }
0x649b   : > { %v14791_v3 = vpop.f32.mrb[43].mxu1 }
0x64f7   : > { %v9616_v2 = vpop.xlane.xlu0 %9615 }
0x64f8   : > { %15723 = vrcp.f32 %v9616_v2 }
0x64fb   : > { %v9731_v46 = vpop.permute.xlu0 %9730 }
0x64fc   : > { %v9736_v41 = vsel %vm1123_vm2, %v9731_v46, 0 }
0x64ff   : > { %v9726_v55 = vpop.xlane.xlu1 %9725 }
0x6500   : > { %15725 = vrcp.f32 %v9726_v55 }
0x6502   : > { %v15724_v17 = vpop.eup %15723 }
0x6503   : > { %v9618_v58 = vmul.f32 %v15724_v17, %v15720_v45 }
0x6505   : > { %v9619_v6 = vpack.c.bf16 %v9618_v58, %v9618_v58 }
0x6507   : > { %14801 = vmatmul.mubr.msk.bf16.vlgmr.msra.gmra.mrb[44].mxu1 %vm1107_vm3, %v9619_v6 }
0x6508   : > { %14811 = vmatpush3.bf16.msra.mxu1 %v9736_v41  ;;  %14812 = vmatprep.mubr.msk.bf16.mxu1 %vm15920_vm0, %v15919_v0 }
0x6509   : > { %14824 = vmatprep.subr.bf16.mxu1 %v15919_v0 }
0x650a   : > { %v15726_v48 = vpop.eup %15725 }
0x650b   : > { %v9728_v28 = vmul.f32 %v15726_v48, %v15722_v52 }
0x650d   : > { %v9729_v54 = vpack.c.bf16 %v9728_v28, %v9728_v28 }
0x650f   : > { %14813 = vmatmul.mubr.msk.bf16.vlgmr.msra.gmra.mrb[48].mxu1 %vm1107_vm3, %v9729_v54 }
0x6510   : > { %14825 = vmatpush3.bf16.msra.mxu1 %v17614_v13  ;;  %14828 = vmatprep.mubr.msk.bf16.mxu1 %vm15920_vm0, %v15919_v0  ;;  %v9868_v13 = vpop.permute.xlu1 %9867 }
0x6511   : > { %14826 = vmatprep.subr.bf16.mxu1 %v15919_v0  ;;  %v9873_v12 = vsel %vm1060_vm1, %v9868_v13, 0 }
0x6514   : > { %14827 = vmatpush3.bf16.msra.mxu1 %v17618_v14  ;;  %v9866_v26 = vpop.permute.xlu1 %9865 }
0x6515   : > { %14838 = vmatprep.subr.bf16.mxu1 %v15919_v0 }
0x65da   : > { %v9661_v4 = vpop.f32.mrb[44].mxu1 }
0x65db   : > { %v9667_v15 = vpack.c.bf16 %v9661_v4, %v9661_v4  ;;  %v14802_v36 = vpop.f32.mrb[45].mxu1 }
0x65dc   : > { %v9664_v62 = vpop.f32.mrb[46].mxu1 }
0x65dd   : > { %v14803_v33 = vpop.f32.mrb[47].mxu1  ;;  %14829 = vmatmul.mubr.msk.bf16.vlgmr.msra.gmra.mrb[52].mxu1 %vm1060_vm1, %v9667_v15 }
0x65de   : > { %14840 = vmatprep.mubr.msk.bf16.mxu1 %vm15920_vm0, %v15919_v0 }
0x65e2   : > { %v9772_v24 = vpop.f32.mrb[48].mxu1 }
0x65e3   : > { %v9778_v8 = vpack.c.bf16 %v9772_v24, %v9772_v24  ;;  %v14814_v10 = vpop.f32.mrb[49].mxu1 }
0x65e4   : > { %v9775_v60 = vpop.f32.mrb[50].mxu1 }
0x65e5   : > { %v14815_v14 = vpop.f32.mrb[51].mxu1  ;;  %14821 = vmatmul.mubr.msk.bf16.vlgmr.msra.gmra.mrb[232].mxu0 %vm1060_vm1, %v9778_v8 }
0x65e6   : > { %14833 = vmatpush3.bf16.xpose.msra.mxu0 %v9873_v12  ;;  %14834 = vmatprep.mubr.msk.bf16.mxu0 %vm15920_vm0, %v15919_v0 }
0x65e7   : > { %14844 = vmatprep.subr.bf16.mxu0 %v15919_v0 }
0x65ed   : > { %14835 = vmatmul.mubr.msk.bf16.vlgmr.msra.gmra.mrb[236].mxu0 %vm1060_vm1, %v9866_v26 }
0x65ee   : > { %14845 = vmatpush3.bf16.msra.mxu0 %v17648_v32  ;;  %14848 = vmatprep.mubr.msk.bf16.mxu0 %vm15920_vm0, %v15919_v0 }
0x65ef   : > { %14846 = vmatprep.subr.bf16.mxu0 %v15919_v0 }
0x65f2   : > { %14847 = vmatpush3.bf16.msra.mxu0 %v17660_v50 }
0x65f3   : > { %14858 = vmatprep.subr.bf16.mxu0 %v15919_v0 }
0x66b0   : > { %v9859_v53 = vpop.f32.mrb[52].mxu1 }
0x66b1   : > { %v14830_v18 = vpop.f32.mrb[53].mxu1 }
0x66b2   : > { %v9862_v22 = vpop.f32.mrb[54].mxu1 }
0x66b3   : > { %v14831_v34 = vpop.f32.mrb[55].mxu1 }
0x66b8   : > { %v9816_v59 = vpop.f32.mrb[232].mxu0 }
0x66b9   : > { %v17762_v11 = vadd.f32 %v9859_v53, %v9816_v59  ;;  %v14822_v29 = vpop.f32.mrb[233].mxu0  ;;  %v15467_v53 = vld [vmem:[#allocation2 + $0x540] sm:$0xff]  }
0x66ba   : > { %v9819_v31 = vpop.f32.mrb[234].mxu0  ;;  %v15469_v29 = vld [vmem:[#allocation2 + $0x550] sm:$0xff]  }
0x66bb   : > { %v14823_v16 = vpop.f32.mrb[235].mxu0  ;;  %v15470_v31 = vld [vmem:[#allocation2 + $0x558] sm:$0xff]  }
0x66bc   : > { %v15471_v16 = vld [vmem:[#allocation2 + $0x560] sm:$0xff]  }
0x66c0   : > { %v9909_v32 = vpop.f32.mrb[236].mxu0 }
0x66c1   : > { %v14836_v21 = vpop.f32.mrb[237].mxu0  ;;  %v9915_v5 = vsel %vm1107_vm3, %v9909_v32, -inf }
0x66c2   : > { %9916 = vmax.xlane.f32.xlu0 %v9915_v5  ;;  %v9912_v39 = vpop.f32.mrb[238].mxu0  ;;  %v15473_v21 = vld [vmem:[#allocation2 + $0x570] sm:$0xff]   ;;  %v15474_v5 = vld [vmem:[#allocation2 + $0x578] sm:$0xff]  }
0x66c3   : > { %v14837_v37 = vpop.f32.mrb[239].mxu0 }
0x66d8   : > { %9927 = vrot.lane.b32.xlu0 %v17714_v19, %s15922_s12 }
0x66dc   : > { %10020 = vrot.lane.b32.xlu0 %v17671_v27, %s15923_s14 }
0x674f   : > { %v9917_v50 = vpop.xlane.xlu0 %9916 }
0x6750   : > { %v9918_v56 = vsub.f32 %v9909_v32, %v9917_v50  ;;  %v15472_v32 = vld [vmem:[#allocation2 + $0x568] sm:$0xff]  }
0x6752   : > { %v9919_v47 = vmul.f32 1.442695, %v9918_v56 }
0x6753   : > { %v9928_v9 = vpop.permute.xlu0 %9927 }
0x6754   : > { %15727 = vpow2.f32 %v9919_v47  ;;  %v9933_v40 = vsel %vm1123_vm2, %v9928_v9, 0 }
0x6755   : > { %14839 = vmatpush3.bf16.msra.mxu1 %v9933_v40 }
0x6756   : > { %14852 = vmatprep.subr.bf16.mxu1 %v15919_v0 }
0x6757   : > { %v10021_v49 = vpop.permute.xlu0 %10020 }
0x675e   : > { %v15728_v23 = vpop.eup %15727 }
0x675f   : > { %v9921_v45 = vsel %vm1107_vm3, %v15728_v23, 0.0 }
0x6760   : > { %9922 = vadd.xlane.f32.xlu1 %v9921_v45 }
0x6771   : > { %10022 = vrot.lane.b32.xlu1 %v17679_v35, %s15923_s14 }
0x67ed   : > { %v9923_v44 = vpop.xlane.xlu1 %9922 }
0x67ee   : > { %15729 = vrcp.f32 %v9923_v44 }
0x67f1   : > { %v10023_v20 = vpop.permute.xlu1 %10022 }
0x67f2   : > { %v10028_v30 = vsel %vm1060_vm1, %v10023_v20, 0 }
0x67f8   : > { %v15730_v27 = vpop.eup %15729 }
0x67f9   : > { %v9925_v52 = vmul.f32 %v15730_v27, %v15728_v23 }
0x67fb   : > { %v9926_v57 = vpack.c.bf16 %v9925_v52, %v9925_v52  ;;  %v13001_v52 = vld [vmem:[#allocation6 + $0x18] ss:$0 sm:$0xff] }
0x67fd   : > { %14841 = vmatmul.mubr.msk.bf16.vlgmr.msra.gmra.mrb[56].mxu1 %vm1107_vm3, %v9926_v57 }
0x67fe   : > { %14853 = vmatpush3.bf16.xpose.msra.mxu1 %v10028_v30  ;;  %14854 = vmatprep.mubr.msk.bf16.mxu1 %vm15920_vm0, %v15919_v0 }
0x67ff   : > { %14864 = vmatprep.subr.bf16.mxu1 %v15919_v0 }
0x6805   : > { %14855 = vmatmul.mubr.msk.bf16.vlgmr.msra.gmra.mrb[60].mxu1 %vm1060_vm1, %v10021_v49 }
0x6806   : > { %14865 = vmatpush3.bf16.msra.mxu1 %v17683_v7  ;;  %14868 = vmatprep.mubr.msk.bf16.mxu1 %vm15920_vm0, %v15919_v0  ;;  %v17789_v7 = vld [vmem:[#allocation6 + $0x12] ss:$0 sm:$0xff] }
0x6807   : > { %14866 = vmatprep.subr.bf16.mxu1 %v15919_v0  ;;  %v10179_v58 = vadd.f32 %v17789_v7, %v17733_v63 }
0x6809   : > { %v17795_v28 = vadd.f32 %v10179_v58, %v17546_v38 }
0x680a   : > { %14867 = vmatpush3.bf16.msra.mxu1 %v17689_v61 }
0x680b   : > { %14892 = vmatprep.subr.bf16.mxu1 %v15919_v0 }
0x68d0   : > { %v9969_v35 = vpop.f32.mrb[56].mxu1 }
0x68d1   : > { %v9975_v3 = vpack.c.bf16 %v9969_v35, %v9969_v35  ;;  %v14842_v2 = vpop.f32.mrb[57].mxu1 }
0x68d2   : > { %v9972_v55 = vpop.f32.mrb[58].mxu1 }
0x68d3   : > { %v14843_v17 = vpop.f32.mrb[59].mxu1  ;;  %14849 = vmatmul.mubr.msk.bf16.vlgmr.msra.gmra.mrb[240].mxu0 %vm1060_vm1, %v9975_v3 }
0x68d4   : > { %14860 = vmatprep.mubr.msk.bf16.mxu0 %vm15920_vm0, %v15919_v0  ;;  %v15475_v17 = vld [vmem:[#allocation2 + $0x500] sm:$0xff]  }
0x68d8   : > { %v10064_v46 = vpop.f32.mrb[60].mxu1 }
0x68d9   : > { %v14856_v6 = vpop.f32.mrb[61].mxu1  ;;  %v10070_v61 = vsel %vm1107_vm3, %v10064_v46, -inf }
0x68da   : > { %10071 = vmax.xlane.f32.xlu1 %v10070_v61  ;;  %v10067_v41 = vpop.f32.mrb[62].mxu1 }
0x68db   : > { %v14857_v48 = vpop.f32.mrb[63].mxu1  ;;  %v15478_v41 = vld [vmem:[#allocation2 + $0x518] sm:$0xff]  }
0x68dc   : > { %v15479_v48 = vld [vmem:[#allocation2 + $0x520] sm:$0xff]  }
0x68de   : > { %10185 = vadd.xlane.f32.xlu1 %v17795_v28 }
0x6967   : > { %v10072_v54 = vpop.xlane.xlu1 %10071 }
0x6968   : > { %v10073_v4 = vsub.f32 %v10064_v46, %v10072_v54  ;;  %v15481_v54 = vld [vmem:[#allocation2 + $0x530] sm:$0xff]  }
0x696a   : > { %v10074_v15 = vmul.f32 1.442695, %v10073_v4  ;;  %v15482_v4 = vld [vmem:[#allocation2 + $0x538] sm:$0xff]  }
0x696b   : > { %v10186_v39 = vpop.xlane.xlu1 %10185 }
0x696c   : > { %15731 = vpow2.f32 %v10074_v15  ;;  %v10189_v50 = vmul.f32 0.0078125, %v10186_v39 }
0x696e   : > { %v10191_v45 = vsub.f32 %v17795_v28, %v10189_v50  ;;  %v15480_v28 = vld [vmem:[#allocation2 + $0x528] sm:$0xff]  }
0x6970   : > { %v10193_v27 = vmul.f32 %v10191_v45, %v10191_v45 }
0x6976   : > { %v15732_v36 = vpop.eup %15731 }
0x6977   : > { %v10076_v62 = vsel %vm1107_vm3, %v15732_v36, 0.0 }
0x6978   : > { %10077 = vadd.xlane.f32.xlu0 %v10076_v62 }
0x698e   : > { %10082 = vrot.lane.b32.xlu0 %v17714_v19, %s15923_s14 }
0x69a6   : > { %v10013_v63 = vpop.f32.mrb[240].mxu0 }
0x69a7   : > { %v10019_v33 = vadd.f32 %v10013_v63, %v17762_v11  ;;  %v14850_v13 = vpop.f32.mrb[241].mxu0  ;;  %v15468_v11 = vld [vmem:[#allocation2 + $0x548] sm:$0xff]  }
0x69a8   : > { %v10016_v24 = vpop.f32.mrb[242].mxu0 }
0x69a9   : > { %v14851_v38 = vpop.f32.mrb[243].mxu0 }
0x6a05   : > { %v10078_v8 = vpop.xlane.xlu0 %10077 }
0x6a06   : > { %15733 = vrcp.f32 %v10078_v8  ;;  %v12990_v8 = vld [vmem:[#allocation6 + $0x2a] ss:$0 sm:$0xff] }
0x6a09   : > { %v10083_v10 = vpop.permute.xlu0 %10082 }
0x6a0a   : > { %v10088_v60 = vsel %vm1123_vm2, %v10083_v10, 0 }
0x6a0b   : > { %14859 = vmatpush3.bf16.msra.mxu0 %v10088_v60 }
0x6a0c   : > { %14872 = vmatprep.subr.bf16.mxu0 %v15919_v0 }
0x6a10   : > { %v15734_v12 = vpop.eup %15733 }
0x6a11   : > { %v10080_v14 = vmul.f32 %v15734_v12, %v15732_v36 }
0x6a13   : > { %v10081_v26 = vpack.c.bf16 %v10080_v14, %v10080_v14  ;;  %v12991_v14 = vld [vmem:[#allocation6 + $0x30] ss:$0 sm:$0xff] }
0x6a15   : > { %14861 = vmatmul.mubr.msk.bf16.vlgmr.msra.gmra.mrb[244].mxu0 %vm1107_vm3, %v10081_v26 }
0x6a16   : > { %14888 = vmatprep.mubr.msk.bf16.mxu0 %vm15920_vm0, %v15919_v0  ;;  %14873 = vmatpush3.bf16.msra.mxu0 %v15475_v17 }
0x6a17   : > { %14874 = vmatprep.subr.bf16.mxu0 %v15919_v0 }
0x6ae8   : > { %v10124_v19 = vpop.f32.mrb[244].mxu0 }
0x6ae9   : > { %v10130_v18 = vpack.c.bf16 %v10124_v19, %v10124_v19  ;;  %v14862_v22 = vpop.f32.mrb[245].mxu0 }
0x6aea   : > { %v10127_v34 = vpop.f32.mrb[246].mxu0 }
0x6aeb   : > { %v14863_v59 = vpop.f32.mrb[247].mxu0  ;;  %14869 = vmatmul.mubr.msk.bf16.vlgmr.msra.gmra.mrb[64].mxu1 %vm1060_vm1, %v10130_v18  ;;  %v15483_v18 = vld [vmem:[#allocation2 + $0x580] sm:$0xff]   ;;  %v15484_v34 = vld [vmem:[#allocation2 + $0x588] sm:$0xff]  }
0x6aec   : > { %14893 = vmatpush3.bf16.msra.mxu1 %v15467_v53  ;;  %14908 = vmatprep.mubr.msk.bf16.mxu1 %vm15920_vm0, %v15919_v0  ;;  %v15485_v59 = vld [vmem:[#allocation2 + $0x590] sm:$0xff]  }
0x6aed   : > { %14894 = vmatprep.subr.bf16.mxu1 %v15919_v0 }
0x6af0   : > { %14895 = vmatpush3.bf16.msra.mxu1 %v15468_v11  ;;  %v15486_v11 = vld [vmem:[#allocation2 + $0x598] sm:$0xff]  }
0x6af1   : > { %14896 = vmatprep.subr.bf16.mxu1 %v15919_v0 }
0x6af4   : > { %14897 = vmatpush3.bf16.msra.mxu1 %v15469_v29  ;;  %v15487_v29 = vld [vmem:[#allocation2 + $0x5a0] sm:$0xff]  }
0x6af5   : > { %14898 = vmatprep.subr.bf16.mxu1 %v15919_v0 }
0x6af8   : > { %14899 = vmatpush3.bf16.msra.mxu1 %v15470_v31  ;;  %v15488_v31 = vld [vmem:[#allocation2 + $0x5a8] sm:$0xff]  }
0x6af9   : > { %14900 = vmatprep.subr.bf16.mxu1 %v15919_v0 }
0x6afc   : > { %14901 = vmatpush3.bf16.msra.mxu1 %v15471_v16  ;;  %v15489_v16 = vld [vmem:[#allocation2 + $0x5b0] sm:$0xff]  }
0x6afd   : > { %14902 = vmatprep.subr.bf16.mxu1 %v15919_v0 }
0x6b00   : > { %14903 = vmatpush3.bf16.msra.mxu1 %v15472_v32  ;;  %v15490_v32 = vld [vmem:[#allocation2 + $0x5b8] sm:$0xff]  }
0x6b01   : > { %14904 = vmatprep.subr.bf16.mxu1 %v15919_v0 }
0x6b04   : > { %14905 = vmatpush3.bf16.msra.mxu1 %v15473_v21  ;;  %v12992_v21 = vld [vmem:[#allocation6 + $0x17] ss:$0 sm:$0xff] }
0x6b05   : > { %14906 = vmatprep.subr.bf16.mxu1 %v15919_v0 }
0x6b08   : > { %14907 = vmatpush3.bf16.msra.mxu1 %v15474_v5 }
0x6b09   : > { %14932 = vmatprep.subr.bf16.mxu1 %v15919_v0 }
0x6b0b   : > { %14909 = vmatmul.mubr.bf16.vlgmr.msra.gmra.mrb[68].mxu1 %v17205_v51 }
0x6b0c   : > { %14934 = vmatprep.mubr.msk.bf16.mxu1 %vm15920_vm0, %v15919_v0 }
0x6bbe   : > { %v10168_v37 = vpop.f32.mrb[64].mxu1 }
0x6bbf   : > { %v10174_v56 = vadd.f32 %v10168_v37, %v10019_v33  ;;  %v14870_v47 = vpop.f32.mrb[65].mxu1 }
0x6bc0   : > { %v10171_v9 = vpop.f32.mrb[66].mxu1 }
0x6bc1   : > { %v10180_v40 = vadd.f32 %v17789_v7, %v10174_v56  ;;  %v14871_v23 = vpop.f32.mrb[67].mxu1  ;;  %v15477_v7 = vld [vmem:[#allocation2 + $0x510] sm:$0xff]  }
0x6bc3   : > { %v10182_v44 = vadd.f32 %v10180_v40, %v17548_v25  ;;  %v15476_v25 = vld [vmem:[#allocation2 + $0x508] sm:$0xff]  }
0x6bc4   : > { %14875 = vmatpush3.bf16.msra.mxu0 %v15476_v25 }
0x6bc5   : > { %10187 = vadd.xlane.f32.xlu1 %v10182_v44  ;;  %14876 = vmatprep.subr.bf16.mxu0 %v15919_v0 }
0x6bc8   : > { %14877 = vmatpush3.bf16.msra.mxu0 %v15477_v7 }
0x6bc9   : > { %10195 = vadd.xlane.f32.xlu1 %v10193_v27  ;;  %14878 = vmatprep.subr.bf16.mxu0 %v15919_v0 }
0x6bcc   : > { %14879 = vmatpush3.bf16.msra.mxu0 %v15478_v41 }
0x6bcd   : > { %14880 = vmatprep.subr.bf16.mxu0 %v15919_v0 }
0x6bd0   : > { %14881 = vmatpush3.bf16.msra.mxu0 %v15479_v48 }
0x6bd1   : > { %14882 = vmatprep.subr.bf16.mxu0 %v15919_v0 }
0x6bd4   : > { %14883 = vmatpush3.bf16.msra.mxu0 %v15480_v28 }
0x6bd5   : > { %14884 = vmatprep.subr.bf16.mxu0 %v15919_v0 }
0x6bd8   : > { %14885 = vmatpush3.bf16.msra.mxu0 %v15481_v54 }
0x6bd9   : > { %14886 = vmatprep.subr.bf16.mxu0 %v15919_v0 }
0x6bdc   : > { %14887 = vmatpush3.bf16.msra.mxu0 %v15482_v4 }
0x6bdd   : > { %14912 = vmatprep.subr.bf16.mxu0 %v15919_v0 }
0x6bde   : > { %v10437_v20 = vpop.f32.mrb[68].mxu1 }
0x6bdf   : > { %v14910_v57 = vpop.f32.mrb[69].mxu1  ;;  %v10438_v49 = vadd.f32 %v13001_v52, %v10437_v20 }
0x6be0   : > { %v10440_v30 = vpop.f32.mrb[70].mxu1 }
0x6be1   : > { %v10441_v35 = vadd.f32 %v13001_v52, %v10440_v30  ;;  %v14911_v3 = vpop.f32.mrb[71].mxu1 }
0x6be3   : > { %v17824_v2 = vpack.c.bf16 %v10441_v35, %v10438_v49 }
0x6be5   : > { %v10580_v55 = vsel %vm1060_vm1, %v17824_v2, 0 }
0x6be6   : > { %14933 = vmatpush3.bf16.xpose.msra.mxu1 %v10580_v55 }
0x6be7   : > { %14938 = vmatprep.subr.bf16.mxu1 %v15919_v0 }
0x6c52   : > { %v10188_v58 = vpop.xlane.xlu1 %10187 }
0x6c53   : > { %v10190_v46 = vmul.f32 0.0078125, %v10188_v58 }
0x6c55   : > { %v10192_v6 = vsub.f32 %v10182_v44, %v10190_v46 }
0x6c56   : > { %v10196_v15 = vpop.xlane.xlu1 %10195 }
0x6c57   : > { %v10194_v61 = vmul.f32 %v10192_v6, %v10192_v6  ;;  %v10199_v36 = vmul.f32 0.0078125, %v10196_v15 }
0x6c59   : > { %10197 = vadd.xlane.f32.xlu1 %v10194_v61  ;;  %v10201_v62 = vadd.f32 1e-05, %v10199_v36 }
0x6c5b   : > { %15735 = vrsqrt.f32 %v10201_v62 }
0x6c65   : > { %v15736_v24 = vpop.eup %15735 }
0x6c66   : > { %v10205_v38 = vmul.f32 %v15736_v24, %v10191_v45 }
0x6c68   : > { %v10211_v12 = vmul.f32 %v12990_v8, %v10205_v38 }
0x6c6a   : > { %v17837_v19 = vadd.f32 %v12991_v14, %v10211_v12 }
0x6ce6   : > { %v10198_v63 = vpop.xlane.xlu1 %10197 }
0x6ce7   : > { %v10200_v33 = vmul.f32 0.0078125, %v10198_v63 }
0x6ce9   : > { %v10202_v13 = vadd.f32 1e-05, %v10200_v33 }
0x6ceb   : > { %15737 = vrsqrt.f32 %v10202_v13 }
0x6cf5   : > { %v15738_v10 = vpop.eup %15737 }
0x6cf6   : > { %v10206_v60 = vmul.f32 %v15738_v10, %v10192_v6 }
0x6cf8   : > { %v10212_v26 = vmul.f32 %v12990_v8, %v10206_v60 }
0x6cfa   : > { %v17839_v53 = vadd.f32 %v12991_v14, %v10212_v26 }
0x6cfc   : > { %v10223_v22 = vpack.c.bf16 %v17839_v53, %v17837_v19 }
0x6cfe   : > { %14889 = vmatmul.mubr.bf16.vlgmr.msra.gmra.mrb[248].mxu0 %v10223_v22 }
0x6cff   : > { %14913 = vmatpush3.bf16.msra.mxu0 %v15483_v18  ;;  %14928 = vmatprep.mubr.msk.bf16.mxu0 %vm15920_vm0, %v15919_v0 }
0x6d00   : > { %14914 = vmatprep.subr.bf16.mxu0 %v15919_v0 }
0x6d03   : > { %14915 = vmatpush3.bf16.msra.mxu0 %v15484_v34  ;;  %v17889_v34 = vld [vmem:[#allocation2 + $0x5d0] sm:$0xff]  }
0x6d04   : > { %14916 = vmatprep.subr.bf16.mxu0 %v15919_v0 }
0x6d07   : > { %14917 = vmatpush3.bf16.msra.mxu0 %v15485_v59  ;;  %v17892_v59 = vld [vmem:[#allocation2 + $0x5d8] sm:$0xff]  }
0x6d08   : > { %14918 = vmatprep.subr.bf16.mxu0 %v15919_v0 }
0x6d0b   : > { %14919 = vmatpush3.bf16.msra.mxu0 %v15486_v11 }
0x6d0c   : > { %14920 = vmatprep.subr.bf16.mxu0 %v15919_v0 }
0x6d0f   : > { %14921 = vmatpush3.bf16.msra.mxu0 %v15487_v29 }
0x6d10   : > { %14922 = vmatprep.subr.bf16.mxu0 %v15919_v0 }
0x6d13   : > { %14923 = vmatpush3.bf16.msra.mxu0 %v15488_v31 }
0x6d14   : > { %14924 = vmatprep.subr.bf16.mxu0 %v15919_v0 }
0x6d17   : > { %14925 = vmatpush3.bf16.msra.mxu0 %v15489_v16 }
0x6d18   : > { %14926 = vmatprep.subr.bf16.mxu0 %v15919_v0 }
0x6d1b   : > { %14927 = vmatpush3.bf16.msra.mxu0 %v15490_v32 }
0x6d1c   : > { %14956 = vmatprep.subr.bf16.mxu0 %v15919_v0 }
0x6d1e   : > { %14929 = vmatmul.mubr.bf16.vlgmr.msra.gmra.mrb[252].mxu0 %v17205_v51  ;;  %v13010_v51 = vld [vmem:[#allocation6 + $0x19] ss:$0 sm:$0xff] }
0x6d1f   : > { %14960 = vmatprep.mubr.msk.bf16.mxu0 %vm15920_vm0, %v15919_v0  ;;  %14957 = vmatpush3.bf16.msra.mxu0 %v17889_v34 }
0x6d20   : > { %14958 = vmatprep.subr.bf16.mxu0 %v15919_v0 }
0x6d23   : > { %14959 = vmatpush3.bf16.msra.mxu0 %v17892_v59 }
0x6d24   : > { %14972 = vmatprep.subr.bf16.mxu0 %v15919_v0 }
0x6dd1   : > { %v10327_v5 = vpop.f32.mrb[248].mxu0 }
0x6dd2   : > { %v10328_v39 = vadd.f32 %v12992_v21, %v10327_v5  ;;  %v14890_v37 = vpop.f32.mrb[249].mxu0 }
0x6dd3   : > { %v10330_v50 = vpop.f32.mrb[250].mxu0 }
0x6dd4   : > { %v10331_v56 = vadd.f32 %v12992_v21, %v10330_v50  ;;  %v14891_v47 = vpop.f32.mrb[251].mxu0  ;;  %v10554_v9 = vmul.f32 0.17677669, %v10328_v39  ;;  %v17899_v21 = vld [vmem:[#allocation2 + $0x5c0] sm:$0xff]   ;;  %v17903_v39 = vld [vmem:[#allocation2 + $0x5c8] sm:$0xff]  }
0x6dd6   : > { %v10555_v40 = vmul.f32 0.17677669, %v10331_v56 }
0x6dd8   : > { %v17856_v23 = vpack.c.bf16 %v10555_v40, %v10554_v9 }
0x6dda   : > { %14935 = vmatmul.mubr.msk.bf16.vlgmr.msra.gmra.mrb[72].mxu1 %vm1060_vm1, %v17856_v23 }
0x6ddb   : > { %14940 = vmatprep.mubr.msk.bf16.mxu1 %vm15920_vm0, %v15919_v0 }
0x6df1   : > { %v10547_v45 = vpop.f32.mrb[252].mxu0 }
0x6df2   : > { %v14930_v44 = vpop.f32.mrb[253].mxu0  ;;  %v10548_v52 = vadd.f32 %v13010_v51, %v10547_v45 }
0x6df3   : > { %v10550_v27 = vpop.f32.mrb[254].mxu0 }
0x6df4   : > { %v10551_v20 = vadd.f32 %v13010_v51, %v10550_v27  ;;  %v14931_v57 = vpop.f32.mrb[255].mxu0 }
0x6df6   : > { %v17862_v30 = vpack.c.bf16 %v10551_v20, %v10548_v52 }
0x6df8   : > { %v10638_v49 = vsel %vm1123_vm2, %v17862_v30, 0 }
0x6df9   : > { %14939 = vmatpush3.bf16.msra.mxu1 %v10638_v49 }
0x6dfa   : > { %14944 = vmatprep.subr.bf16.mxu1 %v15919_v0 }
0x6ead   : > { %v10616_v35 = vpop.f32.mrb[72].mxu1 }
0x6eae   : > { %v14936_v3 = vpop.f32.mrb[73].mxu1  ;;  %v10622_v55 = vsel %vm1107_vm3, %v10616_v35, -inf }
0x6eaf   : > { %10623 = vmax.xlane.f32.xlu1 %v10622_v55  ;;  %v10619_v17 = vpop.f32.mrb[74].mxu1 }
0x6eb0   : > { %v14937_v25 = vpop.f32.mrb[75].mxu1 }
0x6ec0   : > { %10685 = vrot.lane.b32.xlu1 %v17824_v2, %s15921_s18 }
0x6ec4   : > { %10682 = vrot.lane.b32.xlu1 %v17856_v23, %s15921_s18 }
0x6f3c   : > { %v10624_v7 = vpop.xlane.xlu1 %10623 }
0x6f3d   : > { %v10625_v58 = vsub.f32 %v10616_v35, %v10624_v7 }
0x6f3f   : > { %v10626_v46 = vmul.f32 1.442695, %v10625_v58 }
0x6f40   : > { %v10686_v54 = vpop.permute.xlu1 %10685 }
0x6f41   : > { %15739 = vpow2.f32 %v10626_v46  ;;  %v10691_v15 = vsel %vm1060_vm1, %v10686_v54, 0 }
0x6f44   : > { %v10683_v36 = vpop.permute.xlu1 %10682 }
0x6f4b   : > { %v15740_v6 = vpop.eup %15739 }
0x6f4c   : > { %v10628_v61 = vsel %vm1107_vm3, %v15740_v6, 0.0 }
0x6f4d   : > { %10629 = vadd.xlane.f32.xlu0 %v10628_v61 }
0x6fda   : > { %v10630_v41 = vpop.xlane.xlu0 %10629 }
0x6fdb   : > { %15741 = vrcp.f32 %v10630_v41 }
0x6fe5   : > { %v15742_v48 = vpop.eup %15741 }
0x6fe6   : > { %v10632_v28 = vmul.f32 %v15742_v48, %v15740_v6 }
0x6fe8   : > { %v10633_v4 = vpack.c.bf16 %v10632_v28, %v10632_v28 }
0x6fea   : > { %14941 = vmatmul.mubr.msk.bf16.vlgmr.msra.gmra.mrb[76].mxu1 %vm1107_vm3, %v10633_v4 }
0x6feb   : > { %14945 = vmatpush3.bf16.xpose.msra.mxu1 %v10691_v15  ;;  %14946 = vmatprep.mubr.msk.bf16.mxu1 %vm15920_vm0, %v15919_v0 }
0x6fec   : > { %14950 = vmatprep.subr.bf16.mxu1 %v15919_v0 }
0x6ff2   : > { %14947 = vmatmul.mubr.msk.bf16.vlgmr.msra.gmra.mrb[80].mxu1 %vm1060_vm1, %v10683_v36  ;;  %v17933_v36 = vld [vmem:[#allocation2 + $0x5e0] sm:$0xff]  }
0x6ff3   : > { %14952 = vmatprep.mubr.msk.bf16.mxu1 %vm15920_vm0, %v15919_v0 }
0x70bd   : > { %v10674_v62 = vpop.f32.mrb[76].mxu1 }
0x70be   : > { %v14942_v63 = vpop.f32.mrb[77].mxu1  ;;  %v10680_v37 = vpack.c.bf16 %v10674_v62, %v10674_v62 }
0x70bf   : > { %v10677_v33 = vpop.f32.mrb[78].mxu1 }
0x70c0   : > { %v14943_v13 = vpop.f32.mrb[79].mxu1 }
0x70c5   : > { %v10727_v24 = vpop.f32.mrb[80].mxu1 }
0x70c6   : > { %v14948_v38 = vpop.f32.mrb[81].mxu1  ;;  %v10733_v8 = vsel %vm1107_vm3, %v10727_v24, -inf }
0x70c7   : > { %10734 = vmax.xlane.f32.xlu1 %v10733_v8  ;;  %v10730_v10 = vpop.f32.mrb[82].mxu1 }
0x70c8   : > { %v14949_v60 = vpop.f32.mrb[83].mxu1  ;;  %v17945_v10 = vld [vmem:[#allocation2 + $0x5e8] sm:$0xff]  }
0x70d8   : > { %10905 = vrot.lane.b32.xlu1 %v17856_v23, %s15922_s12 }
0x7154   : > { %v10735_v12 = vpop.xlane.xlu1 %10734 }
0x7155   : > { %v10736_v14 = vsub.f32 %v10727_v24, %v10735_v12 }
0x7157   : > { %v10737_v26 = vmul.f32 1.442695, %v10736_v14 }
0x7158   : > { %v10906_v52 = vpop.permute.xlu1 %10905 }
0x7159   : > { %15743 = vpow2.f32 %v10737_v26 }
0x7163   : > { %v15744_v18 = vpop.eup %15743 }
0x7164   : > { %v10739_v22 = vsel %vm1107_vm3, %v15744_v18, 0.0 }
0x7165   : > { %10740 = vadd.xlane.f32.xlu0 %v10739_v22 }
0x717b   : > { %10746 = vrot.lane.b32.xlu0 %v17862_v30, %s15921_s18 }
0x717f   : > { %10907 = vrot.lane.b32.xlu0 %v17824_v2, %s15922_s12 }
0x71f2   : > { %v10741_v11 = vpop.xlane.xlu0 %10740 }
0x71f3   : > { %15745 = vrcp.f32 %v10741_v11 }
0x71f6   : > { %v10747_v29 = vpop.permute.xlu0 %10746 }
0x71f7   : > { %v10752_v31 = vsel %vm1123_vm2, %v10747_v29, 0 }
0x71f8   : > { %14951 = vmatpush3.bf16.msra.mxu1 %v10752_v31 }
0x71f9   : > { %14964 = vmatprep.subr.bf16.mxu1 %v15919_v0 }
0x71fa   : > { %v10908_v50 = vpop.permute.xlu0 %10907 }
0x71fb   : > { %v10913_v51 = vsel %vm1060_vm1, %v10908_v50, 0 }
0x71fd   : > { %v15746_v16 = vpop.eup %15745 }
0x71fe   : > { %v10743_v32 = vmul.f32 %v15746_v16, %v15744_v18 }
0x7200   : > { %v10744_v5 = vpack.c.bf16 %v10743_v32, %v10743_v32  ;;  %v17956_v32 = vrot.slane %v17856_v23, 4 }
0x7202   : > { %14953 = vmatmul.mubr.msk.bf16.vlgmr.msra.gmra.mrb[84].mxu1 %vm1107_vm3, %v10744_v5 }
0x7203   : > { %14965 = vmatpush3.bf16.msra.mxu1 %v17899_v21  ;;  %14968 = vmatprep.mubr.msk.bf16.mxu1 %vm15920_vm0, %v15919_v0 }
0x7204   : > { %14966 = vmatprep.subr.bf16.mxu1 %v15919_v0 }
0x7207   : > { %14967 = vmatpush3.bf16.msra.mxu1 %v17903_v39 }
0x7208   : > { %14978 = vmatprep.subr.bf16.mxu1 %v15919_v0 }
0x720a   : > { %14969 = vmatmul.mubr.msk.bf16.vlgmr.msra.gmra.mrb[88].mxu1 %vm1060_vm1, %v10680_v37 }
0x720b   : > { %14980 = vmatprep.mubr.msk.bf16.mxu1 %vm15920_vm0, %v15919_v0 }
0x72d5   : > { %v10788_v56 = vpop.f32.mrb[84].mxu1 }
0x72d6   : > { %v10794_v47 = vpack.c.bf16 %v10788_v56, %v10788_v56  ;;  %v14954_v9 = vpop.f32.mrb[85].mxu1 }
0x72d7   : > { %v10791_v40 = vpop.f32.mrb[86].mxu1 }
0x72d8   : > { %v14955_v45 = vpop.f32.mrb[87].mxu1  ;;  %14961 = vmatmul.mubr.msk.bf16.vlgmr.msra.gmra.mrb[0].mxu0 %vm1060_vm1, %v10794_v47 }
0x72d9   : > { %14973 = vmatpush3.bf16.xpose.msra.mxu0 %v10913_v51  ;;  %14974 = vmatprep.mubr.msk.bf16.mxu0 %vm15920_vm0, %v15919_v0  ;;  %v17968_v51 = vld [vmem:[#allocation2 + $0x5f0] sm:$0xff]  }
0x72da   : > { %14984 = vmatprep.subr.bf16.mxu0 %v15919_v0 }
0x72dd   : > { %v10899_v44 = vpop.f32.mrb[88].mxu1 }
0x72de   : > { %v14970_v27 = vpop.f32.mrb[89].mxu1 }
0x72df   : > { %v10902_v20 = vpop.f32.mrb[90].mxu1 }
0x72e0   : > { %v14971_v57 = vpop.f32.mrb[91].mxu1  ;;  %14975 = vmatmul.mubr.msk.bf16.vlgmr.msra.gmra.mrb[4].mxu0 %vm1060_vm1, %v10906_v52  ;;  %v17974_v52 = vld [vmem:[#allocation2 + $0x5f8] sm:$0xff]  }
0x72e1   : > { %14988 = vmatprep.mubr.msk.bf16.mxu0 %vm15920_vm0, %v15919_v0  ;;  %14985 = vmatpush3.bf16.msra.mxu0 %v17933_v36 }
0x72e2   : > { %14986 = vmatprep.subr.bf16.mxu0 %v15919_v0 }
0x72e5   : > { %14987 = vmatpush3.bf16.msra.mxu0 %v17945_v10 }
0x72e6   : > { %14998 = vmatprep.subr.bf16.mxu0 %v15919_v0 }
0x73ab   : > { %v10844_v49 = vpop.f32.mrb[0].mxu0 }
0x73ac   : > { %v17921_v35 = vadd.f32 %v10899_v44, %v10844_v49  ;;  %v14962_v3 = vpop.f32.mrb[1].mxu0 }
0x73ad   : > { %v10847_v55 = vpop.f32.mrb[2].mxu0 }
0x73ae   : > { %v14963_v17 = vpop.f32.mrb[3].mxu0 }
0x73b3   : > { %v10949_v25 = vpop.f32.mrb[4].mxu0 }
0x73b4   : > { %v14976_v7 = vpop.f32.mrb[5].mxu0  ;;  %v10955_v58 = vsel %vm1107_vm3, %v10949_v25, -inf }
0x73b5   : > { %10956 = vmax.xlane.f32.xlu0 %v10955_v58  ;;  %v10952_v46 = vpop.f32.mrb[6].mxu0  ;;  %v17999_v58 = vrot.slane %v17862_v30, 4 }
0x73b6   : > { %v14977_v6 = vpop.f32.mrb[7].mxu0 }
0x73cb   : > { %10967 = vrot.lane.b32.xlu0 %v17862_v30, %s15922_s12 }
0x73cf   : > { %11072 = vrot.lane.b32.xlu0 %v17856_v23, %s15923_s14  ;;  %v17964_v23 = vrot.slane %v17824_v2, 4 }
0x7442   : > { %v10957_v61 = vpop.xlane.xlu0 %10956 }
0x7443   : > { %v10958_v41 = vsub.f32 %v10949_v25, %v10957_v61 }
0x7445   : > { %v10959_v48 = vmul.f32 1.442695, %v10958_v41 }
0x7446   : > { %v10968_v28 = vpop.permute.xlu0 %10967 }
0x7447   : > { %15747 = vpow2.f32 %v10959_v48  ;;  %v10973_v54 = vsel %vm1123_vm2, %v10968_v28, 0 }
0x7448   : > { %14979 = vmatpush3.bf16.msra.mxu1 %v10973_v54 }
0x7449   : > { %14992 = vmatprep.subr.bf16.mxu1 %v15919_v0 }
0x744a   : > { %v11073_v8 = vpop.permute.xlu0 %11072 }
0x7451   : > { %v15748_v4 = vpop.eup %15747 }
0x7452   : > { %v10961_v15 = vsel %vm1107_vm3, %v15748_v4, 0.0 }
0x7453   : > { %10962 = vadd.xlane.f32.xlu1 %v10961_v15 }
0x7464   : > { %11074 = vrot.lane.b32.xlu1 %v17824_v2, %s15923_s14 }
0x74e0   : > { %v10963_v62 = vpop.xlane.xlu1 %10962 }
0x74e1   : > { %15749 = vrcp.f32 %v10963_v62 }
0x74e4   : > { %v11075_v13 = vpop.permute.xlu1 %11074 }
0x74e5   : > { %v11080_v38 = vsel %vm1060_vm1, %v11075_v13, 0 }
0x74eb   : > { %v15750_v63 = vpop.eup %15749 }
0x74ec   : > { %v10965_v33 = vmul.f32 %v15750_v63, %v15748_v4 }
0x74ee   : > { %v10966_v24 = vpack.c.bf16 %v10965_v33, %v10965_v33 }
0x74f0   : > { %14981 = vmatmul.mubr.msk.bf16.vlgmr.msra.gmra.mrb[92].mxu1 %vm1107_vm3, %v10966_v24 }
0x74f1   : > { %14993 = vmatpush3.bf16.xpose.msra.mxu1 %v11080_v38  ;;  %14994 = vmatprep.mubr.msk.bf16.mxu1 %vm15920_vm0, %v15919_v0 }
0x74f2   : > { %15004 = vmatprep.subr.bf16.mxu1 %v15919_v0 }
0x74f8   : > { %14995 = vmatmul.mubr.msk.bf16.vlgmr.msra.gmra.mrb[96].mxu1 %vm1060_vm1, %v11073_v8 }
0x74f9   : > { %15008 = vmatprep.mubr.msk.bf16.mxu1 %vm15920_vm0, %v15919_v0  ;;  %15005 = vmatpush3.bf16.msra.mxu1 %v17968_v51 }
0x74fa   : > { %15006 = vmatprep.subr.bf16.mxu1 %v15919_v0 }
0x74fd   : > { %15007 = vmatpush3.bf16.msra.mxu1 %v17974_v52 }
0x74fe   : > { %15018 = vmatprep.subr.bf16.mxu1 %v15919_v0 }
0x75c3   : > { %v11009_v60 = vpop.f32.mrb[92].mxu1 }
0x75c4   : > { %v11015_v12 = vpack.c.bf16 %v11009_v60, %v11009_v60  ;;  %v14982_v14 = vpop.f32.mrb[93].mxu1 }
0x75c5   : > { %v11012_v26 = vpop.f32.mrb[94].mxu1 }
0x75c6   : > { %v14983_v18 = vpop.f32.mrb[95].mxu1  ;;  %14989 = vmatmul.mubr.msk.bf16.vlgmr.msra.gmra.mrb[8].mxu0 %vm1060_vm1, %v11015_v12 }
0x75c7   : > { %15000 = vmatprep.mubr.msk.bf16.mxu0 %vm15920_vm0, %v15919_v0 }
0x75cb   : > { %v11116_v22 = vpop.f32.mrb[96].mxu1 }
0x75cc   : > { %v14996_v11 = vpop.f32.mrb[97].mxu1  ;;  %v11122_v29 = vsel %vm1107_vm3, %v11116_v22, -inf }
0x75cd   : > { %11123 = vmax.xlane.f32.xlu0 %v11122_v29  ;;  %v11119_v31 = vpop.f32.mrb[98].mxu1 }
0x75ce   : > { %v14997_v16 = vpop.f32.mrb[99].mxu1 }
0x75e3   : > { %11134 = vrot.lane.b32.xlu0 %v17862_v30, %s15923_s14 }
0x75e7   : > { %11347 = vrot.lane.b32.xlu0 %v17956_v32, %s15921_s18 }
0x765a   : > { %v11124_v5 = vpop.xlane.xlu0 %11123 }
0x765b   : > { %v11125_v37 = vsub.f32 %v11116_v22, %v11124_v5 }
0x765d   : > { %v11126_v50 = vmul.f32 1.442695, %v11125_v37 }
0x765e   : > { %v11135_v56 = vpop.permute.xlu0 %11134 }
0x765f   : > { %15751 = vpow2.f32 %v11126_v50  ;;  %v11140_v47 = vsel %vm1123_vm2, %v11135_v56, 0 }
0x7660   : > { %14999 = vmatpush3.bf16.msra.mxu0 %v11140_v47 }
0x7661   : > { %15012 = vmatprep.subr.bf16.mxu0 %v15919_v0 }
0x7662   : > { %v11348_v7 = vpop.permute.xlu0 %11347 }
0x7669   : > { %v15752_v9 = vpop.eup %15751 }
0x766a   : > { %v11128_v40 = vsel %vm1107_vm3, %v15752_v9, 0.0 }
0x766b   : > { %11129 = vadd.xlane.f32.xlu1 %v11128_v40 }
0x767c   : > { %11349 = vrot.lane.b32.xlu1 %v17964_v23, %s15921_s18 }
0x7699   : > { %v11065_v45 = vpop.f32.mrb[8].mxu0 }
0x769a   : > { %v17971_v44 = vadd.f32 %v11065_v45, %v17921_v35  ;;  %v14990_v27 = vpop.f32.mrb[9].mxu0  ;;  %v11245_v35 = vsel %vm1060_vm1, %v17964_v23, 0 }
0x769b   : > { %v11068_v20 = vpop.f32.mrb[10].mxu0 }
0x769c   : > { %v14991_v57 = vpop.f32.mrb[11].mxu0 }
0x76f8   : > { %v11130_v2 = vpop.xlane.xlu1 %11129 }
0x76f9   : > { %15753 = vrcp.f32 %v11130_v2 }
0x76fc   : > { %v11350_v17 = vpop.permute.xlu1 %11349 }
0x76fd   : > { %v11355_v25 = vsel %vm1060_vm1, %v11350_v17, 0 }
0x7703   : > { %v15754_v49 = vpop.eup %15753 }
0x7704   : > { %v11132_v3 = vmul.f32 %v15754_v49, %v15752_v9 }
0x7706   : > { %v11133_v55 = vpack.c.bf16 %v11132_v3, %v11132_v3 }
0x7708   : > { %15001 = vmatmul.mubr.msk.bf16.vlgmr.msra.gmra.mrb[12].mxu0 %vm1107_vm3, %v11133_v55 }
0x7709   : > { %15013 = vmatpush3.bf16.xpose.msra.mxu0 %v11245_v35  ;;  %15014 = vmatprep.mubr.msk.bf16.mxu0 %vm15920_vm0, %v15919_v0 }
0x770a   : > { %15024 = vmatprep.subr.bf16.mxu0 %v15919_v0 }
0x7710   : > { %15015 = vmatmul.mubr.msk.bf16.vlgmr.msra.gmra.mrb[16].mxu0 %vm1060_vm1, %v17956_v32 }
0x7711   : > { %15025 = vmatpush3.bf16.xpose.msra.mxu0 %v11355_v25  ;;  %15026 = vmatprep.mubr.msk.bf16.mxu0 %vm15920_vm0, %v15919_v0 }
0x7712   : > { %15036 = vmatprep.subr.bf16.mxu0 %v15919_v0 }
0x7718   : > { %15027 = vmatmul.mubr.msk.bf16.vlgmr.msra.gmra.mrb[20].mxu0 %vm1060_vm1, %v11348_v7 }
0x7719   : > { %15037 = vmatpush3.bf16.msra.mxu0 %v17889_v34  ;;  %15040 = vmatprep.mubr.msk.bf16.mxu0 %vm15920_vm0, %v15919_v0  ;;  %v11304_v34 = vsel %vm1123_vm2, %v17999_v58, 0 }
0x771a   : > { %15038 = vmatprep.subr.bf16.mxu0 %v15919_v0 }
0x771d   : > { %15039 = vmatpush3.bf16.msra.mxu0 %v17892_v59 }
0x771e   : > { %15052 = vmatprep.subr.bf16.mxu0 %v15919_v0 }
0x77db   : > { %v11176_v46 = vpop.f32.mrb[12].mxu0 }
0x77dc   : > { %v11182_v6 = vpack.c.bf16 %v11176_v46, %v11176_v46  ;;  %v15002_v61 = vpop.f32.mrb[13].mxu0 }
0x77dd   : > { %v11179_v41 = vpop.f32.mrb[14].mxu0 }
0x77de   : > { %v15003_v48 = vpop.f32.mrb[15].mxu0  ;;  %15009 = vmatmul.mubr.msk.bf16.vlgmr.msra.gmra.mrb[100].mxu1 %vm1060_vm1, %v11182_v6 }
0x77df   : > { %15019 = vmatpush3.bf16.msra.mxu1 %v11304_v34  ;;  %15020 = vmatprep.mubr.msk.bf16.mxu1 %vm15920_vm0, %v15919_v0 }
0x77e0   : > { %15030 = vmatprep.subr.bf16.mxu1 %v15919_v0 }
0x77e3   : > { %v11281_v59 = vpop.f32.mrb[16].mxu0 }
0x77e4   : > { %v15016_v28 = vpop.f32.mrb[17].mxu0  ;;  %v11287_v30 = vsel %vm1107_vm3, %v11281_v59, -inf }
0x77e5   : > { %11288 = vmax.xlane.f32.xlu0 %v11287_v30  ;;  %v11284_v54 = vpop.f32.mrb[18].mxu0 }
0x77e6   : > { %v15017_v4 = vpop.f32.mrb[19].mxu0 }
0x77eb   : > { %v11391_v15 = vpop.f32.mrb[20].mxu0 }
0x77ec   : > { %v15028_v62 = vpop.f32.mrb[21].mxu0  ;;  %v11397_v63 = vsel %vm1107_vm3, %v11391_v15, -inf }
0x77ed   : > { %11398 = vmax.xlane.f32.xlu1 %v11397_v63  ;;  %v11394_v33 = vpop.f32.mrb[22].mxu0 }
0x77ee   : > { %v15029_v13 = vpop.f32.mrb[23].mxu0 }
0x77fe   : > { %11546 = vrot.lane.b32.xlu1 %v17964_v23, %s15922_s12 }
0x7802   : > { %11544 = vrot.lane.b32.xlu1 %v17956_v32, %s15922_s12 }
0x7872   : > { %v11289_v24 = vpop.xlane.xlu0 %11288 }
0x7873   : > { %v11290_v38 = vsub.f32 %v11281_v59, %v11289_v24 }
0x7875   : > { %v11291_v8 = vmul.f32 1.442695, %v11290_v38 }
0x7877   : > { %15755 = vpow2.f32 %v11291_v8 }
0x787a   : > { %v11399_v60 = vpop.xlane.xlu1 %11398 }
0x787b   : > { %v11400_v12 = vsub.f32 %v11391_v15, %v11399_v60 }
0x787d   : > { %v11401_v14 = vmul.f32 1.442695, %v11400_v12 }
0x787f   : > { %15757 = vpow2.f32 %v11401_v14 }
0x7881   : > { %v15756_v26 = vpop.eup %15755 }
0x7882   : > { %v11293_v18 = vsel %vm1107_vm3, %v15756_v26, 0.0 }
0x7883   : > { %11294 = vadd.xlane.f32.xlu0 %v11293_v18 }
0x7889   : > { %v15758_v22 = vpop.eup %15757 }
0x788a   : > { %v11403_v11 = vsel %vm1107_vm3, %v15758_v22, 0.0 }
0x788b   : > { %11404 = vadd.xlane.f32.xlu0 %v11403_v11 }
0x78a1   : > { %11409 = vrot.lane.b32.xlu0 %v17999_v58, %s15921_s18 }
0x78b1   : > { %v11232_v29 = vpop.f32.mrb[100].mxu1 }
0x78b2   : > { %v18018_v31 = vadd.f32 %v11232_v29, %v17971_v44  ;;  %v15010_v16 = vpop.f32.mrb[101].mxu1 }
0x78b3   : > { %v11235_v5 = vpop.f32.mrb[102].mxu1 }
0x78b4   : > { %v15011_v37 = vpop.f32.mrb[103].mxu1 }
0x7910   : > { %v11295_v50 = vpop.xlane.xlu0 %11294 }
0x7911   : > { %15759 = vrcp.f32 %v11295_v50 }
0x7918   : > { %v11405_v56 = vpop.xlane.xlu0 %11404 }
0x7919   : > { %15761 = vrcp.f32 %v11405_v56 }
0x791b   : > { %v15760_v47 = vpop.eup %15759 }
0x791c   : > { %v11297_v9 = vmul.f32 %v15760_v47, %v15756_v26  ;;  %v11410_v40 = vpop.permute.xlu0 %11409  ;;  %v13051_v47 = vld [vmem:[#allocation6 + $0x1a] ss:$0 sm:$0xff] }
0x791d   : > { %v11415_v27 = vsel %vm1123_vm2, %v11410_v40, 0 }
0x791e   : > { %v11298_v45 = vpack.c.bf16 %v11297_v9, %v11297_v9 }
0x7920   : > { %15021 = vmatmul.mubr.msk.bf16.vlgmr.msra.gmra.mrb[104].mxu1 %vm1107_vm3, %v11298_v45 }
0x7921   : > { %15031 = vmatpush3.bf16.msra.mxu1 %v11415_v27  ;;  %15032 = vmatprep.mubr.msk.bf16.mxu1 %vm15920_vm0, %v15919_v0 }
0x7922   : > { %15044 = vmatprep.subr.bf16.mxu1 %v15919_v0 }
0x7923   : > { %v15762_v44 = vpop.eup %15761 }
0x7924   : > { %v11407_v20 = vmul.f32 %v15762_v44, %v15758_v22 }
0x7926   : > { %v11408_v57 = vpack.c.bf16 %v11407_v20, %v11407_v20 }
0x7928   : > { %15033 = vmatmul.mubr.msk.bf16.vlgmr.msra.gmra.mrb[108].mxu1 %vm1107_vm3, %v11408_v57 }
0x7929   : > { %15045 = vmatpush3.bf16.msra.mxu1 %v17899_v21  ;;  %15048 = vmatprep.mubr.msk.bf16.mxu1 %vm15920_vm0, %v15919_v0  ;;  %v11547_v21 = vpop.permute.xlu1 %11546 }
0x792a   : > { %15046 = vmatprep.subr.bf16.mxu1 %v15919_v0  ;;  %v11552_v6 = vsel %vm1060_vm1, %v11547_v21, 0 }
0x792d   : > { %15047 = vmatpush3.bf16.msra.mxu1 %v17903_v39  ;;  %v11545_v61 = vpop.permute.xlu1 %11544 }
0x792e   : > { %15058 = vmatprep.subr.bf16.mxu1 %v15919_v0 }
0x79f3   : > { %v11340_v2 = vpop.f32.mrb[104].mxu1 }
0x79f4   : > { %v11346_v49 = vpack.c.bf16 %v11340_v2, %v11340_v2  ;;  %v15022_v3 = vpop.f32.mrb[105].mxu1 }
0x79f5   : > { %v11343_v55 = vpop.f32.mrb[106].mxu1 }
0x79f6   : > { %v15023_v35 = vpop.f32.mrb[107].mxu1  ;;  %15049 = vmatmul.mubr.msk.bf16.vlgmr.msra.gmra.mrb[112].mxu1 %vm1060_vm1, %v11346_v49 }
0x79f7   : > { %15060 = vmatprep.mubr.msk.bf16.mxu1 %vm15920_vm0, %v15919_v0 }
0x79fb   : > { %v11451_v17 = vpop.f32.mrb[108].mxu1 }
0x79fc   : > { %v11457_v25 = vpack.c.bf16 %v11451_v17, %v11451_v17  ;;  %v15034_v7 = vpop.f32.mrb[109].mxu1 }
0x79fd   : > { %v11454_v46 = vpop.f32.mrb[110].mxu1 }
0x79fe   : > { %v15035_v39 = vpop.f32.mrb[111].mxu1  ;;  %15041 = vmatmul.mubr.msk.bf16.vlgmr.msra.gmra.mrb[24].mxu0 %vm1060_vm1, %v11457_v25 }
0x79ff   : > { %15053 = vmatpush3.bf16.xpose.msra.mxu0 %v11552_v6  ;;  %15054 = vmatprep.mubr.msk.bf16.mxu0 %vm15920_vm0, %v15919_v0 }
0x7a00   : > { %15064 = vmatprep.subr.bf16.mxu0 %v15919_v0 }
0x7a06   : > { %15055 = vmatmul.mubr.msk.bf16.vlgmr.msra.gmra.mrb[28].mxu0 %vm1060_vm1, %v11545_v61 }
0x7a07   : > { %15065 = vmatpush3.bf16.msra.mxu0 %v17933_v36  ;;  %15068 = vmatprep.mubr.msk.bf16.mxu0 %vm15920_vm0, %v15919_v0 }
0x7a08   : > { %15066 = vmatprep.subr.bf16.mxu0 %v15919_v0 }
0x7a0b   : > { %15067 = vmatpush3.bf16.msra.mxu0 %v17945_v10 }
0x7a0c   : > { %15078 = vmatprep.subr.bf16.mxu0 %v15919_v0 }
0x7ac9   : > { %v11538_v41 = vpop.f32.mrb[112].mxu1 }
0x7aca   : > { %v15050_v48 = vpop.f32.mrb[113].mxu1 }
0x7acb   : > { %v11541_v34 = vpop.f32.mrb[114].mxu1 }
0x7acc   : > { %v15051_v59 = vpop.f32.mrb[115].mxu1 }
0x7ad1   : > { %v11495_v28 = vpop.f32.mrb[24].mxu0 }
0x7ad2   : > { %v18047_v30 = vadd.f32 %v11538_v41, %v11495_v28  ;;  %v15042_v54 = vpop.f32.mrb[25].mxu0 }
0x7ad3   : > { %v11498_v4 = vpop.f32.mrb[26].mxu0 }
0x7ad4   : > { %v15043_v15 = vpop.f32.mrb[27].mxu0 }
0x7ad9   : > { %v11588_v36 = vpop.f32.mrb[28].mxu0 }
0x7ada   : > { %v15056_v62 = vpop.f32.mrb[29].mxu0  ;;  %v11594_v63 = vsel %vm1107_vm3, %v11588_v36, -inf }
0x7adb   : > { %11595 = vmax.xlane.f32.xlu0 %v11594_v63  ;;  %v11591_v33 = vpop.f32.mrb[30].mxu0 }
0x7adc   : > { %v15057_v13 = vpop.f32.mrb[31].mxu0 }
0x7add   : > { %v15499_v13 = vld [vmem:[%s18187_s6 + $0x180] ss:$8 sps:$4 sm:$0xff]  }
0x7af1   : > { %11606 = vrot.lane.b32.xlu0 %v17999_v58, %s15922_s12 }
0x7af5   : > { %11699 = vrot.lane.b32.xlu0 %v17956_v32, %s15923_s14 }
0x7b68   : > { %v11596_v10 = vpop.xlane.xlu0 %11595 }
0x7b69   : > { %v11597_v24 = vsub.f32 %v11588_v36, %v11596_v10  ;;  %v15501_v10 = vld [vmem:[%s18187_s6 + $0x184] ss:$8 sps:$4 sm:$0xff]  }
0x7b6b   : > { %v11598_v38 = vmul.f32 1.442695, %v11597_v24  ;;  %v15504_v24 = vld [vmem:[%s18187_s6 + $0x194] ss:$8 sps:$4 sm:$0xff]  }
0x7b6c   : > { %v11607_v8 = vpop.permute.xlu0 %11606 }
0x7b6d   : > { %15763 = vpow2.f32 %v11598_v38  ;;  %v11612_v60 = vsel %vm1123_vm2, %v11607_v8, 0  ;;  %v15507_v38 = vld [vmem:[%s18187_s6 + $0x1a4] ss:$8 sps:$4 sm:$0xff]   ;;  %v15505_v8 = vld [vmem:[%s18187_s6 + $0x1a0] ss:$8 sps:$4 sm:$0xff]  }
0x7b6e   : > { %15059 = vmatpush3.bf16.msra.mxu1 %v11612_v60 }
0x7b6f   : > { %15072 = vmatprep.subr.bf16.mxu1 %v15919_v0 }
0x7b70   : > { %v11700_v16 = vpop.permute.xlu0 %11699 }
0x7b77   : > { %v15764_v12 = vpop.eup %15763 }
0x7b78   : > { %v11600_v14 = vsel %vm1107_vm3, %v15764_v12, 0.0 }
0x7b79   : > { %11601 = vadd.xlane.f32.xlu1 %v11600_v14 }
0x7b8a   : > { %11701 = vrot.lane.b32.xlu1 %v17964_v23, %s15923_s14 }
0x7c06   : > { %v11602_v26 = vpop.xlane.xlu1 %11601 }
0x7c07   : > { %15765 = vrcp.f32 %v11602_v26 }
0x7c0a   : > { %v11702_v22 = vpop.permute.xlu1 %11701 }
0x7c0b   : > { %v11707_v29 = vsel %vm1060_vm1, %v11702_v22, 0  ;;  %v15513_v22 = vld [vmem:[%s18187_s6 + $0x1c4] ss:$8 sps:$4 sm:$0xff]  }
0x7c11   : > { %v15766_v32 = vpop.eup %15765 }
0x7c12   : > { %v11604_v18 = vmul.f32 %v15766_v32, %v15764_v12  ;;  %v15510_v32 = vld [vmem:[%s18187_s6 + $0x1b4] ss:$8 sps:$4 sm:$0xff]  }
0x7c14   : > { %v11605_v11 = vpack.c.bf16 %v11604_v18, %v11604_v18  ;;  %v15508_v18 = vld [vmem:[%s18187_s6 + $0x1b0] ss:$8 sps:$4 sm:$0xff]  }
0x7c16   : > { %15061 = vmatmul.mubr.msk.bf16.vlgmr.msra.gmra.mrb[116].mxu1 %vm1107_vm3, %v11605_v11  ;;  %v15511_v11 = vld [vmem:[%s18187_s6 + $0x1c0] ss:$8 sps:$4 sm:$0xff]  }
0x7c17   : > { %15073 = vmatpush3.bf16.xpose.msra.mxu1 %v11707_v29  ;;  %15074 = vmatprep.mubr.msk.bf16.mxu1 %vm15920_vm0, %v15919_v0  ;;  %v15516_v29 = vld [vmem:[%s18187_s6 + $0x1d4] ss:$8 sps:$4 sm:$0xff]  }
0x7c18   : > { %15084 = vmatprep.subr.bf16.mxu1 %v15919_v0 }
0x7c1e   : > { %15075 = vmatmul.mubr.msk.bf16.vlgmr.msra.gmra.mrb[120].mxu1 %vm1060_vm1, %v11700_v16  ;;  %v15514_v16 = vld [vmem:[%s18187_s6 + $0x1d0] ss:$8 sps:$4 sm:$0xff]  }
0x7c1f   : > { %15085 = vmatpush3.bf16.msra.mxu1 %v17968_v51  ;;  %15088 = vmatprep.mubr.msk.bf16.mxu1 %vm15920_vm0, %v15919_v0  ;;  %v11858_v51 = vadd.f32 %v13051_v47, %v18018_v31 }
0x7c20   : > { %15086 = vmatprep.subr.bf16.mxu1 %v15919_v0 }
0x7c21   : > { %v11860_v44 = vadd.f32 %v11858_v51, %v17837_v19  ;;  %v15525_v51 = vld [vmem:[#allocation4 + $0x1c8] sm:$0xff]  }
0x7c23   : > { %15087 = vmatpush3.bf16.msra.mxu1 %v17974_v52 }
0x7ce9   : > { %v11648_v23 = vpop.f32.mrb[116].mxu1 }
0x7cea   : > { %v11654_v5 = vpack.c.bf16 %v11648_v23, %v11648_v23  ;;  %v15062_v37 = vpop.f32.mrb[117].mxu1  ;;  %v15519_v23 = vld [vmem:[%s18187_s6 + $0x1e4] ss:$8 sps:$4 sm:$0xff]  }
0x7ceb   : > { %v11651_v50 = vpop.f32.mrb[118].mxu1  ;;  %v15522_v37 = vld [vmem:[%s18187_s6 + $0x1f4] ss:$8 sps:$4 sm:$0xff]  }
0x7cec   : > { %v15063_v56 = vpop.f32.mrb[119].mxu1  ;;  %15069 = vmatmul.mubr.msk.bf16.vlgmr.msra.gmra.mrb[32].mxu0 %vm1060_vm1, %v11654_v5  ;;  %v15517_v5 = vld [vmem:[%s18187_s6 + $0x1e0] ss:$8 sps:$4 sm:$0xff]   ;;  %v15520_v50 = vld [vmem:[%s18187_s6 + $0x1f0] ss:$8 sps:$4 sm:$0xff]  }
0x7ced   : > { %15080 = vmatprep.mubr.msk.bf16.mxu0 %vm15920_vm0, %v15919_v0  ;;  %v15523_v56 = vld [vmem:[#allocation4 + $0x1c0] sm:$0xff]  }
0x7cee   : > { %13701 = vmatprep.subr.bf16.mxu1 %v15523_v56 }
0x7cf1   : > { %v11743_v9 = vpop.f32.mrb[120].mxu1 }
0x7cf2   : > { %v15076_v40 = vpop.f32.mrb[121].mxu1  ;;  %v11749_v45 = vsel %vm1107_vm3, %v11743_v9, -inf }
0x7cf3   : > { %11750 = vmax.xlane.f32.xlu1 %v11749_v45  ;;  %v11746_v27 = vpop.f32.mrb[122].mxu1  ;;  %v15527_v40 = vld [vmem:[#allocation4 + $0x1d0] sm:$0xff]  }
0x7cf4   : > { %v15077_v52 = vpop.f32.mrb[123].mxu1  ;;  %v15528_v45 = vld [vmem:[#allocation4 + $0x190] sm:$0xff]   ;;  %v15529_v27 = vld [vmem:[#allocation4 + $0x1d8] sm:$0xff]  }
0x7cf5   : > { %v15530_v52 = vld [vmem:[#allocation4 + $0x198] sm:$0xff]  }
0x7cf7   : > { %11864 = vadd.xlane.f32.xlu1 %v11860_v44 }
0x7d80   : > { %v11751_v20 = vpop.xlane.xlu1 %11750 }
0x7d81   : > { %v11752_v57 = vsub.f32 %v11743_v9, %v11751_v20  ;;  %v15526_v9 = vld [vmem:[#allocation4 + $0x188] sm:$0xff]   ;;  %v15532_v20 = vld [vmem:[#allocation4 + $0x1a0] sm:$0xff]  }
0x7d83   : > { %v11753_v2 = vmul.f32 1.442695, %v11752_v57  ;;  %v15533_v57 = vld [vmem:[#allocation4 + $0x1e8] sm:$0xff]  }
0x7d84   : > { %v11865_v59 = vpop.xlane.xlu1 %11864 }
0x7d85   : > { %15767 = vpow2.f32 %v11753_v2 }
0x7d8f   : > { %v15768_v49 = vpop.eup %15767 }
0x7d90   : > { %v11755_v3 = vsel %vm1107_vm3, %v15768_v49, 0.0 }
0x7d91   : > { %11756 = vadd.xlane.f32.xlu0 %v11755_v3 }
0x7da7   : > { %11761 = vrot.lane.b32.xlu0 %v17999_v58, %s15923_s14 }
0x7dbf   : > { %v11692_v31 = vpop.f32.mrb[32].mxu0 }
0x7dc0   : > { %v11698_v55 = vadd.f32 %v11692_v31, %v18047_v30  ;;  %v15070_v35 = vpop.f32.mrb[33].mxu0  ;;  %v11868_v30 = vmul.f32 0.0078125, %v11865_v59  ;;  %v15536_v59 = vld [vmem:[#allocation4 + $0x1b0] sm:$0xff]  }
0x7dc1   : > { %v11695_v21 = vpop.f32.mrb[34].mxu0 }
0x7dc2   : > { %v15071_v17 = vpop.f32.mrb[35].mxu0  ;;  %v18084_v63 = vsub.f32 %v11860_v44, %v11868_v30  ;;  %v15531_v44 = vld [vmem:[#allocation4 + $0x1e0] sm:$0xff]   ;;  %v15538_v30 = vld [vmem:[#allocation4 + $0x1b8] sm:$0xff]  }
0x7e1e   : > { %v11757_v25 = vpop.xlane.xlu0 %11756 }
0x7e1f   : > { %15769 = vrcp.f32 %v11757_v25  ;;  %v13052_v25 = vld [vmem:[#allocation6 + $0x2b] ss:$0 sm:$0xff] }
0x7e22   : > { %v11762_v19 = vpop.permute.xlu0 %11761 }
0x7e23   : > { %v11767_v7 = vsel %vm1123_vm2, %v11762_v19, 0 }
0x7e24   : > { %15079 = vmatpush3.bf16.msra.mxu0 %v11767_v7 }
0x7e25   : > { %12045 = vmatprep.subr.bf16.mxu0 %v15501_v10 }
0x7e29   : > { %v15770_v46 = vpop.eup %15769 }
0x7e2a   : > { %v11759_v6 = vmul.f32 %v15770_v46, %v15768_v49 }
0x7e2c   : > { %v11760_v39 = vpack.c.bf16 %v11759_v6, %v11759_v6  ;;  %v13053_v6 = vld [vmem:[#allocation6 + $0x31] ss:$0 sm:$0xff] }
0x7e2e   : > { %15081 = vmatmul.mubr.msk.bf16.vlgmr.msra.gmra.mrb[36].mxu0 %vm1107_vm3, %v11760_v39 }
0x7e2f   : > { %12077 = vmatprep.mubr.bf16.mxu0 %v15924_v1  ;;  %v11872_v1 = vmul.f32 %v18084_v63, %v18084_v63  ;;  %12046 = vmatpush1.bf16.msra.mxu0 %v15499_v13 }
0x7e30   : > { %12047 = vmatprep.subr.bf16.mxu0 %v15504_v24 }
0x7f01   : > { %v11803_v58 = vpop.f32.mrb[36].mxu0 }
0x7f02   : > { %v11809_v61 = vpack.c.bf16 %v11803_v58, %v11803_v58  ;;  %v15082_v41 = vpop.f32.mrb[37].mxu0 }
0x7f03   : > { %v11806_v48 = vpop.f32.mrb[38].mxu0 }
0x7f04   : > { %v15083_v34 = vpop.f32.mrb[39].mxu0  ;;  %15089 = vmatmul.mubr.msk.bf16.vlgmr.msra.gmra.mrb[124].mxu1 %vm1060_vm1, %v11809_v61  ;;  %v15534_v48 = vld [vmem:[#allocation4 + $0x1a8] sm:$0xff]  }
0x7f05   : > { %v15535_v34 = vld [vmem:[#allocation4 + $0x1f0] sm:$0xff]  }
0x7fd7   : > { %v11847_v28 = vpop.f32.mrb[124].mxu1 }
0x7fd8   : > { %v11853_v54 = vadd.f32 %v11847_v28, %v11698_v55  ;;  %v15090_v4 = vpop.f32.mrb[125].mxu1  ;;  %v15537_v28 = vld [vmem:[#allocation4 + $0x1f8] sm:$0xff]  }
0x7fd9   : > { %v11850_v15 = vpop.f32.mrb[126].mxu1 }
0x7fda   : > { %v11859_v36 = vadd.f32 %v13051_v47, %v11853_v54  ;;  %v15091_v62 = vpop.f32.mrb[127].mxu1  ;;  %v15524_v47 = vld [vmem:[#allocation4 + $0x180] sm:$0xff]   ;;  %v11916_v54 = vld [vmem:[#allocation7 + $0x3] ss:$4 sm:$0x3] }
0x7fdb   : > { %13702 = vmatpush3.bf16.msra.mxu1 %v15524_v47  ;;  %v11958_v4 = vrot.slane %v11916_v54, %v16544_v42  ;;  %v11962_v15 = vrot.slane %v11916_v54, %v16546_v43  ;;  %v13086_v42 = vld [vmem:[#allocation6 + $0x1e] ss:$0 sm:$0xff] }
0x7fdc   : > { %v11861_v33 = vadd.f32 %v11859_v36, %v17839_v53  ;;  %v15502_v53 = vld [vmem:[%s18187_s6 + $0x190] ss:$8 sps:$4 sm:$0xff]   ;;  %13703 = vmatprep.subr.bf16.mxu1 %v15525_v51 }
0x7fdd   : > { %12048 = vmatpush1.bf16.msra.mxu0 %v15502_v53 }
0x7fde   : > { %11866 = vadd.xlane.f32.xlu1 %v11861_v33  ;;  %12049 = vmatprep.subr.bf16.mxu0 %v15507_v38 }
0x7fdf   : > { %13704 = vmatpush3.bf16.msra.mxu1 %v15526_v9 }
0x7fe0   : > { %13705 = vmatprep.subr.bf16.mxu1 %v15527_v40 }
0x7fe1   : > { %12050 = vmatpush1.bf16.msra.mxu0 %v15505_v8 }
0x7fe2   : > { %11874 = vadd.xlane.f32.xlu1 %v11872_v1  ;;  %12051 = vmatprep.subr.bf16.mxu0 %v15510_v32 }
0x7fe3   : > { %13706 = vmatpush3.bf16.msra.mxu1 %v15528_v45 }
0x7fe4   : > { %13707 = vmatprep.subr.bf16.mxu1 %v15529_v27 }
0x7fe5   : > { %12052 = vmatpush1.bf16.msra.mxu0 %v15508_v18 }
0x7fe6   : > { %12053 = vmatprep.subr.bf16.mxu0 %v15513_v22 }
0x7fe7   : > { %13708 = vmatpush3.bf16.msra.mxu1 %v15530_v52  ;;  %v15540_v52 = vld [vmem:[%s18189_s8 + $0x8] sm:$0xff]  }
0x7fe8   : > { %13709 = vmatprep.subr.bf16.mxu1 %v15531_v44  ;;  %v15541_v44 = vld [vmem:[%s18189_s8 + $0x10] sm:$0xff]  }
0x7fe9   : > { %12054 = vmatpush1.bf16.msra.mxu0 %v15511_v11 }
0x7fea   : > { %12055 = vmatprep.subr.bf16.mxu0 %v15516_v29 }
0x7feb   : > { %13710 = vmatpush3.bf16.msra.mxu1 %v15532_v20  ;;  %v15542_v20 = vld [vmem:[%s18189_s8 + $0x18] sm:$0xff]  }
0x7fec   : > { %13711 = vmatprep.subr.bf16.mxu1 %v15533_v57  ;;  %v15543_v57 = vld [vmem:[%s18189_s8 + $0x20] sm:$0xff]  }
0x7fed   : > { %12056 = vmatpush1.bf16.msra.mxu0 %v15514_v16 }
0x7fee   : > { %12057 = vmatprep.subr.bf16.mxu0 %v15519_v23 }
0x7fef   : > { %13712 = vmatpush3.bf16.msra.mxu1 %v15534_v48 }
0x7ff0   : > { %13713 = vmatprep.subr.bf16.mxu1 %v15535_v34 }
0x7ff1   : > { %12058 = vmatpush1.bf16.msra.mxu0 %v15517_v5 }
0x7ff2   : > { %12059 = vmatprep.subr.bf16.mxu0 %v15522_v37  ;;  %v15539_v37 = vld [vmem:[%s18189_s8] sm:$0xff]  }
0x7ff3   : > { %13714 = vmatpush3.bf16.msra.mxu1 %v15536_v59  ;;  %v13105_v59 = vld [vmem:[#allocation6 + $0x2] ss:$0 sm:$0xff] }
0x7ff4   : > { %13715 = vmatprep.subr.bf16.mxu1 %v15537_v28 }
0x7ff5   : > { %12060 = vmatpush1.bf16.msra.mxu0 %v15520_v50 }
0x7ff6   : > { %15092 = vmatprep.subr.bf16.mxu0 %v15919_v0 }
0x7ff7   : > { %13716 = vmatpush3.bf16.msra.mxu1 %v15538_v30 }
0x806b   : > { %v11867_v60 = vpop.xlane.xlu1 %11866 }
0x806c   : > { %v11869_v12 = vmul.f32 0.0078125, %v11867_v60 }
0x806e   : > { %v11871_v14 = vsub.f32 %v11861_v33, %v11869_v12 }
0x806f   : > { %v11875_v2 = vpop.xlane.xlu1 %11874 }
0x8070   : > { %v11873_v26 = vmul.f32 %v11871_v14, %v11871_v14  ;;  %v11878_v49 = vmul.f32 0.0078125, %v11875_v2  ;;  %v15544_v2 = vld [vmem:[%s18189_s8 + $0x28] sm:$0xff]  }
0x8072   : > { %11876 = vadd.xlane.f32.xlu1 %v11873_v26  ;;  %v11880_v3 = vadd.f32 1e-05, %v11878_v49  ;;  %v15545_v49 = vld [vmem:[%s18189_s8 + $0x30] sm:$0xff]  }
0x8074   : > { %15771 = vrsqrt.f32 %v11880_v3  ;;  %v15546_v3 = vld [vmem:[%s18189_s8 + $0x38] sm:$0xff]  }
0x807e   : > { %v15772_v21 = vpop.eup %15771 }
0x807f   : > { %v11884_v17 = vmul.f32 %v15772_v21, %v18084_v63 }
0x8081   : > { %v11890_v7 = vmul.f32 %v13052_v25, %v11884_v17 }
0x8083   : > { %v11896_v58 = vadd.f32 %v13053_v6, %v11890_v7 }
0x80ff   : > { %v11877_v31 = vpop.xlane.xlu1 %11876 }
0x8100   : > { %v11879_v55 = vmul.f32 0.0078125, %v11877_v31 }
0x8102   : > { %v11881_v35 = vadd.f32 1e-05, %v11879_v55 }
0x8104   : > { %15773 = vrsqrt.f32 %v11881_v35 }
0x810e   : > { %v15774_v19 = vpop.eup %15773 }
0x810f   : > { %v11885_v46 = vmul.f32 %v15774_v19, %v11871_v14 }
0x8111   : > { %v11891_v39 = vmul.f32 %v13052_v25, %v11885_v46  ;;  %v13103_v46 = vld [vmem:[#allocation6 + $0x2c] ss:$0 sm:$0xff] }
0x8113   : > { %v11897_v61 = vadd.f32 %v13053_v6, %v11891_v39 }
0x8115   : > { %v11953_v41 = vpack.c.bf16 %v11897_v61, %v11896_v58 }
0x8117   : > { %12078 = vmatmul.mubr.bf16.vlgmr.msra.gmra.mrb[40].mxu0 %v11953_v41 }
0x8118   : > { %15108 = vmatprep.mubr.msk.bf16.mxu0 %vm15920_vm0, %v15919_v0  ;;  %15093 = vmatpush3.bf16.msra.mxu0 %v15539_v37 }
0x8119   : > { %15094 = vmatprep.subr.bf16.mxu0 %v15919_v0 }
0x811c   : > { %15095 = vmatpush3.bf16.msra.mxu0 %v15540_v52 }
0x811d   : > { %15096 = vmatprep.subr.bf16.mxu0 %v15919_v0 }
0x8120   : > { %15097 = vmatpush3.bf16.msra.mxu0 %v15541_v44 }
0x8121   : > { %15098 = vmatprep.subr.bf16.mxu0 %v15919_v0 }
0x8124   : > { %15099 = vmatpush3.bf16.msra.mxu0 %v15542_v20 }
0x8125   : > { %15100 = vmatprep.subr.bf16.mxu0 %v15919_v0 }
0x8128   : > { %15101 = vmatpush3.bf16.msra.mxu0 %v15543_v57 }
0x8129   : > { %15102 = vmatprep.subr.bf16.mxu0 %v15919_v0 }
0x812c   : > { %15103 = vmatpush3.bf16.msra.mxu0 %v15544_v2 }
0x812d   : > { %15104 = vmatprep.subr.bf16.mxu0 %v15919_v0 }
0x8130   : > { %15105 = vmatpush3.bf16.msra.mxu0 %v15545_v49 }
0x8131   : > { %15106 = vmatprep.subr.bf16.mxu0 %v15919_v0 }
0x8134   : > { %15107 = vmatpush3.bf16.msra.mxu0 %v15546_v3 }
0x81ea   : > { %v12079_v36 = vpop.f32.mrb[40].mxu0 }
0x81eb   : > { %v12080_v62 = vadd.f32 %v12079_v36, %v11958_v4  ;;  %v12081_v63 = vpop.f32.mrb[41].mxu0 }
0x81ec   : > { %v12082_v33 = vadd.f32 %v12081_v63, %v11962_v15  ;;  %v12083_v1 = vpop.f32.mrb[42].mxu0 }
0x81ed   : > { %v12084_v13 = vadd.f32 %v12083_v1, %v11958_v4  ;;  %v12085_v10 = vpop.f32.mrb[43].mxu0  ;;  %v12088_v53 = vmax.f32 %v12080_v62, 0.0 }
0x81ee   : > { %v12086_v24 = vadd.f32 %v12085_v10, %v11962_v15  ;;  %v12089_v8 = vmax.f32 %v12082_v33, 0.0 }
0x81ef   : > { %v12090_v38 = vmax.f32 %v12084_v13, 0.0 }
0x81f0   : > { %v12091_v60 = vmax.f32 %v12086_v24, 0.0 }
0x81f1   : > { %v12092_v12 = vpack.c.bf16 %v12090_v38, %v12088_v53 }
0x81f2   : > { %v12093_v14 = vpack.c.bf16 %v12091_v60, %v12089_v8 }
0x81f4   : > { %12226 = vmatprep.mubr.bf16.mxu1 %v12093_v14 }
0x81f5   : > { %12227 = vmatmul.mubr.bf16.vlgmr.msra.gmra.mrb[128].mxu1 %v12092_v12 }
0x82c8   : > { %v13717_v26 = vpop.f32.mrb[128].mxu1 }
0x82c9   : > { %v13718_v32 = vpop.f32.mrb[129].mxu1 }
0x82ca   : > { %v13719_v43 = vadd.f32 %v13718_v32, %v13717_v26  ;;  %v13720_v18 = vpop.f32.mrb[130].mxu1 }
0x82cb   : > { %v13721_v22 = vpop.f32.mrb[131].mxu1 }
0x82cc   : > { %v12229_v11 = vadd.f32 %v13719_v43, %v13086_v42  ;;  %v13722_v29 = vadd.f32 %v13721_v22, %v13720_v18 }
0x82ce   : > { %v12232_v16 = vadd.f32 %v13722_v29, %v13086_v42  ;;  %v12235_v23 = vadd.f32 %v12229_v11, %v11896_v58  ;;  %v13104_v58 = vld [vmem:[#allocation6 + $0x32] ss:$0 sm:$0xff] }
0x82d0   : > { %12237 = vadd.xlane.f32.xlu1 %v12235_v23  ;;  %v12236_v5 = vadd.f32 %v12232_v16, %v11897_v61 }
0x82d2   : > { %12239 = vadd.xlane.f32.xlu0 %v12236_v5 }
0x835d   : > { %v12238_v50 = vpop.xlane.xlu1 %12237 }
0x835e   : > { %v12241_v56 = vmul.f32 0.0078125, %v12238_v50 }
0x835f   : > { %v12240_v47 = vpop.xlane.xlu0 %12239 }
0x8360   : > { %v12243_v51 = vsub.f32 %v12235_v23, %v12241_v56  ;;  %v12242_v9 = vmul.f32 0.0078125, %v12240_v47 }
0x8362   : > { %v12244_v40 = vsub.f32 %v12236_v5, %v12242_v9  ;;  %v12245_v45 = vmul.f32 %v12243_v51, %v12243_v51 }
0x8364   : > { %12247 = vadd.xlane.f32.xlu1 %v12245_v45  ;;  %v12246_v27 = vmul.f32 %v12244_v40, %v12244_v40 }
0x8368   : > { %12249 = vadd.xlane.f32.xlu1 %v12246_v27 }
0x83f1   : > { %v12248_v31 = vpop.xlane.xlu1 %12247 }
0x83f2   : > { %v12251_v55 = vmul.f32 0.0078125, %v12248_v31 }
0x83f4   : > { %v12253_v35 = vadd.f32 1e-05, %v12251_v55 }
0x83f5   : > { %v12250_v21 = vpop.xlane.xlu1 %12249 }
0x83f6   : > { %15775 = vrsqrt.f32 %v12253_v35  ;;  %v12252_v17 = vmul.f32 0.0078125, %v12250_v21 }
0x83f8   : > { %v12254_v25 = vadd.f32 1e-05, %v12252_v17 }
0x83fa   : > { %15777 = vrsqrt.f32 %v12254_v25 }
0x8400   : > { %v15776_v19 = vpop.eup %15775 }
0x8401   : > { %v12257_v7 = vmul.f32 %v15776_v19, %v12243_v51 }
0x8403   : > { %v12263_v39 = vmul.f32 %v13103_v46, %v12257_v7 }
0x8404   : > { %v15778_v6 = vpop.eup %15777 }
0x8405   : > { %v12258_v0 = vmul.f32 %v15778_v6, %v12244_v40  ;;  %v12269_v41 = vadd.f32 %v13104_v58, %v12263_v39 }
0x8407   : > { %v12264_v61 = vmul.f32 %v13103_v46, %v12258_v0 }
0x8409   : > { %v12270_v48 = vadd.f32 %v13104_v58, %v12264_v61 }
0x840b   : > { %v12271_v34 = vpack.c.bf16 %v12270_v48, %v12269_v41 }
0x840d   : > { %15109 = vmatmul.mubr.bf16.vlgmr.msra.gmra.mrb[44].mxu0 %v12271_v34 }
0x84e0   : > { %v12375_v28 = vpop.f32.mrb[44].mxu0 }
0x84e1   : > { %v12376_v30 = vadd.f32 %v13105_v59, %v12375_v28  ;;  %v15110_v54 = vpop.f32.mrb[45].mxu0 }
0x84e2   : > { %v12378_v4 = vpop.f32.mrb[46].mxu0 }
0x84e3   : > { %12382 = vst [vmem:[%s463_s16] sm:$0xff] %v12376_v30  ;;  %v12379_v15 = vadd.f32 %v13105_v59, %v12378_v4  ;;  %v15111_v36 = vpop.f32.mrb[47].mxu0 }
0x84e5   : > { %12383 = vst [vmem:[%s463_s16 + $0x8] sm:$0xff] %v12379_v15 }
0x84e6 PF: > { %s24_s17 = sadd.s32 1, %s15909_s17  }
0x84e7   : > { %p21_p6 = scmp.ge.s32.totalorder %s24_s17, 4  }
0x84e9   :  { %23 = sbr.rel (!%p21_p6) target bundleno = 3 (0x3), region = 147 }
0x84f0   :  { %12405 = vsyncpa [#allocation3], 1 }
0x84f1   :  { %12407 = vsyncpa [#allocation3 + $0x1], 1 }
0x84f2   :  { %12408 = vsyncpa [#allocation5], 1 }
0x84f3   :  { %12409 = vsyncpa [#allocation8], 1 }

</bundles_post_ra>
